<compile_context>
chip_gen: v7x
topology: tpu7x:2x2x1
jax: 0.10.0
libtpu: 0.0.40
codegen_flags: <defaults>
</compile_context>

<pallas_src>
import itertools
import math

import jax
import jax.numpy as jnp
import numpy as np
from jax import lax
from jax.experimental import pallas as pl
from jax.experimental.pallas import tpu as pltpu

N_DBOXES = 8732
D_SUB = 72
D_LANE = 128
D_PAD = D_SUB * D_LANE          # 9216 >= 8732
IMG_SIZE = 300.0
IOU_THRESHOLD = 0.5
UNROLL_LIMIT = 16               # fully trace-unroll the GT loop up to this N


# -------------------------------------------------------------------------
# Deterministic "parameter" setup: standard SSD300 default boxes (8732, 4) cwh.
# -------------------------------------------------------------------------
def make_ssd_default_boxes():
    fig_size = 300
    feat_size = [38, 19, 10, 5, 3, 1]
    steps = [8, 16, 32, 64, 100, 300]
    scales = [21, 45, 99, 153, 207, 261, 315]
    aspect_ratios = [[2], [2, 3], [2, 3], [2, 3], [2], [2]]
    boxes = []
    for idx, sfeat in enumerate(feat_size):
        sk1 = scales[idx] / fig_size
        sk2 = scales[idx + 1] / fig_size
        sk3 = math.sqrt(sk1 * sk2)
        all_sizes = [(sk1, sk1), (sk3, sk3)]
        for alpha in aspect_ratios[idx]:
            w, h = sk1 * math.sqrt(alpha), sk1 / math.sqrt(alpha)
            all_sizes.append((w, h))
            all_sizes.append((h, w))
        for w, h in all_sizes:
            for i, j in itertools.product(range(sfeat), repeat=2):
                cx = (j + 0.5) * steps[idx] / fig_size
                cy = (i + 0.5) * steps[idx] / fig_size
                boxes.append((cx, cy, w, h))
    db = np.clip(np.asarray(boxes, dtype=np.float32), 0.0, 1.0)
    assert db.shape == (N_DBOXES, 4)
    return db


def cwh_to_xyxy_np(cwh, denorm=False):
    cx, cy, w, h = cwh[:, 0], cwh[:, 1], cwh[:, 2], cwh[:, 3]
    out = np.stack([cx - w / 2, cy - h / 2, cx + w / 2, cy + h / 2], axis=1)
    return out * IMG_SIZE if denorm else out


def _to_planar(arr_nc):
    """(8732, C) row-major -> (C, 72, 128) planar, zero padded (lane-dense)."""
    c = arr_nc.shape[1]
    pad = np.zeros((D_PAD, c), np.float32)
    pad[:N_DBOXES] = arr_nc
    return np.ascontiguousarray(pad.T).reshape(c, D_SUB, D_LANE)


def prepare_default_boxes():
    """Hoisted constant prep: done once at init, reused for every call."""
    db_cwh = make_ssd_default_boxes()                   # (8732,4) normalized cwh
    db_xyxy = cwh_to_xyxy_np(db_cwh, denorm=True)       # (8732,4) pixel xyxy
    area = ((db_xyxy[:, 2] - db_xyxy[:, 0])
            * (db_xyxy[:, 3] - db_xyxy[:, 1]))[:, None]
    xyxy_area = np.concatenate([db_xyxy, area], axis=1).astype(np.float32)  # (8732,5)
    db_xyxy_planar = jnp.asarray(_to_planar(xyxy_area))  # (5,72,128) xmin,ymin,xmax,ymax,area
    db_cwh_planar = jnp.asarray(_to_planar(db_cwh))      # (4,72,128) cx,cy,w,h
    return db_xyxy_planar, db_cwh_planar, db_cwh, db_xyxy


# -------------------------------------------------------------------------
# Pallas kernel
# -------------------------------------------------------------------------
def _gt_kernel(bb_ref, lab_ref, dbx_ref, dbc_ref,        # inputs
               off_ref, lab_out_ref,                     # outputs
               colmax_ref, force_ref,                    # VMEM scratch
               fgcx_ref, fgcy_ref, fgw_ref, fgh_ref, flab_ref):
    n = bb_ref.shape[0]
    shape = (D_SUB, D_LANE)

    # flat default-box index plane (matches the planar layout flattening)
    iota_flat = (lax.broadcasted_iota(jnp.int32, shape, 0) * D_LANE
                 + lax.broadcasted_iota(jnp.int32, shape, 1))

    # Hoist the default-box xyxy/area planes out of the GT loop (loaded once).
    xmin2 = dbx_ref[0]
    ymin2 = dbx_ref[1]
    xmax2 = dbx_ref[2]
    ymax2 = dbx_ref[3]
    area2 = dbx_ref[4]

    # --- init accumulator planes ---------------------------------------------
    colmax_ref[...] = jnp.full(shape, -1.0, jnp.float32)   # running best IoU per dbox
    force_ref[...] = jnp.full(shape, -1, jnp.int32)        # force-match GT index (-1 = none)
    # Best-match (threshold path) value planes live directly in the outputs.
    off_ref[0] = jnp.zeros(shape, jnp.float32)              # best gcx
    off_ref[1] = jnp.zeros(shape, jnp.float32)              # best gcy
    off_ref[2] = jnp.ones(shape, jnp.float32)               # best gw
    off_ref[3] = jnp.ones(shape, jnp.float32)               # best gh
    lab_out_ref[...] = jnp.zeros(shape, jnp.int32)           # best label
    # Force-match value planes (only read where force_ref >= 0).
    fgcx_ref[...] = jnp.zeros(shape, jnp.float32)
    fgcy_ref[...] = jnp.zeros(shape, jnp.float32)
    fgw_ref[...] = jnp.ones(shape, jnp.float32)
    fgh_ref[...] = jnp.ones(shape, jnp.float32)
    flab_ref[...] = jnp.zeros(shape, jnp.int32)

    inv_img = 1.0 / IMG_SIZE

    def match_body(i, carry):
        # scalar reads from SMEM
        x1 = bb_ref[i, 0]
        y1 = bb_ref[i, 1]
        x2 = bb_ref[i, 2]
        y2 = bb_ref[i, 3]
        lab_i = lab_ref[i]

        area1 = (x2 - x1) * (y2 - y1)
        gcx = (x1 + x2) * (0.5 * inv_img)
        gcy = (y1 + y2) * (0.5 * inv_img)
        gw = (x2 - x1) * inv_img
        gh = (y2 - y1) * inv_img

        iw = jnp.maximum(jnp.minimum(x2, xmax2) - jnp.maximum(x1, xmin2), 0.0)
        ih = jnp.maximum(jnp.minimum(y2, ymax2) - jnp.maximum(y1, ymin2), 0.0)
        inter = iw * ih
        union = area1 + area2 - inter
        # exact IoU, guarded against 0/0 (zero-area GT vs zero padded dboxes)
        ov = jnp.where(union > 0.0,
                       inter / jnp.where(union > 0.0, union, 1.0), 0.0)

        # dbox -> best GT (strict '>' keeps first-max semantics); store values
        # of the winning GT directly (no index plane / second gather pass).
        better = ov > colmax_ref[...]
        colmax_ref[...] = jnp.where(better, ov, colmax_ref[...])
        off_ref[0] = jnp.where(better, gcx, off_ref[0])
        off_ref[1] = jnp.where(better, gcy, off_ref[1])
        off_ref[2] = jnp.where(better, gw, off_ref[2])
        off_ref[3] = jnp.where(better, gh, off_ref[3])
        lab_out_ref[...] = jnp.where(better, lab_i, lab_out_ref[...])

        # GT -> best dbox force-match ("last write wins" across i)
        row_max = jnp.max(ov)
        row_arg = jnp.min(jnp.where(ov == row_max, iota_flat, D_PAD))
        hit = jnp.logical_and(iota_flat == row_arg, row_max > 0.0)
        force_ref[...] = jnp.where(hit, i, force_ref[...])
        fgcx_ref[...] = jnp.where(hit, gcx, fgcx_ref[...])
        fgcy_ref[...] = jnp.where(hit, gcy, fgcy_ref[...])
        fgw_ref[...] = jnp.where(hit, gw, fgw_ref[...])
        fgh_ref[...] = jnp.where(hit, gh, fgh_ref[...])
        flab_ref[...] = jnp.where(hit, lab_i, flab_ref[...])
        return carry

    if n <= UNROLL_LIMIT:
        # fully unrolled at trace time -> best LLO scheduling visibility
        for i in range(n):
            match_body(i, 0)
    else:
        lax.fori_loop(0, n, match_body, 0)

    # --- combine threshold path / force path, encode offsets ------------------
    fvalid = force_ref[...] >= 0
    not_bg = jnp.logical_or(colmax_ref[...] >= IOU_THRESHOLD, fvalid)

    gcx = jnp.where(fvalid, fgcx_ref[...], off_ref[0])
    gcy = jnp.where(fvalid, fgcy_ref[...], off_ref[1])
    gw = jnp.where(fvalid, fgw_ref[...], off_ref[2])
    gh = jnp.where(fvalid, fgh_ref[...], off_ref[3])
    lab_out_ref[...] = jnp.where(
        not_bg, jnp.where(fvalid, flab_ref[...], lab_out_ref[...]), 0)

    dcx = dbc_ref[0]
    dcy = dbc_ref[1]
    dw = dbc_ref[2]
    dh = dbc_ref[3]
    dw_s = jnp.where(not_bg, dw, 1.0)
    dh_s = jnp.where(not_bg, dh, 1.0)
    # exact division kept (only ~36 lane-dense vreg ops after the re-layout);
    # preserves bit-consistency with the reference offsets.
    off_ref[0] = jnp.where(not_bg, (gcx - dcx) / dw_s, 0.0)
    off_ref[1] = jnp.where(not_bg, (gcy - dcy) / dh_s, 0.0)
    off_ref[2] = jnp.where(not_bg, jnp.log(jnp.where(not_bg, gw / dw_s, 1.0)), 0.0)
    off_ref[3] = jnp.where(not_bg, jnp.log(jnp.where(not_bg, gh / dh_s, 1.0)), 0.0)


# -------------------------------------------------------------------------
# Wrapper
# -------------------------------------------------------------------------
def generate_ground_truth(img, bboxes, labels, db_xyxy_planar, db_cwh_planar):
    """Returns (img, offsets(8732,4) f32, labels(8732,) i32)."""
    n = bboxes.shape[0]
    if n == 0:  # static-shape Python branch, mirrors the module's early return
        return (img, jnp.zeros((N_DBOXES, 4), jnp.float32),
                jnp.zeros((N_DBOXES,), jnp.int32))

    bboxes = bboxes.astype(jnp.float32)
    labels_i32 = labels.astype(jnp.int32)

    off_pad, lab_pad = pl.pallas_call(
        _gt_kernel,
        out_shape=(
            jax.ShapeDtypeStruct((4, D_SUB, D_LANE), jnp.float32),
            jax.ShapeDtypeStruct((D_SUB, D_LANE), jnp.int32),
        ),
        in_specs=[
            pl.BlockSpec(memory_space=pltpu.MemorySpace.SMEM),   # bboxes (N,4)
            pl.BlockSpec(memory_space=pltpu.MemorySpace.SMEM),   # labels (N,)
            pl.BlockSpec(memory_space=pltpu.MemorySpace.VMEM),   # dbox xyxy+area (5,72,128)
            pl.BlockSpec(memory_space=pltpu.MemorySpace.VMEM),   # dbox cwh (4,72,128)
        ],
        out_specs=(pl.BlockSpec(memory_space=pltpu.MemorySpace.VMEM),
                   pl.BlockSpec(memory_space=pltpu.MemorySpace.VMEM)),
        scratch_shapes=[
            pltpu.VMEM((D_SUB, D_LANE), jnp.float32),   # running col_max
            pltpu.VMEM((D_SUB, D_LANE), jnp.int32),     # force-match index
            pltpu.VMEM((D_SUB, D_LANE), jnp.float32),   # force gcx
            pltpu.VMEM((D_SUB, D_LANE), jnp.float32),   # force gcy
            pltpu.VMEM((D_SUB, D_LANE), jnp.float32),   # force gw
            pltpu.VMEM((D_SUB, D_LANE), jnp.float32),   # force gh
            pltpu.VMEM((D_SUB, D_LANE), jnp.int32),     # force label
        ],
    )(bboxes, labels_i32, db_xyxy_planar, db_cwh_planar)

    offsets = off_pad.reshape(4, D_PAD)[:, :N_DBOXES].T      # (8732, 4)
    new_labels = lab_pad.reshape(D_PAD)[:N_DBOXES]            # (8732,)
    return img, offsets, new_labels


# -------------------------------------------------------------------------
# Pure numpy reference (mirrors the PyTorch forward)
# -------------------------------------------------------------------------
def reference(bboxes, labels, db_cwh, db_xyxy):
    bboxes = np.asarray(bboxes, np.float32)
    labels = np.asarray(labels, np.int64)
    n = bboxes.shape[0]
    x1, y1, x2, y2 = [bboxes[:, i:i + 1] for i in range(4)]
    dx1, dy1, dx2, dy2 = [db_xyxy[:, i] for i in range(4)]
    iw = np.clip(np.minimum(x2, dx2) - np.maximum(x1, dx1), 0, None)
    ih = np.clip(np.minimum(y2, dy2) - np.maximum(y1, dy1), 0, None)
    inter = iw * ih
    union = (x2 - x1) * (y2 - y1) + (dx2 - dx1) * (dy2 - dy1) - inter
    ov = inter / union                                                  # (N, 8732)

    matched = np.full(N_DBOXES, -1, np.int64)
    col_max, col_arg = ov.max(0), ov.argmax(0)
    m = col_max >= IOU_THRESHOLD
    matched[m] = col_arg[m]
    row_max, row_arg = ov.max(1), ov.argmax(1)
    for i in range(n):
        if row_max[i] > 0:
            matched[row_arg[i]] = i

    bb_cwh = np.stack([(bboxes[:, 0] + bboxes[:, 2]) / 2,
                       (bboxes[:, 1] + bboxes[:, 3]) / 2,
                       bboxes[:, 2] - bboxes[:, 0],
                       bboxes[:, 3] - bboxes[:, 1]], axis=1) / IMG_SIZE

    offsets = np.zeros((N_DBOXES, 4), np.float32)
    nb = matched != -1
    g = bb_cwh[matched[nb]]
    d = db_cwh[nb]
    offsets[nb, 0] = (g[:, 0] - d[:, 0]) / d[:, 2]
    offsets[nb, 1] = (g[:, 1] - d[:, 1]) / d[:, 3]
    offsets[nb, 2] = np.log(g[:, 2] / d[:, 2])
    offsets[nb, 3] = np.log(g[:, 3] / d[:, 3])
    new_labels = np.zeros(N_DBOXES, np.int64)
    new_labels[nb] = labels[matched[nb]]
    return offsets, new_labels


if __name__ == "__main__":
    # Constant default boxes prepared ONCE (hoisted out of the per-call path).
    db_xyxy_planar, db_cwh_planar, db_cwh_np, db_xyxy_np = prepare_default_boxes()

    key = jax.random.PRNGKey(0)
    k1, k2, k3, k4 = jax.random.split(key, 4)
    N = 5
    xy = jax.random.uniform(k1, (N, 2), minval=0.0, maxval=200.0)
    wh = jax.random.uniform(k2, (N, 2), minval=30.0, maxval=120.0)
    bboxes = jnp.concatenate([xy, jnp.minimum(xy + wh, IMG_SIZE)], axis=1)  # (N,4) xyxy px
    labels = jax.random.randint(k3, (N,), 1, 21)
    img = jax.random.uniform(k4, (3, 64, 64), dtype=jnp.float32)

    img_out, offsets, new_labels = generate_ground_truth(
        img, bboxes, labels, db_xyxy_planar, db_cwh_planar)
    jax.block_until_ready((img_out, offsets, new_labels))

    assert offsets.shape == (N_DBOXES, 4) and new_labels.shape == (N_DBOXES,)
    assert bool(jnp.all(jnp.isfinite(offsets)))

    ref_off, ref_lab = reference(np.asarray(bboxes), np.asarray(labels),
                                 db_cwh_np, db_xyxy_np)
    np.testing.assert_allclose(np.asarray(offsets), ref_off, rtol=1e-4, atol=1e-5)
    np.testing.assert_array_equal(np.asarray(new_labels).astype(np.int64), ref_lab)

    print("KERNEL_OK")
</pallas_src>

<mosaic_0001>
module attributes {stable_mosaic.version = 11 : i64} {
  func.func @_gt_kernel(%arg0: memref<5x4xf32, #tpu.memory_space<smem>>, %arg1: memref<5xi32, #tpu.memory_space<smem>>, %arg2: memref<5x72x128xf32, #tpu.memory_space<vmem>>, %arg3: memref<4x72x128xf32, #tpu.memory_space<vmem>>, %arg4: memref<4x72x128xf32, #tpu.memory_space<vmem>>, %arg5: memref<72x128xi32, #tpu.memory_space<vmem>>, %arg6: memref<72x128xf32, #tpu.memory_space<vmem>>, %arg7: memref<72x128xi32, #tpu.memory_space<vmem>>, %arg8: memref<72x128xf32, #tpu.memory_space<vmem>>, %arg9: memref<72x128xf32, #tpu.memory_space<vmem>>, %arg10: memref<72x128xf32, #tpu.memory_space<vmem>>, %arg11: memref<72x128xf32, #tpu.memory_space<vmem>>, %arg12: memref<72x128xi32, #tpu.memory_space<vmem>>) attributes {dimension_semantics = [], scalar_prefetch = 0 : i64, scratch_operands = 7 : i64, tpu.core_type = #tpu.core_type<tc>} {
    %0 = tpu.iota {dimensions = array<i32: 0>} : vector<72x128xi32>
    %c128_i32 = arith.constant 128 : i32
    %1 = vector.broadcast %c128_i32 : i32 to vector<72x128xi32>
    %2 = arith.muli %0, %1 : vector<72x128xi32>
    %3 = tpu.iota {dimensions = array<i32: 1>} : vector<72x128xi32>
    %4 = arith.addi %2, %3 : vector<72x128xi32>
    %c0 = arith.constant 0 : index
    %c0_0 = arith.constant 0 : index
    %c0_1 = arith.constant 0 : index
    %5 = vector.load %arg2[%c0, %c0_0, %c0_1] : memref<5x72x128xf32, #tpu.memory_space<vmem>>, vector<1x72x128xf32>
    %6 = vector.shape_cast %5 : vector<1x72x128xf32> to vector<72x128xf32>
    %c1 = arith.constant 1 : index
    %c0_2 = arith.constant 0 : index
    %c0_3 = arith.constant 0 : index
    %7 = vector.load %arg2[%c1, %c0_2, %c0_3] : memref<5x72x128xf32, #tpu.memory_space<vmem>>, vector<1x72x128xf32>
    %8 = vector.shape_cast %7 : vector<1x72x128xf32> to vector<72x128xf32>
    %c2 = arith.constant 2 : index
    %c0_4 = arith.constant 0 : index
    %c0_5 = arith.constant 0 : index
    %9 = vector.load %arg2[%c2, %c0_4, %c0_5] : memref<5x72x128xf32, #tpu.memory_space<vmem>>, vector<1x72x128xf32>
    %10 = vector.shape_cast %9 : vector<1x72x128xf32> to vector<72x128xf32>
    %c3 = arith.constant 3 : index
    %c0_6 = arith.constant 0 : index
    %c0_7 = arith.constant 0 : index
    %11 = vector.load %arg2[%c3, %c0_6, %c0_7] : memref<5x72x128xf32, #tpu.memory_space<vmem>>, vector<1x72x128xf32>
    %12 = vector.shape_cast %11 : vector<1x72x128xf32> to vector<72x128xf32>
    %c4 = arith.constant 4 : index
    %c0_8 = arith.constant 0 : index
    %c0_9 = arith.constant 0 : index
    %13 = vector.load %arg2[%c4, %c0_8, %c0_9] : memref<5x72x128xf32, #tpu.memory_space<vmem>>, vector<1x72x128xf32>
    %14 = vector.shape_cast %13 : vector<1x72x128xf32> to vector<72x128xf32>
    %cst = arith.constant -1.000000e+00 : f32
    %15 = vector.broadcast %cst : f32 to vector<72x128xf32>
    %c0_10 = arith.constant 0 : index
    %c0_11 = arith.constant 0 : index
    %16 = vector.load %arg6[%c0_10, %c0_11] : memref<72x128xf32, #tpu.memory_space<vmem>>, vector<72x128xf32>
    tpu.vector_store %arg6[%c0_10, %c0_11], %15 {strides = array<i32>} : memref<72x128xf32, #tpu.memory_space<vmem>>, vector<72x128xf32>,
    %c-1_i32 = arith.constant -1 : i32
    %17 = vector.broadcast %c-1_i32 : i32 to vector<72x128xi32>
    %c0_12 = arith.constant 0 : index
    %c0_13 = arith.constant 0 : index
    %18 = vector.load %arg7[%c0_12, %c0_13] : memref<72x128xi32, #tpu.memory_space<vmem>>, vector<72x128xi32>
    tpu.vector_store %arg7[%c0_12, %c0_13], %17 {strides = array<i32>} : memref<72x128xi32, #tpu.memory_space<vmem>>, vector<72x128xi32>,
    %cst_14 = arith.constant 0.000000e+00 : f32
    %19 = vector.broadcast %cst_14 : f32 to vector<72x128xf32>
    %c0_15 = arith.constant 0 : index
    %c0_16 = arith.constant 0 : index
    %c0_17 = arith.constant 0 : index
    %20 = vector.load %arg4[%c0_15, %c0_16, %c0_17] : memref<4x72x128xf32, #tpu.memory_space<vmem>>, vector<1x72x128xf32>
    %21 = vector.shape_cast %20 : vector<1x72x128xf32> to vector<72x128xf32>
    %22 = vector.shape_cast %19 : vector<72x128xf32> to vector<1x72x128xf32>
    tpu.vector_store %arg4[%c0_15, %c0_16, %c0_17], %22 {strides = array<i32>} : memref<4x72x128xf32, #tpu.memory_space<vmem>>, vector<1x72x128xf32>,
    %cst_18 = arith.constant 0.000000e+00 : f32
    %23 = vector.broadcast %cst_18 : f32 to vector<72x128xf32>
    %c1_19 = arith.constant 1 : index
    %c0_20 = arith.constant 0 : index
    %c0_21 = arith.constant 0 : index
    %24 = vector.load %arg4[%c1_19, %c0_20, %c0_21] : memref<4x72x128xf32, #tpu.memory_space<vmem>>, vector<1x72x128xf32>
    %25 = vector.shape_cast %24 : vector<1x72x128xf32> to vector<72x128xf32>
    %26 = vector.shape_cast %23 : vector<72x128xf32> to vector<1x72x128xf32>
    tpu.vector_store %arg4[%c1_19, %c0_20, %c0_21], %26 {strides = array<i32>} : memref<4x72x128xf32, #tpu.memory_space<vmem>>, vector<1x72x128xf32>,
    %cst_22 = arith.constant 1.000000e+00 : f32
    %27 = vector.broadcast %cst_22 : f32 to vector<72x128xf32>
    %c2_23 = arith.constant 2 : index
    %c0_24 = arith.constant 0 : index
    %c0_25 = arith.constant 0 : index
    %28 = vector.load %arg4[%c2_23, %c0_24, %c0_25] : memref<4x72x128xf32, #tpu.memory_space<vmem>>, vector<1x72x128xf32>
    %29 = vector.shape_cast %28 : vector<1x72x128xf32> to vector<72x128xf32>
    %30 = vector.shape_cast %27 : vector<72x128xf32> to vector<1x72x128xf32>
    tpu.vector_store %arg4[%c2_23, %c0_24, %c0_25], %30 {strides = array<i32>} : memref<4x72x128xf32, #tpu.memory_space<vmem>>, vector<1x72x128xf32>,
    %cst_26 = arith.constant 1.000000e+00 : f32
    %31 = vector.broadcast %cst_26 : f32 to vector<72x128xf32>
    %c3_27 = arith.constant 3 : index
    %c0_28 = arith.constant 0 : index
    %c0_29 = arith.constant 0 : index
    %32 = vector.load %arg4[%c3_27, %c0_28, %c0_29] : memref<4x72x128xf32, #tpu.memory_space<vmem>>, vector<1x72x128xf32>
    %33 = vector.shape_cast %32 : vector<1x72x128xf32> to vector<72x128xf32>
    %34 = vector.shape_cast %31 : vector<72x128xf32> to vector<1x72x128xf32>
    tpu.vector_store %arg4[%c3_27, %c0_28, %c0_29], %34 {strides = array<i32>} : memref<4x72x128xf32, #tpu.memory_space<vmem>>, vector<1x72x128xf32>,
    %c0_i32 = arith.constant 0 : i32
    %35 = vector.broadcast %c0_i32 : i32 to vector<72x128xi32>
    %c0_30 = arith.constant 0 : index
    %c0_31 = arith.constant 0 : index
    %36 = vector.load %arg5[%c0_30, %c0_31] : memref<72x128xi32, #tpu.memory_space<vmem>>, vector<72x128xi32>
    tpu.vector_store %arg5[%c0_30, %c0_31], %35 {strides = array<i32>} : memref<72x128xi32, #tpu.memory_space<vmem>>, vector<72x128xi32>,
    %cst_32 = arith.constant 0.000000e+00 : f32
    %37 = vector.broadcast %cst_32 : f32 to vector<72x128xf32>
    %c0_33 = arith.constant 0 : index
    %c0_34 = arith.constant 0 : index
    %38 = vector.load %arg8[%c0_33, %c0_34] : memref<72x128xf32, #tpu.memory_space<vmem>>, vector<72x128xf32>
    tpu.vector_store %arg8[%c0_33, %c0_34], %37 {strides = array<i32>} : memref<72x128xf32, #tpu.memory_space<vmem>>, vector<72x128xf32>,
    %cst_35 = arith.constant 0.000000e+00 : f32
    %39 = vector.broadcast %cst_35 : f32 to vector<72x128xf32>
    %c0_36 = arith.constant 0 : index
    %c0_37 = arith.constant 0 : index
    %40 = vector.load %arg9[%c0_36, %c0_37] : memref<72x128xf32, #tpu.memory_space<vmem>>, vector<72x128xf32>
    tpu.vector_store %arg9[%c0_36, %c0_37], %39 {strides = array<i32>} : memref<72x128xf32, #tpu.memory_space<vmem>>, vector<72x128xf32>,
    %cst_38 = arith.constant 1.000000e+00 : f32
    %41 = vector.broadcast %cst_38 : f32 to vector<72x128xf32>
    %c0_39 = arith.constant 0 : index
    %c0_40 = arith.constant 0 : index
    %42 = vector.load %arg10[%c0_39, %c0_40] : memref<72x128xf32, #tpu.memory_space<vmem>>, vector<72x128xf32>
    tpu.vector_store %arg10[%c0_39, %c0_40], %41 {strides = array<i32>} : memref<72x128xf32, #tpu.memory_space<vmem>>, vector<72x128xf32>,
    %cst_41 = arith.constant 1.000000e+00 : f32
    %43 = vector.broadcast %cst_41 : f32 to vector<72x128xf32>
    %c0_42 = arith.constant 0 : index
    %c0_43 = arith.constant 0 : index
    %44 = vector.load %arg11[%c0_42, %c0_43] : memref<72x128xf32, #tpu.memory_space<vmem>>, vector<72x128xf32>
    tpu.vector_store %arg11[%c0_42, %c0_43], %43 {strides = array<i32>} : memref<72x128xf32, #tpu.memory_space<vmem>>, vector<72x128xf32>,
    %c0_i32_44 = arith.constant 0 : i32
    %45 = vector.broadcast %c0_i32_44 : i32 to vector<72x128xi32>
    %c0_45 = arith.constant 0 : index
    %c0_46 = arith.constant 0 : index
    %46 = vector.load %arg12[%c0_45, %c0_46] : memref<72x128xi32, #tpu.memory_space<vmem>>, vector<72x128xi32>
    tpu.vector_store %arg12[%c0_45, %c0_46], %45 {strides = array<i32>} : memref<72x128xi32, #tpu.memory_space<vmem>>, vector<72x128xi32>,
    %c0_47 = arith.constant 0 : index
    %c0_48 = arith.constant 0 : index
    %47 = memref.load %arg0[%c0_47, %c0_48] : memref<5x4xf32, #tpu.memory_space<smem>>
    %c0_49 = arith.constant 0 : index
    %c1_50 = arith.constant 1 : index
    %48 = memref.load %arg0[%c0_49, %c1_50] : memref<5x4xf32, #tpu.memory_space<smem>>
    %c0_51 = arith.constant 0 : index
    %c2_52 = arith.constant 2 : index
    %49 = memref.load %arg0[%c0_51, %c2_52] : memref<5x4xf32, #tpu.memory_space<smem>>
    %c0_53 = arith.constant 0 : index
    %c3_54 = arith.constant 3 : index
    %50 = memref.load %arg0[%c0_53, %c3_54] : memref<5x4xf32, #tpu.memory_space<smem>>
    %c0_55 = arith.constant 0 : index
    %51 = memref.load %arg1[%c0_55] : memref<5xi32, #tpu.memory_space<smem>>
    %52 = arith.subf %49, %47 : f32
    %53 = arith.subf %50, %48 : f32
    %54 = arith.mulf %52, %53 : f32
    %55 = arith.addf %47, %49 : f32
    %cst_56 = arith.constant 0.00166666671 : f32
    %56 = arith.mulf %55, %cst_56 : f32
    %57 = arith.addf %48, %50 : f32
    %cst_57 = arith.constant 0.00166666671 : f32
    %58 = arith.mulf %57, %cst_57 : f32
    %59 = arith.subf %49, %47 : f32
    %cst_58 = arith.constant 0.00333333341 : f32
    %60 = arith.mulf %59, %cst_58 : f32
    %61 = arith.subf %50, %48 : f32
    %cst_59 = arith.constant 0.00333333341 : f32
    %62 = arith.mulf %61, %cst_59 : f32
    %63 = vector.broadcast %49 : f32 to vector<72x128xf32>
    %64 = arith.minimumf %63, %10 : vector<72x128xf32>
    %65 = vector.broadcast %47 : f32 to vector<72x128xf32>
    %66 = arith.maximumf %65, %6 : vector<72x128xf32>
    %67 = arith.subf %64, %66 : vector<72x128xf32>
    %cst_60 = arith.constant 0.000000e+00 : f32
    %68 = vector.broadcast %cst_60 : f32 to vector<72x128xf32>
    %69 = arith.maximumf %67, %68 : vector<72x128xf32>
    %70 = vector.broadcast %50 : f32 to vector<72x128xf32>
    %71 = arith.minimumf %70, %12 : vector<72x128xf32>
    %72 = vector.broadcast %48 : f32 to vector<72x128xf32>
    %73 = arith.maximumf %72, %8 : vector<72x128xf32>
    %74 = arith.subf %71, %73 : vector<72x128xf32>
    %cst_61 = arith.constant 0.000000e+00 : f32
    %75 = vector.broadcast %cst_61 : f32 to vector<72x128xf32>
    %76 = arith.maximumf %74, %75 : vector<72x128xf32>
    %77 = arith.mulf %69, %76 : vector<72x128xf32>
    %78 = vector.broadcast %54 : f32 to vector<72x128xf32>
    %79 = arith.addf %78, %14 : vector<72x128xf32>
    %80 = arith.subf %79, %77 : vector<72x128xf32>
    %cst_62 = arith.constant 0.000000e+00 : f32
    %81 = vector.broadcast %cst_62 : f32 to vector<72x128xf32>
    %82 = arith.cmpf ogt, %80, %81 : vector<72x128xf32>
    %cst_63 = arith.constant 0.000000e+00 : f32
    %83 = vector.broadcast %cst_63 : f32 to vector<72x128xf32>
    %84 = arith.cmpf ogt, %80, %83 : vector<72x128xf32>
    %cst_64 = arith.constant 1.000000e+00 : f32
    %85 = vector.broadcast %cst_64 : f32 to vector<72x128xf32>
    %86 = arith.select %84, %80, %85 : vector<72x128xi1>, vector<72x128xf32>
    %87 = arith.divf %77, %86 : vector<72x128xf32>
    %cst_65 = arith.constant 0.000000e+00 : f32
    %88 = vector.broadcast %cst_65 : f32 to vector<72x128xf32>
    %89 = arith.select %82, %87, %88 : vector<72x128xi1>, vector<72x128xf32>
    %c0_66 = arith.constant 0 : index
    %c0_67 = arith.constant 0 : index
    %90 = vector.load %arg6[%c0_66, %c0_67] : memref<72x128xf32, #tpu.memory_space<vmem>>, vector<72x128xf32>
    %91 = arith.cmpf ogt, %89, %90 : vector<72x128xf32>
    %c0_68 = arith.constant 0 : index
    %c0_69 = arith.constant 0 : index
    %92 = vector.load %arg6[%c0_68, %c0_69] : memref<72x128xf32, #tpu.memory_space<vmem>>, vector<72x128xf32>
    %93 = arith.select %91, %89, %92 : vector<72x128xi1>, vector<72x128xf32>
    %c0_70 = arith.constant 0 : index
    %c0_71 = arith.constant 0 : index
    %94 = vector.load %arg6[%c0_70, %c0_71] : memref<72x128xf32, #tpu.memory_space<vmem>>, vector<72x128xf32>
    tpu.vector_store %arg6[%c0_70, %c0_71], %93 {strides = array<i32>} : memref<72x128xf32, #tpu.memory_space<vmem>>, vector<72x128xf32>,
    %c0_72 = arith.constant 0 : index
    %c0_73 = arith.constant 0 : index
    %c0_74 = arith.constant 0 : index
    %95 = vector.load %arg4[%c0_72, %c0_73, %c0_74] : memref<4x72x128xf32, #tpu.memory_space<vmem>>, vector<1x72x128xf32>
    %96 = vector.shape_cast %95 : vector<1x72x128xf32> to vector<72x128xf32>
    %97 = vector.broadcast %56 : f32 to vector<72x128xf32>
    %98 = arith.select %91, %97, %96 : vector<72x128xi1>, vector<72x128xf32>
    %c0_75 = arith.constant 0 : index
    %c0_76 = arith.constant 0 : index
    %c0_77 = arith.constant 0 : index
    %99 = vector.load %arg4[%c0_75, %c0_76, %c0_77] : memref<4x72x128xf32, #tpu.memory_space<vmem>>, vector<1x72x128xf32>
    %100 = vector.shape_cast %99 : vector<1x72x128xf32> to vector<72x128xf32>
    %101 = vector.shape_cast %98 : vector<72x128xf32> to vector<1x72x128xf32>
    tpu.vector_store %arg4[%c0_75, %c0_76, %c0_77], %101 {strides = array<i32>} : memref<4x72x128xf32, #tpu.memory_space<vmem>>, vector<1x72x128xf32>,
    %c1_78 = arith.constant 1 : index
    %c0_79 = arith.constant 0 : index
    %c0_80 = arith.constant 0 : index
    %102 = vector.load %arg4[%c1_78, %c0_79, %c0_80] : memref<4x72x128xf32, #tpu.memory_space<vmem>>, vector<1x72x128xf32>
    %103 = vector.shape_cast %102 : vector<1x72x128xf32> to vector<72x128xf32>
    %104 = vector.broadcast %58 : f32 to vector<72x128xf32>
    %105 = arith.select %91, %104, %103 : vector<72x128xi1>, vector<72x128xf32>
    %c1_81 = arith.constant 1 : index
    %c0_82 = arith.constant 0 : index
    %c0_83 = arith.constant 0 : index
    %106 = vector.load %arg4[%c1_81, %c0_82, %c0_83] : memref<4x72x128xf32, #tpu.memory_space<vmem>>, vector<1x72x128xf32>
    %107 = vector.shape_cast %106 : vector<1x72x128xf32> to vector<72x128xf32>
    %108 = vector.shape_cast %105 : vector<72x128xf32> to vector<1x72x128xf32>
    tpu.vector_store %arg4[%c1_81, %c0_82, %c0_83], %108 {strides = array<i32>} : memref<4x72x128xf32, #tpu.memory_space<vmem>>, vector<1x72x128xf32>,
    %c2_84 = arith.constant 2 : index
    %c0_85 = arith.constant 0 : index
    %c0_86 = arith.constant 0 : index
    %109 = vector.load %arg4[%c2_84, %c0_85, %c0_86] : memref<4x72x128xf32, #tpu.memory_space<vmem>>, vector<1x72x128xf32>
    %110 = vector.shape_cast %109 : vector<1x72x128xf32> to vector<72x128xf32>
    %111 = vector.broadcast %60 : f32 to vector<72x128xf32>
    %112 = arith.select %91, %111, %110 : vector<72x128xi1>, vector<72x128xf32>
    %c2_87 = arith.constant 2 : index
    %c0_88 = arith.constant 0 : index
    %c0_89 = arith.constant 0 : index
    %113 = vector.load %arg4[%c2_87, %c0_88, %c0_89] : memref<4x72x128xf32, #tpu.memory_space<vmem>>, vector<1x72x128xf32>
    %114 = vector.shape_cast %113 : vector<1x72x128xf32> to vector<72x128xf32>
    %115 = vector.shape_cast %112 : vector<72x128xf32> to vector<1x72x128xf32>
    tpu.vector_store %arg4[%c2_87, %c0_88, %c0_89], %115 {strides = array<i32>} : memref<4x72x128xf32, #tpu.memory_space<vmem>>, vector<1x72x128xf32>,
    %c3_90 = arith.constant 3 : index
    %c0_91 = arith.constant 0 : index
    %c0_92 = arith.constant 0 : index
    %116 = vector.load %arg4[%c3_90, %c0_91, %c0_92] : memref<4x72x128xf32, #tpu.memory_space<vmem>>, vector<1x72x128xf32>
    %117 = vector.shape_cast %116 : vector<1x72x128xf32> to vector<72x128xf32>
    %118 = vector.broadcast %62 : f32 to vector<72x128xf32>
    %119 = arith.select %91, %118, %117 : vector<72x128xi1>, vector<72x128xf32>
    %c3_93 = arith.constant 3 : index
    %c0_94 = arith.constant 0 : index
    %c0_95 = arith.constant 0 : index
    %120 = vector.load %arg4[%c3_93, %c0_94, %c0_95] : memref<4x72x128xf32, #tpu.memory_space<vmem>>, vector<1x72x128xf32>
    %121 = vector.shape_cast %120 : vector<1x72x128xf32> to vector<72x128xf32>
    %122 = vector.shape_cast %119 : vector<72x128xf32> to vector<1x72x128xf32>
    tpu.vector_store %arg4[%c3_93, %c0_94, %c0_95], %122 {strides = array<i32>} : memref<4x72x128xf32, #tpu.memory_space<vmem>>, vector<1x72x128xf32>,
    %c0_96 = arith.constant 0 : index
    %c0_97 = arith.constant 0 : index
    %123 = vector.load %arg5[%c0_96, %c0_97] : memref<72x128xi32, #tpu.memory_space<vmem>>, vector<72x128xi32>
    %124 = vector.broadcast %51 : i32 to vector<72x128xi32>
    %125 = arith.select %91, %124, %123 : vector<72x128xi1>, vector<72x128xi32>
    %c0_98 = arith.constant 0 : index
    %c0_99 = arith.constant 0 : index
    %126 = vector.load %arg5[%c0_98, %c0_99] : memref<72x128xi32, #tpu.memory_space<vmem>>, vector<72x128xi32>
    tpu.vector_store %arg5[%c0_98, %c0_99], %125 {strides = array<i32>} : memref<72x128xi32, #tpu.memory_space<vmem>>, vector<72x128xi32>,
    %127 = vector.shape_cast %89 : vector<72x128xf32> to vector<1x72x128xf32>
    %cst_100 = arith.constant dense<0xFF800000> : vector<1xf32>
    %128 = vector.multi_reduction <maximumf>, %127, %cst_100 [1, 2] : vector<1x72x128xf32> to vector<1xf32>
    %129 = vector.shape_cast %128 : vector<1xf32> to vector<1x1x1xf32>
    %130 = vector.extract %129[0, 0, 0] : f32 from vector<1x1x1xf32>
    %131 = vector.broadcast %130 : f32 to vector<72x128xf32>
    %132 = arith.cmpf oeq, %89, %131 : vector<72x128xf32>
    %c9216_i32 = arith.constant 9216 : i32
    %133 = vector.broadcast %c9216_i32 : i32 to vector<72x128xi32>
    %134 = arith.select %132, %4, %133 : vector<72x128xi1>, vector<72x128xi32>
    %135 = vector.shape_cast %134 : vector<72x128xi32> to vector<1x72x128xi32>
    %cst_101 = arith.constant dense<2147483647> : vector<1xi32>
    %136 = vector.multi_reduction <minsi>, %135, %cst_101 [1, 2] : vector<1x72x128xi32> to vector<1xi32>
    %137 = vector.shape_cast %136 : vector<1xi32> to vector<1x1x1xi32>
    %138 = vector.extract %137[0, 0, 0] : i32 from vector<1x1x1xi32>
    %139 = vector.broadcast %138 : i32 to vector<72x128xi32>
    %140 = arith.cmpi eq, %4, %139 : vector<72x128xi32>
    %cst_102 = arith.constant 0.000000e+00 : f32
    %141 = arith.cmpf ogt, %130, %cst_102 : f32
    %142 = vector.broadcast %141 : i1 to vector<72x128xi1>
    %143 = arith.andi %140, %142 : vector<72x128xi1>
    %c0_103 = arith.constant 0 : index
    %c0_104 = arith.constant 0 : index
    %144 = vector.load %arg7[%c0_103, %c0_104] : memref<72x128xi32, #tpu.memory_space<vmem>>, vector<72x128xi32>
    %c0_i32_105 = arith.constant 0 : i32
    %145 = vector.broadcast %c0_i32_105 : i32 to vector<72x128xi32>
    %146 = arith.select %143, %145, %144 : vector<72x128xi1>, vector<72x128xi32>
    %c0_106 = arith.constant 0 : index
    %c0_107 = arith.constant 0 : index
    %147 = vector.load %arg7[%c0_106, %c0_107] : memref<72x128xi32, #tpu.memory_space<vmem>>, vector<72x128xi32>
    tpu.vector_store %arg7[%c0_106, %c0_107], %146 {strides = array<i32>} : memref<72x128xi32, #tpu.memory_space<vmem>>, vector<72x128xi32>,
    %c0_108 = arith.constant 0 : index
    %c0_109 = arith.constant 0 : index
    %148 = vector.load %arg8[%c0_108, %c0_109] : memref<72x128xf32, #tpu.memory_space<vmem>>, vector<72x128xf32>
    %149 = vector.broadcast %56 : f32 to vector<72x128xf32>
    %150 = arith.select %143, %149, %148 : vector<72x128xi1>, vector<72x128xf32>
    %c0_110 = arith.constant 0 : index
    %c0_111 = arith.constant 0 : index
    %151 = vector.load %arg8[%c0_110, %c0_111] : memref<72x128xf32, #tpu.memory_space<vmem>>, vector<72x128xf32>
    tpu.vector_store %arg8[%c0_110, %c0_111], %150 {strides = array<i32>} : memref<72x128xf32, #tpu.memory_space<vmem>>, vector<72x128xf32>,
    %c0_112 = arith.constant 0 : index
    %c0_113 = arith.constant 0 : index
    %152 = vector.load %arg9[%c0_112, %c0_113] : memref<72x128xf32, #tpu.memory_space<vmem>>, vector<72x128xf32>
    %153 = vector.broadcast %58 : f32 to vector<72x128xf32>
    %154 = arith.select %143, %153, %152 : vector<72x128xi1>, vector<72x128xf32>
    %c0_114 = arith.constant 0 : index
    %c0_115 = arith.constant 0 : index
    %155 = vector.load %arg9[%c0_114, %c0_115] : memref<72x128xf32, #tpu.memory_space<vmem>>, vector<72x128xf32>
    tpu.vector_store %arg9[%c0_114, %c0_115], %154 {strides = array<i32>} : memref<72x128xf32, #tpu.memory_space<vmem>>, vector<72x128xf32>,
    %c0_116 = arith.constant 0 : index
    %c0_117 = arith.constant 0 : index
    %156 = vector.load %arg10[%c0_116, %c0_117] : memref<72x128xf32, #tpu.memory_space<vmem>>, vector<72x128xf32>
    %157 = vector.broadcast %60 : f32 to vector<72x128xf32>
    %158 = arith.select %143, %157, %156 : vector<72x128xi1>, vector<72x128xf32>
    %c0_118 = arith.constant 0 : index
    %c0_119 = arith.constant 0 : index
    %159 = vector.load %arg10[%c0_118, %c0_119] : memref<72x128xf32, #tpu.memory_space<vmem>>, vector<72x128xf32>
    tpu.vector_store %arg10[%c0_118, %c0_119], %158 {strides = array<i32>} : memref<72x128xf32, #tpu.memory_space<vmem>>, vector<72x128xf32>,
    %c0_120 = arith.constant 0 : index
    %c0_121 = arith.constant 0 : index
    %160 = vector.load %arg11[%c0_120, %c0_121] : memref<72x128xf32, #tpu.memory_space<vmem>>, vector<72x128xf32>
    %161 = vector.broadcast %62 : f32 to vector<72x128xf32>
    %162 = arith.select %143, %161, %160 : vector<72x128xi1>, vector<72x128xf32>
    %c0_122 = arith.constant 0 : index
    %c0_123 = arith.constant 0 : index
    %163 = vector.load %arg11[%c0_122, %c0_123] : memref<72x128xf32, #tpu.memory_space<vmem>>, vector<72x128xf32>
    tpu.vector_store %arg11[%c0_122, %c0_123], %162 {strides = array<i32>} : memref<72x128xf32, #tpu.memory_space<vmem>>, vector<72x128xf32>,
    %c0_124 = arith.constant 0 : index
    %c0_125 = arith.constant 0 : index
    %164 = vector.load %arg12[%c0_124, %c0_125] : memref<72x128xi32, #tpu.memory_space<vmem>>, vector<72x128xi32>
    %165 = vector.broadcast %51 : i32 to vector<72x128xi32>
    %166 = arith.select %143, %165, %164 : vector<72x128xi1>, vector<72x128xi32>
    %c0_126 = arith.constant 0 : index
    %c0_127 = arith.constant 0 : index
    %167 = vector.load %arg12[%c0_126, %c0_127] : memref<72x128xi32, #tpu.memory_space<vmem>>, vector<72x128xi32>
    tpu.vector_store %arg12[%c0_126, %c0_127], %166 {strides = array<i32>} : memref<72x128xi32, #tpu.memory_space<vmem>>, vector<72x128xi32>,
    %c1_128 = arith.constant 1 : index
    %c0_129 = arith.constant 0 : index
    %168 = memref.load %arg0[%c1_128, %c0_129] : memref<5x4xf32, #tpu.memory_space<smem>>
    %c1_130 = arith.constant 1 : index
    %c1_131 = arith.constant 1 : index
    %169 = memref.load %arg0[%c1_130, %c1_131] : memref<5x4xf32, #tpu.memory_space<smem>>
    %c1_132 = arith.constant 1 : index
    %c2_133 = arith.constant 2 : index
    %170 = memref.load %arg0[%c1_132, %c2_133] : memref<5x4xf32, #tpu.memory_space<smem>>
    %c1_134 = arith.constant 1 : index
    %c3_135 = arith.constant 3 : index
    %171 = memref.load %arg0[%c1_134, %c3_135] : memref<5x4xf32, #tpu.memory_space<smem>>
    %c1_136 = arith.constant 1 : index
    %172 = memref.load %arg1[%c1_136] : memref<5xi32, #tpu.memory_space<smem>>
    %173 = arith.subf %170, %168 : f32
    %174 = arith.subf %171, %169 : f32
    %175 = arith.mulf %173, %174 : f32
    %176 = arith.addf %168, %170 : f32
    %cst_137 = arith.constant 0.00166666671 : f32
    %177 = arith.mulf %176, %cst_137 : f32
    %178 = arith.addf %169, %171 : f32
    %cst_138 = arith.constant 0.00166666671 : f32
    %179 = arith.mulf %178, %cst_138 : f32
    %180 = arith.subf %170, %168 : f32
    %cst_139 = arith.constant 0.00333333341 : f32
    %181 = arith.mulf %180, %cst_139 : f32
    %182 = arith.subf %171, %169 : f32
    %cst_140 = arith.constant 0.00333333341 : f32
    %183 = arith.mulf %182, %cst_140 : f32
    %184 = vector.broadcast %170 : f32 to vector<72x128xf32>
    %185 = arith.minimumf %184, %10 : vector<72x128xf32>
    %186 = vector.broadcast %168 : f32 to vector<72x128xf32>
    %187 = arith.maximumf %186, %6 : vector<72x128xf32>
    %188 = arith.subf %185, %187 : vector<72x128xf32>
    %cst_141 = arith.constant 0.000000e+00 : f32
    %189 = vector.broadcast %cst_141 : f32 to vector<72x128xf32>
    %190 = arith.maximumf %188, %189 : vector<72x128xf32>
    %191 = vector.broadcast %171 : f32 to vector<72x128xf32>
    %192 = arith.minimumf %191, %12 : vector<72x128xf32>
    %193 = vector.broadcast %169 : f32 to vector<72x128xf32>
    %194 = arith.maximumf %193, %8 : vector<72x128xf32>
    %195 = arith.subf %192, %194 : vector<72x128xf32>
    %cst_142 = arith.constant 0.000000e+00 : f32
    %196 = vector.broadcast %cst_142 : f32 to vector<72x128xf32>
    %197 = arith.maximumf %195, %196 : vector<72x128xf32>
    %198 = arith.mulf %190, %197 : vector<72x128xf32>
    %199 = vector.broadcast %175 : f32 to vector<72x128xf32>
    %200 = arith.addf %199, %14 : vector<72x128xf32>
    %201 = arith.subf %200, %198 : vector<72x128xf32>
    %cst_143 = arith.constant 0.000000e+00 : f32
    %202 = vector.broadcast %cst_143 : f32 to vector<72x128xf32>
    %203 = arith.cmpf ogt, %201, %202 : vector<72x128xf32>
    %cst_144 = arith.constant 0.000000e+00 : f32
    %204 = vector.broadcast %cst_144 : f32 to vector<72x128xf32>
    %205 = arith.cmpf ogt, %201, %204 : vector<72x128xf32>
    %cst_145 = arith.constant 1.000000e+00 : f32
    %206 = vector.broadcast %cst_145 : f32 to vector<72x128xf32>
    %207 = arith.select %205, %201, %206 : vector<72x128xi1>, vector<72x128xf32>
    %208 = arith.divf %198, %207 : vector<72x128xf32>
    %cst_146 = arith.constant 0.000000e+00 : f32
    %209 = vector.broadcast %cst_146 : f32 to vector<72x128xf32>
    %210 = arith.select %203, %208, %209 : vector<72x128xi1>, vector<72x128xf32>
    %c0_147 = arith.constant 0 : index
    %c0_148 = arith.constant 0 : index
    %211 = vector.load %arg6[%c0_147, %c0_148] : memref<72x128xf32, #tpu.memory_space<vmem>>, vector<72x128xf32>
    %212 = arith.cmpf ogt, %210, %211 : vector<72x128xf32>
    %c0_149 = arith.constant 0 : index
    %c0_150 = arith.constant 0 : index
    %213 = vector.load %arg6[%c0_149, %c0_150] : memref<72x128xf32, #tpu.memory_space<vmem>>, vector<72x128xf32>
    %214 = arith.select %212, %210, %213 : vector<72x128xi1>, vector<72x128xf32>
    %c0_151 = arith.constant 0 : index
    %c0_152 = arith.constant 0 : index
    %215 = vector.load %arg6[%c0_151, %c0_152] : memref<72x128xf32, #tpu.memory_space<vmem>>, vector<72x128xf32>
    tpu.vector_store %arg6[%c0_151, %c0_152], %214 {strides = array<i32>} : memref<72x128xf32, #tpu.memory_space<vmem>>, vector<72x128xf32>,
    %c0_153 = arith.constant 0 : index
    %c0_154 = arith.constant 0 : index
    %c0_155 = arith.constant 0 : index
    %216 = vector.load %arg4[%c0_153, %c0_154, %c0_155] : memref<4x72x128xf32, #tpu.memory_space<vmem>>, vector<1x72x128xf32>
    %217 = vector.shape_cast %216 : vector<1x72x128xf32> to vector<72x128xf32>
    %218 = vector.broadcast %177 : f32 to vector<72x128xf32>
    %219 = arith.select %212, %218, %217 : vector<72x128xi1>, vector<72x128xf32>
    %c0_156 = arith.constant 0 : index
    %c0_157 = arith.constant 0 : index
    %c0_158 = arith.constant 0 : index
    %220 = vector.load %arg4[%c0_156, %c0_157, %c0_158] : memref<4x72x128xf32, #tpu.memory_space<vmem>>, vector<1x72x128xf32>
    %221 = vector.shape_cast %220 : vector<1x72x128xf32> to vector<72x128xf32>
    %222 = vector.shape_cast %219 : vector<72x128xf32> to vector<1x72x128xf32>
    tpu.vector_store %arg4[%c0_156, %c0_157, %c0_158], %222 {strides = array<i32>} : memref<4x72x128xf32, #tpu.memory_space<vmem>>, vector<1x72x128xf32>,
    %c1_159 = arith.constant 1 : index
    %c0_160 = arith.constant 0 : index
    %c0_161 = arith.constant 0 : index
    %223 = vector.load %arg4[%c1_159, %c0_160, %c0_161] : memref<4x72x128xf32, #tpu.memory_space<vmem>>, vector<1x72x128xf32>
    %224 = vector.shape_cast %223 : vector<1x72x128xf32> to vector<72x128xf32>
    %225 = vector.broadcast %179 : f32 to vector<72x128xf32>
    %226 = arith.select %212, %225, %224 : vector<72x128xi1>, vector<72x128xf32>
    %c1_162 = arith.constant 1 : index
    %c0_163 = arith.constant 0 : index
    %c0_164 = arith.constant 0 : index
    %227 = vector.load %arg4[%c1_162, %c0_163, %c0_164] : memref<4x72x128xf32, #tpu.memory_space<vmem>>, vector<1x72x128xf32>
    %228 = vector.shape_cast %227 : vector<1x72x128xf32> to vector<72x128xf32>
    %229 = vector.shape_cast %226 : vector<72x128xf32> to vector<1x72x128xf32>
    tpu.vector_store %arg4[%c1_162, %c0_163, %c0_164], %229 {strides = array<i32>} : memref<4x72x128xf32, #tpu.memory_space<vmem>>, vector<1x72x128xf32>,
    %c2_165 = arith.constant 2 : index
    %c0_166 = arith.constant 0 : index
    %c0_167 = arith.constant 0 : index
    %230 = vector.load %arg4[%c2_165, %c0_166, %c0_167] : memref<4x72x128xf32, #tpu.memory_space<vmem>>, vector<1x72x128xf32>
    %231 = vector.shape_cast %230 : vector<1x72x128xf32> to vector<72x128xf32>
    %232 = vector.broadcast %181 : f32 to vector<72x128xf32>
    %233 = arith.select %212, %232, %231 : vector<72x128xi1>, vector<72x128xf32>
    %c2_168 = arith.constant 2 : index
    %c0_169 = arith.constant 0 : index
    %c0_170 = arith.constant 0 : index
    %234 = vector.load %arg4[%c2_168, %c0_169, %c0_170] : memref<4x72x128xf32, #tpu.memory_space<vmem>>, vector<1x72x128xf32>
    %235 = vector.shape_cast %234 : vector<1x72x128xf32> to vector<72x128xf32>
    %236 = vector.shape_cast %233 : vector<72x128xf32> to vector<1x72x128xf32>
    tpu.vector_store %arg4[%c2_168, %c0_169, %c0_170], %236 {strides = array<i32>} : memref<4x72x128xf32, #tpu.memory_space<vmem>>, vector<1x72x128xf32>,
    %c3_171 = arith.constant 3 : index
    %c0_172 = arith.constant 0 : index
    %c0_173 = arith.constant 0 : index
    %237 = vector.load %arg4[%c3_171, %c0_172, %c0_173] : memref<4x72x128xf32, #tpu.memory_space<vmem>>, vector<1x72x128xf32>
    %238 = vector.shape_cast %237 : vector<1x72x128xf32> to vector<72x128xf32>
    %239 = vector.broadcast %183 : f32 to vector<72x128xf32>
    %240 = arith.select %212, %239, %238 : vector<72x128xi1>, vector<72x128xf32>
    %c3_174 = arith.constant 3 : index
    %c0_175 = arith.constant 0 : index
    %c0_176 = arith.constant 0 : index
    %241 = vector.load %arg4[%c3_174, %c0_175, %c0_176] : memref<4x72x128xf32, #tpu.memory_space<vmem>>, vector<1x72x128xf32>
    %242 = vector.shape_cast %241 : vector<1x72x128xf32> to vector<72x128xf32>
    %243 = vector.shape_cast %240 : vector<72x128xf32> to vector<1x72x128xf32>
    tpu.vector_store %arg4[%c3_174, %c0_175, %c0_176], %243 {strides = array<i32>} : memref<4x72x128xf32, #tpu.memory_space<vmem>>, vector<1x72x128xf32>,
    %c0_177 = arith.constant 0 : index
    %c0_178 = arith.constant 0 : index
    %244 = vector.load %arg5[%c0_177, %c0_178] : memref<72x128xi32, #tpu.memory_space<vmem>>, vector<72x128xi32>
    %245 = vector.broadcast %172 : i32 to vector<72x128xi32>
    %246 = arith.select %212, %245, %244 : vector<72x128xi1>, vector<72x128xi32>
    %c0_179 = arith.constant 0 : index
    %c0_180 = arith.constant 0 : index
    %247 = vector.load %arg5[%c0_179, %c0_180] : memref<72x128xi32, #tpu.memory_space<vmem>>, vector<72x128xi32>
    tpu.vector_store %arg5[%c0_179, %c0_180], %246 {strides = array<i32>} : memref<72x128xi32, #tpu.memory_space<vmem>>, vector<72x128xi32>,
    %248 = vector.shape_cast %210 : vector<72x128xf32> to vector<1x72x128xf32>
    %cst_181 = arith.constant dense<0xFF800000> : vector<1xf32>
    %249 = vector.multi_reduction <maximumf>, %248, %cst_181 [1, 2] : vector<1x72x128xf32> to vector<1xf32>
    %250 = vector.shape_cast %249 : vector<1xf32> to vector<1x1x1xf32>
    %251 = vector.extract %250[0, 0, 0] : f32 from vector<1x1x1xf32>
    %252 = vector.broadcast %251 : f32 to vector<72x128xf32>
    %253 = arith.cmpf oeq, %210, %252 : vector<72x128xf32>
    %c9216_i32_182 = arith.constant 9216 : i32
    %254 = vector.broadcast %c9216_i32_182 : i32 to vector<72x128xi32>
    %255 = arith.select %253, %4, %254 : vector<72x128xi1>, vector<72x128xi32>
    %256 = vector.shape_cast %255 : vector<72x128xi32> to vector<1x72x128xi32>
    %cst_183 = arith.constant dense<2147483647> : vector<1xi32>
    %257 = vector.multi_reduction <minsi>, %256, %cst_183 [1, 2] : vector<1x72x128xi32> to vector<1xi32>
    %258 = vector.shape_cast %257 : vector<1xi32> to vector<1x1x1xi32>
    %259 = vector.extract %258[0, 0, 0] : i32 from vector<1x1x1xi32>
    %260 = vector.broadcast %259 : i32 to vector<72x128xi32>
    %261 = arith.cmpi eq, %4, %260 : vector<72x128xi32>
    %cst_184 = arith.constant 0.000000e+00 : f32
    %262 = arith.cmpf ogt, %251, %cst_184 : f32
    %263 = vector.broadcast %262 : i1 to vector<72x128xi1>
    %264 = arith.andi %261, %263 : vector<72x128xi1>
    %c0_185 = arith.constant 0 : index
    %c0_186 = arith.constant 0 : index
    %265 = vector.load %arg7[%c0_185, %c0_186] : memref<72x128xi32, #tpu.memory_space<vmem>>, vector<72x128xi32>
    %c1_i32 = arith.constant 1 : i32
    %266 = vector.broadcast %c1_i32 : i32 to vector<72x128xi32>
    %267 = arith.select %264, %266, %265 : vector<72x128xi1>, vector<72x128xi32>
    %c0_187 = arith.constant 0 : index
    %c0_188 = arith.constant 0 : index
    %268 = vector.load %arg7[%c0_187, %c0_188] : memref<72x128xi32, #tpu.memory_space<vmem>>, vector<72x128xi32>
    tpu.vector_store %arg7[%c0_187, %c0_188], %267 {strides = array<i32>} : memref<72x128xi32, #tpu.memory_space<vmem>>, vector<72x128xi32>,
    %c0_189 = arith.constant 0 : index
    %c0_190 = arith.constant 0 : index
    %269 = vector.load %arg8[%c0_189, %c0_190] : memref<72x128xf32, #tpu.memory_space<vmem>>, vector<72x128xf32>
    %270 = vector.broadcast %177 : f32 to vector<72x128xf32>
    %271 = arith.select %264, %270, %269 : vector<72x128xi1>, vector<72x128xf32>
    %c0_191 = arith.constant 0 : index
    %c0_192 = arith.constant 0 : index
    %272 = vector.load %arg8[%c0_191, %c0_192] : memref<72x128xf32, #tpu.memory_space<vmem>>, vector<72x128xf32>
    tpu.vector_store %arg8[%c0_191, %c0_192], %271 {strides = array<i32>} : memref<72x128xf32, #tpu.memory_space<vmem>>, vector<72x128xf32>,
    %c0_193 = arith.constant 0 : index
    %c0_194 = arith.constant 0 : index
    %273 = vector.load %arg9[%c0_193, %c0_194] : memref<72x128xf32, #tpu.memory_space<vmem>>, vector<72x128xf32>
    %274 = vector.broadcast %179 : f32 to vector<72x128xf32>
    %275 = arith.select %264, %274, %273 : vector<72x128xi1>, vector<72x128xf32>
    %c0_195 = arith.constant 0 : index
    %c0_196 = arith.constant 0 : index
    %276 = vector.load %arg9[%c0_195, %c0_196] : memref<72x128xf32, #tpu.memory_space<vmem>>, vector<72x128xf32>
    tpu.vector_store %arg9[%c0_195, %c0_196], %275 {strides = array<i32>} : memref<72x128xf32, #tpu.memory_space<vmem>>, vector<72x128xf32>,
    %c0_197 = arith.constant 0 : index
    %c0_198 = arith.constant 0 : index
    %277 = vector.load %arg10[%c0_197, %c0_198] : memref<72x128xf32, #tpu.memory_space<vmem>>, vector<72x128xf32>
    %278 = vector.broadcast %181 : f32 to vector<72x128xf32>
    %279 = arith.select %264, %278, %277 : vector<72x128xi1>, vector<72x128xf32>
    %c0_199 = arith.constant 0 : index
    %c0_200 = arith.constant 0 : index
    %280 = vector.load %arg10[%c0_199, %c0_200] : memref<72x128xf32, #tpu.memory_space<vmem>>, vector<72x128xf32>
    tpu.vector_store %arg10[%c0_199, %c0_200], %279 {strides = array<i32>} : memref<72x128xf32, #tpu.memory_space<vmem>>, vector<72x128xf32>,
    %c0_201 = arith.constant 0 : index
    %c0_202 = arith.constant 0 : index
    %281 = vector.load %arg11[%c0_201, %c0_202] : memref<72x128xf32, #tpu.memory_space<vmem>>, vector<72x128xf32>
    %282 = vector.broadcast %183 : f32 to vector<72x128xf32>
    %283 = arith.select %264, %282, %281 : vector<72x128xi1>, vector<72x128xf32>
    %c0_203 = arith.constant 0 : index
    %c0_204 = arith.constant 0 : index
    %284 = vector.load %arg11[%c0_203, %c0_204] : memref<72x128xf32, #tpu.memory_space<vmem>>, vector<72x128xf32>
    tpu.vector_store %arg11[%c0_203, %c0_204], %283 {strides = array<i32>} : memref<72x128xf32, #tpu.memory_space<vmem>>, vector<72x128xf32>,
    %c0_205 = arith.constant 0 : index
    %c0_206 = arith.constant 0 : index
    %285 = vector.load %arg12[%c0_205, %c0_206] : memref<72x128xi32, #tpu.memory_space<vmem>>, vector<72x128xi32>
    %286 = vector.broadcast %172 : i32 to vector<72x128xi32>
    %287 = arith.select %264, %286, %285 : vector<72x128xi1>, vector<72x128xi32>
    %c0_207 = arith.constant 0 : index
    %c0_208 = arith.constant 0 : index
    %288 = vector.load %arg12[%c0_207, %c0_208] : memref<72x128xi32, #tpu.memory_space<vmem>>, vector<72x128xi32>
    tpu.vector_store %arg12[%c0_207, %c0_208], %287 {strides = array<i32>} : memref<72x128xi32, #tpu.memory_space<vmem>>, vector<72x128xi32>,
    %c2_209 = arith.constant 2 : index
    %c0_210 = arith.constant 0 : index
    %289 = memref.load %arg0[%c2_209, %c0_210] : memref<5x4xf32, #tpu.memory_space<smem>>
    %c2_211 = arith.constant 2 : index
    %c1_212 = arith.constant 1 : index
    %290 = memref.load %arg0[%c2_211, %c1_212] : memref<5x4xf32, #tpu.memory_space<smem>>
    %c2_213 = arith.constant 2 : index
    %c2_214 = arith.constant 2 : index
    %291 = memref.load %arg0[%c2_213, %c2_214] : memref<5x4xf32, #tpu.memory_space<smem>>
    %c2_215 = arith.constant 2 : index
    %c3_216 = arith.constant 3 : index
    %292 = memref.load %arg0[%c2_215, %c3_216] : memref<5x4xf32, #tpu.memory_space<smem>>
    %c2_217 = arith.constant 2 : index
    %293 = memref.load %arg1[%c2_217] : memref<5xi32, #tpu.memory_space<smem>>
    %294 = arith.subf %291, %289 : f32
    %295 = arith.subf %292, %290 : f32
    %296 = arith.mulf %294, %295 : f32
    %297 = arith.addf %289, %291 : f32
    %cst_218 = arith.constant 0.00166666671 : f32
    %298 = arith.mulf %297, %cst_218 : f32
    %299 = arith.addf %290, %292 : f32
    %cst_219 = arith.constant 0.00166666671 : f32
    %300 = arith.mulf %299, %cst_219 : f32
    %301 = arith.subf %291, %289 : f32
    %cst_220 = arith.constant 0.00333333341 : f32
    %302 = arith.mulf %301, %cst_220 : f32
    %303 = arith.subf %292, %290 : f32
    %cst_221 = arith.constant 0.00333333341 : f32
    %304 = arith.mulf %303, %cst_221 : f32
    %305 = vector.broadcast %291 : f32 to vector<72x128xf32>
    %306 = arith.minimumf %305, %10 : vector<72x128xf32>
    %307 = vector.broadcast %289 : f32 to vector<72x128xf32>
    %308 = arith.maximumf %307, %6 : vector<72x128xf32>
    %309 = arith.subf %306, %308 : vector<72x128xf32>
    %cst_222 = arith.constant 0.000000e+00 : f32
    %310 = vector.broadcast %cst_222 : f32 to vector<72x128xf32>
    %311 = arith.maximumf %309, %310 : vector<72x128xf32>
    %312 = vector.broadcast %292 : f32 to vector<72x128xf32>
    %313 = arith.minimumf %312, %12 : vector<72x128xf32>
    %314 = vector.broadcast %290 : f32 to vector<72x128xf32>
    %315 = arith.maximumf %314, %8 : vector<72x128xf32>
    %316 = arith.subf %313, %315 : vector<72x128xf32>
    %cst_223 = arith.constant 0.000000e+00 : f32
    %317 = vector.broadcast %cst_223 : f32 to vector<72x128xf32>
    %318 = arith.maximumf %316, %317 : vector<72x128xf32>
    %319 = arith.mulf %311, %318 : vector<72x128xf32>
    %320 = vector.broadcast %296 : f32 to vector<72x128xf32>
    %321 = arith.addf %320, %14 : vector<72x128xf32>
    %322 = arith.subf %321, %319 : vector<72x128xf32>
    %cst_224 = arith.constant 0.000000e+00 : f32
    %323 = vector.broadcast %cst_224 : f32 to vector<72x128xf32>
    %324 = arith.cmpf ogt, %322, %323 : vector<72x128xf32>
    %cst_225 = arith.constant 0.000000e+00 : f32
    %325 = vector.broadcast %cst_225 : f32 to vector<72x128xf32>
    %326 = arith.cmpf ogt, %322, %325 : vector<72x128xf32>
    %cst_226 = arith.constant 1.000000e+00 : f32
    %327 = vector.broadcast %cst_226 : f32 to vector<72x128xf32>
    %328 = arith.select %326, %322, %327 : vector<72x128xi1>, vector<72x128xf32>
    %329 = arith.divf %319, %328 : vector<72x128xf32>
    %cst_227 = arith.constant 0.000000e+00 : f32
    %330 = vector.broadcast %cst_227 : f32 to vector<72x128xf32>
    %331 = arith.select %324, %329, %330 : vector<72x128xi1>, vector<72x128xf32>
    %c0_228 = arith.constant 0 : index
    %c0_229 = arith.constant 0 : index
    %332 = vector.load %arg6[%c0_228, %c0_229] : memref<72x128xf32, #tpu.memory_space<vmem>>, vector<72x128xf32>
    %333 = arith.cmpf ogt, %331, %332 : vector<72x128xf32>
    %c0_230 = arith.constant 0 : index
    %c0_231 = arith.constant 0 : index
    %334 = vector.load %arg6[%c0_230, %c0_231] : memref<72x128xf32, #tpu.memory_space<vmem>>, vector<72x128xf32>
    %335 = arith.select %333, %331, %334 : vector<72x128xi1>, vector<72x128xf32>
    %c0_232 = arith.constant 0 : index
    %c0_233 = arith.constant 0 : index
    %336 = vector.load %arg6[%c0_232, %c0_233] : memref<72x128xf32, #tpu.memory_space<vmem>>, vector<72x128xf32>
    tpu.vector_store %arg6[%c0_232, %c0_233], %335 {strides = array<i32>} : memref<72x128xf32, #tpu.memory_space<vmem>>, vector<72x128xf32>,
    %c0_234 = arith.constant 0 : index
    %c0_235 = arith.constant 0 : index
    %c0_236 = arith.constant 0 : index
    %337 = vector.load %arg4[%c0_234, %c0_235, %c0_236] : memref<4x72x128xf32, #tpu.memory_space<vmem>>, vector<1x72x128xf32>
    %338 = vector.shape_cast %337 : vector<1x72x128xf32> to vector<72x128xf32>
    %339 = vector.broadcast %298 : f32 to vector<72x128xf32>
    %340 = arith.select %333, %339, %338 : vector<72x128xi1>, vector<72x128xf32>
    %c0_237 = arith.constant 0 : index
    %c0_238 = arith.constant 0 : index
    %c0_239 = arith.constant 0 : index
    %341 = vector.load %arg4[%c0_237, %c0_238, %c0_239] : memref<4x72x128xf32, #tpu.memory_space<vmem>>, vector<1x72x128xf32>
    %342 = vector.shape_cast %341 : vector<1x72x128xf32> to vector<72x128xf32>
    %343 = vector.shape_cast %340 : vector<72x128xf32> to vector<1x72x128xf32>
    tpu.vector_store %arg4[%c0_237, %c0_238, %c0_239], %343 {strides = array<i32>} : memref<4x72x128xf32, #tpu.memory_space<vmem>>, vector<1x72x128xf32>,
    %c1_240 = arith.constant 1 : index
    %c0_241 = arith.constant 0 : index
    %c0_242 = arith.constant 0 : index
    %344 = vector.load %arg4[%c1_240, %c0_241, %c0_242] : memref<4x72x128xf32, #tpu.memory_space<vmem>>, vector<1x72x128xf32>
    %345 = vector.shape_cast %344 : vector<1x72x128xf32> to vector<72x128xf32>
    %346 = vector.broadcast %300 : f32 to vector<72x128xf32>
    %347 = arith.select %333, %346, %345 : vector<72x128xi1>, vector<72x128xf32>
    %c1_243 = arith.constant 1 : index
    %c0_244 = arith.constant 0 : index
    %c0_245 = arith.constant 0 : index
    %348 = vector.load %arg4[%c1_243, %c0_244, %c0_245] : memref<4x72x128xf32, #tpu.memory_space<vmem>>, vector<1x72x128xf32>
    %349 = vector.shape_cast %348 : vector<1x72x128xf32> to vector<72x128xf32>
    %350 = vector.shape_cast %347 : vector<72x128xf32> to vector<1x72x128xf32>
    tpu.vector_store %arg4[%c1_243, %c0_244, %c0_245], %350 {strides = array<i32>} : memref<4x72x128xf32, #tpu.memory_space<vmem>>, vector<1x72x128xf32>,
    %c2_246 = arith.constant 2 : index
    %c0_247 = arith.constant 0 : index
    %c0_248 = arith.constant 0 : index
    %351 = vector.load %arg4[%c2_246, %c0_247, %c0_248] : memref<4x72x128xf32, #tpu.memory_space<vmem>>, vector<1x72x128xf32>
    %352 = vector.shape_cast %351 : vector<1x72x128xf32> to vector<72x128xf32>
    %353 = vector.broadcast %302 : f32 to vector<72x128xf32>
    %354 = arith.select %333, %353, %352 : vector<72x128xi1>, vector<72x128xf32>
    %c2_249 = arith.constant 2 : index
    %c0_250 = arith.constant 0 : index
    %c0_251 = arith.constant 0 : index
    %355 = vector.load %arg4[%c2_249, %c0_250, %c0_251] : memref<4x72x128xf32, #tpu.memory_space<vmem>>, vector<1x72x128xf32>
    %356 = vector.shape_cast %355 : vector<1x72x128xf32> to vector<72x128xf32>
    %357 = vector.shape_cast %354 : vector<72x128xf32> to vector<1x72x128xf32>
    tpu.vector_store %arg4[%c2_249, %c0_250, %c0_251], %357 {strides = array<i32>} : memref<4x72x128xf32, #tpu.memory_space<vmem>>, vector<1x72x128xf32>,
    %c3_252 = arith.constant 3 : index
    %c0_253 = arith.constant 0 : index
    %c0_254 = arith.constant 0 : index
    %358 = vector.load %arg4[%c3_252, %c0_253, %c0_254] : memref<4x72x128xf32, #tpu.memory_space<vmem>>, vector<1x72x128xf32>
    %359 = vector.shape_cast %358 : vector<1x72x128xf32> to vector<72x128xf32>
    %360 = vector.broadcast %304 : f32 to vector<72x128xf32>
    %361 = arith.select %333, %360, %359 : vector<72x128xi1>, vector<72x128xf32>
    %c3_255 = arith.constant 3 : index
    %c0_256 = arith.constant 0 : index
    %c0_257 = arith.constant 0 : index
    %362 = vector.load %arg4[%c3_255, %c0_256, %c0_257] : memref<4x72x128xf32, #tpu.memory_space<vmem>>, vector<1x72x128xf32>
    %363 = vector.shape_cast %362 : vector<1x72x128xf32> to vector<72x128xf32>
    %364 = vector.shape_cast %361 : vector<72x128xf32> to vector<1x72x128xf32>
    tpu.vector_store %arg4[%c3_255, %c0_256, %c0_257], %364 {strides = array<i32>} : memref<4x72x128xf32, #tpu.memory_space<vmem>>, vector<1x72x128xf32>,
    %c0_258 = arith.constant 0 : index
    %c0_259 = arith.constant 0 : index
    %365 = vector.load %arg5[%c0_258, %c0_259] : memref<72x128xi32, #tpu.memory_space<vmem>>, vector<72x128xi32>
    %366 = vector.broadcast %293 : i32 to vector<72x128xi32>
    %367 = arith.select %333, %366, %365 : vector<72x128xi1>, vector<72x128xi32>
    %c0_260 = arith.constant 0 : index
    %c0_261 = arith.constant 0 : index
    %368 = vector.load %arg5[%c0_260, %c0_261] : memref<72x128xi32, #tpu.memory_space<vmem>>, vector<72x128xi32>
    tpu.vector_store %arg5[%c0_260, %c0_261], %367 {strides = array<i32>} : memref<72x128xi32, #tpu.memory_space<vmem>>, vector<72x128xi32>,
    %369 = vector.shape_cast %331 : vector<72x128xf32> to vector<1x72x128xf32>
    %cst_262 = arith.constant dense<0xFF800000> : vector<1xf32>
    %370 = vector.multi_reduction <maximumf>, %369, %cst_262 [1, 2] : vector<1x72x128xf32> to vector<1xf32>
    %371 = vector.shape_cast %370 : vector<1xf32> to vector<1x1x1xf32>
    %372 = vector.extract %371[0, 0, 0] : f32 from vector<1x1x1xf32>
    %373 = vector.broadcast %372 : f32 to vector<72x128xf32>
    %374 = arith.cmpf oeq, %331, %373 : vector<72x128xf32>
    %c9216_i32_263 = arith.constant 9216 : i32
    %375 = vector.broadcast %c9216_i32_263 : i32 to vector<72x128xi32>
    %376 = arith.select %374, %4, %375 : vector<72x128xi1>, vector<72x128xi32>
    %377 = vector.shape_cast %376 : vector<72x128xi32> to vector<1x72x128xi32>
    %cst_264 = arith.constant dense<2147483647> : vector<1xi32>
    %378 = vector.multi_reduction <minsi>, %377, %cst_264 [1, 2] : vector<1x72x128xi32> to vector<1xi32>
    %379 = vector.shape_cast %378 : vector<1xi32> to vector<1x1x1xi32>
    %380 = vector.extract %379[0, 0, 0] : i32 from vector<1x1x1xi32>
    %381 = vector.broadcast %380 : i32 to vector<72x128xi32>
    %382 = arith.cmpi eq, %4, %381 : vector<72x128xi32>
    %cst_265 = arith.constant 0.000000e+00 : f32
    %383 = arith.cmpf ogt, %372, %cst_265 : f32
    %384 = vector.broadcast %383 : i1 to vector<72x128xi1>
    %385 = arith.andi %382, %384 : vector<72x128xi1>
    %c0_266 = arith.constant 0 : index
    %c0_267 = arith.constant 0 : index
    %386 = vector.load %arg7[%c0_266, %c0_267] : memref<72x128xi32, #tpu.memory_space<vmem>>, vector<72x128xi32>
    %c2_i32 = arith.constant 2 : i32
    %387 = vector.broadcast %c2_i32 : i32 to vector<72x128xi32>
    %388 = arith.select %385, %387, %386 : vector<72x128xi1>, vector<72x128xi32>
    %c0_268 = arith.constant 0 : index
    %c0_269 = arith.constant 0 : index
    %389 = vector.load %arg7[%c0_268, %c0_269] : memref<72x128xi32, #tpu.memory_space<vmem>>, vector<72x128xi32>
    tpu.vector_store %arg7[%c0_268, %c0_269], %388 {strides = array<i32>} : memref<72x128xi32, #tpu.memory_space<vmem>>, vector<72x128xi32>,
    %c0_270 = arith.constant 0 : index
    %c0_271 = arith.constant 0 : index
    %390 = vector.load %arg8[%c0_270, %c0_271] : memref<72x128xf32, #tpu.memory_space<vmem>>, vector<72x128xf32>
    %391 = vector.broadcast %298 : f32 to vector<72x128xf32>
    %392 = arith.select %385, %391, %390 : vector<72x128xi1>, vector<72x128xf32>
    %c0_272 = arith.constant 0 : index
    %c0_273 = arith.constant 0 : index
    %393 = vector.load %arg8[%c0_272, %c0_273] : memref<72x128xf32, #tpu.memory_space<vmem>>, vector<72x128xf32>
    tpu.vector_store %arg8[%c0_272, %c0_273], %392 {strides = array<i32>} : memref<72x128xf32, #tpu.memory_space<vmem>>, vector<72x128xf32>,
    %c0_274 = arith.constant 0 : index
    %c0_275 = arith.constant 0 : index
    %394 = vector.load %arg9[%c0_274, %c0_275] : memref<72x128xf32, #tpu.memory_space<vmem>>, vector<72x128xf32>
    %395 = vector.broadcast %300 : f32 to vector<72x128xf32>
    %396 = arith.select %385, %395, %394 : vector<72x128xi1>, vector<72x128xf32>
    %c0_276 = arith.constant 0 : index
    %c0_277 = arith.constant 0 : index
    %397 = vector.load %arg9[%c0_276, %c0_277] : memref<72x128xf32, #tpu.memory_space<vmem>>, vector<72x128xf32>
    tpu.vector_store %arg9[%c0_276, %c0_277], %396 {strides = array<i32>} : memref<72x128xf32, #tpu.memory_space<vmem>>, vector<72x128xf32>,
    %c0_278 = arith.constant 0 : index
    %c0_279 = arith.constant 0 : index
    %398 = vector.load %arg10[%c0_278, %c0_279] : memref<72x128xf32, #tpu.memory_space<vmem>>, vector<72x128xf32>
    %399 = vector.broadcast %302 : f32 to vector<72x128xf32>
    %400 = arith.select %385, %399, %398 : vector<72x128xi1>, vector<72x128xf32>
    %c0_280 = arith.constant 0 : index
    %c0_281 = arith.constant 0 : index
    %401 = vector.load %arg10[%c0_280, %c0_281] : memref<72x128xf32, #tpu.memory_space<vmem>>, vector<72x128xf32>
    tpu.vector_store %arg10[%c0_280, %c0_281], %400 {strides = array<i32>} : memref<72x128xf32, #tpu.memory_space<vmem>>, vector<72x128xf32>,
    %c0_282 = arith.constant 0 : index
    %c0_283 = arith.constant 0 : index
    %402 = vector.load %arg11[%c0_282, %c0_283] : memref<72x128xf32, #tpu.memory_space<vmem>>, vector<72x128xf32>
    %403 = vector.broadcast %304 : f32 to vector<72x128xf32>
    %404 = arith.select %385, %403, %402 : vector<72x128xi1>, vector<72x128xf32>
    %c0_284 = arith.constant 0 : index
    %c0_285 = arith.constant 0 : index
    %405 = vector.load %arg11[%c0_284, %c0_285] : memref<72x128xf32, #tpu.memory_space<vmem>>, vector<72x128xf32>
    tpu.vector_store %arg11[%c0_284, %c0_285], %404 {strides = array<i32>} : memref<72x128xf32, #tpu.memory_space<vmem>>, vector<72x128xf32>,
    %c0_286 = arith.constant 0 : index
    %c0_287 = arith.constant 0 : index
    %406 = vector.load %arg12[%c0_286, %c0_287] : memref<72x128xi32, #tpu.memory_space<vmem>>, vector<72x128xi32>
    %407 = vector.broadcast %293 : i32 to vector<72x128xi32>
    %408 = arith.select %385, %407, %406 : vector<72x128xi1>, vector<72x128xi32>
    %c0_288 = arith.constant 0 : index
    %c0_289 = arith.constant 0 : index
    %409 = vector.load %arg12[%c0_288, %c0_289] : memref<72x128xi32, #tpu.memory_space<vmem>>, vector<72x128xi32>
    tpu.vector_store %arg12[%c0_288, %c0_289], %408 {strides = array<i32>} : memref<72x128xi32, #tpu.memory_space<vmem>>, vector<72x128xi32>,
    %c3_290 = arith.constant 3 : index
    %c0_291 = arith.constant 0 : index
    %410 = memref.load %arg0[%c3_290, %c0_291] : memref<5x4xf32, #tpu.memory_space<smem>>
    %c3_292 = arith.constant 3 : index
    %c1_293 = arith.constant 1 : index
    %411 = memref.load %arg0[%c3_292, %c1_293] : memref<5x4xf32, #tpu.memory_space<smem>>
    %c3_294 = arith.constant 3 : index
    %c2_295 = arith.constant 2 : index
    %412 = memref.load %arg0[%c3_294, %c2_295] : memref<5x4xf32, #tpu.memory_space<smem>>
    %c3_296 = arith.constant 3 : index
    %c3_297 = arith.constant 3 : index
    %413 = memref.load %arg0[%c3_296, %c3_297] : memref<5x4xf32, #tpu.memory_space<smem>>
    %c3_298 = arith.constant 3 : index
    %414 = memref.load %arg1[%c3_298] : memref<5xi32, #tpu.memory_space<smem>>
    %415 = arith.subf %412, %410 : f32
    %416 = arith.subf %413, %411 : f32
    %417 = arith.mulf %415, %416 : f32
    %418 = arith.addf %410, %412 : f32
    %cst_299 = arith.constant 0.00166666671 : f32
    %419 = arith.mulf %418, %cst_299 : f32
    %420 = arith.addf %411, %413 : f32
    %cst_300 = arith.constant 0.00166666671 : f32
    %421 = arith.mulf %420, %cst_300 : f32
    %422 = arith.subf %412, %410 : f32
    %cst_301 = arith.constant 0.00333333341 : f32
    %423 = arith.mulf %422, %cst_301 : f32
    %424 = arith.subf %413, %411 : f32
    %cst_302 = arith.constant 0.00333333341 : f32
    %425 = arith.mulf %424, %cst_302 : f32
    %426 = vector.broadcast %412 : f32 to vector<72x128xf32>
    %427 = arith.minimumf %426, %10 : vector<72x128xf32>
    %428 = vector.broadcast %410 : f32 to vector<72x128xf32>
    %429 = arith.maximumf %428, %6 : vector<72x128xf32>
    %430 = arith.subf %427, %429 : vector<72x128xf32>
    %cst_303 = arith.constant 0.000000e+00 : f32
    %431 = vector.broadcast %cst_303 : f32 to vector<72x128xf32>
    %432 = arith.maximumf %430, %431 : vector<72x128xf32>
    %433 = vector.broadcast %413 : f32 to vector<72x128xf32>
    %434 = arith.minimumf %433, %12 : vector<72x128xf32>
    %435 = vector.broadcast %411 : f32 to vector<72x128xf32>
    %436 = arith.maximumf %435, %8 : vector<72x128xf32>
    %437 = arith.subf %434, %436 : vector<72x128xf32>
    %cst_304 = arith.constant 0.000000e+00 : f32
    %438 = vector.broadcast %cst_304 : f32 to vector<72x128xf32>
    %439 = arith.maximumf %437, %438 : vector<72x128xf32>
    %440 = arith.mulf %432, %439 : vector<72x128xf32>
    %441 = vector.broadcast %417 : f32 to vector<72x128xf32>
    %442 = arith.addf %441, %14 : vector<72x128xf32>
    %443 = arith.subf %442, %440 : vector<72x128xf32>
    %cst_305 = arith.constant 0.000000e+00 : f32
    %444 = vector.broadcast %cst_305 : f32 to vector<72x128xf32>
    %445 = arith.cmpf ogt, %443, %444 : vector<72x128xf32>
    %cst_306 = arith.constant 0.000000e+00 : f32
    %446 = vector.broadcast %cst_306 : f32 to vector<72x128xf32>
    %447 = arith.cmpf ogt, %443, %446 : vector<72x128xf32>
    %cst_307 = arith.constant 1.000000e+00 : f32
    %448 = vector.broadcast %cst_307 : f32 to vector<72x128xf32>
    %449 = arith.select %447, %443, %448 : vector<72x128xi1>, vector<72x128xf32>
    %450 = arith.divf %440, %449 : vector<72x128xf32>
    %cst_308 = arith.constant 0.000000e+00 : f32
    %451 = vector.broadcast %cst_308 : f32 to vector<72x128xf32>
    %452 = arith.select %445, %450, %451 : vector<72x128xi1>, vector<72x128xf32>
    %c0_309 = arith.constant 0 : index
    %c0_310 = arith.constant 0 : index
    %453 = vector.load %arg6[%c0_309, %c0_310] : memref<72x128xf32, #tpu.memory_space<vmem>>, vector<72x128xf32>
    %454 = arith.cmpf ogt, %452, %453 : vector<72x128xf32>
    %c0_311 = arith.constant 0 : index
    %c0_312 = arith.constant 0 : index
    %455 = vector.load %arg6[%c0_311, %c0_312] : memref<72x128xf32, #tpu.memory_space<vmem>>, vector<72x128xf32>
    %456 = arith.select %454, %452, %455 : vector<72x128xi1>, vector<72x128xf32>
    %c0_313 = arith.constant 0 : index
    %c0_314 = arith.constant 0 : index
    %457 = vector.load %arg6[%c0_313, %c0_314] : memref<72x128xf32, #tpu.memory_space<vmem>>, vector<72x128xf32>
    tpu.vector_store %arg6[%c0_313, %c0_314], %456 {strides = array<i32>} : memref<72x128xf32, #tpu.memory_space<vmem>>, vector<72x128xf32>,
    %c0_315 = arith.constant 0 : index
    %c0_316 = arith.constant 0 : index
    %c0_317 = arith.constant 0 : index
    %458 = vector.load %arg4[%c0_315, %c0_316, %c0_317] : memref<4x72x128xf32, #tpu.memory_space<vmem>>, vector<1x72x128xf32>
    %459 = vector.shape_cast %458 : vector<1x72x128xf32> to vector<72x128xf32>
    %460 = vector.broadcast %419 : f32 to vector<72x128xf32>
    %461 = arith.select %454, %460, %459 : vector<72x128xi1>, vector<72x128xf32>
    %c0_318 = arith.constant 0 : index
    %c0_319 = arith.constant 0 : index
    %c0_320 = arith.constant 0 : index
    %462 = vector.load %arg4[%c0_318, %c0_319, %c0_320] : memref<4x72x128xf32, #tpu.memory_space<vmem>>, vector<1x72x128xf32>
    %463 = vector.shape_cast %462 : vector<1x72x128xf32> to vector<72x128xf32>
    %464 = vector.shape_cast %461 : vector<72x128xf32> to vector<1x72x128xf32>
    tpu.vector_store %arg4[%c0_318, %c0_319, %c0_320], %464 {strides = array<i32>} : memref<4x72x128xf32, #tpu.memory_space<vmem>>, vector<1x72x128xf32>,
    %c1_321 = arith.constant 1 : index
    %c0_322 = arith.constant 0 : index
    %c0_323 = arith.constant 0 : index
    %465 = vector.load %arg4[%c1_321, %c0_322, %c0_323] : memref<4x72x128xf32, #tpu.memory_space<vmem>>, vector<1x72x128xf32>
    %466 = vector.shape_cast %465 : vector<1x72x128xf32> to vector<72x128xf32>
    %467 = vector.broadcast %421 : f32 to vector<72x128xf32>
    %468 = arith.select %454, %467, %466 : vector<72x128xi1>, vector<72x128xf32>
    %c1_324 = arith.constant 1 : index
    %c0_325 = arith.constant 0 : index
    %c0_326 = arith.constant 0 : index
    %469 = vector.load %arg4[%c1_324, %c0_325, %c0_326] : memref<4x72x128xf32, #tpu.memory_space<vmem>>, vector<1x72x128xf32>
    %470 = vector.shape_cast %469 : vector<1x72x128xf32> to vector<72x128xf32>
    %471 = vector.shape_cast %468 : vector<72x128xf32> to vector<1x72x128xf32>
    tpu.vector_store %arg4[%c1_324, %c0_325, %c0_326], %471 {strides = array<i32>} : memref<4x72x128xf32, #tpu.memory_space<vmem>>, vector<1x72x128xf32>,
    %c2_327 = arith.constant 2 : index
    %c0_328 = arith.constant 0 : index
    %c0_329 = arith.constant 0 : index
    %472 = vector.load %arg4[%c2_327, %c0_328, %c0_329] : memref<4x72x128xf32, #tpu.memory_space<vmem>>, vector<1x72x128xf32>
    %473 = vector.shape_cast %472 : vector<1x72x128xf32> to vector<72x128xf32>
    %474 = vector.broadcast %423 : f32 to vector<72x128xf32>
    %475 = arith.select %454, %474, %473 : vector<72x128xi1>, vector<72x128xf32>
    %c2_330 = arith.constant 2 : index
    %c0_331 = arith.constant 0 : index
    %c0_332 = arith.constant 0 : index
    %476 = vector.load %arg4[%c2_330, %c0_331, %c0_332] : memref<4x72x128xf32, #tpu.memory_space<vmem>>, vector<1x72x128xf32>
    %477 = vector.shape_cast %476 : vector<1x72x128xf32> to vector<72x128xf32>
    %478 = vector.shape_cast %475 : vector<72x128xf32> to vector<1x72x128xf32>
    tpu.vector_store %arg4[%c2_330, %c0_331, %c0_332], %478 {strides = array<i32>} : memref<4x72x128xf32, #tpu.memory_space<vmem>>, vector<1x72x128xf32>,
    %c3_333 = arith.constant 3 : index
    %c0_334 = arith.constant 0 : index
    %c0_335 = arith.constant 0 : index
    %479 = vector.load %arg4[%c3_333, %c0_334, %c0_335] : memref<4x72x128xf32, #tpu.memory_space<vmem>>, vector<1x72x128xf32>
    %480 = vector.shape_cast %479 : vector<1x72x128xf32> to vector<72x128xf32>
    %481 = vector.broadcast %425 : f32 to vector<72x128xf32>
    %482 = arith.select %454, %481, %480 : vector<72x128xi1>, vector<72x128xf32>
    %c3_336 = arith.constant 3 : index
    %c0_337 = arith.constant 0 : index
    %c0_338 = arith.constant 0 : index
    %483 = vector.load %arg4[%c3_336, %c0_337, %c0_338] : memref<4x72x128xf32, #tpu.memory_space<vmem>>, vector<1x72x128xf32>
    %484 = vector.shape_cast %483 : vector<1x72x128xf32> to vector<72x128xf32>
    %485 = vector.shape_cast %482 : vector<72x128xf32> to vector<1x72x128xf32>
    tpu.vector_store %arg4[%c3_336, %c0_337, %c0_338], %485 {strides = array<i32>} : memref<4x72x128xf32, #tpu.memory_space<vmem>>, vector<1x72x128xf32>,
    %c0_339 = arith.constant 0 : index
    %c0_340 = arith.constant 0 : index
    %486 = vector.load %arg5[%c0_339, %c0_340] : memref<72x128xi32, #tpu.memory_space<vmem>>, vector<72x128xi32>
    %487 = vector.broadcast %414 : i32 to vector<72x128xi32>
    %488 = arith.select %454, %487, %486 : vector<72x128xi1>, vector<72x128xi32>
    %c0_341 = arith.constant 0 : index
    %c0_342 = arith.constant 0 : index
    %489 = vector.load %arg5[%c0_341, %c0_342] : memref<72x128xi32, #tpu.memory_space<vmem>>, vector<72x128xi32>
    tpu.vector_store %arg5[%c0_341, %c0_342], %488 {strides = array<i32>} : memref<72x128xi32, #tpu.memory_space<vmem>>, vector<72x128xi32>,
    %490 = vector.shape_cast %452 : vector<72x128xf32> to vector<1x72x128xf32>
    %cst_343 = arith.constant dense<0xFF800000> : vector<1xf32>
    %491 = vector.multi_reduction <maximumf>, %490, %cst_343 [1, 2] : vector<1x72x128xf32> to vector<1xf32>
    %492 = vector.shape_cast %491 : vector<1xf32> to vector<1x1x1xf32>
    %493 = vector.extract %492[0, 0, 0] : f32 from vector<1x1x1xf32>
    %494 = vector.broadcast %493 : f32 to vector<72x128xf32>
    %495 = arith.cmpf oeq, %452, %494 : vector<72x128xf32>
    %c9216_i32_344 = arith.constant 9216 : i32
    %496 = vector.broadcast %c9216_i32_344 : i32 to vector<72x128xi32>
    %497 = arith.select %495, %4, %496 : vector<72x128xi1>, vector<72x128xi32>
    %498 = vector.shape_cast %497 : vector<72x128xi32> to vector<1x72x128xi32>
    %cst_345 = arith.constant dense<2147483647> : vector<1xi32>
    %499 = vector.multi_reduction <minsi>, %498, %cst_345 [1, 2] : vector<1x72x128xi32> to vector<1xi32>
    %500 = vector.shape_cast %499 : vector<1xi32> to vector<1x1x1xi32>
    %501 = vector.extract %500[0, 0, 0] : i32 from vector<1x1x1xi32>
    %502 = vector.broadcast %501 : i32 to vector<72x128xi32>
    %503 = arith.cmpi eq, %4, %502 : vector<72x128xi32>
    %cst_346 = arith.constant 0.000000e+00 : f32
    %504 = arith.cmpf ogt, %493, %cst_346 : f32
    %505 = vector.broadcast %504 : i1 to vector<72x128xi1>
    %506 = arith.andi %503, %505 : vector<72x128xi1>
    %c0_347 = arith.constant 0 : index
    %c0_348 = arith.constant 0 : index
    %507 = vector.load %arg7[%c0_347, %c0_348] : memref<72x128xi32, #tpu.memory_space<vmem>>, vector<72x128xi32>
    %c3_i32 = arith.constant 3 : i32
    %508 = vector.broadcast %c3_i32 : i32 to vector<72x128xi32>
    %509 = arith.select %506, %508, %507 : vector<72x128xi1>, vector<72x128xi32>
    %c0_349 = arith.constant 0 : index
    %c0_350 = arith.constant 0 : index
    %510 = vector.load %arg7[%c0_349, %c0_350] : memref<72x128xi32, #tpu.memory_space<vmem>>, vector<72x128xi32>
    tpu.vector_store %arg7[%c0_349, %c0_350], %509 {strides = array<i32>} : memref<72x128xi32, #tpu.memory_space<vmem>>, vector<72x128xi32>,
    %c0_351 = arith.constant 0 : index
    %c0_352 = arith.constant 0 : index
    %511 = vector.load %arg8[%c0_351, %c0_352] : memref<72x128xf32, #tpu.memory_space<vmem>>, vector<72x128xf32>
    %512 = vector.broadcast %419 : f32 to vector<72x128xf32>
    %513 = arith.select %506, %512, %511 : vector<72x128xi1>, vector<72x128xf32>
    %c0_353 = arith.constant 0 : index
    %c0_354 = arith.constant 0 : index
    %514 = vector.load %arg8[%c0_353, %c0_354] : memref<72x128xf32, #tpu.memory_space<vmem>>, vector<72x128xf32>
    tpu.vector_store %arg8[%c0_353, %c0_354], %513 {strides = array<i32>} : memref<72x128xf32, #tpu.memory_space<vmem>>, vector<72x128xf32>,
    %c0_355 = arith.constant 0 : index
    %c0_356 = arith.constant 0 : index
    %515 = vector.load %arg9[%c0_355, %c0_356] : memref<72x128xf32, #tpu.memory_space<vmem>>, vector<72x128xf32>
    %516 = vector.broadcast %421 : f32 to vector<72x128xf32>
    %517 = arith.select %506, %516, %515 : vector<72x128xi1>, vector<72x128xf32>
    %c0_357 = arith.constant 0 : index
    %c0_358 = arith.constant 0 : index
    %518 = vector.load %arg9[%c0_357, %c0_358] : memref<72x128xf32, #tpu.memory_space<vmem>>, vector<72x128xf32>
    tpu.vector_store %arg9[%c0_357, %c0_358], %517 {strides = array<i32>} : memref<72x128xf32, #tpu.memory_space<vmem>>, vector<72x128xf32>,
    %c0_359 = arith.constant 0 : index
    %c0_360 = arith.constant 0 : index
    %519 = vector.load %arg10[%c0_359, %c0_360] : memref<72x128xf32, #tpu.memory_space<vmem>>, vector<72x128xf32>
    %520 = vector.broadcast %423 : f32 to vector<72x128xf32>
    %521 = arith.select %506, %520, %519 : vector<72x128xi1>, vector<72x128xf32>
    %c0_361 = arith.constant 0 : index
    %c0_362 = arith.constant 0 : index
    %522 = vector.load %arg10[%c0_361, %c0_362] : memref<72x128xf32, #tpu.memory_space<vmem>>, vector<72x128xf32>
    tpu.vector_store %arg10[%c0_361, %c0_362], %521 {strides = array<i32>} : memref<72x128xf32, #tpu.memory_space<vmem>>, vector<72x128xf32>,
    %c0_363 = arith.constant 0 : index
    %c0_364 = arith.constant 0 : index
    %523 = vector.load %arg11[%c0_363, %c0_364] : memref<72x128xf32, #tpu.memory_space<vmem>>, vector<72x128xf32>
    %524 = vector.broadcast %425 : f32 to vector<72x128xf32>
    %525 = arith.select %506, %524, %523 : vector<72x128xi1>, vector<72x128xf32>
    %c0_365 = arith.constant 0 : index
    %c0_366 = arith.constant 0 : index
    %526 = vector.load %arg11[%c0_365, %c0_366] : memref<72x128xf32, #tpu.memory_space<vmem>>, vector<72x128xf32>
    tpu.vector_store %arg11[%c0_365, %c0_366], %525 {strides = array<i32>} : memref<72x128xf32, #tpu.memory_space<vmem>>, vector<72x128xf32>,
    %c0_367 = arith.constant 0 : index
    %c0_368 = arith.constant 0 : index
    %527 = vector.load %arg12[%c0_367, %c0_368] : memref<72x128xi32, #tpu.memory_space<vmem>>, vector<72x128xi32>
    %528 = vector.broadcast %414 : i32 to vector<72x128xi32>
    %529 = arith.select %506, %528, %527 : vector<72x128xi1>, vector<72x128xi32>
    %c0_369 = arith.constant 0 : index
    %c0_370 = arith.constant 0 : index
    %530 = vector.load %arg12[%c0_369, %c0_370] : memref<72x128xi32, #tpu.memory_space<vmem>>, vector<72x128xi32>
    tpu.vector_store %arg12[%c0_369, %c0_370], %529 {strides = array<i32>} : memref<72x128xi32, #tpu.memory_space<vmem>>, vector<72x128xi32>,
    %c4_371 = arith.constant 4 : index
    %c0_372 = arith.constant 0 : index
    %531 = memref.load %arg0[%c4_371, %c0_372] : memref<5x4xf32, #tpu.memory_space<smem>>
    %c4_373 = arith.constant 4 : index
    %c1_374 = arith.constant 1 : index
    %532 = memref.load %arg0[%c4_373, %c1_374] : memref<5x4xf32, #tpu.memory_space<smem>>
    %c4_375 = arith.constant 4 : index
    %c2_376 = arith.constant 2 : index
    %533 = memref.load %arg0[%c4_375, %c2_376] : memref<5x4xf32, #tpu.memory_space<smem>>
    %c4_377 = arith.constant 4 : index
    %c3_378 = arith.constant 3 : index
    %534 = memref.load %arg0[%c4_377, %c3_378] : memref<5x4xf32, #tpu.memory_space<smem>>
    %c4_379 = arith.constant 4 : index
    %535 = memref.load %arg1[%c4_379] : memref<5xi32, #tpu.memory_space<smem>>
    %536 = arith.subf %533, %531 : f32
    %537 = arith.subf %534, %532 : f32
    %538 = arith.mulf %536, %537 : f32
    %539 = arith.addf %531, %533 : f32
    %cst_380 = arith.constant 0.00166666671 : f32
    %540 = arith.mulf %539, %cst_380 : f32
    %541 = arith.addf %532, %534 : f32
    %cst_381 = arith.constant 0.00166666671 : f32
    %542 = arith.mulf %541, %cst_381 : f32
    %543 = arith.subf %533, %531 : f32
    %cst_382 = arith.constant 0.00333333341 : f32
    %544 = arith.mulf %543, %cst_382 : f32
    %545 = arith.subf %534, %532 : f32
    %cst_383 = arith.constant 0.00333333341 : f32
    %546 = arith.mulf %545, %cst_383 : f32
    %547 = vector.broadcast %533 : f32 to vector<72x128xf32>
    %548 = arith.minimumf %547, %10 : vector<72x128xf32>
    %549 = vector.broadcast %531 : f32 to vector<72x128xf32>
    %550 = arith.maximumf %549, %6 : vector<72x128xf32>
    %551 = arith.subf %548, %550 : vector<72x128xf32>
    %cst_384 = arith.constant 0.000000e+00 : f32
    %552 = vector.broadcast %cst_384 : f32 to vector<72x128xf32>
    %553 = arith.maximumf %551, %552 : vector<72x128xf32>
    %554 = vector.broadcast %534 : f32 to vector<72x128xf32>
    %555 = arith.minimumf %554, %12 : vector<72x128xf32>
    %556 = vector.broadcast %532 : f32 to vector<72x128xf32>
    %557 = arith.maximumf %556, %8 : vector<72x128xf32>
    %558 = arith.subf %555, %557 : vector<72x128xf32>
    %cst_385 = arith.constant 0.000000e+00 : f32
    %559 = vector.broadcast %cst_385 : f32 to vector<72x128xf32>
    %560 = arith.maximumf %558, %559 : vector<72x128xf32>
    %561 = arith.mulf %553, %560 : vector<72x128xf32>
    %562 = vector.broadcast %538 : f32 to vector<72x128xf32>
    %563 = arith.addf %562, %14 : vector<72x128xf32>
    %564 = arith.subf %563, %561 : vector<72x128xf32>
    %cst_386 = arith.constant 0.000000e+00 : f32
    %565 = vector.broadcast %cst_386 : f32 to vector<72x128xf32>
    %566 = arith.cmpf ogt, %564, %565 : vector<72x128xf32>
    %cst_387 = arith.constant 0.000000e+00 : f32
    %567 = vector.broadcast %cst_387 : f32 to vector<72x128xf32>
    %568 = arith.cmpf ogt, %564, %567 : vector<72x128xf32>
    %cst_388 = arith.constant 1.000000e+00 : f32
    %569 = vector.broadcast %cst_388 : f32 to vector<72x128xf32>
    %570 = arith.select %568, %564, %569 : vector<72x128xi1>, vector<72x128xf32>
    %571 = arith.divf %561, %570 : vector<72x128xf32>
    %cst_389 = arith.constant 0.000000e+00 : f32
    %572 = vector.broadcast %cst_389 : f32 to vector<72x128xf32>
    %573 = arith.select %566, %571, %572 : vector<72x128xi1>, vector<72x128xf32>
    %c0_390 = arith.constant 0 : index
    %c0_391 = arith.constant 0 : index
    %574 = vector.load %arg6[%c0_390, %c0_391] : memref<72x128xf32, #tpu.memory_space<vmem>>, vector<72x128xf32>
    %575 = arith.cmpf ogt, %573, %574 : vector<72x128xf32>
    %c0_392 = arith.constant 0 : index
    %c0_393 = arith.constant 0 : index
    %576 = vector.load %arg6[%c0_392, %c0_393] : memref<72x128xf32, #tpu.memory_space<vmem>>, vector<72x128xf32>
    %577 = arith.select %575, %573, %576 : vector<72x128xi1>, vector<72x128xf32>
    %c0_394 = arith.constant 0 : index
    %c0_395 = arith.constant 0 : index
    %578 = vector.load %arg6[%c0_394, %c0_395] : memref<72x128xf32, #tpu.memory_space<vmem>>, vector<72x128xf32>
    tpu.vector_store %arg6[%c0_394, %c0_395], %577 {strides = array<i32>} : memref<72x128xf32, #tpu.memory_space<vmem>>, vector<72x128xf32>,
    %c0_396 = arith.constant 0 : index
    %c0_397 = arith.constant 0 : index
    %c0_398 = arith.constant 0 : index
    %579 = vector.load %arg4[%c0_396, %c0_397, %c0_398] : memref<4x72x128xf32, #tpu.memory_space<vmem>>, vector<1x72x128xf32>
    %580 = vector.shape_cast %579 : vector<1x72x128xf32> to vector<72x128xf32>
    %581 = vector.broadcast %540 : f32 to vector<72x128xf32>
    %582 = arith.select %575, %581, %580 : vector<72x128xi1>, vector<72x128xf32>
    %c0_399 = arith.constant 0 : index
    %c0_400 = arith.constant 0 : index
    %c0_401 = arith.constant 0 : index
    %583 = vector.load %arg4[%c0_399, %c0_400, %c0_401] : memref<4x72x128xf32, #tpu.memory_space<vmem>>, vector<1x72x128xf32>
    %584 = vector.shape_cast %583 : vector<1x72x128xf32> to vector<72x128xf32>
    %585 = vector.shape_cast %582 : vector<72x128xf32> to vector<1x72x128xf32>
    tpu.vector_store %arg4[%c0_399, %c0_400, %c0_401], %585 {strides = array<i32>} : memref<4x72x128xf32, #tpu.memory_space<vmem>>, vector<1x72x128xf32>,
    %c1_402 = arith.constant 1 : index
    %c0_403 = arith.constant 0 : index
    %c0_404 = arith.constant 0 : index
    %586 = vector.load %arg4[%c1_402, %c0_403, %c0_404] : memref<4x72x128xf32, #tpu.memory_space<vmem>>, vector<1x72x128xf32>
    %587 = vector.shape_cast %586 : vector<1x72x128xf32> to vector<72x128xf32>
    %588 = vector.broadcast %542 : f32 to vector<72x128xf32>
    %589 = arith.select %575, %588, %587 : vector<72x128xi1>, vector<72x128xf32>
    %c1_405 = arith.constant 1 : index
    %c0_406 = arith.constant 0 : index
    %c0_407 = arith.constant 0 : index
    %590 = vector.load %arg4[%c1_405, %c0_406, %c0_407] : memref<4x72x128xf32, #tpu.memory_space<vmem>>, vector<1x72x128xf32>
    %591 = vector.shape_cast %590 : vector<1x72x128xf32> to vector<72x128xf32>
    %592 = vector.shape_cast %589 : vector<72x128xf32> to vector<1x72x128xf32>
    tpu.vector_store %arg4[%c1_405, %c0_406, %c0_407], %592 {strides = array<i32>} : memref<4x72x128xf32, #tpu.memory_space<vmem>>, vector<1x72x128xf32>,
    %c2_408 = arith.constant 2 : index
    %c0_409 = arith.constant 0 : index
    %c0_410 = arith.constant 0 : index
    %593 = vector.load %arg4[%c2_408, %c0_409, %c0_410] : memref<4x72x128xf32, #tpu.memory_space<vmem>>, vector<1x72x128xf32>
    %594 = vector.shape_cast %593 : vector<1x72x128xf32> to vector<72x128xf32>
    %595 = vector.broadcast %544 : f32 to vector<72x128xf32>
    %596 = arith.select %575, %595, %594 : vector<72x128xi1>, vector<72x128xf32>
    %c2_411 = arith.constant 2 : index
    %c0_412 = arith.constant 0 : index
    %c0_413 = arith.constant 0 : index
    %597 = vector.load %arg4[%c2_411, %c0_412, %c0_413] : memref<4x72x128xf32, #tpu.memory_space<vmem>>, vector<1x72x128xf32>
    %598 = vector.shape_cast %597 : vector<1x72x128xf32> to vector<72x128xf32>
    %599 = vector.shape_cast %596 : vector<72x128xf32> to vector<1x72x128xf32>
    tpu.vector_store %arg4[%c2_411, %c0_412, %c0_413], %599 {strides = array<i32>} : memref<4x72x128xf32, #tpu.memory_space<vmem>>, vector<1x72x128xf32>,
    %c3_414 = arith.constant 3 : index
    %c0_415 = arith.constant 0 : index
    %c0_416 = arith.constant 0 : index
    %600 = vector.load %arg4[%c3_414, %c0_415, %c0_416] : memref<4x72x128xf32, #tpu.memory_space<vmem>>, vector<1x72x128xf32>
    %601 = vector.shape_cast %600 : vector<1x72x128xf32> to vector<72x128xf32>
    %602 = vector.broadcast %546 : f32 to vector<72x128xf32>
    %603 = arith.select %575, %602, %601 : vector<72x128xi1>, vector<72x128xf32>
    %c3_417 = arith.constant 3 : index
    %c0_418 = arith.constant 0 : index
    %c0_419 = arith.constant 0 : index
    %604 = vector.load %arg4[%c3_417, %c0_418, %c0_419] : memref<4x72x128xf32, #tpu.memory_space<vmem>>, vector<1x72x128xf32>
    %605 = vector.shape_cast %604 : vector<1x72x128xf32> to vector<72x128xf32>
    %606 = vector.shape_cast %603 : vector<72x128xf32> to vector<1x72x128xf32>
    tpu.vector_store %arg4[%c3_417, %c0_418, %c0_419], %606 {strides = array<i32>} : memref<4x72x128xf32, #tpu.memory_space<vmem>>, vector<1x72x128xf32>,
    %c0_420 = arith.constant 0 : index
    %c0_421 = arith.constant 0 : index
    %607 = vector.load %arg5[%c0_420, %c0_421] : memref<72x128xi32, #tpu.memory_space<vmem>>, vector<72x128xi32>
    %608 = vector.broadcast %535 : i32 to vector<72x128xi32>
    %609 = arith.select %575, %608, %607 : vector<72x128xi1>, vector<72x128xi32>
    %c0_422 = arith.constant 0 : index
    %c0_423 = arith.constant 0 : index
    %610 = vector.load %arg5[%c0_422, %c0_423] : memref<72x128xi32, #tpu.memory_space<vmem>>, vector<72x128xi32>
    tpu.vector_store %arg5[%c0_422, %c0_423], %609 {strides = array<i32>} : memref<72x128xi32, #tpu.memory_space<vmem>>, vector<72x128xi32>,
    %611 = vector.shape_cast %573 : vector<72x128xf32> to vector<1x72x128xf32>
    %cst_424 = arith.constant dense<0xFF800000> : vector<1xf32>
    %612 = vector.multi_reduction <maximumf>, %611, %cst_424 [1, 2] : vector<1x72x128xf32> to vector<1xf32>
    %613 = vector.shape_cast %612 : vector<1xf32> to vector<1x1x1xf32>
    %614 = vector.extract %613[0, 0, 0] : f32 from vector<1x1x1xf32>
    %615 = vector.broadcast %614 : f32 to vector<72x128xf32>
    %616 = arith.cmpf oeq, %573, %615 : vector<72x128xf32>
    %c9216_i32_425 = arith.constant 9216 : i32
    %617 = vector.broadcast %c9216_i32_425 : i32 to vector<72x128xi32>
    %618 = arith.select %616, %4, %617 : vector<72x128xi1>, vector<72x128xi32>
    %619 = vector.shape_cast %618 : vector<72x128xi32> to vector<1x72x128xi32>
    %cst_426 = arith.constant dense<2147483647> : vector<1xi32>
    %620 = vector.multi_reduction <minsi>, %619, %cst_426 [1, 2] : vector<1x72x128xi32> to vector<1xi32>
    %621 = vector.shape_cast %620 : vector<1xi32> to vector<1x1x1xi32>
    %622 = vector.extract %621[0, 0, 0] : i32 from vector<1x1x1xi32>
    %623 = vector.broadcast %622 : i32 to vector<72x128xi32>
    %624 = arith.cmpi eq, %4, %623 : vector<72x128xi32>
    %cst_427 = arith.constant 0.000000e+00 : f32
    %625 = arith.cmpf ogt, %614, %cst_427 : f32
    %626 = vector.broadcast %625 : i1 to vector<72x128xi1>
    %627 = arith.andi %624, %626 : vector<72x128xi1>
    %c0_428 = arith.constant 0 : index
    %c0_429 = arith.constant 0 : index
    %628 = vector.load %arg7[%c0_428, %c0_429] : memref<72x128xi32, #tpu.memory_space<vmem>>, vector<72x128xi32>
    %c4_i32 = arith.constant 4 : i32
    %629 = vector.broadcast %c4_i32 : i32 to vector<72x128xi32>
    %630 = arith.select %627, %629, %628 : vector<72x128xi1>, vector<72x128xi32>
    %c0_430 = arith.constant 0 : index
    %c0_431 = arith.constant 0 : index
    %631 = vector.load %arg7[%c0_430, %c0_431] : memref<72x128xi32, #tpu.memory_space<vmem>>, vector<72x128xi32>
    tpu.vector_store %arg7[%c0_430, %c0_431], %630 {strides = array<i32>} : memref<72x128xi32, #tpu.memory_space<vmem>>, vector<72x128xi32>,
    %c0_432 = arith.constant 0 : index
    %c0_433 = arith.constant 0 : index
    %632 = vector.load %arg8[%c0_432, %c0_433] : memref<72x128xf32, #tpu.memory_space<vmem>>, vector<72x128xf32>
    %633 = vector.broadcast %540 : f32 to vector<72x128xf32>
    %634 = arith.select %627, %633, %632 : vector<72x128xi1>, vector<72x128xf32>
    %c0_434 = arith.constant 0 : index
    %c0_435 = arith.constant 0 : index
    %635 = vector.load %arg8[%c0_434, %c0_435] : memref<72x128xf32, #tpu.memory_space<vmem>>, vector<72x128xf32>
    tpu.vector_store %arg8[%c0_434, %c0_435], %634 {strides = array<i32>} : memref<72x128xf32, #tpu.memory_space<vmem>>, vector<72x128xf32>,
    %c0_436 = arith.constant 0 : index
    %c0_437 = arith.constant 0 : index
    %636 = vector.load %arg9[%c0_436, %c0_437] : memref<72x128xf32, #tpu.memory_space<vmem>>, vector<72x128xf32>
    %637 = vector.broadcast %542 : f32 to vector<72x128xf32>
    %638 = arith.select %627, %637, %636 : vector<72x128xi1>, vector<72x128xf32>
    %c0_438 = arith.constant 0 : index
    %c0_439 = arith.constant 0 : index
    %639 = vector.load %arg9[%c0_438, %c0_439] : memref<72x128xf32, #tpu.memory_space<vmem>>, vector<72x128xf32>
    tpu.vector_store %arg9[%c0_438, %c0_439], %638 {strides = array<i32>} : memref<72x128xf32, #tpu.memory_space<vmem>>, vector<72x128xf32>,
    %c0_440 = arith.constant 0 : index
    %c0_441 = arith.constant 0 : index
    %640 = vector.load %arg10[%c0_440, %c0_441] : memref<72x128xf32, #tpu.memory_space<vmem>>, vector<72x128xf32>
    %641 = vector.broadcast %544 : f32 to vector<72x128xf32>
    %642 = arith.select %627, %641, %640 : vector<72x128xi1>, vector<72x128xf32>
    %c0_442 = arith.constant 0 : index
    %c0_443 = arith.constant 0 : index
    %643 = vector.load %arg10[%c0_442, %c0_443] : memref<72x128xf32, #tpu.memory_space<vmem>>, vector<72x128xf32>
    tpu.vector_store %arg10[%c0_442, %c0_443], %642 {strides = array<i32>} : memref<72x128xf32, #tpu.memory_space<vmem>>, vector<72x128xf32>,
    %c0_444 = arith.constant 0 : index
    %c0_445 = arith.constant 0 : index
    %644 = vector.load %arg11[%c0_444, %c0_445] : memref<72x128xf32, #tpu.memory_space<vmem>>, vector<72x128xf32>
    %645 = vector.broadcast %546 : f32 to vector<72x128xf32>
    %646 = arith.select %627, %645, %644 : vector<72x128xi1>, vector<72x128xf32>
    %c0_446 = arith.constant 0 : index
    %c0_447 = arith.constant 0 : index
    %647 = vector.load %arg11[%c0_446, %c0_447] : memref<72x128xf32, #tpu.memory_space<vmem>>, vector<72x128xf32>
    tpu.vector_store %arg11[%c0_446, %c0_447], %646 {strides = array<i32>} : memref<72x128xf32, #tpu.memory_space<vmem>>, vector<72x128xf32>,
    %c0_448 = arith.constant 0 : index
    %c0_449 = arith.constant 0 : index
    %648 = vector.load %arg12[%c0_448, %c0_449] : memref<72x128xi32, #tpu.memory_space<vmem>>, vector<72x128xi32>
    %649 = vector.broadcast %535 : i32 to vector<72x128xi32>
    %650 = arith.select %627, %649, %648 : vector<72x128xi1>, vector<72x128xi32>
    %c0_450 = arith.constant 0 : index
    %c0_451 = arith.constant 0 : index
    %651 = vector.load %arg12[%c0_450, %c0_451] : memref<72x128xi32, #tpu.memory_space<vmem>>, vector<72x128xi32>
    tpu.vector_store %arg12[%c0_450, %c0_451], %650 {strides = array<i32>} : memref<72x128xi32, #tpu.memory_space<vmem>>, vector<72x128xi32>,
    %c0_452 = arith.constant 0 : index
    %c0_453 = arith.constant 0 : index
    %652 = vector.load %arg7[%c0_452, %c0_453] : memref<72x128xi32, #tpu.memory_space<vmem>>, vector<72x128xi32>
    %c0_i32_454 = arith.constant 0 : i32
    %653 = vector.broadcast %c0_i32_454 : i32 to vector<72x128xi32>
    %654 = arith.cmpi sge, %652, %653 : vector<72x128xi32>
    %c0_455 = arith.constant 0 : index
    %c0_456 = arith.constant 0 : index
    %655 = vector.load %arg6[%c0_455, %c0_456] : memref<72x128xf32, #tpu.memory_space<vmem>>, vector<72x128xf32>
    %cst_457 = arith.constant 5.000000e-01 : f32
    %656 = vector.broadcast %cst_457 : f32 to vector<72x128xf32>
    %657 = arith.cmpf oge, %655, %656 : vector<72x128xf32>
    %658 = arith.ori %657, %654 : vector<72x128xi1>
    %c0_458 = arith.constant 0 : index
    %c0_459 = arith.constant 0 : index
    %659 = vector.load %arg8[%c0_458, %c0_459] : memref<72x128xf32, #tpu.memory_space<vmem>>, vector<72x128xf32>
    %c0_460 = arith.constant 0 : index
    %c0_461 = arith.constant 0 : index
    %c0_462 = arith.constant 0 : index
    %660 = vector.load %arg4[%c0_460, %c0_461, %c0_462] : memref<4x72x128xf32, #tpu.memory_space<vmem>>, vector<1x72x128xf32>
    %661 = vector.shape_cast %660 : vector<1x72x128xf32> to vector<72x128xf32>
    %662 = arith.select %654, %659, %661 : vector<72x128xi1>, vector<72x128xf32>
    %c0_463 = arith.constant 0 : index
    %c0_464 = arith.constant 0 : index
    %663 = vector.load %arg9[%c0_463, %c0_464] : memref<72x128xf32, #tpu.memory_space<vmem>>, vector<72x128xf32>
    %c1_465 = arith.constant 1 : index
    %c0_466 = arith.constant 0 : index
    %c0_467 = arith.constant 0 : index
    %664 = vector.load %arg4[%c1_465, %c0_466, %c0_467] : memref<4x72x128xf32, #tpu.memory_space<vmem>>, vector<1x72x128xf32>
    %665 = vector.shape_cast %664 : vector<1x72x128xf32> to vector<72x128xf32>
    %666 = arith.select %654, %663, %665 : vector<72x128xi1>, vector<72x128xf32>
    %c0_468 = arith.constant 0 : index
    %c0_469 = arith.constant 0 : index
    %667 = vector.load %arg10[%c0_468, %c0_469] : memref<72x128xf32, #tpu.memory_space<vmem>>, vector<72x128xf32>
    %c2_470 = arith.constant 2 : index
    %c0_471 = arith.constant 0 : index
    %c0_472 = arith.constant 0 : index
    %668 = vector.load %arg4[%c2_470, %c0_471, %c0_472] : memref<4x72x128xf32, #tpu.memory_space<vmem>>, vector<1x72x128xf32>
    %669 = vector.shape_cast %668 : vector<1x72x128xf32> to vector<72x128xf32>
    %670 = arith.select %654, %667, %669 : vector<72x128xi1>, vector<72x128xf32>
    %c0_473 = arith.constant 0 : index
    %c0_474 = arith.constant 0 : index
    %671 = vector.load %arg11[%c0_473, %c0_474] : memref<72x128xf32, #tpu.memory_space<vmem>>, vector<72x128xf32>
    %c3_475 = arith.constant 3 : index
    %c0_476 = arith.constant 0 : index
    %c0_477 = arith.constant 0 : index
    %672 = vector.load %arg4[%c3_475, %c0_476, %c0_477] : memref<4x72x128xf32, #tpu.memory_space<vmem>>, vector<1x72x128xf32>
    %673 = vector.shape_cast %672 : vector<1x72x128xf32> to vector<72x128xf32>
    %674 = arith.select %654, %671, %673 : vector<72x128xi1>, vector<72x128xf32>
    %c0_478 = arith.constant 0 : index
    %c0_479 = arith.constant 0 : index
    %675 = vector.load %arg12[%c0_478, %c0_479] : memref<72x128xi32, #tpu.memory_space<vmem>>, vector<72x128xi32>
    %c0_480 = arith.constant 0 : index
    %c0_481 = arith.constant 0 : index
    %676 = vector.load %arg5[%c0_480, %c0_481] : memref<72x128xi32, #tpu.memory_space<vmem>>, vector<72x128xi32>
    %677 = arith.select %654, %675, %676 : vector<72x128xi1>, vector<72x128xi32>
    %c0_i32_482 = arith.constant 0 : i32
    %678 = vector.broadcast %c0_i32_482 : i32 to vector<72x128xi32>
    %679 = arith.select %658, %677, %678 : vector<72x128xi1>, vector<72x128xi32>
    %c0_483 = arith.constant 0 : index
    %c0_484 = arith.constant 0 : index
    %680 = vector.load %arg5[%c0_483, %c0_484] : memref<72x128xi32, #tpu.memory_space<vmem>>, vector<72x128xi32>
    tpu.vector_store %arg5[%c0_483, %c0_484], %679 {strides = array<i32>} : memref<72x128xi32, #tpu.memory_space<vmem>>, vector<72x128xi32>,
    %c0_485 = arith.constant 0 : index
    %c0_486 = arith.constant 0 : index
    %c0_487 = arith.constant 0 : index
    %681 = vector.load %arg3[%c0_485, %c0_486, %c0_487] : memref<4x72x128xf32, #tpu.memory_space<vmem>>, vector<1x72x128xf32>
    %682 = vector.shape_cast %681 : vector<1x72x128xf32> to vector<72x128xf32>
    %c1_488 = arith.constant 1 : index
    %c0_489 = arith.constant 0 : index
    %c0_490 = arith.constant 0 : index
    %683 = vector.load %arg3[%c1_488, %c0_489, %c0_490] : memref<4x72x128xf32, #tpu.memory_space<vmem>>, vector<1x72x128xf32>
    %684 = vector.shape_cast %683 : vector<1x72x128xf32> to vector<72x128xf32>
    %c2_491 = arith.constant 2 : index
    %c0_492 = arith.constant 0 : index
    %c0_493 = arith.constant 0 : index
    %685 = vector.load %arg3[%c2_491, %c0_492, %c0_493] : memref<4x72x128xf32, #tpu.memory_space<vmem>>, vector<1x72x128xf32>
    %686 = vector.shape_cast %685 : vector<1x72x128xf32> to vector<72x128xf32>
    %c3_494 = arith.constant 3 : index
    %c0_495 = arith.constant 0 : index
    %c0_496 = arith.constant 0 : index
    %687 = vector.load %arg3[%c3_494, %c0_495, %c0_496] : memref<4x72x128xf32, #tpu.memory_space<vmem>>, vector<1x72x128xf32>
    %688 = vector.shape_cast %687 : vector<1x72x128xf32> to vector<72x128xf32>
    %cst_497 = arith.constant 1.000000e+00 : f32
    %689 = vector.broadcast %cst_497 : f32 to vector<72x128xf32>
    %690 = arith.select %658, %686, %689 : vector<72x128xi1>, vector<72x128xf32>
    %cst_498 = arith.constant 1.000000e+00 : f32
    %691 = vector.broadcast %cst_498 : f32 to vector<72x128xf32>
    %692 = arith.select %658, %688, %691 : vector<72x128xi1>, vector<72x128xf32>
    %693 = arith.subf %662, %682 : vector<72x128xf32>
    %694 = arith.divf %693, %690 : vector<72x128xf32>
    %cst_499 = arith.constant 0.000000e+00 : f32
    %695 = vector.broadcast %cst_499 : f32 to vector<72x128xf32>
    %696 = arith.select %658, %694, %695 : vector<72x128xi1>, vector<72x128xf32>
    %c0_500 = arith.constant 0 : index
    %c0_501 = arith.constant 0 : index
    %c0_502 = arith.constant 0 : index
    %697 = vector.load %arg4[%c0_500, %c0_501, %c0_502] : memref<4x72x128xf32, #tpu.memory_space<vmem>>, vector<1x72x128xf32>
    %698 = vector.shape_cast %697 : vector<1x72x128xf32> to vector<72x128xf32>
    %699 = vector.shape_cast %696 : vector<72x128xf32> to vector<1x72x128xf32>
    tpu.vector_store %arg4[%c0_500, %c0_501, %c0_502], %699 {strides = array<i32>} : memref<4x72x128xf32, #tpu.memory_space<vmem>>, vector<1x72x128xf32>,
    %700 = arith.subf %666, %684 : vector<72x128xf32>
    %701 = arith.divf %700, %692 : vector<72x128xf32>
    %cst_503 = arith.constant 0.000000e+00 : f32
    %702 = vector.broadcast %cst_503 : f32 to vector<72x128xf32>
    %703 = arith.select %658, %701, %702 : vector<72x128xi1>, vector<72x128xf32>
    %c1_504 = arith.constant 1 : index
    %c0_505 = arith.constant 0 : index
    %c0_506 = arith.constant 0 : index
    %704 = vector.load %arg4[%c1_504, %c0_505, %c0_506] : memref<4x72x128xf32, #tpu.memory_space<vmem>>, vector<1x72x128xf32>
    %705 = vector.shape_cast %704 : vector<1x72x128xf32> to vector<72x128xf32>
    %706 = vector.shape_cast %703 : vector<72x128xf32> to vector<1x72x128xf32>
    tpu.vector_store %arg4[%c1_504, %c0_505, %c0_506], %706 {strides = array<i32>} : memref<4x72x128xf32, #tpu.memory_space<vmem>>, vector<1x72x128xf32>,
    %707 = arith.divf %670, %690 : vector<72x128xf32>
    %cst_507 = arith.constant 1.000000e+00 : f32
    %708 = vector.broadcast %cst_507 : f32 to vector<72x128xf32>
    %709 = arith.select %658, %707, %708 : vector<72x128xi1>, vector<72x128xf32>
    %710 = math.log %709 : vector<72x128xf32>
    %cst_508 = arith.constant 0.000000e+00 : f32
    %711 = vector.broadcast %cst_508 : f32 to vector<72x128xf32>
    %712 = arith.select %658, %710, %711 : vector<72x128xi1>, vector<72x128xf32>
    %c2_509 = arith.constant 2 : index
    %c0_510 = arith.constant 0 : index
    %c0_511 = arith.constant 0 : index
    %713 = vector.load %arg4[%c2_509, %c0_510, %c0_511] : memref<4x72x128xf32, #tpu.memory_space<vmem>>, vector<1x72x128xf32>
    %714 = vector.shape_cast %713 : vector<1x72x128xf32> to vector<72x128xf32>
    %715 = vector.shape_cast %712 : vector<72x128xf32> to vector<1x72x128xf32>
    tpu.vector_store %arg4[%c2_509, %c0_510, %c0_511], %715 {strides = array<i32>} : memref<4x72x128xf32, #tpu.memory_space<vmem>>, vector<1x72x128xf32>,
    %716 = arith.divf %674, %692 : vector<72x128xf32>
    %cst_512 = arith.constant 1.000000e+00 : f32
    %717 = vector.broadcast %cst_512 : f32 to vector<72x128xf32>
    %718 = arith.select %658, %716, %717 : vector<72x128xi1>, vector<72x128xf32>
    %719 = math.log %718 : vector<72x128xf32>
    %cst_513 = arith.constant 0.000000e+00 : f32
    %720 = vector.broadcast %cst_513 : f32 to vector<72x128xf32>
    %721 = arith.select %658, %719, %720 : vector<72x128xi1>, vector<72x128xf32>
    %c3_514 = arith.constant 3 : index
    %c0_515 = arith.constant 0 : index
    %c0_516 = arith.constant 0 : index
    %722 = vector.load %arg4[%c3_514, %c0_515, %c0_516] : memref<4x72x128xf32, #tpu.memory_space<vmem>>, vector<1x72x128xf32>
    %723 = vector.shape_cast %722 : vector<1x72x128xf32> to vector<72x128xf32>
    %724 = vector.shape_cast %721 : vector<72x128xf32> to vector<1x72x128xf32>
    tpu.vector_store %arg4[%c3_514, %c0_515, %c0_516], %724 {strides = array<i32>} : memref<4x72x128xf32, #tpu.memory_space<vmem>>, vector<1x72x128xf32>,
    return
  }
}

</mosaic_0001>

<bundles_post_ra>
// kernel: tpu_custom_call.1
= control target key start
LH: loop header
LB: loop body
LE: loop exit
PB: predicated region body
PF: predicated region fallthrough
CT: control target
= control target key end

     0   :  { %11 = vsyncpa [#allocation12], 0  ;;  %s10635_s0 = inlined_call_operand.vmem [shape: f32[5,4], index: 0, kind: input, shape index: {}]   ;;  %s10636_s1 = inlined_call_operand.vmem [shape: s32[5], index: 1, kind: input, shape index: {}]   ;;  %s10637_s2 = inlined_call_operand.hbm [shape: f32[5,72,128], index: 2, kind: input, shape index: {}]   ;;  %s10638_s3 = inlined_call_operand.hbm [shape: f32[4,72,128], index: 3, kind: input, shape index: {}]   ;;  %s10639_s4 = inlined_call_operand.hbm [shape: f32[4,72,128], index: 4, kind: output, shape index: {0}]   ;;  %s10640_s5 = inlined_call_operand.hbm [shape: s32[72,128], index: 5, kind: output, shape index: {1}]  }
   0x1   :  { %12 = vsyncpa [#allocation14], 0 }
   0x2   :  { %13 = vsyncpa [#allocation10], 0 }
   0x3   :  { %14 = vsyncpa [#allocation17], 0 }
   0x4   :  { %15 = vsyncpa [#allocation11], 0 }
   0x5   :  { %16 = vsyncpa [#allocation20], 0  ;;  %s23_s20 = sshll.u32 %s10635_s0, 4  ;;  %s33_s23 = sshll.u32 %s10636_s1, 4  ;;  %s24_s20 = int_to_ptr.vmem [resolvable:$true] %s23_s20  ;;  %s34_s23 = int_to_ptr.vmem [resolvable:$true] %s33_s23 }
   0x6   :  { %s4060_s24 = scalar_lea.vmem %s24_s20, 128  ;;  %p4065_p1 = scmp.lt.s32.totalorder %s24_s20, %s24_s20 }
   0x7   :  { %p4061_p0 = scmp.ne.s32.totalorder %s24_s20, %s4060_s24  ;;  %p4066_p2 = scmp.lt.s32.totalorder %s4060_s24, %s4060_s24 }
   0x9   :  { %p4067_p3 = por %p4066_p2, %p4065_p1 }
   0xb   :  { %p4068_p4 = pnand %p4067_p3, %p4061_p0 }
   0xd   :  { %4071 = shalt.err (!%p4068_p4)
}
   0xe   :  { %s4184_s25 = smov [#allocation9]   ;;  %s4072_s26 = scalar_lea.vmem %s34_s23, 16 }
   0xf   :  { %26 = dma.vmem_to_smem %s24_s20, 128, %s4184_s25, [#allocation12]  }
  0x10   :  { %p4073_p5 = scmp.ne.s32.totalorder %s34_s23, %s4072_s26  ;;  %p4077_p6 = scmp.lt.s32.totalorder %s34_s23, %s34_s23 }
  0x11   :  { %p4078_p7 = scmp.lt.s32.totalorder %s4072_s26, %s4072_s26 }
  0x13   :  { %p4079_p8 = por %p4078_p7, %p4077_p6 }
  0x15   :  { %p4080_p9 = pnand %p4079_p8, %p4073_p5 }
  0x17   :  { %4083 = shalt.err (!%p4080_p9)
}
  0x18   :  { %s4185_s0 = smov [#allocation13]   ;;  %s4186_s1 = smov [#allocation15]  }
  0x19   :  { %36 = dma.vmem_to_smem %s34_s23, 16, %s4185_s0, [#allocation14]  }
  0x1a   :  { %s42_s27 = sshll.u32 %s4186_s1, 4  ;;  %s4084_s30 = scalar_lea.hbm %s10637_s2, 5760  ;;  %s43_s27 = int_to_ptr.vmem [resolvable:$true] %s42_s27 }
  0x1b   :  { %p4085_p10 = scmp.ne.s32.totalorder %s10637_s2, %s4084_s30  ;;  %p4088_p11 = scmp.lt.u32.totalorder %s4084_s30, %s10637_s2 }
  0x1d   :  { %p4090_p12 = pnand %p4088_p11, %p4085_p10 }
  0x1f   :  { %4093 = shalt.err (!%p4090_p12)
}
  0x20   :  { %s4094_s10 = scalar_lea.vmem %s43_s27, 5760  ;;  %p4099_p0 = scmp.lt.s32.totalorder %s43_s27, %s43_s27 }
  0x21   :  { %p4095_p13 = scmp.ne.s32.totalorder %s43_s27, %s4094_s10  ;;  %p4100_p1 = scmp.lt.s32.totalorder %s4094_s10, %s4094_s10 }
  0x23   :  { %p4101_p2 = por %p4100_p1, %p4099_p0 }
  0x25   :  { %p4102_p3 = pnand %p4101_p2, %p4095_p13 }
  0x27   :  { %4105 = shalt.err (!%p4102_p3)
}
  0x28   :  { %s4187_s11 = smov 128   ;;  %s4188_s12 = smov 8  }
  0x29   :  { %48 = dma.hbm_to_vmem [thread:$0]  %s10637_s2, 5760, %s43_s27, [#allocation10], %s4187_s11, %s4187_s11, %s4188_s12  }
  0x2a   :  { %s4189_s15 = smov [#allocation16]   ;;  %s4106_s19 = scalar_lea.hbm %s10638_s3, 4608 }
  0x2b   :  { %s54_s16 = sshll.u32 %s4189_s15, 4  ;;  %p4107_p4 = scmp.ne.s32.totalorder %s10638_s3, %s4106_s19  ;;  %s55_s16 = int_to_ptr.vmem [resolvable:$true] %s54_s16 }
  0x2c   :  { %p4110_p5 = scmp.lt.u32.totalorder %s4106_s19, %s10638_s3 }
  0x2e   :  { %p4112_p6 = pnand %p4110_p5, %p4107_p4 }
  0x30   :  { %4115 = shalt.err (!%p4112_p6)
}
  0x31   :  { %s4116_s24 = scalar_lea.vmem %s55_s16, 4608  ;;  %p4121_p8 = scmp.lt.s32.totalorder %s55_s16, %s55_s16 }
  0x32   :  { %p4117_p7 = scmp.ne.s32.totalorder %s55_s16, %s4116_s24  ;;  %p4122_p9 = scmp.lt.s32.totalorder %s4116_s24, %s4116_s24 }
  0x34   :  { %p4123_p10 = por %p4122_p9, %p4121_p8 }
  0x36   :  { %p4124_p11 = pnand %p4123_p10, %p4117_p7 }
  0x38   :  { %4127 = shalt.err (!%p4124_p11)
}
  0x39   :  { %60 = dma.hbm_to_vmem [thread:$0]  %s10638_s3, 4608, %s55_s16, [#allocation17], %s4187_s11, %s4187_s11, %s4188_s12  }
  0x3a   :  { %4172 = dma.done.wait [#allocation12], 128  }
  0x3b   :  { %4173 = vsyncadd [#allocation12], 4294967168 }
  0x3c   :  { %4174 = dma.done.wait [#allocation14], 16  }
  0x3d   :  { %4175 = vsyncadd [#allocation14], 4294967280 }
  0x3e   :  { %4176 = dma.done.wait [#allocation10], 5760  }
  0x3f   :  { %4177 = vsyncadd [#allocation10], 4294961536 }
  0x40   :  { %4178 = dma.done.wait [#allocation17], 4608  }
  0x41   :  { %4179 = vsyncadd [#allocation17], 4294962688 }
  0x42   :  { %73 = sfence }
  0x43   :  { %s4259_s26 = sld [smem:[#allocation9]]  ;;  %v4261_v0 = vld [vmem:[#allocation15] sm:$0xff]  ;;  %s4263_s0 = sld [smem:[#allocation9 + $0x2]]  ;;  %v4265_v1 = vld [vmem:[#allocation15 + $0x8] sm:$0xff]  ;;  %v4267_v2 = vld [vmem:[#allocation15 + $0x10] sm:$0xff] }
  0x44   :  { %v4269_v3 = vld [vmem:[#allocation15 + $0x18] sm:$0xff]  ;;  %v4271_v4 = vld [vmem:[#allocation15 + $0x20] sm:$0xff]  ;;  %v4273_v5 = vld [vmem:[#allocation15 + $0x28] sm:$0xff]  ;;  %s4281_s3 = sld [smem:[#allocation9 + $0x1]]  ;;  %s4283_s1 = sld [smem:[#allocation9 + $0x3]] }
  0x45   :  { %v4275_v6 = vld [vmem:[#allocation15 + $0x30] sm:$0xff]  ;;  %v4279_v8 = vld [vmem:[#allocation15 + $0x98] sm:$0xff]  ;;  %v4285_v9 = vld [vmem:[#allocation15 + $0xa0] sm:$0xff]  ;;  %s4800_s14 = sld [smem:[#allocation9 + $0x82]]  ;;  %s4806_s15 = sld [smem:[#allocation9 + $0x80]] }
  0x46   :  { %v4277_v7 = vld [vmem:[#allocation15 + $0x90] sm:$0xff]  ;;  %v4287_v10 = vld [vmem:[#allocation15 + $0xa8] sm:$0xff]  ;;  %v4292_v13 = vld [vmem:[#allocation15 + $0xb8] sm:$0xff]  ;;  %s4833_s16 = sld [smem:[#allocation9 + $0x81]]  ;;  %s4835_s17 = sld [smem:[#allocation9 + $0x83]] }
  0x47   :  { %v4289_v11 = vld [vmem:[#allocation15 + $0xb0] sm:$0xff]  ;;  %v4294_v14 = vld [vmem:[#allocation15 + $0xc0] sm:$0xff]  ;;  %v4296_v15 = vld [vmem:[#allocation15 + $0xc8] sm:$0xff] }
  0x48   :  { %v4302_v20 = vld [vmem:[#allocation15 + $0x38] sm:$0xff]  ;;  %v4304_v21 = vld [vmem:[#allocation15 + $0x40] sm:$0xff]  ;;  %v4306_v22 = vld [vmem:[#allocation15 + $0xd0] sm:$0xff] }
  0x49   :  { %v288_v12 = vstv %s4259_s26  ;;  %v278_v23 = vstv %s4263_s0  ;;  %s272_s27 = sadd.f32 %s4263_s0, %s4259_s26  ;;  %v4337_v43 = vld [vmem:[#allocation15 + $0xd8] sm:$0xff]  ;;  %v4339_v44 = vld [vmem:[#allocation15 + $0xe0] sm:$0xff]  ;;  %v4341_v45 = vld [vmem:[#allocation15 + $0xe8] sm:$0xff] }
  0x4a   :  { %v289_v16 = vmax.f32 %v288_v12, %v4261_v0  ;;  %v290_v17 = vmax.f32 %v288_v12, %v4265_v1  ;;  %v291_v18 = vmax.f32 %v288_v12, %v4267_v2  ;;  %v292_v19 = vmax.f32 %v288_v12, %v4269_v3  ;;  %s274_s28 = sadd.f32 %s4283_s1, %s4281_s3  ;;  %11351 = vst [vmem:[#allocation27_spill] sm:$0xff] %v4337_v43  ;;  %v4351_v50 = vld [vmem:[#allocation15 + $0x48] sm:$0xff]  ;;  %v4353_v51 = vld [vmem:[#allocation15 + $0x50] sm:$0xff]  ;;  %v4357_v53 = vld [vmem:[#allocation15 + $0xf8] sm:$0xff] }
  0x4b   :  { %v293_v24 = vmax.f32 %v288_v12, %v4271_v4  ;;  %v294_v25 = vmax.f32 %v288_v12, %v4273_v5  ;;  %v295_v26 = vmax.f32 %v288_v12, %v4275_v6  ;;  %v279_v27 = vmin.f32 %v278_v23, %v4277_v7  ;;  %11352 = vst [vmem:[#allocation28_spill] sm:$0xff] %v4339_v44  ;;  %v4355_v52 = vld [vmem:[#allocation15 + $0xf0] sm:$0xff]  ;;  %v4359_v54 = vld [vmem:[#allocation15 + $0x100] sm:$0xff]  ;;  %v4364_v58 = vld [vmem:[#allocation15 + $0x108] sm:$0xff]  ;;  %s4380_s29 = ssub.f32 %s4263_s0, %s4259_s26  ;;  %s273_s8 = smul.f32 0.0016666667, %s272_s27 }
  0x4c   :  { %v280_v28 = vmin.f32 %v278_v23, %v4279_v8  ;;  %v281_v29 = vmin.f32 %v278_v23, %v4285_v9  ;;  %v282_v30 = vmin.f32 %v278_v23, %v4287_v10  ;;  %v283_v31 = vmin.f32 %v278_v23, %v4289_v11  ;;  %11353 = vst [vmem:[#allocation29_spill] sm:$0xff] %v4341_v45  ;;  %v4366_v59 = vld [vmem:[#allocation15 + $0x110] sm:$0xff]  ;;  %s4394_s30 = ssub.f32 %s4283_s1, %s4281_s3  ;;  %s275_s9 = smul.f32 0.0016666667, %s274_s28 }
  0x4d   :  { %v284_v32 = vmin.f32 %v278_v23, %v4292_v13  ;;  %v285_v33 = vmin.f32 %v278_v23, %v4294_v14  ;;  %v286_v34 = vmin.f32 %v278_v23, %v4296_v15  ;;  %v287_v35 = vmin.f32 %v278_v23, %v4306_v22  ;;  %11354 = vst [vmem:[#allocation30_spill] sm:$0xff] %v4351_v50  ;;  %s276_s7 = smul.f32 0.0033333334, %s4380_s29  ;;  %s4870_s18 = ssub.f32 %s4800_s14, %s4806_s15 }
  0x4e   :  { %v296_v36 = vmax.f32 %v288_v12, %v4302_v20  ;;  %v297_v37 = vmax.f32 %v288_v12, %v4304_v21  ;;  %v4327_v38 = vsub.f32 %v279_v27, %v289_v16  ;;  %v4329_v39 = vsub.f32 %v280_v28, %v290_v17  ;;  %11355 = vst [vmem:[#allocation31_spill] sm:$0xff] %v4353_v51  ;;  %v4372_v12 = vld [vmem:[#allocation15 + $0x58] sm:$0xff]  ;;  %v4374_v16 = vld [vmem:[#allocation15 + $0x60] sm:$0xff]  ;;  %s271_s6 = smul.f32 %s4394_s30, %s4380_s29  ;;  %s4878_s19 = ssub.f32 %s4835_s17, %s4833_s16 }
  0x4f   :  { %v4331_v40 = vsub.f32 %v281_v29, %v291_v18  ;;  %v4333_v41 = vsub.f32 %v282_v30, %v292_v19  ;;  %v4335_v42 = vsub.f32 %v283_v31, %v293_v24  ;;  %v4343_v46 = vsub.f32 %v284_v32, %v294_v25  ;;  %11356 = vst [vmem:[#allocation32_spill] sm:$0xff] %v4355_v52  ;;  %v4376_v17 = vld [vmem:[#allocation15 + $0x118] sm:$0xff]  ;;  %v4386_v25 = vld [vmem:[#allocation15 + $0x68] sm:$0xff]  ;;  %v4400_v32 = vld [vmem:[#allocation15 + $0x80] sm:$0xff]  ;;  %s277_s10 = smul.f32 0.0033333334, %s4394_s30  ;;  %s872_s21 = sadd.f32 %s4800_s14, %s4806_s15 }
  0x50   :  { %v4345_v47 = vsub.f32 %v285_v33, %v295_v26  ;;  %v4347_v48 = vsub.f32 %v286_v34, %v296_v36  ;;  %v4349_v49 = vsub.f32 %v287_v35, %v297_v37  ;;  %11357 = vst [vmem:[#allocation33_spill] sm:$0xff] %v4357_v53  ;;  %11358 = vst [vmem:[#allocation34_spill] sm:$0xff] %v4359_v54  ;;  %v316_v23 = vstv %s4283_s1  ;;  %v4388_v26 = vld [vmem:[#allocation15 + $0x70] sm:$0xff]  ;;  %v4390_v27 = vld [vmem:[#allocation15 + $0x78] sm:$0xff]  ;;  %s871_s20 = smul.f32 %s4878_s19, %s4870_s18  ;;  %s874_s22 = sadd.f32 %s4835_s17, %s4833_s16 }
  0x51   :  { %11359 = vst [vmem:[#allocation35_spill] sm:$0xff] %v4364_v58  ;;  %11360 = vst [vmem:[#allocation36_spill] sm:$0xff] %v4366_v59  ;;  %v326_v24 = vstv %s4281_s3  ;;  %v317_v28 = vmin.f32 %v316_v23, %v4337_v43  ;;  %v318_v29 = vmin.f32 %v316_v23, %v4339_v44  ;;  %v319_v30 = vmin.f32 %v316_v23, %v4341_v45  ;;  %v4402_v33 = vld [vmem:[#allocation15 + $0x88] sm:$0xff]  ;;  %s876_s23 = smul.f32 0.0033333334, %s4870_s18  ;;  %s5484_s1 = sld [smem:[#allocation9 + $0x100]] }
  0x52   :  { %11361 = vst [vmem:[#allocation37_spill] sm:$0xff] %v4372_v12  ;;  %11362 = vst [vmem:[#allocation38_spill] sm:$0xff] %v4374_v16  ;;  %v320_v31 = vmin.f32 %v316_v23, %v4355_v52  ;;  %v321_v34 = vmin.f32 %v316_v23, %v4357_v53  ;;  %v322_v35 = vmin.f32 %v316_v23, %v4359_v54  ;;  %v4422_v43 = vld [vmem:[#allocation15 + $0x128] sm:$0xff]  ;;  %s873_s24 = smul.f32 0.0016666667, %s872_s21  ;;  %s5486_s27 = sld [smem:[#allocation9 + $0x102]] }
  0x53   :  { %11363 = vst [vmem:[#allocation39_spill] sm:$0xff] %v4376_v17  ;;  %11364 = vst [vmem:[#allocation40_spill] sm:$0xff] %v4386_v25  ;;  %v323_v36 = vmin.f32 %v316_v23, %v4364_v58  ;;  %v324_v37 = vmin.f32 %v316_v23, %v4366_v59  ;;  %v325_v19 = vmin.f32 %v316_v23, %v4376_v17  ;;  %s875_s2 = smul.f32 0.0016666667, %s874_s22  ;;  %s5532_s28 = sld [smem:[#allocation9 + $0x101]] }
  0x54   :  { %11365 = vst [vmem:[#allocation41_spill] sm:$0xff] %v4388_v26  ;;  %11366 = vst [vmem:[#allocation42_spill] sm:$0xff] %v4390_v27  ;;  %v327_v18 = vmax.f32 %v326_v24, %v4351_v50  ;;  %v328_v63 = vmax.f32 %v326_v24, %v4353_v51  ;;  %v329_v62 = vmax.f32 %v326_v24, %v4372_v12  ;;  %s877_s25 = smul.f32 0.0033333334, %s4878_s19  ;;  %s5534_s29 = sld [smem:[#allocation9 + $0x103]] }
  0x55   :  { %11367 = vst [vmem:[#allocation43_spill] sm:$0xff] %v4400_v32  ;;  %v330_v61 = vmax.f32 %v326_v24, %v4374_v16  ;;  %v331_v60 = vmax.f32 %v326_v24, %v4386_v25  ;;  %v332_v57 = vmax.f32 %v326_v24, %v4388_v26  ;;  %v333_v56 = vmax.f32 %v326_v24, %v4390_v27  ;;  %v4420_v25 = vld [vmem:[#allocation15 + $0x120] sm:$0xff]  ;;  %s6917_s21 = sld [smem:[#allocation9 + $0x180]]  ;;  %s6919_s22 = sld [smem:[#allocation9 + $0x182]] }
  0x56   :  { %v334_v55 = vmax.f32 %v326_v24, %v4400_v32  ;;  %v335_v59 = vmax.f32 %v326_v24, %v4402_v33  ;;  %v336_v23 = vsub.f32 %v317_v28, %v327_v18  ;;  %v337_v17 = vsub.f32 %v318_v29, %v328_v63  ;;  %v4424_v32 = vld [vmem:[#allocation15 + $0x130] sm:$0xff]  ;;  %v4426_v18 = vld [vmem:[#allocation15 + $0x138] sm:$0xff] }
  0x57   :  { %v338_v50 = vsub.f32 %v319_v30, %v329_v62  ;;  %v339_v58 = vsub.f32 %v320_v31, %v330_v61  ;;  %v340_v51 = vsub.f32 %v321_v34, %v331_v60  ;;  %v341_v54 = vsub.f32 %v322_v35, %v332_v57 }
  0x58   :  { %v342_v12 = vsub.f32 %v323_v36, %v333_v56  ;;  %v343_v53 = vsub.f32 %v324_v37, %v334_v55  ;;  %v344_v16 = vsub.f32 %v325_v19, %v335_v59  ;;  %v345_v52 = vmax.f32 %v336_v23, 0.0  ;;  %v4428_v56 = vld [vmem:[#allocation15 + $0x140] sm:$0xff]  ;;  %v4430_v55 = vld [vmem:[#allocation15 + $0x148] sm:$0xff]  ;;  %v4432_v59 = vld [vmem:[#allocation15 + $0x150] sm:$0xff]  ;;  %s5599_s30 = ssub.f32 %s5486_s27, %s5484_s1 }
  0x59   :  { %v346_v26 = vmax.f32 %v337_v17, 0.0  ;;  %v347_v45 = vmax.f32 %v338_v50, 0.0  ;;  %v348_v27 = vmax.f32 %v339_v58, 0.0  ;;  %v349_v44 = vmax.f32 %v340_v51, 0.0 }
  0x5a   :  { %v350_v62 = vmax.f32 %v341_v54, 0.0  ;;  %v351_v61 = vmax.f32 %v342_v12, 0.0  ;;  %v352_v60 = vmax.f32 %v343_v53, 0.0  ;;  %v363_v57 = vstv %s271_s6  ;;  %v4446_v53 = vld [vmem:[#allocation15 + $0x158] sm:$0xff]  ;;  %s5607_s6 = ssub.f32 %s5534_s29, %s5532_s28 }
  0x5b   :  { %v353_v63 = vmax.f32 %v344_v16, 0.0  ;;  %v11368_v50 = vmax.f32 %v4327_v38, 0.0  ;;  %v11369_v58 = vmax.f32 %v4329_v39, 0.0  ;;  %v11370_v54 = vmax.f32 %v4331_v40, 0.0  ;;  %v4464_v40 = vld [vmem:[#allocation15 + $0x160] sm:$0xff] }
  0x5c   :  { %v11371_v19 = vmax.f32 %v4333_v41, 0.0  ;;  %v11372_v16 = vmax.f32 %v4335_v42, 0.0  ;;  %v11373_v38 = vmax.f32 %v4343_v46, 0.0  ;;  %v11374_v39 = vmax.f32 %v4345_v47, 0.0 }
  0x5d   :  { %v4436_v51 = vmul.f32 %v345_v52, %v11368_v50  ;;  %v4440_v17 = vmul.f32 %v346_v26, %v11369_v58  ;;  %v4444_v12 = vmul.f32 %v347_v45, %v11370_v54  ;;  %v11375_v45 = vmax.f32 %v4347_v48, 0.0 }
  0x5e   :  { %v4450_v24 = vmul.f32 %v348_v27, %v11371_v19  ;;  %v4454_v28 = vmul.f32 %v349_v44, %v11372_v16  ;;  %v4458_v52 = vmul.f32 %v350_v62, %v11373_v38  ;;  %v4462_v26 = vmul.f32 %v351_v61, %v11374_v39 }
  0x5f   :  { %v4468_v29 = vmul.f32 %v352_v60, %v11375_v45  ;;  %v364_v41 = vadd.f32 %v363_v57, %v4420_v25  ;;  %v365_v42 = vadd.f32 %v363_v57, %v4422_v43  ;;  %v366_v44 = vadd.f32 %v363_v57, %v4424_v32 }
  0x60   :  { %v367_v46 = vadd.f32 %v363_v57, %v4426_v18  ;;  %v368_v27 = vadd.f32 %v363_v57, %v4428_v56  ;;  %v369_v47 = vadd.f32 %v363_v57, %v4430_v55  ;;  %v370_v30 = vadd.f32 %v363_v57, %v4432_v59 }
  0x61   :  { %v11376_v31 = vmax.f32 %v4349_v49, 0.0  ;;  %v371_v48 = vadd.f32 %v363_v57, %v4446_v53  ;;  %v373_v35 = vsub.f32 %v364_v41, %v4436_v51  ;;  %v374_v36 = vsub.f32 %v365_v42, %v4440_v17 }
  0x62   :  { %v372_v37 = vadd.f32 %v363_v57, %v4464_v40  ;;  %v375_v23 = vsub.f32 %v366_v44, %v4444_v12  ;;  %v376_v62 = vsub.f32 %v367_v46, %v4450_v24  ;;  %v4488_v61 = vsub.f32 %v368_v27, %v4454_v28 }
  0x63   :  { %v4479_v34 = vmul.f32 %v353_v63, %v11376_v31  ;;  %v4491_v60 = vsub.f32 %v369_v47, %v4458_v52  ;;  %vm382_vm0 = vcmp.gt.f32.partialorder %v373_v35, 0.0  ;;  %v4494_v49 = vsub.f32 %v370_v30, %v4462_v26 }
  0x64   :  { %vm383_vm1 = vcmp.gt.f32.partialorder %v374_v36, 0.0  ;;  %vm384_vm2 = vcmp.gt.f32.partialorder %v375_v23, 0.0  ;;  %v4497_v63 = vsub.f32 %v371_v48, %v4468_v29  ;;  %vm385_vm3 = vcmp.gt.f32.partialorder %v376_v62, 0.0 }
  0x65   :  { %v4500_v57 = vsub.f32 %v372_v37, %v4479_v34  ;;  %vm386_vm4 = vcmp.gt.f32.partialorder %v4488_v61, 0.0  ;;  %v391_v50 = vsel %vm382_vm0, %v373_v35, 1.0  ;;  %v392_v58 = vsel %vm383_vm1, %v374_v36, 1.0 }
  0x66   :  { %vm387_vm5 = vcmp.gt.f32.partialorder %v4491_v60, 0.0  ;;  %v393_v54 = vsel %vm384_vm2, %v375_v23, 1.0  ;;  %vm388_vm6 = vcmp.gt.f32.partialorder %v4494_v49, 0.0  ;;  %v394_v19 = vsel %vm385_vm3, %v376_v62, 1.0 }
  0x67   :  { %3808 = vrcp.f32 %v391_v50  ;;  %vm389_vm7 = vcmp.gt.f32.partialorder %v4497_v63, 0.0  ;;  %v395_v16 = vsel %vm386_vm4, %v4488_v61, 1.0  ;;  %vm390_vm8 = vcmp.gt.f32.partialorder %v4500_v57, 0.0 }
  0x68   :  { %3810 = vrcp.f32 %v392_v58  ;;  %v396_v38 = vsel %vm387_vm5, %v4491_v60, 1.0  ;;  %v397_v39 = vsel %vm388_vm6, %v4494_v49, 1.0  ;;  %v398_v45 = vsel %vm389_vm7, %v4497_v63, 1.0 }
  0x69   :  { %3812 = vrcp.f32 %v393_v54  ;;  %v399_v41 = vsel %vm390_vm8, %v4500_v57, 1.0 }
  0x6a   :  { %3814 = vrcp.f32 %v394_v19 }
  0x6b   :  { %3816 = vrcp.f32 %v395_v16  ;;  %v4540_v16 = vstv %s273_s8  ;;  %s1472_s8 = sadd.f32 %s5486_s27, %s5484_s1 }
  0x6c   :  { %3818 = vrcp.f32 %v396_v38  ;;  %11377 = vst [vmem:[#allocation44_spill] sm:$0xff] %v4540_v16  ;;  %v4542_v38 = vstv %s275_s9  ;;  %s1474_s9 = sadd.f32 %s5534_s29, %s5532_s28 }
  0x6d   :  { %3820 = vrcp.f32 %v397_v39  ;;  %11378 = vst [vmem:[#allocation45_spill] sm:$0xff] %v4542_v38  ;;  %v4544_v39 = vstv %s276_s7  ;;  %s1471_s7 = smul.f32 %s5607_s6, %s5599_s30 }
  0x6e   :  { %3822 = vrcp.f32 %v398_v45  ;;  %11379 = vst [vmem:[#allocation46_spill] sm:$0xff] %v4544_v39 }
  0x6f   :  { %3824 = vrcp.f32 %v399_v41 }
  0x71   :  { %v3809_v42 = vpop.eup %3808 }
  0x72   :  { %v3811_v44 = vpop.eup %3810  ;;  %v401_v47 = vmul.f32 %v3809_v42, %v4436_v51 }
  0x73   :  { %v3813_v46 = vpop.eup %3812  ;;  %v403_v30 = vmul.f32 %v3811_v44, %v4440_v17 }
  0x74   :  { %v3815_v27 = vpop.eup %3814  ;;  %v405_v48 = vmul.f32 %v3813_v46, %v4444_v12  ;;  %v4548_v45 = vsel %vm382_vm0, %v401_v47, 0.0 }
  0x75   :  { %v3817_v31 = vpop.eup %3816  ;;  %v407_v37 = vmul.f32 %v3815_v27, %v4450_v24  ;;  %11380 = vst [vmem:[#allocation47_spill] sm:$0xff] %v4548_v45  ;;  %v4551_v12 = vsel %vm383_vm1, %v403_v30, 0.0  ;;  %v4553_v24 = vstv %s277_s10  ;;  %vm10726_vm1 = vcmp.gt.f32.partialorder %v4548_v45, -1.0  ;;  %s1476_s10 = smul.f32 0.0033333334, %s5599_s30  ;;  %s3765_s30 = sld [smem:[#allocation13 + $0x2]] }
  0x76   :  { %v3819_v50 = vpop.eup %3818  ;;  %v409_v58 = vmul.f32 %v3817_v31, %v4454_v28  ;;  %11381 = vst [vmem:[#allocation48_spill] sm:$0xff] %v4551_v12  ;;  %11382 = vst [vmem:[#allocation49_spill] sm:$0xff] %v4553_v24  ;;  %v4557_v41 = vsel %vm384_vm2, %v405_v48, 0.0  ;;  %vm10743_vm9 = vcmp.gt.f32.partialorder %v4551_v12, -1.0 }
  0x77   :  { %v3821_v54 = vpop.eup %3820  ;;  %v411_v19 = vmul.f32 %v3819_v50, %v4458_v52  ;;  %11383 = vst [vmem:[#allocation50_spill] sm:$0xff] %v4557_v41  ;;  %v4560_v42 = vsel %vm385_vm3, %v407_v37, 0.0  ;;  %vm10742_vm10 = vcmp.gt.f32.partialorder %v4557_v41, -1.0  ;;  %v4634_v27 = vsel %vm10743_vm9, %v4542_v38, 0.0 }
  0x78   :  { %v3823_v51 = vpop.eup %3822  ;;  %v413_v17 = vmul.f32 %v3821_v54, %v4462_v26  ;;  %11384 = vst [vmem:[#allocation51_spill] sm:$0xff] %v4560_v42  ;;  %v4566_v35 = vsel %vm386_vm4, %v409_v58, 0.0  ;;  %vm10741_vm11 = vcmp.gt.f32.partialorder %v4560_v42, -1.0  ;;  %v4593_v62 = vsel %vm10742_vm10, %v4540_v16, 0.0  ;;  %11398 = vst [vmem:[#allocation65_spill] sm:$0xff] %v4634_v27 }
  0x79   :  { %v3825_v28 = vpop.eup %3824  ;;  %v415_v52 = vmul.f32 %v3823_v51, %v4468_v29  ;;  %11385 = vst [vmem:[#allocation52_spill] sm:$0xff] %v4566_v35  ;;  %v4572_v29 = vsel %vm387_vm5, %v411_v19, 0.0  ;;  %vm10727_vm12 = vcmp.gt.f32.partialorder %v4566_v35, -1.0  ;;  %11390 = vst [vmem:[#allocation57_spill] sm:$0xff] %v4593_v62  ;;  %v4603_v60 = vsel %vm10741_vm11, %v4540_v16, 0.0 }
  0x7a   :  { %v417_v26 = vmul.f32 %v3825_v28, %v4479_v34  ;;  %11386 = vst [vmem:[#allocation53_spill] sm:$0xff] %v4572_v29  ;;  %v4576_v36 = vsel %vm388_vm6, %v413_v17, 0.0  ;;  %v4582_v34 = vsel %vm10743_vm9, %v4540_v16, 0.0  ;;  %vm10702_vm13 = vcmp.gt.f32.partialorder %v4572_v29, -1.0  ;;  %11392 = vst [vmem:[#allocation59_spill] sm:$0xff] %v4603_v60 }
  0x7b   :  { %11387 = vst [vmem:[#allocation54_spill] sm:$0xff] %v4576_v36  ;;  %11388 = vst [vmem:[#allocation55_spill] sm:$0xff] %v4582_v34  ;;  %v4586_v23 = vsel %vm389_vm7, %v415_v52, 0.0  ;;  %vm10701_vm14 = vcmp.gt.f32.partialorder %v4576_v36, -1.0  ;;  %v4608_v49 = vsel %vm10727_vm12, %v4540_v16, 0.0  ;;  %v4614_v63 = vsel %vm10702_vm13, %v4540_v16, 0.0 }
  0x7c   :  { %11389 = vst [vmem:[#allocation56_spill] sm:$0xff] %v4586_v23  ;;  %v4597_v61 = vsel %vm390_vm8, %v417_v26, 0.0  ;;  %vm10700_vm15 = vcmp.gt.f32.partialorder %v4586_v23, -1.0  ;;  %11393 = vst [vmem:[#allocation60_spill] sm:$0xff] %v4608_v49  ;;  %v4619_v57 = vsel %vm10701_vm14, %v4540_v16, 0.0  ;;  %v4639_v47 = vsel %vm10742_vm10, %v4542_v38, 0.0 }
  0x7d   :  { %11391 = vst [vmem:[#allocation58_spill] sm:$0xff] %v4597_v61  ;;  %vm10699_vm0 = vcmp.gt.f32.partialorder %v4597_v61, -1.0  ;;  %11394 = vst [vmem:[#allocation61_spill] sm:$0xff] %v4614_v63  ;;  %v4624_v44 = vsel %vm10700_vm15, %v4540_v16, 0.0  ;;  %v4644_v30 = vsel %vm10741_vm11, %v4542_v38, 0.0  ;;  %v4649_v31 = vsel %vm10727_vm12, %v4542_v38, 0.0 }
  0x7e   :  { %11395 = vst [vmem:[#allocation62_spill] sm:$0xff] %v4619_v57  ;;  %11396 = vst [vmem:[#allocation63_spill] sm:$0xff] %v4624_v44  ;;  %v4629_v46 = vsel %vm10699_vm0, %v4540_v16, 0.0  ;;  %v4654_v48 = vsel %vm10702_vm13, %v4542_v38, 0.0  ;;  %v4659_v37 = vsel %vm10701_vm14, %v4542_v38, 0.0  ;;  %v4664_v50 = vsel %vm10700_vm15, %v4542_v38, 0.0 }
  0x7f   :  { %11397 = vst [vmem:[#allocation64_spill] sm:$0xff] %v4629_v46  ;;  %11399 = vst [vmem:[#allocation66_spill] sm:$0xff] %v4639_v47  ;;  %v4669_v58 = vsel %vm10699_vm0, %v4542_v38, 0.0  ;;  %v4674_v54 = vsel %vm10743_vm9, %v4544_v39, 1.0  ;;  %v4679_v19 = vsel %vm10742_vm10, %v4544_v39, 1.0  ;;  %v4684_v51 = vsel %vm10741_vm11, %v4544_v39, 1.0 }
  0x80   :  { %11400 = vst [vmem:[#allocation67_spill] sm:$0xff] %v4644_v30  ;;  %11401 = vst [vmem:[#allocation68_spill] sm:$0xff] %v4649_v31  ;;  %v4689_v17 = vsel %vm10727_vm12, %v4544_v39, 1.0  ;;  %v4694_v28 = vsel %vm10702_vm13, %v4544_v39, 1.0  ;;  %v4699_v52 = vsel %vm10701_vm14, %v4544_v39, 1.0  ;;  %v4704_v26 = vsel %vm10700_vm15, %v4544_v39, 1.0 }
  0x81   :  { %11402 = vst [vmem:[#allocation69_spill] sm:$0xff] %v4654_v48  ;;  %11403 = vst [vmem:[#allocation70_spill] sm:$0xff] %v4659_v37 }
  0x82   :  { %11404 = vst [vmem:[#allocation71_spill] sm:$0xff] %v4664_v50  ;;  %11405 = vst [vmem:[#allocation72_spill] sm:$0xff] %v4669_v58  ;;  %v4779_v50 = vsel %vm10726_vm1, %v4553_v24, 1.0 }
  0x83   :  { %11406 = vst [vmem:[#allocation73_spill] sm:$0xff] %v4674_v54  ;;  %11407 = vst [vmem:[#allocation74_spill] sm:$0xff] %v4679_v19  ;;  %v605_v19 = vmax.f32 %v4557_v41, %v4576_v36  ;;  %v4773_v54 = vsel %vm10726_vm1, %v4544_v39, 1.0 }
  0x84   :  { %11408 = vst [vmem:[#allocation75_spill] sm:$0xff] %v4684_v51  ;;  %11409 = vst [vmem:[#allocation76_spill] sm:$0xff] %v4689_v17  ;;  %v4709_v51 = vsel %vm10699_vm0, %v4544_v39, 1.0  ;;  %v4714_v17 = vsel %vm10743_vm9, %v4553_v24, 1.0  ;;  %v74_v39 = vlaneseq }
  0x85   :  { %11410 = vst [vmem:[#allocation77_spill] sm:$0xff] %v4694_v28  ;;  %11411 = vst [vmem:[#allocation78_spill] sm:$0xff] %v4699_v52  ;;  %v4719_v28 = vsel %vm10742_vm10, %v4553_v24, 1.0  ;;  %v4724_v52 = vsel %vm10741_vm11, %v4553_v24, 1.0 }
  0x86   :  { %11412 = vst [vmem:[#allocation79_spill] sm:$0xff] %v4704_v26  ;;  %11413 = vst [vmem:[#allocation80_spill] sm:$0xff] %v4709_v51  ;;  %v4729_v26 = vsel %vm10727_vm12, %v4553_v24, 1.0  ;;  %v4734_v51 = vsel %vm10702_vm13, %v4553_v24, 1.0 }
  0x87   :  { %11414 = vst [vmem:[#allocation81_spill] sm:$0xff] %v4714_v17  ;;  %11415 = vst [vmem:[#allocation82_spill] sm:$0xff] %v4719_v28  ;;  %v4739_v17 = vsel %vm10701_vm14, %v4553_v24, 1.0  ;;  %v4744_v28 = vsel %vm10700_vm15, %v4553_v24, 1.0 }
  0x88   :  { %11416 = vst [vmem:[#allocation83_spill] sm:$0xff] %v4724_v52  ;;  %11417 = vst [vmem:[#allocation84_spill] sm:$0xff] %v4729_v26  ;;  %v4749_v52 = vsel %vm10699_vm0, %v4553_v24, 1.0  ;;  %v603_v26 = vmax.f32 %v4548_v45, %v4566_v35 }
  0x89   :  { %11418 = vst [vmem:[#allocation85_spill] sm:$0xff] %v4734_v51  ;;  %11419 = vst [vmem:[#allocation86_spill] sm:$0xff] %v4739_v17  ;;  %v604_v51 = vmax.f32 %v4551_v12, %v4572_v29  ;;  %v606_v17 = vmax.f32 %v4560_v42, %v4586_v23 }
  0x8a   :  { %11420 = vst [vmem:[#allocation87_spill] sm:$0xff] %v4744_v28  ;;  %11421 = vst [vmem:[#allocation88_spill] sm:$0xff] %v4749_v52  ;;  %v4763_v28 = vsel %vm10726_vm1, %v4540_v16, 0.0  ;;  %v4768_v52 = vsel %vm10726_vm1, %v4542_v38, 0.0  ;;  %v607_v58 = vmax.f32 %v603_v26, %v4597_v61 }
  0x8b   :  { %11422 = vst [vmem:[#allocation89_spill] sm:$0xff] %v4763_v28  ;;  %11423 = vst [vmem:[#allocation90_spill] sm:$0xff] %v4768_v52  ;;  %v609_v37 = vmax.f32 %v605_v19, %v606_v17 }
  0x8c   :  { %11424 = vst [vmem:[#allocation91_spill] sm:$0xff] %v4773_v54  ;;  %11425 = vst [vmem:[#allocation92_spill] sm:$0xff] %v4779_v50  ;;  %v608_v16 = vmax.f32 %v607_v58, %v604_v51  ;;  %v75_v54 = vshrl.u32 %v74_v39, 7  ;;  %v94_v51 = vand.u32 127, %v74_v39 }
  0x8e   :  { %v610_v48 = vmax.f32 %v608_v16, %v609_v37  ;;  %v76_v26 = vadd.s32 8, %v75_v54  ;;  %v77_v44 = vadd.s32 16, %v75_v54  ;;  %v78_v57 = vadd.s32 24, %v75_v54 }
  0x8f   :  { %v79_v63 = vadd.s32 32, %v75_v54  ;;  %v80_v24 = vadd.s32 40, %v75_v54  ;;  %v81_v50 = vadd.s32 48, %v75_v54  ;;  %v82_v19 = vadd.s32 56, %v75_v54 }
  0x90   :  { %611 = vmax.xlane.f32.xlu0 %v610_v48  ;;  %v84_v58 = vmul.u32 128, %v75_v54  ;;  %v85_v16 = vmul.u32 128, %v76_v26 }
  0x91   :  { %v86_v48 = vmul.u32 128, %v77_v44  ;;  %v87_v37 = vmul.u32 128, %v78_v57 }
  0x92   :  { %v4783_v17 = vadd.s32 %v94_v51, %v85_v16 }
  0x93   :  { %v4787_v49 = vadd.s32 %v94_v51, %v86_v48  ;;  %v4789_v60 = vadd.s32 %v94_v51, %v87_v37 }
  0x94   :  { %11427 = vst [vmem:[#allocation94_spill] sm:$0xff] %v4783_v17 }
  0x95   :  { %11428 = vst [vmem:[#allocation95_spill] sm:$0xff] %v4787_v49  ;;  %11429 = vst [vmem:[#allocation96_spill] sm:$0xff] %v4789_v60 }
 0x11d   :  { %v612_v31 = vpop.xlane.xlu0 %611 }
 0x11e   :  { %v613_v30 = vrot.slane %v612_v31, 4 }
 0x120   :  { %v614_v38 = vmax.f32 %v612_v31, %v613_v30  ;;  %v83_v30 = vadd.s32 64, %v75_v54  ;;  %v88_v31 = vmul.u32 128, %v79_v63 }
 0x122   :  { %v615_v47 = vrot.slane %v614_v38, 2  ;;  %v4791_v44 = vadd.s32 %v94_v51, %v88_v31 }
 0x124   :  { %v616_v27 = vmax.f32 %v614_v38, %v615_v47  ;;  %v89_v38 = vmul.u32 128, %v80_v24  ;;  %v90_v47 = vmul.u32 128, %v81_v50  ;;  %11430 = vst [vmem:[#allocation97_spill] sm:$0xff] %v4791_v44 }
 0x126   :  { %v617_v52 = vrot.slane %v616_v27, 1  ;;  %v4794_v57 = vadd.s32 %v94_v51, %v89_v38  ;;  %v4796_v24 = vadd.s32 %v94_v51, %v90_v47 }
 0x128   :  { %v618_v46 = vmax.f32 %v616_v27, %v617_v52  ;;  %v91_v27 = vmul.u32 128, %v82_v19  ;;  %v92_v52 = vmul.u32 128, %v83_v30  ;;  %11431 = vst [vmem:[#allocation98_spill] sm:$0xff] %v4794_v57  ;;  %11432 = vst [vmem:[#allocation99_spill] sm:$0xff] %v4796_v24 }
 0x12a   :  { %3776 = vpush %v618_v46  ;;  %v4781_v46 = vadd.s32 %v94_v51, %v84_v58  ;;  %v4798_v63 = vadd.s32 %v94_v51, %v91_v27  ;;  %v4812_v50 = vadd.s32 %v94_v51, %v92_v52  ;;  %v878_v52 = vstv %s4800_s14  ;;  %s1475_s14 = smul.f32 0.0016666667, %s1474_s9  ;;  %s7791_s9 = sld [smem:[#allocation9 + $0x200]] }
 0x12c   :  { %11426 = vst [vmem:[#allocation93_spill] sm:$0xff] %v4781_v46  ;;  %11433 = vst [vmem:[#allocation100_spill] sm:$0xff] %v4798_v63 }
 0x12d   :  { %11434 = vst [vmem:[#allocation101_spill] sm:$0xff] %v4812_v50 }
 0x15b   :  { %s4785_s13 = spop %3776 }
 0x15c   :  { %v620_v39 = vstv %s4785_s13  ;;  %p689_p12 = scmp.gt.f32.partialorder %s4785_s13, 0.0  ;;  %s1473_s13 = smul.f32 0.0016666667, %s1472_s8 }
 0x15d   :  { %vm621_vm2 = vcmp.eq.f32.partialorder %v4548_v45, %v620_v39  ;;  %vm622_vm3 = vcmp.eq.f32.partialorder %v4551_v12, %v620_v39  ;;  %vm623_vm4 = vcmp.eq.f32.partialorder %v4557_v41, %v620_v39  ;;  %vm624_vm5 = vcmp.eq.f32.partialorder %v4560_v42, %v620_v39 }
 0x15e   :  { %vm625_vm6 = vcmp.eq.f32.partialorder %v4566_v35, %v620_v39  ;;  %vm626_vm7 = vcmp.eq.f32.partialorder %v4572_v29, %v620_v39  ;;  %vm627_vm8 = vcmp.eq.f32.partialorder %v4576_v36, %v620_v39  ;;  %vm628_vm0 = vcmp.eq.f32.partialorder %v4586_v23, %v620_v39  ;;  %s690_s26 = scalar_select %p689_p12, 1, 0 }
 0x15f   :  { %v630_v54 = vsel %vm621_vm2, %v4781_v46, 9216  ;;  %v631_v26 = vsel %vm622_vm3, %v4783_v17, 9216  ;;  %v632_v19 = vsel %vm623_vm4, %v4787_v49, 9216  ;;  %vm629_vm15 = vcmp.eq.f32.partialorder %v4597_v61, %v620_v39 }
 0x160   :  { %v633_v58 = vsel %vm624_vm5, %v4789_v60, 9216  ;;  %v634_v16 = vsel %vm625_vm6, %v4791_v44, 9216  ;;  %v635_v48 = vsel %vm626_vm7, %v4794_v57, 9216  ;;  %v636_v37 = vsel %vm627_vm8, %v4796_v24, 9216 }
 0x161   :  { %v637_v51 = vsel %vm628_vm0, %v4798_v63, 9216  ;;  %vm639_vm14 = vcmp.lt.s32.totalorder %v630_v54, %v634_v16  ;;  %vm641_vm2 = vcmp.lt.s32.totalorder %v631_v26, %v635_v48  ;;  %vm643_vm13 = vcmp.lt.s32.totalorder %v632_v19, %v636_v37 }
 0x162   :  { %vm645_vm3 = vcmp.lt.s32.totalorder %v633_v58, %v637_v51  ;;  %v638_v30 = vsel %vm629_vm15, %v4812_v50, 9216  ;;  %v640_v31 = vsel %vm639_vm14, %v630_v54, %v634_v16  ;;  %v644_v38 = vsel %vm643_vm13, %v632_v19, %v636_v37 }
 0x163   :  { %v646_v47 = vsel %vm645_vm3, %v633_v58, %v637_v51  ;;  %v642_v27 = vsel %vm641_vm2, %v631_v26, %v635_v48  ;;  %vm647_vm4 = vcmp.lt.s32.totalorder %v640_v31, %v638_v30  ;;  %v879_v24 = vmin.f32 %v878_v52, %v4277_v7 }
 0x164   :  { %vm651_vm5 = vcmp.lt.s32.totalorder %v644_v38, %v646_v47  ;;  %v648_v39 = vsel %vm647_vm4, %v640_v31, %v638_v30  ;;  %v888_v44 = vstv %s4806_s15  ;;  %v880_v63 = vmin.f32 %v878_v52, %v4279_v8  ;;  %s1477_s15 = smul.f32 0.0033333334, %s5607_s6 }
 0x165   :  { %v652_v57 = vsel %vm651_vm5, %v644_v38, %v646_v47  ;;  %vm649_vm0 = vcmp.lt.s32.totalorder %v648_v39, %v642_v27  ;;  %v881_v60 = vmin.f32 %v878_v52, %v4285_v9  ;;  %v882_v49 = vmin.f32 %v878_v52, %v4287_v10  ;;  %v11437_v38 = vld [vmem:[#allocation27_spill] sm:$0xff] }
 0x166   :  { %v650_v50 = vsel %vm649_vm0, %v648_v39, %v642_v27  ;;  %v883_v54 = vmin.f32 %v878_v52, %v4289_v11  ;;  %v884_v26 = vmin.f32 %v878_v52, %v4292_v13  ;;  %v885_v19 = vmin.f32 %v878_v52, %v4294_v14  ;;  %v11438_v27 = vld [vmem:[#allocation28_spill] sm:$0xff]  ;;  %v11439_v39 = vld [vmem:[#allocation29_spill] sm:$0xff] }
 0x167   :  { %vm653_vm13 = vcmp.lt.s32.totalorder %v650_v50, %v652_v57  ;;  %v886_v7 = vmin.f32 %v878_v52, %v4296_v15  ;;  %v889_v8 = vmax.f32 %v888_v44, %v4261_v0  ;;  %v890_v9 = vmax.f32 %v888_v44, %v4265_v1 }
 0x168   :  { %v4840_v58 = vsel %vm653_vm13, %v650_v50, %v652_v57  ;;  %v891_v10 = vmax.f32 %v888_v44, %v4267_v2  ;;  %v892_v11 = vmax.f32 %v888_v44, %v4269_v3  ;;  %v893_v13 = vmax.f32 %v888_v44, %v4271_v4 }
 0x169   :  { %11435 = vst [vmem:[#allocation102_spill] sm:$0xff] %v4840_v58  ;;  %v656_v14 = vshra.s32 %v4840_v58, 16  ;;  %v887_v16 = vmin.f32 %v878_v52, %v4306_v22  ;;  %v894_v48 = vmax.f32 %v888_v44, %v4273_v5  ;;  %v895_v15 = vmax.f32 %v888_v44, %v4275_v6 }
 0x16a   :  { %v896_v0 = vmax.f32 %v888_v44, %v4302_v20  ;;  %v897_v1 = vmax.f32 %v888_v44, %v4304_v21  ;;  %v898_v57 = vsub.f32 %v879_v24, %v889_v8  ;;  %v899_v50 = vsub.f32 %v880_v63, %v890_v9  ;;  %v11442_v9 = vld [vmem:[#allocation34_spill] sm:$0xff] }
 0x16b   :  { %v4851_v37 = vcvt.s32.f32 %v656_v14  ;;  %v900_v2 = vsub.f32 %v881_v60, %v891_v10  ;;  %v901_v3 = vsub.f32 %v882_v49, %v892_v11  ;;  %v902_v4 = vsub.f32 %v883_v54, %v893_v13  ;;  %v11443_v11 = vld [vmem:[#allocation35_spill] sm:$0xff]  ;;  %v11444_v14 = vld [vmem:[#allocation36_spill] sm:$0xff] }
 0x16c   :  { %v903_v51 = vsub.f32 %v884_v26, %v894_v48  ;;  %v904_v30 = vsub.f32 %v885_v19, %v895_v15  ;;  %v4854_v5 = vsub.f32 %v886_v7, %v896_v0  ;;  %v4856_v6 = vsub.f32 %v887_v16, %v897_v1  ;;  %v11440_v26 = vld [vmem:[#allocation32_spill] sm:$0xff]  ;;  %v11441_v7 = vld [vmem:[#allocation33_spill] sm:$0xff]  ;;  %v11445_v48 = vld [vmem:[#allocation39_spill] sm:$0xff] }
 0x16d   :  { %11436 = vst [vmem:[#allocation103_spill] sm:$0xff] %v4851_v37  ;;  %659 = vmin.xlane.f32.xlu0 %v4851_v37  ;;  %v907_v20 = vmax.f32 %v898_v57, 0.0  ;;  %v908_v22 = vmax.f32 %v899_v50, 0.0  ;;  %v909_v21 = vmax.f32 %v900_v2, 0.0  ;;  %v910_v44 = vmax.f32 %v901_v3, 0.0  ;;  %v11446_v0 = vld [vmem:[#allocation30_spill] sm:$0xff] }
 0x16e   :  { %v911_v24 = vmax.f32 %v902_v4, 0.0  ;;  %v912_v63 = vmax.f32 %v903_v51, 0.0  ;;  %v913_v60 = vmax.f32 %v904_v30, 0.0  ;;  %v916_v49 = vstv %s4835_s17  ;;  %v11447_v57 = vld [vmem:[#allocation31_spill] sm:$0xff]  ;;  %v11448_v2 = vld [vmem:[#allocation37_spill] sm:$0xff]  ;;  %v11449_v4 = vld [vmem:[#allocation38_spill] sm:$0xff] }
 0x16f   :  { %v926_v31 = vstv %s4833_s16  ;;  %v917_v47 = vmin.f32 %v916_v49, %v11437_v38  ;;  %v918_v52 = vmin.f32 %v916_v49, %v11438_v27  ;;  %v919_v54 = vmin.f32 %v916_v49, %v11439_v39  ;;  %v11450_v30 = vld [vmem:[#allocation40_spill] sm:$0xff]  ;;  %v11451_v27 = vld [vmem:[#allocation41_spill] sm:$0xff]  ;;  %s268_s16 = sld [smem:[#allocation13]]  ;;  %s3760_s17 = sld [smem:[#allocation13 + $0x1]] }
 0x170   :  { %v920_v19 = vmin.f32 %v916_v49, %v11440_v26  ;;  %v921_v8 = vmin.f32 %v916_v49, %v11441_v7  ;;  %v922_v10 = vmin.f32 %v916_v49, %v11442_v9  ;;  %v923_v13 = vmin.f32 %v916_v49, %v11443_v11  ;;  %v11452_v26 = vld [vmem:[#allocation42_spill] sm:$0xff]  ;;  %v11453_v9 = vld [vmem:[#allocation43_spill] sm:$0xff] }
 0x171   :  { %v924_v16 = vmin.f32 %v916_v49, %v11444_v14  ;;  %v925_v15 = vmin.f32 %v916_v49, %v11445_v48  ;;  %v927_v1 = vmax.f32 %v926_v31, %v11446_v0  ;;  %v928_v50 = vmax.f32 %v926_v31, %v11447_v57 }
 0x172   :  { %v929_v3 = vmax.f32 %v926_v31, %v11448_v2  ;;  %v930_v51 = vmax.f32 %v926_v31, %v11449_v4  ;;  %v931_v38 = vmax.f32 %v926_v31, %v11450_v30  ;;  %v932_v39 = vmax.f32 %v926_v31, %v11451_v27 }
 0x173   :  { %v933_v7 = vmax.f32 %v926_v31, %v11452_v26  ;;  %v934_v49 = vmax.f32 %v926_v31, %v11453_v9  ;;  %v935_v11 = vmax.f32 %v926_v31, %v4402_v33  ;;  %v936_v14 = vsub.f32 %v917_v47, %v927_v1 }
 0x174   :  { %v937_v48 = vsub.f32 %v918_v52, %v928_v50  ;;  %v938_v0 = vsub.f32 %v919_v54, %v929_v3  ;;  %v939_v57 = vsub.f32 %v920_v19, %v930_v51  ;;  %v940_v2 = vsub.f32 %v921_v8, %v931_v38 }
 0x175   :  { %v941_v17 = vsub.f32 %v922_v10, %v932_v39  ;;  %v942_v46 = vsub.f32 %v923_v13, %v933_v7  ;;  %v943_v4 = vsub.f32 %v924_v16, %v934_v49  ;;  %v944_v37 = vsub.f32 %v925_v15, %v935_v11 }
 0x176   :  { %v945_v58 = vmax.f32 %v936_v14, 0.0  ;;  %v946_v30 = vmax.f32 %v937_v48, 0.0  ;;  %v947_v62 = vmax.f32 %v938_v0, 0.0  ;;  %v948_v27 = vmax.f32 %v939_v57, 0.0 }
 0x177   :  { %v949_v34 = vmax.f32 %v940_v2, 0.0  ;;  %v950_v26 = vmax.f32 %v941_v17, 0.0  ;;  %v951_v28 = vmax.f32 %v942_v46, 0.0  ;;  %v914_v9 = vmax.f32 %v4854_v5, 0.0 }
 0x178   :  { %v915_v33 = vmax.f32 %v4856_v6, 0.0  ;;  %v952_v31 = vmax.f32 %v943_v4, 0.0  ;;  %v953_v47 = vmax.f32 %v944_v37, 0.0  ;;  %v4890_v52 = vmul.f32 %v945_v58, %v907_v20 }
 0x179   :  { %v4892_v54 = vmul.f32 %v946_v30, %v908_v22  ;;  %v4894_v19 = vmul.f32 %v947_v62, %v909_v21  ;;  %v4896_v8 = vmul.f32 %v948_v27, %v910_v44  ;;  %v4898_v17 = vmul.f32 %v949_v34, %v911_v24 }
 0x17a   :  { %v4900_v46 = vmul.f32 %v950_v26, %v912_v63  ;;  %v4902_v5 = vmul.f32 %v951_v28, %v913_v60  ;;  %v963_v10 = vstv %s871_s20  ;;  %v4910_v62 = vmul.f32 %v952_v31, %v914_v9 }
 0x17b   :  { %v964_v6 = vadd.f32 %v963_v10, %v4420_v25  ;;  %v965_v58 = vadd.f32 %v963_v10, %v4422_v43  ;;  %v966_v37 = vadd.f32 %v963_v10, %v4424_v32  ;;  %v967_v20 = vadd.f32 %v963_v10, %v4426_v18 }
 0x17c   :  { %v968_v22 = vadd.f32 %v963_v10, %v4428_v56  ;;  %v969_v34 = vadd.f32 %v963_v10, %v4430_v55  ;;  %v970_v21 = vadd.f32 %v963_v10, %v4432_v59  ;;  %v971_v28 = vadd.f32 %v963_v10, %v4446_v53 }
 0x17d   :  { %v4919_v25 = vsub.f32 %v964_v6, %v4890_v52  ;;  %v4922_v43 = vsub.f32 %v965_v58, %v4892_v54  ;;  %v4925_v32 = vsub.f32 %v966_v37, %v4894_v19  ;;  %v4927_v18 = vmul.f32 %v953_v47, %v915_v33 }
 0x17e   :  { %v972_v56 = vadd.f32 %v963_v10, %v4464_v40  ;;  %v4931_v55 = vsub.f32 %v967_v20, %v4896_v8  ;;  %v4934_v59 = vsub.f32 %v968_v22, %v4898_v17  ;;  %v4937_v53 = vsub.f32 %v969_v34, %v4900_v46 }
 0x17f   :  { %vm982_vm14 = vcmp.gt.f32.partialorder %v4919_v25, 0.0  ;;  %vm983_vm15 = vcmp.gt.f32.partialorder %v4922_v43, 0.0  ;;  %v4942_v44 = vsub.f32 %v970_v21, %v4902_v5  ;;  %vm984_vm6 = vcmp.gt.f32.partialorder %v4925_v32, 0.0 }
 0x180   :  { %v4946_v40 = vsub.f32 %v971_v28, %v4910_v62  ;;  %vm985_vm7 = vcmp.gt.f32.partialorder %v4931_v55, 0.0  ;;  %v991_v24 = vsel %vm982_vm14, %v4919_v25, 1.0  ;;  %v4953_v63 = vsub.f32 %v972_v56, %v4927_v18 }
 0x181   :  { %vm986_vm8 = vcmp.gt.f32.partialorder %v4934_v59, 0.0  ;;  %v992_v60 = vsel %vm983_vm15, %v4922_v43, 1.0  ;;  %vm987_vm2 = vcmp.gt.f32.partialorder %v4937_v53, 0.0  ;;  %v993_v13 = vsel %vm984_vm6, %v4925_v32, 1.0 }
 0x182   :  { %vm988_vm3 = vcmp.gt.f32.partialorder %v4942_v44, 0.0  ;;  %v994_v16 = vsel %vm985_vm7, %v4931_v55, 1.0  ;;  %3826 = vrcp.f32 %v991_v24  ;;  %vm989_vm4 = vcmp.gt.f32.partialorder %v4946_v40, 0.0 }
 0x183   :  { %v995_v15 = vsel %vm986_vm8, %v4934_v59, 1.0  ;;  %3828 = vrcp.f32 %v992_v60  ;;  %vm990_vm5 = vcmp.gt.f32.partialorder %v4953_v63, 0.0  ;;  %v996_v1 = vsel %vm987_vm2, %v4937_v53, 1.0 }
 0x184   :  { %3830 = vrcp.f32 %v993_v13  ;;  %v997_v50 = vsel %vm988_vm3, %v4942_v44, 1.0  ;;  %v998_v3 = vsel %vm989_vm4, %v4946_v40, 1.0  ;;  %v999_v51 = vsel %vm990_vm5, %v4953_v63, 1.0 }
 0x185   :  { %3832 = vrcp.f32 %v994_v16  ;;  %v4991_v49 = vsel %vm10743_vm9, %v4551_v12, -1.0  ;;  %v4996_v11 = vsel %vm10726_vm1, %v4548_v45, -1.0  ;;  %v5005_v0 = vsel %vm10742_vm10, %v4557_v41, -1.0 }
 0x186   :  { %3834 = vrcp.f32 %v995_v15  ;;  %v5010_v57 = vsel %vm10741_vm11, %v4560_v42, -1.0  ;;  %v5015_v2 = vsel %vm10727_vm12, %v4566_v35, -1.0  ;;  %vm11454_vm0 = vcmp.gt.f32.partialorder %v4572_v29, -1.0  ;;  %v11533_v35 = vld [vmem:[#allocation103_spill] sm:$0xff] }
 0x187   :  { %3836 = vrcp.f32 %v996_v1  ;;  %v5022_v27 = vsel %vm11454_vm0, %v4572_v29, -1.0  ;;  %vm11455_vm13 = vcmp.gt.f32.partialorder %v4576_v36, -1.0  ;;  %vm11457_vm1 = vcmp.gt.f32.partialorder %v4586_v23, -1.0 }
 0x188   :  { %3838 = vrcp.f32 %v997_v50  ;;  %v5027_v26 = vsel %vm11455_vm13, %v4576_v36, -1.0  ;;  %v5034_v47 = vsel %vm11457_vm1, %v4586_v23, -1.0  ;;  %vm11459_vm12 = vcmp.gt.f32.partialorder %v4597_v61, -1.0 }
 0x189   :  { %3840 = vrcp.f32 %v998_v3  ;;  %11456 = vst [vmem:[#allocation27_spill] sm:$0xff] %v5027_v26  ;;  %11458 = vst [vmem:[#allocation28_spill] sm:$0xff] %v5034_v47  ;;  %v5042_v10 = vstv %s873_s24  ;;  %v5049_v58 = vstv %s875_s2  ;;  %v5051_v37 = vstv %s876_s23  ;;  %s6949_s23 = sld [smem:[#allocation9 + $0x181]]  ;;  %s6951_s24 = sld [smem:[#allocation9 + $0x183]] }
 0x18a   :  { %3842 = vrcp.f32 %v999_v51  ;;  %11461 = vst [vmem:[#allocation32_spill] sm:$0xff] %v5042_v10  ;;  %11462 = vst [vmem:[#allocation33_spill] sm:$0xff] %v5049_v58  ;;  %v11468_v43 = vmov 0  ;;  %v11474_v32 = vmov 0  ;;  %v11479_v59 = vmov 0  ;;  %s6982_s2 = ssub.f32 %s6919_s22, %s6917_s21 }
 0x18b   :  { %11463 = vst [vmem:[#allocation34_spill] sm:$0xff] %v5051_v37  ;;  %v11484_v44 = vmov 0  ;;  %v11487_v16 = vmov 0  ;;  %v11492_v50 = vmov 0  ;;  %v11497_v63 = vmov 0 }
 0x18c   :  { %v3827_v38 = vpop.eup %3826 }
 0x18d   :  { %v3829_v39 = vpop.eup %3828  ;;  %v1001_v14 = vmul.f32 %v3827_v38, %v4890_v52  ;;  %v5039_v52 = vsel %vm11459_vm12, %v4597_v61, -1.0  ;;  %v5662_v38 = vld [vmem:[#allocation15 + $0x88] sm:$0xff] }
 0x18e   :  { %v3831_v7 = vpop.eup %3830  ;;  %v1003_v4 = vmul.f32 %v3829_v39, %v4892_v54  ;;  %11460 = vst [vmem:[#allocation29_spill] sm:$0xff] %v5039_v52 }
 0x18f   :  { %v3833_v48 = vpop.eup %3832  ;;  %v1005_v9 = vmul.f32 %v3831_v7, %v4894_v19  ;;  %v5659_v7 = vld [vmem:[#allocation15 + $0x80] sm:$0xff] }
 0x190   :  { %v3835_v30 = vpop.eup %3834  ;;  %v1007_v33 = vmul.f32 %v3833_v48, %v4896_v8  ;;  %v5047_v8 = vsel %vm982_vm14, %v1001_v14, 0.0  ;;  %v5056_v34 = vsel %vm983_vm15, %v1003_v4, 0.0  ;;  %v5654_v48 = vld [vmem:[#allocation15 + $0x78] sm:$0xff]  ;;  %11614 = vst [vmem:[#allocation150_spill] sm:$0xff] %v5659_v7 }
 0x191   :  { %v3837_v31 = vpop.eup %3836  ;;  %v1009_v54 = vmul.f32 %v3835_v30, %v4898_v17  ;;  %vm5060_vm12 = vcmp.gt.f32.partialorder %v5047_v8, %v4996_v11  ;;  %v11464_v17 = vmov 0  ;;  %v5069_v25 = vsel %vm984_vm6, %v1005_v9, 0.0  ;;  %v11562_v9 = vld [vmem:[#allocation101_spill] sm:$0xff]  ;;  %v5648_v30 = vld [vmem:[#allocation15 + $0x68] sm:$0xff]  ;;  %11613 = vst [vmem:[#allocation149_spill] sm:$0xff] %v5654_v48 }
 0x192   :  { %v3839_v6 = vpop.eup %3838  ;;  %v1011_v19 = vmul.f32 %v3837_v31, %v4900_v46  ;;  %v11465_v17 = vsel %vm5060_vm12, 4294967295, %v11464_v17  ;;  %v5064_v46 = vstv %s877_s25  ;;  %vm5077_vm1 = vcmp.gt.f32.partialorder %v5056_v34, %v4991_v49  ;;  %11611 = vst [vmem:[#allocation147_spill] sm:$0xff] %v5648_v30  ;;  %s6989_s25 = ssub.f32 %s6951_s24, %s6949_s23 }
 0x193   :  { %v3841_v20 = vpop.eup %3840  ;;  %v1013_v22 = vmul.f32 %v3839_v6, %v4902_v5  ;;  %11466 = vst [vmem:[#allocation35_spill] sm:$0xff] %v11465_v17  ;;  %11467 = vst [vmem:[#allocation36_spill] sm:$0xff] %v5064_v46  ;;  %v5073_v5 = vsel %vm985_vm7, %v1007_v33, 0.0  ;;  %v11469_v43 = vsel %vm5077_vm1, 4294967295, %v11468_v43  ;;  %v5084_v24 = vsel %vm986_vm8, %v1009_v54, 0.0  ;;  %v11785_v17 = vld [vmem:[#allocation82_spill] sm:$0xff] }
 0x194   :  { %v3843_v21 = vpop.eup %3842  ;;  %v1015_v28 = vmul.f32 %v3841_v20, %v4910_v62  ;;  %11470 = vst [vmem:[#allocation39_spill] sm:$0xff] %v11469_v43  ;;  %vm5088_vm14 = vcmp.gt.f32.partialorder %v5069_v25, %v5005_v0  ;;  %v11471_v62 = vmov 0  ;;  %vm5094_vm15 = vcmp.gt.f32.partialorder %v5073_v5, %v5010_v57  ;;  %v11788_v43 = vld [vmem:[#allocation83_spill] sm:$0xff] }
 0x195   :  { %v1017_v56 = vmul.f32 %v3843_v21, %v4927_v18  ;;  %v11472_v62 = vsel %vm5088_vm14, 4294967295, %v11471_v62  ;;  %v11475_v32 = vsel %vm5094_vm15, 4294967295, %v11474_v32  ;;  %v5100_v55 = vsel %vm987_vm2, %v1011_v19, 0.0  ;;  %v11532_v21 = vld [vmem:[#allocation102_spill] sm:$0xff] }
 0x196   :  { %11473 = vst [vmem:[#allocation30_spill] sm:$0xff] %v11472_v62  ;;  %11476 = vst [vmem:[#allocation31_spill] sm:$0xff] %v11475_v32  ;;  %v5104_v18 = vsel %vm988_vm3, %v1013_v22, 0.0  ;;  %vm5108_vm6 = vcmp.gt.f32.partialorder %v5084_v24, %v5015_v2  ;;  %v5118_v53 = vsel %vm989_vm4, %v1015_v28, 0.0  ;;  %vm5122_vm7 = vcmp.gt.f32.partialorder %v5100_v55, %v5022_v27 }
 0x197   :  { %11477 = vst [vmem:[#allocation37_spill] sm:$0xff] %v5100_v55  ;;  %11478 = vst [vmem:[#allocation38_spill] sm:$0xff] %v5104_v18  ;;  %v11480_v59 = vsel %vm5108_vm6, 4294967295, %v11479_v59  ;;  %v11485_v44 = vsel %vm5122_vm7, 4294967295, %v11484_v44  ;;  %vm5128_vm8 = vcmp.gt.f32.partialorder %v5104_v18, %v5027_v26  ;;  %v5138_v40 = vsel %vm990_vm5, %v1017_v56, 0.0 }
 0x198   :  { %11481 = vst [vmem:[#allocation40_spill] sm:$0xff] %v11480_v59  ;;  %11483 = vst [vmem:[#allocation41_spill] sm:$0xff] %v5118_v53  ;;  %v11488_v16 = vsel %vm5128_vm8, 4294967295, %v11487_v16  ;;  %vm5142_vm2 = vcmp.gt.f32.partialorder %v5118_v53, %v5034_v47  ;;  %vm5156_vm3 = vcmp.gt.f32.partialorder %v5138_v40, %v5039_v52  ;;  %v1203_v42 = vmax.f32 %v5047_v8, %v5084_v24 }
 0x199   :  { %11486 = vst [vmem:[#allocation42_spill] sm:$0xff] %v11485_v44  ;;  %11489 = vst [vmem:[#allocation43_spill] sm:$0xff] %v11488_v16  ;;  %v11493_v50 = vsel %vm5142_vm2, 4294967295, %v11492_v50  ;;  %v11498_v63 = vsel %vm5156_vm3, 4294967295, %v11497_v63  ;;  %v1204_v6 = vmax.f32 %v5056_v34, %v5100_v55  ;;  %v1205_v41 = vmax.f32 %v5069_v25, %v5104_v18 }
 0x19a   :  { %11491 = vst [vmem:[#allocation104_spill] sm:$0xff] %v5138_v40  ;;  %11494 = vst [vmem:[#allocation105_spill] sm:$0xff] %v11493_v50  ;;  %v1206_v20 = vmax.f32 %v5073_v5, %v5118_v53  ;;  %v1207_v12 = vmax.f32 %v1203_v42, %v5138_v40  ;;  %v655_v29 = vand.u32 65535, %v11532_v21  ;;  %v11543_v21 = vld [vmem:[#allocation97_spill] sm:$0xff]  ;;  %v11564_v31 = vmov 0 }
 0x19b   :  { %11499 = vst [vmem:[#allocation106_spill] sm:$0xff] %v11498_v63  ;;  %v11568_v28 = vmov 0  ;;  %v1563_v44 = vstv %s1471_s7 }
 0x19c   :  { %v1208_v36 = vmax.f32 %v1207_v12, %v1204_v6  ;;  %v1209_v23 = vmax.f32 %v1205_v41, %v1206_v20  ;;  %v657_v56 = vcvt.s32.f32 %v655_v29 }
 0x19e   :  { %v1210_v45 = vmax.f32 %v1208_v36, %v1209_v23 }
 0x1fa   :  { %v660_v61 = vpop.xlane.xlu0 %659 }
 0x1fb   :  { %vm661_vm4 = vcmp.eq.f32.partialorder %v11533_v35, %v660_v61  ;;  %v666_v13 = vcvt.f32.s32 %v660_v61  ;;  %v691_v61 = vstv %s690_s26  ;;  %s2071_s26 = smul.f32 %s6989_s25, %s6982_s2 }
 0x1fc   :  { %v662_v46 = vsel %vm661_vm4, %v657_v56, inf  ;;  %vm5300_vm4 = vcmp.eq.s32.totalorder %v691_v61, 1  ;;  %v11544_v56 = vmov 0  ;;  %v11555_v61 = vmov 0 }
 0x1fd   :  { %663 = vmin.xlane.f32.xlu1 %v662_v46  ;;  %v667_v37 = vshll.u32 %v666_v13, 16 }
 0x201   :  { %1211 = vmax.xlane.f32.xlu1 %v1210_v45 }
 0x28a   :  { %v664_v1 = vpop.xlane.xlu1 %663 }
 0x28b   :  { %v665_v51 = vcvt.f32.s32 %v664_v1  ;;  %v11536_v1 = vld [vmem:[#allocation93_spill] sm:$0xff] }
 0x28d   :  { %v668_v39 = vadd.s32 %v667_v37, %v665_v51  ;;  %v11537_v51 = vld [vmem:[#allocation94_spill] sm:$0xff] }
 0x28e   :  { %v1212_v14 = vpop.xlane.xlu1 %1211 }
 0x28f   :  { %v669_v4 = vrot.slane %v668_v39, 4  ;;  %v1213_v42 = vrot.slane %v1212_v14, 4 }
 0x291   :  { %vm670_vm5 = vcmp.lt.s32.totalorder %v668_v39, %v669_v4  ;;  %v1214_v12 = vmax.f32 %v1212_v14, %v1213_v42  ;;  %v11539_v14 = vld [vmem:[#allocation96_spill] sm:$0xff] }
 0x292   :  { %v671_v41 = vsel %vm670_vm5, %v668_v39, %v669_v4  ;;  %v11538_v39 = vld [vmem:[#allocation95_spill] sm:$0xff]  ;;  %v11540_v4 = vmov 0 }
 0x293   :  { %v1215_v6 = vrot.slane %v1214_v12, 2  ;;  %v672_v29 = vrot.slane %v671_v41, 2 }
 0x295   :  { %vm673_vm0 = vcmp.lt.s32.totalorder %v671_v41, %v672_v29  ;;  %v1216_v35 = vmax.f32 %v1214_v12, %v1215_v6  ;;  %v11558_v6 = vld [vmem:[#allocation100_spill] sm:$0xff]  ;;  %v11559_v12 = vmov 0 }
 0x296   :  { %v674_v20 = vsel %vm673_vm0, %v671_v41, %v672_v29  ;;  %v11549_v29 = vld [vmem:[#allocation98_spill] sm:$0xff] }
 0x297   :  { %v675_v46 = vrot.slane %v674_v20, 1  ;;  %v1217_v36 = vrot.slane %v1216_v35, 1 }
 0x299   :  { %vm676_vm13 = vcmp.lt.s32.totalorder %v674_v20, %v675_v46  ;;  %v1218_v45 = vmax.f32 %v1216_v35, %v1217_v36  ;;  %v11550_v35 = vmov 0 }
 0x29a   :  { %v677_v23 = vsel %vm676_vm13, %v674_v20, %v675_v46 }
 0x29b   :  { %3778 = vpush %v677_v23  ;;  %v11554_v23 = vld [vmem:[#allocation99_spill] sm:$0xff] }
 0x29c   :  { %3780 = vpush %v1218_v45  ;;  %v11574_v45 = vmov 0 }
 0x2cc   :  { %s3779_s0 = spop %3778 }
 0x2cd   :  { %v679_v37 = vstv %s3779_s0  ;;  %s5475_s3 = spop %3780  ;;  %s2072_s0 = sadd.f32 %s6919_s22, %s6917_s21 }
 0x2ce   :  { %vm680_vm5 = vcmp.eq.s32.totalorder %v11536_v1, %v679_v37  ;;  %vm681_vm0 = vcmp.eq.s32.totalorder %v11537_v51, %v679_v37  ;;  %vm682_vm11 = vcmp.eq.s32.totalorder %v11538_v39, %v679_v37  ;;  %vm683_vm10 = vcmp.eq.s32.totalorder %v11539_v14, %v679_v37  ;;  %p1289_p13 = scmp.gt.f32.partialorder %s5475_s3, 0.0 }
 0x2cf   :  { %vm5310_vm13 = vmand %vm680_vm5, %vm5300_vm4  ;;  %vm684_vm9 = vcmp.eq.s32.totalorder %v11543_v21, %v679_v37  ;;  %vm688_vm5 = vcmp.eq.s32.totalorder %v11562_v9, %v679_v37  ;;  %vm11567_vm7 = vcmp.eq.s32.totalorder %v11554_v23, %v679_v37  ;;  %v1220_v22 = vstv %s5475_s3  ;;  %s2074_s3 = sadd.f32 %s6951_s24, %s6949_s23 }
 0x2d0   :  { %v11541_v4 = vsel %vm5310_vm13, 4294967295, %v11540_v4  ;;  %vm5317_vm3 = vmand %vm681_vm0, %vm5300_vm4  ;;  %vm687_vm0 = vcmp.eq.s32.totalorder %v11558_v6, %v679_v37  ;;  %s1290_s18 = scalar_select %p1289_p13, 1, 0 }
 0x2d1   :  { %11542 = vst [vmem:[#allocation102_spill] sm:$0xff] %v11541_v4  ;;  %v11545_v56 = vsel %vm5317_vm3, 4294967295, %v11544_v56  ;;  %vm5330_vm2 = vmand %vm682_vm11, %vm5300_vm4 }
 0x2d2   :  { %11546 = vst [vmem:[#allocation103_spill] sm:$0xff] %v11545_v56  ;;  %v11551_v35 = vsel %vm5330_vm2, 4294967295, %v11550_v35  ;;  %vm5346_vm11 = vmand %vm683_vm10, %vm5300_vm4  ;;  %v5566_v56 = vld [vmem:[#allocation15 + $0x40] sm:$0xff] }
 0x2d3   :  { %11552 = vst [vmem:[#allocation107_spill] sm:$0xff] %v11551_v35  ;;  %v11556_v61 = vsel %vm5346_vm11, 4294967295, %v11555_v61  ;;  %vm5364_vm10 = vmand %vm684_vm9, %vm5300_vm4  ;;  %vm11563_vm9 = vcmp.eq.s32.totalorder %v11549_v29, %v679_v37  ;;  %v11571_v37 = vmov 0  ;;  %vm1229_vm11 = vcmp.eq.f32.partialorder %v5138_v40, %v1220_v22  ;;  %v5563_v35 = vld [vmem:[#allocation15 + $0x38] sm:$0xff] }
 0x2d4   :  { %11557 = vst [vmem:[#allocation108_spill] sm:$0xff] %v11556_v61  ;;  %v11560_v12 = vsel %vm5364_vm10, 4294967295, %v11559_v12  ;;  %vm5382_vm8 = vmand %vm11563_vm9, %vm5300_vm4  ;;  %vm1227_vm10 = vcmp.eq.f32.partialorder %v5104_v18, %v1220_v22  ;;  %v5553_v61 = vld [vmem:[#allocation15 + $0x20] sm:$0xff] }
 0x2d5   :  { %11561 = vst [vmem:[#allocation109_spill] sm:$0xff] %v11560_v12  ;;  %v11565_v31 = vsel %vm5382_vm8, 4294967295, %v11564_v31  ;;  %vm5399_vm9 = vmand %vm11567_vm7, %vm5300_vm4  ;;  %vm1225_vm8 = vcmp.eq.f32.partialorder %v5084_v24, %v1220_v22  ;;  %v1236_v41 = vsel %vm1227_vm10, %v11554_v23, 9216  ;;  %v5511_v23 = vld [vmem:[#allocation15 + $0x98] sm:$0xff] }
 0x2d6   :  { %11566 = vst [vmem:[#allocation110_spill] sm:$0xff] %v11565_v31  ;;  %v11569_v28 = vsel %vm5399_vm9, 4294967295, %v11568_v28  ;;  %vm5414_vm6 = vmand %vm687_vm0, %vm5300_vm4  ;;  %vm1223_vm0 = vcmp.eq.f32.partialorder %v5069_v25, %v1220_v22  ;;  %vm1224_vm9 = vcmp.eq.f32.partialorder %v5073_v5, %v1220_v22  ;;  %v1234_v58 = vsel %vm1225_vm8, %v11543_v21, 9216  ;;  %v5514_v31 = vld [vmem:[#allocation15 + $0xa0] sm:$0xff] }
 0x2d7   :  { %11570 = vst [vmem:[#allocation111_spill] sm:$0xff] %v11569_v28  ;;  %v11572_v37 = vsel %vm5414_vm6, 4294967295, %v11571_v37  ;;  %vm5429_vm7 = vmand %vm688_vm5, %vm5300_vm4  ;;  %vm1221_vm4 = vcmp.eq.f32.partialorder %v5047_v8, %v1220_v22  ;;  %vm1222_vm5 = vcmp.eq.f32.partialorder %v5056_v34, %v1220_v22  ;;  %vm1226_vm6 = vcmp.eq.f32.partialorder %v5100_v55, %v1220_v22  ;;  %v5508_v28 = vld [vmem:[#allocation15 + $0x90] sm:$0xff] }
 0x2d8   :  { %11573 = vst [vmem:[#allocation112_spill] sm:$0xff] %v11572_v37  ;;  %v11575_v45 = vsel %vm5429_vm7, 4294967295, %v11574_v45  ;;  %vm1228_vm7 = vcmp.eq.f32.partialorder %v5118_v53, %v1220_v22  ;;  %v1230_v19 = vsel %vm1221_vm4, %v11536_v1, 9216  ;;  %v1231_v46 = vsel %vm1222_vm5, %v11537_v51, 9216  ;;  %11578 = vst [vmem:[#allocation114_spill] sm:$0xff] %v5508_v28 }
 0x2d9   :  { %11576 = vst [vmem:[#allocation113_spill] sm:$0xff] %v11575_v45  ;;  %v1232_v13 = vsel %vm1223_vm0, %v11538_v39, 9216  ;;  %v1233_v20 = vsel %vm1224_vm9, %v11539_v14, 9216  ;;  %v1235_v36 = vsel %vm1226_vm6, %v11549_v29, 9216  ;;  %v1237_v42 = vsel %vm1228_vm7, %v11558_v6, 9216  ;;  %11579 = vst [vmem:[#allocation115_spill] sm:$0xff] %v5511_v23 }
 0x2da   :  { %v1238_v22 = vsel %vm1229_vm11, %v11562_v9, 9216  ;;  %vm1239_vm2 = vcmp.lt.s32.totalorder %v1230_v19, %v1234_v58  ;;  %vm1241_vm4 = vcmp.lt.s32.totalorder %v1231_v46, %v1235_v36  ;;  %vm1243_vm3 = vcmp.lt.s32.totalorder %v1232_v13, %v1236_v41  ;;  %11580 = vst [vmem:[#allocation116_spill] sm:$0xff] %v5514_v31  ;;  %11592 = vst [vmem:[#allocation128_spill] sm:$0xff] %v5553_v61 }
 0x2db   :  { %vm1245_vm5 = vcmp.lt.s32.totalorder %v1233_v20, %v1237_v42  ;;  %v1240_v51 = vsel %vm1239_vm2, %v1230_v19, %v1234_v58  ;;  %v1242_v39 = vsel %vm1241_vm4, %v1231_v46, %v1235_v36  ;;  %v1244_v1 = vsel %vm1243_vm3, %v1232_v13, %v1236_v41  ;;  %v5517_v19 = vld [vmem:[#allocation15 + $0xa8] sm:$0xff]  ;;  %v5520_v41 = vld [vmem:[#allocation15 + $0xb0] sm:$0xff]  ;;  %v5526_v46 = vld [vmem:[#allocation15 + $0xc0] sm:$0xff]  ;;  %11595 = vst [vmem:[#allocation131_spill] sm:$0xff] %v5563_v35 }
 0x2dc   :  { %v1246_v14 = vsel %vm1245_vm5, %v1233_v20, %v1237_v42  ;;  %vm1247_vm9 = vcmp.lt.s32.totalorder %v1240_v51, %v1238_v22  ;;  %v1478_v21 = vstv %s5486_s27  ;;  %v1488_v45 = vstv %s5484_s1  ;;  %11581 = vst [vmem:[#allocation117_spill] sm:$0xff] %v5517_v19  ;;  %11582 = vst [vmem:[#allocation118_spill] sm:$0xff] %v5520_v41  ;;  %v5529_v13 = vld [vmem:[#allocation15 + $0xc8] sm:$0xff]  ;;  %s2076_s1 = smul.f32 0.0033333334, %s6982_s2 }
 0x2dd   :  { %vm1251_vm0 = vcmp.lt.s32.totalorder %v1244_v1, %v1246_v14  ;;  %v1248_v37 = vsel %vm1247_vm9, %v1240_v51, %v1238_v22  ;;  %v1479_v6 = vmin.f32 %v1478_v21, %v5508_v28  ;;  %v1480_v9 = vmin.f32 %v1478_v21, %v5511_v23  ;;  %11584 = vst [vmem:[#allocation120_spill] sm:$0xff] %v5526_v46  ;;  %v5550_v28 = vld [vmem:[#allocation15 + $0x18] sm:$0xff]  ;;  %s2073_s27 = smul.f32 0.0016666667, %s2072_s0 }
 0x2de   :  { %v1252_v29 = vsel %vm1251_vm0, %v1244_v1, %v1246_v14  ;;  %vm1249_vm6 = vcmp.lt.s32.totalorder %v1248_v37, %v1242_v39  ;;  %v1481_v58 = vmin.f32 %v1478_v21, %v5514_v31  ;;  %v1482_v42 = vmin.f32 %v1478_v21, %v5517_v19  ;;  %v5523_v14 = vld [vmem:[#allocation15 + $0xb8] sm:$0xff]  ;;  %11585 = vst [vmem:[#allocation121_spill] sm:$0xff] %v5529_v13  ;;  %v5536_v19 = vld [vmem:[#allocation15 + $0xd0] sm:$0xff] }
 0x2df   :  { %v1483_v1 = vmin.f32 %v1478_v21, %v5520_v41  ;;  %v1250_v51 = vsel %vm1249_vm6, %v1248_v37, %v1242_v39  ;;  %11583 = vst [vmem:[#allocation119_spill] sm:$0xff] %v5523_v14  ;;  %v1484_v20 = vmin.f32 %v1478_v21, %v5523_v14  ;;  %v1485_v36 = vmin.f32 %v1478_v21, %v5526_v46  ;;  %v5539_v37 = vld [vmem:[#allocation15] sm:$0xff]  ;;  %v5542_v41 = vld [vmem:[#allocation15 + $0x8] sm:$0xff] }
 0x2e0   :  { %v1486_v22 = vmin.f32 %v1478_v21, %v5529_v13  ;;  %vm1253_vm8 = vcmp.lt.s32.totalorder %v1250_v51, %v1252_v29  ;;  %11586 = vst [vmem:[#allocation122_spill] sm:$0xff] %v5536_v19  ;;  %v1487_v39 = vmin.f32 %v1478_v21, %v5536_v19  ;;  %11587 = vst [vmem:[#allocation123_spill] sm:$0xff] %v5539_v37  ;;  %v5547_v13 = vld [vmem:[#allocation15 + $0x10] sm:$0xff]  ;;  %v5557_v19 = vld [vmem:[#allocation15 + $0x28] sm:$0xff]  ;;  %vm11628_vm6 = vnez %v11480_v59 }
 0x2e1   :  { %v1489_v14 = vmax.f32 %v1488_v45, %v5539_v37  ;;  %11588 = vst [vmem:[#allocation124_spill] sm:$0xff] %v5542_v41  ;;  %v1490_v46 = vmax.f32 %v1488_v45, %v5542_v41  ;;  %v5545_v31 = vsel %vm1253_vm8, %v1250_v51, %v1252_v29  ;;  %11590 = vst [vmem:[#allocation126_spill] sm:$0xff] %v5547_v13  ;;  %v5560_v29 = vld [vmem:[#allocation15 + $0x30] sm:$0xff]  ;;  %v11797_v59 = vld [vmem:[#allocation86_spill] sm:$0xff] }
 0x2e2   :  { %11589 = vst [vmem:[#allocation125_spill] sm:$0xff] %v5545_v31  ;;  %v1491_v23 = vmax.f32 %v1488_v45, %v5547_v13  ;;  %11591 = vst [vmem:[#allocation127_spill] sm:$0xff] %v5550_v28  ;;  %v1492_v12 = vmax.f32 %v1488_v45, %v5550_v28  ;;  %v1493_v21 = vmax.f32 %v1488_v45, %v5553_v61  ;;  %v1256_v37 = vshra.s32 %v5545_v31, 16 }
 0x2e3   :  { %11593 = vst [vmem:[#allocation129_spill] sm:$0xff] %v5557_v19  ;;  %v1494_v41 = vmax.f32 %v1488_v45, %v5557_v19  ;;  %11594 = vst [vmem:[#allocation130_spill] sm:$0xff] %v5560_v29  ;;  %v1495_v51 = vmax.f32 %v1488_v45, %v5560_v29  ;;  %v1496_v13 = vmax.f32 %v1488_v45, %v5563_v35 }
 0x2e4   :  { %11596 = vst [vmem:[#allocation132_spill] sm:$0xff] %v5566_v56  ;;  %v1497_v28 = vmax.f32 %v1488_v45, %v5566_v56  ;;  %v5569_v4 = vsub.f32 %v1479_v6, %v1489_v14  ;;  %v5571_v61 = vsub.f32 %v1480_v9, %v1490_v46  ;;  %v5573_v31 = vsub.f32 %v1481_v58, %v1491_v23  ;;  %v5627_v58 = vld [vmem:[#allocation15 + $0x108] sm:$0xff]  ;;  %v5642_v56 = vld [vmem:[#allocation15 + $0x58] sm:$0xff] }
 0x2e5   :  { %v5575_v19 = vcvt.s32.f32 %v1256_v37  ;;  %v5577_v54 = vsub.f32 %v1482_v42, %v1492_v12  ;;  %v5579_v29 = vsub.f32 %v1483_v1, %v1493_v21  ;;  %v5581_v35 = vsub.f32 %v1484_v20, %v1494_v41  ;;  %v5615_v37 = vld [vmem:[#allocation15 + $0xe8] sm:$0xff]  ;;  %v5624_v41 = vld [vmem:[#allocation15 + $0x100] sm:$0xff]  ;;  %11604 = vst [vmem:[#allocation140_spill] sm:$0xff] %v5627_v58  ;;  %v5630_v12 = vld [vmem:[#allocation15 + $0x110] sm:$0xff] }
 0x2e6   :  { %v5583_v33 = vsub.f32 %v1485_v36, %v1495_v51  ;;  %v5585_v9 = vsub.f32 %v1486_v22, %v1496_v13  ;;  %v5587_v6 = vsub.f32 %v1487_v39, %v1497_v28  ;;  %v1516_v20 = vstv %s5534_s29  ;;  %v5609_v36 = vld [vmem:[#allocation15 + $0xd8] sm:$0xff]  ;;  %v5612_v22 = vld [vmem:[#allocation15 + $0xe0] sm:$0xff]  ;;  %11600 = vst [vmem:[#allocation136_spill] sm:$0xff] %v5615_v37  ;;  %v5618_v51 = vld [vmem:[#allocation15 + $0xf0] sm:$0xff]  ;;  %s2077_s29 = smul.f32 0.0033333334, %s6989_s25 }
 0x2e7   :  { %11597 = vst [vmem:[#allocation133_spill] sm:$0xff] %v5575_v19  ;;  %1259 = vmin.xlane.f32.xlu0 %v5575_v19  ;;  %v1526_v46 = vstv %s5532_s28  ;;  %11598 = vst [vmem:[#allocation134_spill] sm:$0xff] %v5609_v36  ;;  %v1517_v13 = vmin.f32 %v1516_v20, %v5609_v36  ;;  %v1518_v39 = vmin.f32 %v1516_v20, %v5612_v22  ;;  %v5621_v28 = vld [vmem:[#allocation15 + $0xf8] sm:$0xff]  ;;  %v5639_v36 = vld [vmem:[#allocation15 + $0x50] sm:$0xff]  ;;  %s2075_s28 = smul.f32 0.0016666667, %s2074_s3 }
 0x2e8   :  { %11599 = vst [vmem:[#allocation135_spill] sm:$0xff] %v5612_v22  ;;  %v1519_v21 = vmin.f32 %v1516_v20, %v5615_v37  ;;  %11601 = vst [vmem:[#allocation137_spill] sm:$0xff] %v5618_v51  ;;  %v1520_v14 = vmin.f32 %v1516_v20, %v5618_v51  ;;  %v1521_v1 = vmin.f32 %v1516_v20, %v5621_v28  ;;  %v5633_v37 = vld [vmem:[#allocation15 + $0x118] sm:$0xff]  ;;  %v5636_v22 = vld [vmem:[#allocation15 + $0x48] sm:$0xff] }
 0x2e9   :  { %11602 = vst [vmem:[#allocation138_spill] sm:$0xff] %v5621_v28  ;;  %11603 = vst [vmem:[#allocation139_spill] sm:$0xff] %v5624_v41  ;;  %v1522_v42 = vmin.f32 %v1516_v20, %v5624_v41  ;;  %v1523_v23 = vmin.f32 %v1516_v20, %v5627_v58  ;;  %v1524_v45 = vmin.f32 %v1516_v20, %v5630_v12  ;;  %v5645_v19 = vld [vmem:[#allocation15 + $0x60] sm:$0xff] }
 0x2ea   :  { %11605 = vst [vmem:[#allocation141_spill] sm:$0xff] %v5630_v12  ;;  %11606 = vst [vmem:[#allocation142_spill] sm:$0xff] %v5633_v37  ;;  %v1525_v51 = vmin.f32 %v1516_v20, %v5633_v37  ;;  %v1527_v28 = vmax.f32 %v1526_v46, %v5636_v22  ;;  %v1528_v41 = vmax.f32 %v1526_v46, %v5639_v36  ;;  %v5651_v37 = vld [vmem:[#allocation15 + $0x70] sm:$0xff] }
 0x2eb   :  { %11607 = vst [vmem:[#allocation143_spill] sm:$0xff] %v5636_v22  ;;  %11608 = vst [vmem:[#allocation144_spill] sm:$0xff] %v5639_v36  ;;  %v1529_v58 = vmax.f32 %v1526_v46, %v5642_v56  ;;  %v1530_v12 = vmax.f32 %v1526_v46, %v5645_v19  ;;  %v1531_v20 = vmax.f32 %v1526_v46, %v5648_v30 }
 0x2ec   :  { %11609 = vst [vmem:[#allocation145_spill] sm:$0xff] %v5642_v56  ;;  %11610 = vst [vmem:[#allocation146_spill] sm:$0xff] %v5645_v19  ;;  %v1532_v22 = vmax.f32 %v1526_v46, %v5651_v37  ;;  %v1533_v36 = vmax.f32 %v1526_v46, %v5654_v48  ;;  %v1534_v56 = vmax.f32 %v1526_v46, %v5659_v7 }
 0x2ed   :  { %11612 = vst [vmem:[#allocation148_spill] sm:$0xff] %v5651_v37  ;;  %v1535_v19 = vmax.f32 %v1526_v46, %v5662_v38  ;;  %v1536_v3 = vsub.f32 %v1517_v13, %v1527_v28  ;;  %v1537_v15 = vsub.f32 %v1518_v39, %v1528_v41  ;;  %v1538_v30 = vsub.f32 %v1519_v21, %v1529_v58 }
 0x2ee   :  { %v1539_v60 = vsub.f32 %v1520_v14, %v1530_v12  ;;  %v1540_v10 = vsub.f32 %v1521_v1, %v1531_v20  ;;  %v1541_v63 = vsub.f32 %v1522_v42, %v1532_v22  ;;  %v1542_v37 = vsub.f32 %v1523_v23, %v1533_v36  ;;  %v5724_v42 = vld [vmem:[#allocation15 + $0x158] sm:$0xff]  ;;  %v5735_v36 = vld [vmem:[#allocation15 + $0x160] sm:$0xff] }
 0x2ef   :  { %v1543_v40 = vsub.f32 %v1524_v45, %v1534_v56  ;;  %v1544_v52 = vsub.f32 %v1525_v51, %v1535_v19  ;;  %v1545_v50 = vmax.f32 %v1536_v3, 0.0  ;;  %v1546_v48 = vmax.f32 %v1537_v15, 0.0 }
 0x2f0   :  { %v1547_v53 = vmax.f32 %v1538_v30, 0.0  ;;  %v1548_v47 = vmax.f32 %v1539_v60, 0.0  ;;  %v1549_v16 = vmax.f32 %v1540_v10, 0.0  ;;  %v1550_v18 = vmax.f32 %v1541_v63, 0.0 }
 0x2f1   :  { %v1551_v7 = vmax.f32 %v1542_v37, 0.0  ;;  %v1552_v26 = vmax.f32 %v1543_v40, 0.0  ;;  %v1553_v55 = vmax.f32 %v1544_v52, 0.0  ;;  %v11615_v28 = vmax.f32 %v5569_v4, 0.0 }
 0x2f2   :  { %v11616_v12 = vmax.f32 %v5571_v61, 0.0  ;;  %v11617_v56 = vmax.f32 %v5573_v31, 0.0  ;;  %v11618_v60 = vmax.f32 %v5577_v54, 0.0  ;;  %v11619_v15 = vmax.f32 %v5579_v29, 0.0  ;;  %v5712_v61 = vld [vmem:[#allocation15 + $0x148] sm:$0xff]  ;;  %v5715_v29 = vld [vmem:[#allocation15 + $0x150] sm:$0xff] }
 0x2f3   :  { %v5667_v41 = vmul.f32 %v1545_v50, %v11615_v28  ;;  %v11620_v52 = vmax.f32 %v5581_v35, 0.0  ;;  %v11621_v63 = vmax.f32 %v5583_v33, 0.0  ;;  %v11622_v30 = vmax.f32 %v5585_v9, 0.0  ;;  %v5706_v33 = vld [vmem:[#allocation15 + $0x138] sm:$0xff] }
 0x2f4   :  { %v5671_v58 = vmul.f32 %v1546_v48, %v11616_v12  ;;  %v5675_v3 = vmul.f32 %v1547_v53, %v11617_v56  ;;  %v5679_v10 = vmul.f32 %v1548_v47, %v11618_v60  ;;  %v5683_v40 = vmul.f32 %v1549_v16, %v11619_v15  ;;  %v5697_v47 = vld [vmem:[#allocation15 + $0x120] sm:$0xff]  ;;  %v5700_v16 = vld [vmem:[#allocation15 + $0x128] sm:$0xff] }
 0x2f5   :  { %v5687_v50 = vmul.f32 %v1550_v18, %v11620_v52  ;;  %v5691_v48 = vmul.f32 %v1551_v7, %v11621_v63  ;;  %v5695_v53 = vmul.f32 %v1552_v26, %v11622_v30  ;;  %v1564_v31 = vadd.f32 %v5697_v47, %v1563_v44  ;;  %v5703_v18 = vld [vmem:[#allocation15 + $0x130] sm:$0xff]  ;;  %v5709_v26 = vld [vmem:[#allocation15 + $0x140] sm:$0xff] }
 0x2f6   :  { %v1565_v54 = vadd.f32 %v5700_v16, %v1563_v44  ;;  %v1566_v7 = vadd.f32 %v5703_v18, %v1563_v44  ;;  %v1567_v4 = vadd.f32 %v5706_v33, %v1563_v44  ;;  %v1568_v35 = vadd.f32 %v5709_v26, %v1563_v44 }
 0x2f7   :  { %v1569_v19 = vadd.f32 %v5712_v61, %v1563_v44  ;;  %v1570_v9 = vadd.f32 %v5715_v29, %v1563_v44  ;;  %v11623_v45 = vmax.f32 %v5587_v6, 0.0  ;;  %v1571_v1 = vadd.f32 %v5724_v42, %v1563_v44 }
 0x2f8   :  { %v5728_v14 = vsub.f32 %v1564_v31, %v5667_v41  ;;  %v5731_v46 = vsub.f32 %v1565_v54, %v5671_v58  ;;  %v1572_v13 = vadd.f32 %v5735_v36, %v1563_v44  ;;  %v5739_v22 = vsub.f32 %v1566_v7, %v5675_v3 }
 0x2f9   :  { %v5722_v23 = vmul.f32 %v1553_v55, %v11623_v45  ;;  %v5742_v55 = vsub.f32 %v1567_v4, %v5679_v10  ;;  %v5745_v6 = vsub.f32 %v1568_v35, %v5683_v40  ;;  %v5748_v39 = vsub.f32 %v1569_v19, %v5687_v50  ;;  %v11634_v45 = vld [vmem:[#allocation27_spill] sm:$0xff] }
 0x2fa   :  { %vm1582_vm2 = vcmp.gt.f32.partialorder %v5728_v14, 0.0  ;;  %v5752_v37 = vsub.f32 %v1570_v9, %v5691_v48  ;;  %vm1583_vm3 = vcmp.gt.f32.partialorder %v5731_v46, 0.0  ;;  %vm1584_vm11 = vcmp.gt.f32.partialorder %v5739_v22, 0.0 }
 0x2fb   :  { %v5757_v44 = vsub.f32 %v1571_v1, %v5695_v53  ;;  %vm1585_vm10 = vcmp.gt.f32.partialorder %v5742_v55, 0.0  ;;  %v5761_v21 = vsub.f32 %v1572_v13, %v5722_v23  ;;  %vm1586_vm7 = vcmp.gt.f32.partialorder %v5745_v6, 0.0  ;;  %v11635_v1 = vld [vmem:[#allocation38_spill] sm:$0xff] }
 0x2fc   :  { %v1591_v51 = vsel %vm1582_vm2, %v5728_v14, 1.0  ;;  %v1592_v20 = vsel %vm1583_vm3, %v5731_v46, 1.0  ;;  %vm10860_vm4 = vcmp.gt.f32.partialorder %v5748_v39, 0.0  ;;  %v1593_v28 = vsel %vm1584_vm11, %v5739_v22, 1.0 }
 0x2fd   :  { %vm10859_vm5 = vcmp.gt.f32.partialorder %v5752_v37, 0.0  ;;  %v1594_v12 = vsel %vm1585_vm10, %v5742_v55, 1.0  ;;  %3844 = vrcp.f32 %v1591_v51  ;;  %vm10858_vm9 = vcmp.gt.f32.partialorder %v5757_v44, 0.0  ;;  %v11639_v51 = vld [vmem:[#allocation28_spill] sm:$0xff] }
 0x2fe   :  { %v1595_v56 = vsel %vm1586_vm7, %v5745_v6, 1.0  ;;  %3846 = vrcp.f32 %v1592_v20  ;;  %vm10857_vm0 = vcmp.gt.f32.partialorder %v5761_v21, 0.0  ;;  %v1596_v60 = vsel %vm10860_vm4, %v5748_v39, 1.0  ;;  %v11641_v20 = vld [vmem:[#allocation105_spill] sm:$0xff] }
 0x2ff   :  { %3848 = vrcp.f32 %v1593_v28  ;;  %v1597_v15 = vsel %vm10859_vm5, %v5752_v37, 1.0  ;;  %v1598_v52 = vsel %vm10858_vm9, %v5757_v44, 1.0  ;;  %v1599_v63 = vsel %vm10857_vm0, %v5761_v21, 1.0 }
 0x300   :  { %3850 = vrcp.f32 %v1594_v12  ;;  %v5803_v7 = vsel %vm5060_vm12, %v5047_v8, %v4996_v11  ;;  %v5809_v4 = vsel %vm5077_vm1, %v5056_v34, %v4991_v49  ;;  %v5819_v9 = vsel %vm5088_vm14, %v5069_v25, %v5005_v0  ;;  %v11631_v0 = vld [vmem:[#allocation42_spill] sm:$0xff]  ;;  %v11644_v12 = vld [vmem:[#allocation29_spill] sm:$0xff] }
 0x301   :  { %3852 = vrcp.f32 %v1595_v56  ;;  %11624 = vst [vmem:[#allocation151_spill] sm:$0xff] %v5803_v7  ;;  %11625 = vst [vmem:[#allocation152_spill] sm:$0xff] %v5809_v4  ;;  %v5825_v11 = vsel %vm5094_vm15, %v5073_v5, %v5010_v57  ;;  %v5831_v49 = vsel %vm11628_vm6, %v5084_v24, %v5015_v2  ;;  %vm11632_vm8 = vnez %v11631_v0  ;;  %v11636_v57 = vld [vmem:[#allocation43_spill] sm:$0xff]  ;;  %v11646_v56 = vld [vmem:[#allocation106_spill] sm:$0xff] }
 0x302   :  { %3854 = vrcp.f32 %v1596_v60  ;;  %11626 = vst [vmem:[#allocation153_spill] sm:$0xff] %v5819_v9  ;;  %11627 = vst [vmem:[#allocation154_spill] sm:$0xff] %v5825_v11  ;;  %vm11637_vm0 = vnez %v11636_v57  ;;  %vm11642_vm9 = vnez %v11641_v20  ;;  %vm11647_vm5 = vnez %v11646_v56  ;;  %v11801_v0 = vld [vmem:[#allocation87_spill] sm:$0xff]  ;;  %v11804_v57 = vld [vmem:[#allocation88_spill] sm:$0xff] }
 0x303   :  { %3856 = vrcp.f32 %v1597_v15  ;;  %11629 = vst [vmem:[#allocation155_spill] sm:$0xff] %v5831_v49  ;;  %v5845_v5 = vsel %vm11637_vm0, %v11635_v1, %v11634_v45  ;;  %v11656_v46 = vmov 0  ;;  %v11662_v22 = vmov 0  ;;  %v11670_v1 = vld [vmem:[#allocation32_spill] sm:$0xff] }
 0x304   :  { %3858 = vrcp.f32 %v1598_v52  ;;  %11638 = vst [vmem:[#allocation27_spill] sm:$0xff] %v5845_v5  ;;  %v5862_v52 = vstv %s1473_s13  ;;  %vm11666_vm13 = vcmp.gt.f32.partialorder %v5752_v37, 0.0  ;;  %v11667_v6 = vmov 0  ;;  %s7825_s13 = sld [smem:[#allocation9 + $0x201]] }
 0x305   :  { %3860 = vrcp.f32 %v1599_v63 }
 0x307   :  { %v3845_v30 = vpop.eup %3844 }
 0x308   :  { %v3847_v31 = vpop.eup %3846  ;;  %v1601_v35 = vmul.f32 %v3845_v30, %v5667_v41  ;;  %v11630_v41 = vld [vmem:[#allocation37_spill] sm:$0xff]  ;;  %v5869_v30 = vstv %s1475_s14  ;;  %s7827_s14 = sld [smem:[#allocation9 + $0x203]] }
 0x309   :  { %v3849_v54 = vpop.eup %3848  ;;  %v1603_v8 = vmul.f32 %v3847_v31, %v5671_v58  ;;  %v5839_v25 = vsel %vm11632_vm8, %v11630_v41, %v5022_v27  ;;  %v11640_v58 = vld [vmem:[#allocation41_spill] sm:$0xff]  ;;  %v11645_v27 = vld [vmem:[#allocation104_spill] sm:$0xff]  ;;  %11650 = vst [vmem:[#allocation29_spill] sm:$0xff] %v5869_v30  ;;  %v5871_v31 = vstv %s1476_s10  ;;  %s7793_s10 = sld [smem:[#allocation9 + $0x202]] }
 0x30a   :  { %v3851_v19 = vpop.eup %3850  ;;  %11633 = vst [vmem:[#allocation37_spill] sm:$0xff] %v5839_v25  ;;  %v1605_v13 = vmul.f32 %v3849_v54, %v5675_v3  ;;  %v5853_v28 = vsel %vm11642_vm9, %v11640_v58, %v11639_v51  ;;  %v5859_v60 = vsel %vm11647_vm5, %v11645_v27, %v11644_v12  ;;  %11649 = vst [vmem:[#allocation41_spill] sm:$0xff] %v5862_v52  ;;  %v5867_v63 = vsel %vm1582_vm2, %v1601_v35, 0.0  ;;  %v11682_v58 = vld [vmem:[#allocation55_spill] sm:$0xff] }
 0x30b   :  { %v3853_v34 = vpop.eup %3852  ;;  %v1607_v2 = vmul.f32 %v3851_v19, %v5679_v10  ;;  %11643 = vst [vmem:[#allocation38_spill] sm:$0xff] %v5853_v28  ;;  %11648 = vst [vmem:[#allocation28_spill] sm:$0xff] %v5859_v60  ;;  %v5876_v41 = vsel %vm1583_vm3, %v1603_v8, 0.0  ;;  %vm5880_vm4 = vcmp.gt.f32.partialorder %v5867_v63, %v5803_v7  ;;  %v11679_v51 = vmov 0 }
 0x30c   :  { %v3855_v24 = vpop.eup %3854  ;;  %v1609_v15 = vmul.f32 %v3853_v34, %v5683_v40  ;;  %11651 = vst [vmem:[#allocation104_spill] sm:$0xff] %v5871_v31  ;;  %v11652_v40 = vmov 0  ;;  %v5889_v34 = vsel %vm1584_vm11, %v1605_v13, 0.0  ;;  %vm5897_vm2 = vcmp.gt.f32.partialorder %v5876_v41, %v5809_v4  ;;  %v11671_v13 = vld [vmem:[#allocation89_spill] sm:$0xff] }
 0x30d   :  { %v3857_v3 = vpop.eup %3856  ;;  %v1611_v10 = vmul.f32 %v3855_v24, %v5687_v50  ;;  %v11653_v40 = vsel %vm5880_vm4, 4294967295, %v11652_v40  ;;  %v5884_v50 = vstv %s1477_s15  ;;  %v11657_v46 = vsel %vm5897_vm2, 4294967295, %v11656_v46 }
 0x30e   :  { %v3859_v54 = vpop.eup %3858  ;;  %v1613_v19 = vmul.f32 %v3857_v3, %v5691_v48  ;;  %11654 = vst [vmem:[#allocation156_spill] sm:$0xff] %v11653_v40  ;;  %11655 = vst [vmem:[#allocation157_spill] sm:$0xff] %v5884_v50  ;;  %v5893_v48 = vsel %vm1585_vm10, %v1607_v2, 0.0  ;;  %v5904_v45 = vsel %vm1586_vm7, %v1609_v15, 0.0  ;;  %vm5908_vm3 = vcmp.gt.f32.partialorder %v5889_v34, %v5819_v9  ;;  %v11690_v3 = vld [vmem:[#allocation57_spill] sm:$0xff] }
 0x30f   :  { %v3861_v14 = vpop.eup %3860  ;;  %v1615_v35 = vmul.f32 %v3859_v54, %v5695_v53  ;;  %11658 = vst [vmem:[#allocation158_spill] sm:$0xff] %v11657_v46  ;;  %v11659_v53 = vmov 0  ;;  %vm5914_vm11 = vcmp.gt.f32.partialorder %v5893_v48, %v5825_v11  ;;  %vm11665_vm10 = vcmp.gt.f32.partialorder %v5748_v39, 0.0  ;;  %v11856_v11 = vld [vmem:[#allocation44_spill] sm:$0xff]  ;;  %v11859_v46 = vld [vmem:[#allocation45_spill] sm:$0xff]  ;;  %s7872_s15 = ssub.f32 %s7793_s10, %s7791_s9 }
 0x310   :  { %v1617_v8 = vmul.f32 %v3861_v14, %v5722_v23  ;;  %v11660_v53 = vsel %vm5908_vm3, 4294967295, %v11659_v53  ;;  %v11663_v22 = vsel %vm5914_vm11, 4294967295, %v11662_v22  ;;  %v5920_v55 = vsel %vm11665_vm10, %v1611_v10, 0.0 }
 0x311   :  { %11661 = vst [vmem:[#allocation159_spill] sm:$0xff] %v11660_v53  ;;  %11664 = vst [vmem:[#allocation160_spill] sm:$0xff] %v11663_v22  ;;  %v5924_v23 = vsel %vm11666_vm13, %v1613_v19, 0.0  ;;  %vm5928_vm7 = vcmp.gt.f32.partialorder %v5904_v45, %v5831_v49  ;;  %v11672_v2 = vsel %vm5060_vm12, %v11670_v1, %v11671_v13  ;;  %vm11674_vm10 = vcmp.gt.f32.partialorder %v5757_v44, 0.0 }
 0x312   :  { %v11668_v6 = vsel %vm5928_vm7, 4294967295, %v11667_v6  ;;  %v5940_v39 = vsel %vm5880_vm4, %v5862_v52, %v11672_v2  ;;  %v5944_v37 = vsel %vm11674_vm10, %v1615_v35, 0.0  ;;  %vm5948_vm13 = vcmp.gt.f32.partialorder %v5920_v55, %v5839_v25  ;;  %v11847_v25 = vld [vmem:[#allocation99_spill] sm:$0xff] }
 0x313   :  { %11669 = vst [vmem:[#allocation161_spill] sm:$0xff] %v11668_v6  ;;  %11673 = vst [vmem:[#allocation32_spill] sm:$0xff] %v5940_v39  ;;  %v11676_v24 = vmov 0  ;;  %vm5954_vm5 = vcmp.gt.f32.partialorder %v5924_v23, %v5845_v5  ;;  %v11683_v12 = vsel %vm5077_vm1, %v11670_v1, %v11682_v58  ;;  %vm11685_vm10 = vcmp.gt.f32.partialorder %v5761_v21, 0.0  ;;  %v11693_v21 = vld [vmem:[#allocation59_spill] sm:$0xff]  ;;  %v11702_v58 = vld [vmem:[#allocation61_spill] sm:$0xff] }
 0x314   :  { %11675 = vst [vmem:[#allocation89_spill] sm:$0xff] %v5944_v37  ;;  %v11677_v24 = vsel %vm5948_vm13, 4294967295, %v11676_v24  ;;  %v11680_v51 = vsel %vm5954_vm5, 4294967295, %v11679_v51  ;;  %v5966_v44 = vsel %vm5897_vm2, %v5862_v52, %v11683_v12  ;;  %v5970_v27 = vsel %vm11685_vm10, %v1617_v8, 0.0  ;;  %v11699_v8 = vld [vmem:[#allocation60_spill] sm:$0xff]  ;;  %v11842_v39 = vld [vmem:[#allocation94_spill] sm:$0xff] }
 0x315   :  { %11678 = vst [vmem:[#allocation162_spill] sm:$0xff] %v11677_v24  ;;  %11681 = vst [vmem:[#allocation163_spill] sm:$0xff] %v11680_v51  ;;  %vm5974_vm4 = vcmp.gt.f32.partialorder %v5944_v37, %v5853_v28  ;;  %v11687_v15 = vmov 0  ;;  %v11691_v10 = vsel %vm5088_vm14, %v11670_v1, %v11690_v3  ;;  %v11694_v19 = vsel %vm5094_vm15, %v11670_v1, %v11693_v21  ;;  %v11841_v51 = vld [vmem:[#allocation93_spill] sm:$0xff]  ;;  %v11843_v5 = vld [vmem:[#allocation95_spill] sm:$0xff] }
 0x316   :  { %11684 = vst [vmem:[#allocation55_spill] sm:$0xff] %v5966_v44  ;;  %11686 = vst [vmem:[#allocation164_spill] sm:$0xff] %v5970_v27  ;;  %v11688_v15 = vsel %vm5974_vm4, 4294967295, %v11687_v15  ;;  %v5986_v54 = vsel %vm5908_vm3, %v5862_v52, %v11691_v10  ;;  %v5996_v14 = vsel %vm5914_vm11, %v5862_v52, %v11694_v19  ;;  %vm6000_vm10 = vcmp.gt.f32.partialorder %v5970_v27, %v5859_v60  ;;  %v11705_v10 = vld [vmem:[#allocation62_spill] sm:$0xff] }
 0x317   :  { %11689 = vst [vmem:[#allocation165_spill] sm:$0xff] %v11688_v15  ;;  %11692 = vst [vmem:[#allocation57_spill] sm:$0xff] %v5986_v54  ;;  %v11696_v35 = vmov 0  ;;  %v11700_v13 = vsel %vm11628_vm6, %v11670_v1, %v11699_v8  ;;  %v11703_v12 = vsel %vm11632_vm8, %v11670_v1, %v11702_v58  ;;  %v11706_v21 = vsel %vm11637_vm0, %v11670_v1, %v11705_v10  ;;  %v11708_v8 = vld [vmem:[#allocation63_spill] sm:$0xff]  ;;  %v11846_v60 = vld [vmem:[#allocation98_spill] sm:$0xff] }
 0x318   :  { %11695 = vst [vmem:[#allocation59_spill] sm:$0xff] %v5996_v14  ;;  %v11697_v35 = vsel %vm6000_vm10, 4294967295, %v11696_v35  ;;  %v6012_v2 = vsel %vm5928_vm7, %v5862_v52, %v11700_v13  ;;  %v6022_v3 = vsel %vm5948_vm13, %v5862_v52, %v11703_v12  ;;  %v6032_v19 = vsel %vm5954_vm5, %v5862_v52, %v11706_v21  ;;  %v11712_v12 = vld [vmem:[#allocation64_spill] sm:$0xff] }
 0x319   :  { %11698 = vst [vmem:[#allocation166_spill] sm:$0xff] %v11697_v35  ;;  %11701 = vst [vmem:[#allocation60_spill] sm:$0xff] %v6012_v2  ;;  %v11709_v13 = vsel %vm11642_vm9, %v11670_v1, %v11708_v8  ;;  %vm11711_vm13 = vnez %v11646_v56  ;;  %vm11718_vm9 = vnez %v11653_v40  ;;  %v1806_v56 = vmax.f32 %v5893_v48, %v5944_v37  ;;  %v11848_v15 = vld [vmem:[#allocation100_spill] sm:$0xff] }
 0x31a   :  { %11704 = vst [vmem:[#allocation61_spill] sm:$0xff] %v6022_v3  ;;  %11707 = vst [vmem:[#allocation62_spill] sm:$0xff] %v6032_v19  ;;  %v6042_v58 = vsel %vm5974_vm4, %v5862_v52, %v11709_v13  ;;  %v11713_v10 = vsel %vm11711_vm13, %v11670_v1, %v11712_v12  ;;  %v11715_v19 = vld [vmem:[#allocation33_spill] sm:$0xff]  ;;  %v11716_v3 = vld [vmem:[#allocation90_spill] sm:$0xff]  ;;  %v11853_v49 = vmov 0  ;;  %v11862_v22 = vmov 0 }
 0x31b   :  { %11710 = vst [vmem:[#allocation63_spill] sm:$0xff] %v6042_v58  ;;  %v6052_v21 = vsel %vm6000_vm10, %v5862_v52, %v11713_v10  ;;  %v11717_v8 = vsel %vm5060_vm12, %v11715_v19, %v11716_v3  ;;  %v11720_v58 = vld [vmem:[#allocation65_spill] sm:$0xff]  ;;  %v11723_v52 = vld [vmem:[#allocation66_spill] sm:$0xff] }
 0x31c   :  { %11714 = vst [vmem:[#allocation64_spill] sm:$0xff] %v6052_v21  ;;  %v6062_v13 = vsel %vm11718_vm9, %v5869_v30, %v11717_v8  ;;  %v11721_v12 = vsel %vm5077_vm1, %v11715_v19, %v11720_v58  ;;  %v11724_v3 = vsel %vm5088_vm14, %v11715_v19, %v11723_v52  ;;  %v11747_v21 = vld [vmem:[#allocation91_spill] sm:$0xff] }
 0x31d   :  { %11719 = vst [vmem:[#allocation33_spill] sm:$0xff] %v6062_v13  ;;  %v6072_v10 = vsel %vm5897_vm2, %v5869_v30, %v11721_v12  ;;  %v6082_v8 = vsel %vm5908_vm3, %v5869_v30, %v11724_v3  ;;  %v11726_v13 = vld [vmem:[#allocation67_spill] sm:$0xff] }
 0x31e   :  { %11722 = vst [vmem:[#allocation90_spill] sm:$0xff] %v6072_v10  ;;  %11725 = vst [vmem:[#allocation65_spill] sm:$0xff] %v6082_v8  ;;  %v11727_v58 = vsel %vm5094_vm15, %v11715_v19, %v11726_v13  ;;  %v11729_v10 = vld [vmem:[#allocation68_spill] sm:$0xff]  ;;  %v11732_v8 = vld [vmem:[#allocation69_spill] sm:$0xff]  ;;  %vm11734_vm15 = vnez %v11677_v24 }
 0x31f   :  { %v6092_v12 = vsel %vm5914_vm11, %v5869_v30, %v11727_v58  ;;  %v11730_v52 = vsel %vm11628_vm6, %v11715_v19, %v11729_v10  ;;  %v11733_v13 = vsel %vm11632_vm8, %v11715_v19, %v11732_v8  ;;  %v11845_v24 = vld [vmem:[#allocation97_spill] sm:$0xff] }
 0x320   :  { %11728 = vst [vmem:[#allocation66_spill] sm:$0xff] %v6092_v12  ;;  %v6102_v3 = vsel %vm5928_vm7, %v5869_v30, %v11730_v52  ;;  %v6112_v58 = vsel %vm11734_vm15, %v5869_v30, %v11733_v13  ;;  %v11736_v12 = vld [vmem:[#allocation70_spill] sm:$0xff]  ;;  %vm11739_vm7 = vnez %v11641_v20 }
 0x321   :  { %11731 = vst [vmem:[#allocation67_spill] sm:$0xff] %v6102_v3  ;;  %11735 = vst [vmem:[#allocation68_spill] sm:$0xff] %v6112_v58  ;;  %v11737_v10 = vsel %vm11637_vm0, %v11715_v19, %v11736_v12  ;;  %v11740_v3 = vld [vmem:[#allocation71_spill] sm:$0xff]  ;;  %v11743_v58 = vld [vmem:[#allocation72_spill] sm:$0xff] }
 0x322   :  { %v6122_v52 = vsel %vm5954_vm5, %v5869_v30, %v11737_v10  ;;  %v11741_v8 = vsel %vm11739_vm7, %v11715_v19, %v11740_v3  ;;  %v11744_v12 = vsel %vm11711_vm13, %v11715_v19, %v11743_v58 }
 0x323   :  { %11738 = vst [vmem:[#allocation69_spill] sm:$0xff] %v6122_v52  ;;  %v6132_v13 = vsel %vm5974_vm4, %v5869_v30, %v11741_v8  ;;  %v6142_v10 = vsel %vm6000_vm10, %v5869_v30, %v11744_v12  ;;  %v11746_v52 = vld [vmem:[#allocation34_spill] sm:$0xff] }
 0x324   :  { %11742 = vst [vmem:[#allocation70_spill] sm:$0xff] %v6132_v13  ;;  %11745 = vst [vmem:[#allocation71_spill] sm:$0xff] %v6142_v10  ;;  %v11748_v3 = vsel %vm5060_vm12, %v11746_v52, %v11747_v21  ;;  %v11750_v13 = vld [vmem:[#allocation73_spill] sm:$0xff]  ;;  %v11753_v30 = vld [vmem:[#allocation74_spill] sm:$0xff] }
 0x325   :  { %v6152_v8 = vsel %vm11718_vm9, %v5871_v31, %v11748_v3  ;;  %v11751_v58 = vsel %vm5077_vm1, %v11746_v52, %v11750_v13  ;;  %v11754_v21 = vsel %vm5088_vm14, %v11746_v52, %v11753_v30  ;;  %vm11756_vm9 = vnez %v11475_v32  ;;  %v11777_v10 = vld [vmem:[#allocation92_spill] sm:$0xff]  ;;  %v11794_v32 = vld [vmem:[#allocation85_spill] sm:$0xff] }
 0x326   :  { %11749 = vst [vmem:[#allocation72_spill] sm:$0xff] %v6152_v8  ;;  %v6162_v12 = vsel %vm5897_vm2, %v5871_v31, %v11751_v58  ;;  %v6172_v3 = vsel %vm5908_vm3, %v5871_v31, %v11754_v21  ;;  %v11757_v8 = vld [vmem:[#allocation75_spill] sm:$0xff]  ;;  %vm11762_vm14 = vnez %v11668_v6  ;;  %v11852_v6 = vld [vmem:[#allocation101_spill] sm:$0xff] }
 0x327   :  { %11752 = vst [vmem:[#allocation34_spill] sm:$0xff] %v6162_v12  ;;  %11755 = vst [vmem:[#allocation91_spill] sm:$0xff] %v6172_v3  ;;  %v11758_v13 = vsel %vm11756_vm9, %v11746_v52, %v11757_v8  ;;  %v11760_v12 = vld [vmem:[#allocation76_spill] sm:$0xff]  ;;  %v11764_v3 = vld [vmem:[#allocation77_spill] sm:$0xff] }
 0x328   :  { %v6182_v58 = vsel %vm5914_vm11, %v5871_v31, %v11758_v13  ;;  %v11761_v30 = vsel %vm11628_vm6, %v11746_v52, %v11760_v12  ;;  %v11765_v8 = vsel %vm11632_vm8, %v11746_v52, %v11764_v3 }
 0x329   :  { %11759 = vst [vmem:[#allocation73_spill] sm:$0xff] %v6182_v58  ;;  %v6192_v21 = vsel %vm11762_vm14, %v5871_v31, %v11761_v30  ;;  %v6202_v13 = vsel %vm11734_vm15, %v5871_v31, %v11765_v8  ;;  %v11767_v58 = vld [vmem:[#allocation78_spill] sm:$0xff] }
 0x32a   :  { %11763 = vst [vmem:[#allocation74_spill] sm:$0xff] %v6192_v21  ;;  %11766 = vst [vmem:[#allocation75_spill] sm:$0xff] %v6202_v13  ;;  %v11768_v12 = vsel %vm11637_vm0, %v11746_v52, %v11767_v58  ;;  %v11770_v21 = vld [vmem:[#allocation79_spill] sm:$0xff]  ;;  %v11773_v13 = vld [vmem:[#allocation80_spill] sm:$0xff] }
 0x32b   :  { %v6212_v30 = vsel %vm5954_vm5, %v5871_v31, %v11768_v12  ;;  %v11771_v3 = vsel %vm11739_vm7, %v11746_v52, %v11770_v21  ;;  %v11774_v58 = vsel %vm11711_vm13, %v11746_v52, %v11773_v13  ;;  %vm11779_vm7 = vnez %v11653_v40 }
 0x32c   :  { %11769 = vst [vmem:[#allocation76_spill] sm:$0xff] %v6212_v30  ;;  %v6222_v8 = vsel %vm5974_vm4, %v5871_v31, %v11771_v3  ;;  %v6232_v12 = vsel %vm6000_vm10, %v5871_v31, %v11774_v58  ;;  %v11776_v30 = vld [vmem:[#allocation36_spill] sm:$0xff]  ;;  %vm11784_vm10 = vnez %v11472_v62 }
 0x32d   :  { %11772 = vst [vmem:[#allocation77_spill] sm:$0xff] %v6222_v8  ;;  %11775 = vst [vmem:[#allocation78_spill] sm:$0xff] %v6232_v12  ;;  %v11778_v21 = vsel %vm5060_vm12, %v11776_v30, %v11777_v10  ;;  %v11781_v8 = vld [vmem:[#allocation81_spill] sm:$0xff]  ;;  %v11786_v10 = vsel %vm11784_vm10, %v11776_v30, %v11785_v17  ;;  %v11791_v62 = vld [vmem:[#allocation84_spill] sm:$0xff] }
 0x32e   :  { %v6242_v3 = vsel %vm11779_vm7, %v5884_v50, %v11778_v21  ;;  %v11782_v13 = vsel %vm5077_vm1, %v11776_v30, %v11781_v8  ;;  %v6262_v21 = vsel %vm5908_vm3, %v5884_v50, %v11786_v10  ;;  %v11789_v8 = vsel %vm11756_vm9, %v11776_v30, %v11788_v43 }
 0x32f   :  { %11780 = vst [vmem:[#allocation79_spill] sm:$0xff] %v6242_v3  ;;  %v6252_v58 = vsel %vm5897_vm2, %v5884_v50, %v11782_v13  ;;  %11787 = vst [vmem:[#allocation36_spill] sm:$0xff] %v6262_v21  ;;  %v6272_v13 = vsel %vm5914_vm11, %v5884_v50, %v11789_v8  ;;  %v11792_v17 = vsel %vm11628_vm6, %v11776_v30, %v11791_v62  ;;  %vm11800_vm6 = vnez %v11641_v20 }
 0x330   :  { %11783 = vst [vmem:[#allocation80_spill] sm:$0xff] %v6252_v58  ;;  %11790 = vst [vmem:[#allocation92_spill] sm:$0xff] %v6272_v13  ;;  %v6282_v10 = vsel %vm11762_vm14, %v5884_v50, %v11792_v17  ;;  %v11795_v43 = vsel %vm11632_vm8, %v11776_v30, %v11794_v32  ;;  %v11798_v62 = vsel %vm11637_vm0, %v11776_v30, %v11797_v59  ;;  %vm11806_vm0 = vnez %v11697_v35  ;;  %v11844_v35 = vld [vmem:[#allocation96_spill] sm:$0xff] }
 0x331   :  { %11793 = vst [vmem:[#allocation81_spill] sm:$0xff] %v6282_v10  ;;  %v6292_v8 = vsel %vm11734_vm15, %v5884_v50, %v11795_v43  ;;  %v6302_v17 = vsel %vm5954_vm5, %v5884_v50, %v11798_v62  ;;  %v11802_v32 = vsel %vm11800_vm6, %v11776_v30, %v11801_v0  ;;  %v11805_v59 = vsel %vm11711_vm13, %v11776_v30, %v11804_v57  ;;  %v11809_v10 = vld [vmem:[#allocation133_spill] sm:$0xff] }
 0x332   :  { %11796 = vst [vmem:[#allocation82_spill] sm:$0xff] %v6292_v8  ;;  %11799 = vst [vmem:[#allocation83_spill] sm:$0xff] %v6302_v17  ;;  %v6312_v43 = vsel %vm5974_vm4, %v5884_v50, %v11802_v32  ;;  %v6322_v62 = vsel %vm11806_vm0, %v5884_v50, %v11805_v59  ;;  %v1803_v20 = vmax.f32 %v5867_v63, %v5904_v45  ;;  %v11808_v59 = vld [vmem:[#allocation125_spill] sm:$0xff] }
 0x333   :  { %11803 = vst [vmem:[#allocation84_spill] sm:$0xff] %v6312_v43  ;;  %11807 = vst [vmem:[#allocation85_spill] sm:$0xff] %v6322_v62  ;;  %v1804_v0 = vmax.f32 %v5876_v41, %v5920_v55  ;;  %v1805_v32 = vmax.f32 %v5889_v34, %v5924_v23  ;;  %v1255_v50 = vand.u32 65535, %v11808_v59  ;;  %v11821_v59 = vld [vmem:[#allocation108_spill] sm:$0xff] }
 0x334   :  { %v1807_v31 = vmax.f32 %v1803_v20, %v5970_v27  ;;  %vm11822_vm9 = vnez %v11821_v59 }
 0x335   :  { %v1809_v57 = vmax.f32 %v1805_v32, %v1806_v56  ;;  %v1257_v8 = vcvt.s32.f32 %v1255_v50 }
 0x336   :  { %v1808_v43 = vmax.f32 %v1807_v31, %v1804_v0 }
 0x338   :  { %v1810_v17 = vmax.f32 %v1808_v43, %v1809_v57 }
 0x33a   :  { %1811 = vmax.xlane.f32.xlu0 %v1810_v17 }
 0x374   :  { %v1260_v62 = vpop.xlane.xlu0 %1259 }
 0x375   :  { %vm1261_vm13 = vcmp.eq.f32.partialorder %v11809_v10, %v1260_v62  ;;  %v1266_v3 = vcvt.f32.s32 %v1260_v62  ;;  %v11818_v62 = vld [vmem:[#allocation107_spill] sm:$0xff] }
 0x376   :  { %v1262_v13 = vsel %vm1261_vm13, %v1257_v8, inf }
 0x377   :  { %1263 = vmin.xlane.f32.xlu1 %v1262_v13  ;;  %v1267_v14 = vshll.u32 %v1266_v3, 16 }
 0x3c7   :  { %v1812_v21 = vpop.xlane.xlu0 %1811 }
 0x3c8   :  { %v1813_v58 = vrot.slane %v1812_v21, 4 }
 0x3ca   :  { %v1814_v12 = vmax.f32 %v1812_v21, %v1813_v58  ;;  %v11815_v58 = vld [vmem:[#allocation103_spill] sm:$0xff] }
 0x3cc   :  { %v1815_v56 = vrot.slane %v1814_v12, 2 }
 0x3ce   :  { %v1816_v43 = vmax.f32 %v1814_v12, %v1815_v56  ;;  %v11812_v12 = vld [vmem:[#allocation102_spill] sm:$0xff]  ;;  %v11824_v56 = vld [vmem:[#allocation109_spill] sm:$0xff] }
 0x3cf   :  { %vm11825_vm10 = vnez %v11824_v56 }
 0x3d0   :  { %v1817_v10 = vrot.slane %v1816_v43, 1 }
 0x3d2   :  { %v1818_v32 = vmax.f32 %v1816_v43, %v1817_v10  ;;  %v11833_v10 = vld [vmem:[#allocation112_spill] sm:$0xff] }
 0x3d3   :  { %vm11834_vm0 = vnez %v11833_v10 }
 0x404   :  { %v1264_v2 = vpop.xlane.xlu1 %1263 }
 0x405   :  { %v1265_v54 = vcvt.f32.s32 %v1264_v2  ;;  %v4190_v2 = vmov 4294967295  }
 0x407   :  { %v1268_v20 = vadd.s32 %v1267_v14, %v1265_v54  ;;  %v6336_v54 = vstv %s268_s16  ;;  %v6338_v14 = vstv %s3760_s17  ;;  %s7880_s16 = ssub.f32 %s7827_s14, %s7825_s13 }
 0x408   :  { %11810 = vst [vmem:[#allocation86_spill] sm:$0xff] %v6336_v54  ;;  %11811 = vst [vmem:[#allocation87_spill] sm:$0xff] %v6338_v14 }
 0x409   :  { %v1269_v31 = vrot.slane %v1268_v20, 4  ;;  %s2671_s17 = smul.f32 %s7880_s16, %s7872_s15 }
 0x40a   :  { %s2677_s2 = smul.f32 0.0033333334, %s7880_s16 }
 0x40b   :  { %vm1270_vm6 = vcmp.lt.s32.totalorder %v1268_v20, %v1269_v31 }
 0x40c   :  { %v1271_v17 = vsel %vm1270_vm6, %v1268_v20, %v1269_v31  ;;  %vm11813_vm6 = vnez %v11812_v12  ;;  %v6354_v20 = vsel %vm11822_vm9, 0, %v4190_v2  ;;  %v6358_v31 = vsel %vm11825_vm10, 0, %v4190_v2 }
 0x40d   :  { %v1272_v0 = vrot.slane %v1271_v17, 2  ;;  %v6342_v3 = vsel %vm11813_vm6, 0, %v4190_v2  ;;  %11823 = vst [vmem:[#allocation102_spill] sm:$0xff] %v6354_v20  ;;  %11826 = vst [vmem:[#allocation103_spill] sm:$0xff] %v6358_v31  ;;  %v11857_v53 = vsel %vm11813_vm6, %v11856_v11, 0.0  ;;  %v11860_v4 = vsel %vm11813_vm6, %v11859_v46, 0.0 }
 0x40e   :  { %11814 = vst [vmem:[#allocation88_spill] sm:$0xff] %v6342_v3 }
 0x40f   :  { %vm1273_vm8 = vcmp.lt.s32.totalorder %v1271_v17, %v1272_v0 }
 0x410   :  { %v1274_v50 = vsel %vm1273_vm8, %v1271_v17, %v1272_v0  ;;  %vm11816_vm8 = vnez %v11815_v58  ;;  %v11827_v17 = vld [vmem:[#allocation110_spill] sm:$0xff]  ;;  %v11830_v0 = vld [vmem:[#allocation111_spill] sm:$0xff]  ;;  %v11969_v58 = vsel %vm11822_vm9, %v6336_v54, 0 }
 0x411   :  { %v1275_v8 = vrot.slane %v1274_v50, 1  ;;  %v6346_v21 = vsel %vm11816_vm8, 0, %v4190_v2  ;;  %vm11828_vm1 = vnez %v11827_v17  ;;  %vm11831_vm12 = vnez %v11830_v0 }
 0x412   :  { %11817 = vst [vmem:[#allocation125_spill] sm:$0xff] %v6346_v21  ;;  %v6362_v43 = vsel %vm11828_vm1, 0, %v4190_v2  ;;  %v11973_v59 = vsel %vm11828_vm1, %v6336_v54, 0 }
 0x413   :  { %vm1276_vm13 = vcmp.lt.s32.totalorder %v1274_v50, %v1275_v8  ;;  %11829 = vst [vmem:[#allocation107_spill] sm:$0xff] %v6362_v43 }
 0x414   :  { %v1277_v13 = vsel %vm1276_vm13, %v1274_v50, %v1275_v8  ;;  %vm11819_vm13 = vnez %v11818_v62  ;;  %v6366_v50 = vsel %vm11831_vm12, 0, %v4190_v2  ;;  %v6370_v8 = vsel %vm11834_vm0, 0, %v4190_v2 }
 0x415   :  { %3782 = vpush %v1277_v13  ;;  %v6350_v57 = vsel %vm11819_vm13, 0, %v4190_v2  ;;  %11832 = vst [vmem:[#allocation108_spill] sm:$0xff] %v6366_v50  ;;  %v1291_v13 = vstv %s1290_s18  ;;  %s2672_s18 = sadd.f32 %s7793_s10, %s7791_s9 }
 0x416   :  { %3784 = vpush %v1818_v32  ;;  %11820 = vst [vmem:[#allocation133_spill] sm:$0xff] %v6350_v57  ;;  %v11836_v32 = vld [vmem:[#allocation113_spill] sm:$0xff]  ;;  %vm6403_vm5 = vcmp.eq.s32.totalorder %v1291_v13, 1  ;;  %v11849_v13 = vmov 0 }
 0x417   :  { %11835 = vst [vmem:[#allocation109_spill] sm:$0xff] %v6370_v8  ;;  %vm11837_vm4 = vnez %v11836_v32 }
 0x418   :  { %v6374_v44 = vsel %vm11837_vm4, 0, %v4190_v2 }
 0x419   :  { %11838 = vst [vmem:[#allocation110_spill] sm:$0xff] %v6374_v44 }
 0x446   :  { %s3783_s19 = spop %3782 }
 0x447   :  { %v1279_v2 = vstv %s3783_s19  ;;  %s6815_s20 = spop %3784  ;;  %s2674_s19 = sadd.f32 %s7827_s14, %s7825_s13 }
 0x448   :  { %vm1280_vm15 = vcmp.eq.s32.totalorder %v11841_v51, %v1279_v2  ;;  %vm1281_vm14 = vcmp.eq.s32.totalorder %v11842_v39, %v1279_v2  ;;  %vm1282_vm11 = vcmp.eq.s32.totalorder %v11843_v5, %v1279_v2  ;;  %vm1283_vm3 = vcmp.eq.s32.totalorder %v11844_v35, %v1279_v2  ;;  %p1889_p0 = scmp.gt.f32.partialorder %s6815_s20, 0.0 }
 0x449   :  { %vm1284_vm2 = vcmp.eq.s32.totalorder %v11845_v24, %v1279_v2  ;;  %vm1285_vm7 = vcmp.eq.s32.totalorder %v11846_v60, %v1279_v2  ;;  %vm1286_vm0 = vcmp.eq.s32.totalorder %v11847_v25, %v1279_v2  ;;  %vm1287_vm4 = vcmp.eq.s32.totalorder %v11848_v15, %v1279_v2  ;;  %vm6417_vm12 = vmand %vm1280_vm15, %vm6403_vm5 }
 0x44a   :  { %v11850_v13 = vsel %vm6417_vm12, 4294967295, %v11849_v13  ;;  %vm6424_vm10 = vmand %vm1281_vm14, %vm6403_vm5  ;;  %v6438_v9 = vsel %vm6417_vm12, %v11670_v1, %v11857_v53  ;;  %v6447_v40 = vsel %vm6417_vm12, %v11715_v19, %v11860_v4  ;;  %v11867_v4 = vsel %vm11816_vm8, %v11859_v46, 0.0  ;;  %v11869_v53 = vld [vmem:[#allocation46_spill] sm:$0xff]  ;;  %s1890_s6 = scalar_select %p1889_p0, 1, 0 }
 0x44b   :  { %11851 = vst [vmem:[#allocation111_spill] sm:$0xff] %v11850_v13  ;;  %v11854_v49 = vsel %vm6424_vm10, 4294967295, %v11853_v49  ;;  %11858 = vst [vmem:[#allocation113_spill] sm:$0xff] %v6438_v9  ;;  %v11865_v9 = vsel %vm11816_vm8, %v11856_v11, 0.0  ;;  %v11870_v21 = vsel %vm11813_vm6, %v11869_v53, 1.0  ;;  %v12014_v13 = vld [vmem:[#allocation145_spill] sm:$0xff] }
 0x44c   :  { %11855 = vst [vmem:[#allocation112_spill] sm:$0xff] %v11854_v49  ;;  %11861 = vst [vmem:[#allocation44_spill] sm:$0xff] %v6447_v40  ;;  %v6465_v3 = vsel %vm6424_vm10, %v11670_v1, %v11865_v9  ;;  %v6474_v40 = vsel %vm6424_vm10, %v11715_v19, %v11867_v4  ;;  %v6483_v7 = vsel %vm6417_vm12, %v11746_v52, %v11870_v21  ;;  %v11872_v9 = vmov 0 }
 0x44d   :  { %vm6451_vm14 = vmand %vm1282_vm11, %vm6403_vm5  ;;  %11866 = vst [vmem:[#allocation167_spill] sm:$0xff] %v6465_v3  ;;  %v11879_v4 = vsel %vm11816_vm8, %v11869_v53, 1.0  ;;  %vm11893_vm11 = vnez %v11824_v56 }
 0x44e   :  { %v11863_v22 = vsel %vm6451_vm14, 4294967295, %v11862_v22  ;;  %11868 = vst [vmem:[#allocation168_spill] sm:$0xff] %v6474_v40  ;;  %11871 = vst [vmem:[#allocation46_spill] sm:$0xff] %v6483_v7  ;;  %v11875_v40 = vsel %vm11819_vm13, %v11856_v11, 0.0  ;;  %v11877_v7 = vsel %vm11819_vm13, %v11859_v46, 0.0  ;;  %v6521_v57 = vsel %vm6424_vm10, %v11746_v52, %v11879_v4 }
 0x44f   :  { %11864 = vst [vmem:[#allocation45_spill] sm:$0xff] %v11863_v22  ;;  %vm6489_vm15 = vmand %vm1283_vm3, %vm6403_vm5  ;;  %v6503_v21 = vsel %vm6451_vm14, %v11670_v1, %v11875_v40  ;;  %v6512_v3 = vsel %vm6451_vm14, %v11715_v19, %v11877_v7  ;;  %v11881_v40 = vmov 0  ;;  %v11888_v7 = vsel %vm11819_vm13, %v11869_v53, 1.0  ;;  %v12013_v22 = vld [vmem:[#allocation144_spill] sm:$0xff] }
 0x450   :  { %v11873_v9 = vsel %vm6489_vm15, 4294967295, %v11872_v9  ;;  %11876 = vst [vmem:[#allocation170_spill] sm:$0xff] %v6503_v21  ;;  %11878 = vst [vmem:[#allocation171_spill] sm:$0xff] %v6512_v3  ;;  %v11884_v3 = vsel %vm11822_vm9, %v11856_v11, 0.0  ;;  %v6559_v20 = vsel %vm6451_vm14, %v11746_v52, %v11888_v7 }
 0x451   :  { %11874 = vst [vmem:[#allocation169_spill] sm:$0xff] %v11873_v9  ;;  %11880 = vst [vmem:[#allocation172_spill] sm:$0xff] %v6521_v57  ;;  %v6541_v4 = vsel %vm6489_vm15, %v11670_v1, %v11884_v3  ;;  %v11886_v57 = vsel %vm11822_vm9, %v11859_v46, 0.0  ;;  %v11890_v3 = vmov 0 }
 0x452   :  { %vm6527_vm3 = vmand %vm1284_vm2, %vm6403_vm5  ;;  %11885 = vst [vmem:[#allocation174_spill] sm:$0xff] %v6541_v4  ;;  %v6550_v21 = vsel %vm6489_vm15, %v11715_v19, %v11886_v57  ;;  %v11898_v57 = vsel %vm11822_vm9, %v11869_v53, 1.0 }
 0x453   :  { %v11882_v40 = vsel %vm6527_vm3, 4294967295, %v11881_v40  ;;  %11887 = vst [vmem:[#allocation175_spill] sm:$0xff] %v6550_v21  ;;  %11889 = vst [vmem:[#allocation176_spill] sm:$0xff] %v6559_v20  ;;  %v11894_v21 = vsel %vm11893_vm11, %v11856_v11, 0.0  ;;  %v11896_v20 = vsel %vm11893_vm11, %v11859_v46, 0.0  ;;  %v6597_v31 = vsel %vm6489_vm15, %v11746_v52, %v11898_v57 }
 0x454   :  { %11883 = vst [vmem:[#allocation173_spill] sm:$0xff] %v11882_v40  ;;  %vm6565_vm2 = vmand %vm1285_vm7, %vm6403_vm5  ;;  %v6579_v7 = vsel %vm6527_vm3, %v11670_v1, %v11894_v21  ;;  %v6588_v4 = vsel %vm6527_vm3, %v11715_v19, %v11896_v20  ;;  %v11900_v21 = vmov 0  ;;  %v11907_v20 = vsel %vm11893_vm11, %v11869_v53, 1.0 }
 0x455   :  { %v11891_v3 = vsel %vm6565_vm2, 4294967295, %v11890_v3  ;;  %11895 = vst [vmem:[#allocation178_spill] sm:$0xff] %v6579_v7  ;;  %11897 = vst [vmem:[#allocation179_spill] sm:$0xff] %v6588_v4  ;;  %v11903_v4 = vsel %vm11828_vm1, %v11856_v11, 0.0  ;;  %v6635_v43 = vsel %vm6527_vm3, %v11746_v52, %v11907_v20  ;;  %vm11912_vm15 = vnez %v11830_v0 }
 0x456   :  { %11892 = vst [vmem:[#allocation177_spill] sm:$0xff] %v11891_v3  ;;  %11899 = vst [vmem:[#allocation180_spill] sm:$0xff] %v6597_v31  ;;  %v6617_v57 = vsel %vm6565_vm2, %v11670_v1, %v11903_v4  ;;  %v11905_v31 = vsel %vm11828_vm1, %v11859_v46, 0.0  ;;  %v11909_v4 = vmov 0  ;;  %vm11923_vm11 = vnez %v11833_v10 }
 0x457   :  { %vm6603_vm7 = vmand %vm1286_vm0, %vm6403_vm5  ;;  %11904 = vst [vmem:[#allocation182_spill] sm:$0xff] %v6617_v57  ;;  %v6626_v7 = vsel %vm6565_vm2, %v11715_v19, %v11905_v31  ;;  %v11917_v31 = vsel %vm11828_vm1, %v11869_v53, 1.0  ;;  %v11926_v28 = vsel %vm11923_vm11, %v11859_v46, 0.0  ;;  %v11977_v17 = vsel %vm11923_vm11, %v6336_v54, 0 }
 0x458   :  { %v11901_v21 = vsel %vm6603_vm7, 4294967295, %v11900_v21  ;;  %11906 = vst [vmem:[#allocation183_spill] sm:$0xff] %v6626_v7  ;;  %11908 = vst [vmem:[#allocation184_spill] sm:$0xff] %v6635_v43  ;;  %v11913_v7 = vsel %vm11912_vm15, %v11856_v11, 0.0  ;;  %v11915_v43 = vsel %vm11912_vm15, %v11859_v46, 0.0  ;;  %v6673_v50 = vsel %vm6565_vm2, %v11746_v52, %v11917_v31 }
 0x459   :  { %11902 = vst [vmem:[#allocation181_spill] sm:$0xff] %v11901_v21  ;;  %vm6641_vm0 = vmand %vm1287_vm4, %vm6403_vm5  ;;  %v6655_v20 = vsel %vm6603_vm7, %v11670_v1, %v11913_v7  ;;  %v6664_v57 = vsel %vm6603_vm7, %v11715_v19, %v11915_v43  ;;  %vm11919_vm4 = vcmp.eq.s32.totalorder %v11852_v6, %v1279_v2  ;;  %v11920_v7 = vmov 0  ;;  %v11999_v21 = vld [vmem:[#allocation130_spill] sm:$0xff] }
 0x45a   :  { %v11910_v4 = vsel %vm6641_vm0, 4294967295, %v11909_v4  ;;  %11914 = vst [vmem:[#allocation186_spill] sm:$0xff] %v6655_v20  ;;  %11916 = vst [vmem:[#allocation187_spill] sm:$0xff] %v6664_v57  ;;  %v11924_v57 = vsel %vm11923_vm11, %v11856_v11, 0.0  ;;  %v6702_v2 = vsel %vm6641_vm0, %v11715_v19, %v11926_v28  ;;  %v11928_v43 = vsel %vm11912_vm15, %v11869_v53, 1.0 }
 0x45b   :  { %11911 = vst [vmem:[#allocation185_spill] sm:$0xff] %v11910_v4  ;;  %11918 = vst [vmem:[#allocation188_spill] sm:$0xff] %v6673_v50  ;;  %v6693_v31 = vsel %vm6641_vm0, %v11670_v1, %v11924_v57  ;;  %v6711_v8 = vsel %vm6603_vm7, %v11746_v52, %v11928_v43  ;;  %v11935_v57 = vsel %vm11923_vm11, %v11869_v53, 1.0  ;;  %v11987_v4 = vld [vmem:[#allocation118_spill] sm:$0xff]  ;;  %v11998_v50 = vld [vmem:[#allocation129_spill] sm:$0xff] }
 0x45c   :  { %vm6679_vm3 = vmand %vm11919_vm4, %vm6403_vm5  ;;  %11925 = vst [vmem:[#allocation190_spill] sm:$0xff] %v6693_v31  ;;  %vm11930_vm5 = vnez %v11836_v32  ;;  %vm11947_vm4 = vnez %v11873_v9 }
 0x45d   :  { %v11921_v7 = vsel %vm6679_vm3, 4294967295, %v11920_v7  ;;  %11927 = vst [vmem:[#allocation191_spill] sm:$0xff] %v6702_v2  ;;  %11929 = vst [vmem:[#allocation192_spill] sm:$0xff] %v6711_v8  ;;  %v11931_v31 = vsel %vm11930_vm5, %v11856_v11, 0.0  ;;  %v11933_v2 = vsel %vm11930_vm5, %v11859_v46, 0.0  ;;  %v6741_v11 = vsel %vm6641_vm0, %v11746_v52, %v11935_v57 }
 0x45e   :  { %11922 = vst [vmem:[#allocation189_spill] sm:$0xff] %v11921_v7  ;;  %v6723_v28 = vsel %vm6679_vm3, %v11670_v1, %v11931_v31  ;;  %v6732_v43 = vsel %vm6679_vm3, %v11715_v19, %v11933_v2  ;;  %11936 = vst [vmem:[#allocation195_spill] sm:$0xff] %v6741_v11  ;;  %v11937_v1 = vsel %vm11930_vm5, %v11869_v53, 1.0  ;;  %v11939_v19 = vld [vmem:[#allocation49_spill] sm:$0xff]  ;;  %v11984_v11 = vld [vmem:[#allocation115_spill] sm:$0xff] }
 0x45f   :  { %11932 = vst [vmem:[#allocation193_spill] sm:$0xff] %v6723_v28  ;;  %11934 = vst [vmem:[#allocation194_spill] sm:$0xff] %v6732_v43  ;;  %v6750_v46 = vsel %vm6679_vm3, %v11746_v52, %v11937_v1  ;;  %v11940_v31 = vsel %vm11813_vm6, %v11939_v19, 1.0  ;;  %v11942_v57 = vsel %vm11816_vm8, %v11939_v19, 1.0  ;;  %v11944_v52 = vsel %vm11819_vm13, %v11939_v19, 1.0  ;;  %v11985_v28 = vld [vmem:[#allocation116_spill] sm:$0xff] }
 0x460   :  { %11938 = vst [vmem:[#allocation196_spill] sm:$0xff] %v6750_v46  ;;  %v6759_v2 = vsel %vm6417_vm12, %v11776_v30, %v11940_v31  ;;  %v6768_v53 = vsel %vm6424_vm10, %v11776_v30, %v11942_v57  ;;  %v6777_v1 = vsel %vm6451_vm14, %v11776_v30, %v11944_v52  ;;  %v11946_v31 = vsel %vm11822_vm9, %v11939_v19, 1.0 }
 0x461   :  { %11941 = vst [vmem:[#allocation49_spill] sm:$0xff] %v6759_v2  ;;  %11943 = vst [vmem:[#allocation197_spill] sm:$0xff] %v6768_v53  ;;  %v6786_v2 = vsel %vm11947_vm4, %v11776_v30, %v11946_v31  ;;  %vm11949_vm10 = vnez %v11824_v56  ;;  %vm11951_vm13 = vnez %v11882_v40  ;;  %v11953_v52 = vsel %vm11828_vm1, %v11939_v19, 1.0  ;;  %v12000_v40 = vld [vmem:[#allocation131_spill] sm:$0xff] }
 0x462   :  { %11945 = vst [vmem:[#allocation198_spill] sm:$0xff] %v6777_v1  ;;  %11948 = vst [vmem:[#allocation199_spill] sm:$0xff] %v6786_v2  ;;  %v11950_v57 = vsel %vm11949_vm10, %v11939_v19, 1.0  ;;  %v6804_v1 = vsel %vm6565_vm2, %v11776_v30, %v11953_v52  ;;  %v11955_v31 = vsel %vm11912_vm15, %v11939_v19, 1.0  ;;  %v11975_v56 = vsel %vm11912_vm15, %v6336_v54, 0 }
 0x463   :  { %v6795_v53 = vsel %vm11951_vm13, %v11776_v30, %v11950_v57  ;;  %11954 = vst [vmem:[#allocation201_spill] sm:$0xff] %v6804_v1  ;;  %v6813_v2 = vsel %vm6603_vm7, %v11776_v30, %v11955_v31  ;;  %v11957_v57 = vsel %vm11923_vm11, %v11939_v19, 1.0  ;;  %v11959_v1 = vsel %vm11930_vm5, %v11939_v19, 1.0 }
 0x464   :  { %11952 = vst [vmem:[#allocation200_spill] sm:$0xff] %v6795_v53  ;;  %11956 = vst [vmem:[#allocation202_spill] sm:$0xff] %v6813_v2  ;;  %v6824_v52 = vsel %vm6641_vm0, %v11776_v30, %v11957_v57  ;;  %v6833_v31 = vsel %vm6679_vm3, %v11776_v30, %v11959_v1  ;;  %v11961_v2 = vsel %vm11813_vm6, %v6336_v54, 0  ;;  %v11963_v57 = vsel %vm11816_vm8, %v6336_v54, 0 }
 0x465   :  { %11958 = vst [vmem:[#allocation203_spill] sm:$0xff] %v6824_v52  ;;  %11960 = vst [vmem:[#allocation204_spill] sm:$0xff] %v6833_v31  ;;  %v6842_v53 = vsel %vm6417_vm12, %v6338_v14, %v11961_v2  ;;  %vm11964_vm5 = vnez %v11854_v49  ;;  %vm11966_vm3 = vnez %v11818_v62  ;;  %v6869_v2 = vsel %vm11947_vm4, %v6338_v14, %v11969_v58  ;;  %v11983_v52 = vld [vmem:[#allocation114_spill] sm:$0xff] }
 0x466   :  { %11962 = vst [vmem:[#allocation205_spill] sm:$0xff] %v6842_v53  ;;  %v6851_v19 = vsel %vm11964_vm5, %v6338_v14, %v11963_v57  ;;  %v11967_v30 = vsel %vm11966_vm3, %v6336_v54, 0  ;;  %11970 = vst [vmem:[#allocation208_spill] sm:$0xff] %v6869_v2  ;;  %v11971_v62 = vsel %vm11949_vm10, %v6336_v54, 0  ;;  %v6887_v57 = vsel %vm6565_vm2, %v6338_v14, %v11973_v59 }
 0x467   :  { %11965 = vst [vmem:[#allocation206_spill] sm:$0xff] %v6851_v19  ;;  %v6860_v12 = vsel %vm6451_vm14, %v6338_v14, %v11967_v30  ;;  %v6878_v1 = vsel %vm11951_vm13, %v6338_v14, %v11971_v62  ;;  %11974 = vst [vmem:[#allocation210_spill] sm:$0xff] %v6887_v57  ;;  %v6896_v30 = vsel %vm6603_vm7, %v6338_v14, %v11975_v56  ;;  %vm11979_vm1 = vnez %v11836_v32 }
 0x468   :  { %11968 = vst [vmem:[#allocation207_spill] sm:$0xff] %v6860_v12  ;;  %11972 = vst [vmem:[#allocation209_spill] sm:$0xff] %v6878_v1  ;;  %v6905_v58 = vsel %vm6641_vm0, %v6338_v14, %v11977_v17  ;;  %v11980_v0 = vsel %vm11979_vm1, %v6336_v54, 0  ;;  %vm11981_vm9 = vnez %v11921_v7  ;;  %v1820_v59 = vstv %s6815_s20  ;;  %v11986_v7 = vld [vmem:[#allocation117_spill] sm:$0xff]  ;;  %s7972_s20 = sld [smem:[#allocation13 + $0x3]] }
 0x469   :  { %11976 = vst [vmem:[#allocation211_spill] sm:$0xff] %v6896_v30  ;;  %11978 = vst [vmem:[#allocation212_spill] sm:$0xff] %v6905_v58  ;;  %v6914_v62 = vsel %vm11981_vm9, %v6338_v14, %v11980_v0  ;;  %vm1821_vm10 = vcmp.eq.f32.partialorder %v5867_v63, %v1820_v59  ;;  %vm1822_vm6 = vcmp.eq.f32.partialorder %v5876_v41, %v1820_v59  ;;  %v2078_v12 = vstv %s6919_s22  ;;  %s2676_s22 = smul.f32 0.0033333334, %s7872_s15 }
 0x46a   :  { %11982 = vst [vmem:[#allocation213_spill] sm:$0xff] %v6914_v62  ;;  %vm1823_vm8 = vcmp.eq.f32.partialorder %v5889_v34, %v1820_v59  ;;  %vm1824_vm15 = vcmp.eq.f32.partialorder %v5893_v48, %v1820_v59  ;;  %vm1825_vm3 = vcmp.eq.f32.partialorder %v5904_v45, %v1820_v59  ;;  %vm1826_vm11 = vcmp.eq.f32.partialorder %v5920_v55, %v1820_v59 }
 0x46b   :  { %vm1827_vm1 = vcmp.eq.f32.partialorder %v5924_v23, %v1820_v59  ;;  %vm1828_vm9 = vcmp.eq.f32.partialorder %v5944_v37, %v1820_v59  ;;  %vm1829_vm0 = vcmp.eq.f32.partialorder %v5970_v27, %v1820_v59  ;;  %v1830_v10 = vsel %vm1821_vm10, %v11841_v51, 9216 }
 0x46c   :  { %v1831_v32 = vsel %vm1822_vm6, %v11842_v39, 9216  ;;  %v1832_v56 = vsel %vm1823_vm8, %v11843_v5, 9216  ;;  %v1833_v17 = vsel %vm1824_vm15, %v11844_v35, 9216  ;;  %v1834_v0 = vsel %vm1825_vm3, %v11845_v24, 9216 }
 0x46d   :  { %v1835_v14 = vsel %vm1826_vm11, %v11846_v60, 9216  ;;  %v1836_v62 = vsel %vm1827_vm1, %v11847_v25, 9216  ;;  %v1837_v58 = vsel %vm1828_vm9, %v11848_v15, 9216  ;;  %v1838_v59 = vsel %vm1829_vm0, %v11852_v6, 9216  ;;  %v12015_v6 = vld [vmem:[#allocation146_spill] sm:$0xff]  ;;  %v12016_v15 = vld [vmem:[#allocation147_spill] sm:$0xff] }
 0x46e   :  { %vm1839_vm7 = vcmp.lt.s32.totalorder %v1830_v10, %v1834_v0  ;;  %vm1841_vm10 = vcmp.lt.s32.totalorder %v1831_v32, %v1835_v14  ;;  %vm1843_vm2 = vcmp.lt.s32.totalorder %v1832_v56, %v1836_v62  ;;  %vm1845_vm6 = vcmp.lt.s32.totalorder %v1833_v17, %v1837_v58  ;;  %v12017_v25 = vld [vmem:[#allocation148_spill] sm:$0xff]  ;;  %v12018_v60 = vld [vmem:[#allocation149_spill] sm:$0xff] }
 0x46f   :  { %v1840_v30 = vsel %vm1839_vm7, %v1830_v10, %v1834_v0  ;;  %v1842_v57 = vsel %vm1841_vm10, %v1831_v32, %v1835_v14  ;;  %v1844_v1 = vsel %vm1843_vm2, %v1832_v56, %v1836_v62  ;;  %v1846_v2 = vsel %vm1845_vm6, %v1833_v17, %v1837_v58  ;;  %v11988_v62 = vld [vmem:[#allocation119_spill] sm:$0xff]  ;;  %v11989_v32 = vld [vmem:[#allocation120_spill] sm:$0xff]  ;;  %v11990_v17 = vld [vmem:[#allocation121_spill] sm:$0xff] }
 0x470   :  { %vm1847_vm8 = vcmp.lt.s32.totalorder %v1840_v30, %v1838_v59  ;;  %vm1851_vm15 = vcmp.lt.s32.totalorder %v1844_v1, %v1846_v2  ;;  %v2088_v19 = vstv %s6917_s21  ;;  %v2079_v46 = vmin.f32 %v2078_v12, %v11983_v52  ;;  %s8073_s21 = sld [smem:[#allocation13 + $0x4]] }
 0x471   :  { %v1848_v53 = vsel %vm1847_vm8, %v1840_v30, %v1838_v59  ;;  %v1852_v31 = vsel %vm1851_vm15, %v1844_v1, %v1846_v2  ;;  %v2080_v43 = vmin.f32 %v2078_v12, %v11984_v11  ;;  %v2081_v44 = vmin.f32 %v2078_v12, %v11985_v28  ;;  %v11991_v11 = vld [vmem:[#allocation122_spill] sm:$0xff]  ;;  %v11992_v2 = vld [vmem:[#allocation123_spill] sm:$0xff]  ;;  %v11993_v1 = vld [vmem:[#allocation124_spill] sm:$0xff] }
 0x472   :  { %vm1849_vm9 = vcmp.lt.s32.totalorder %v1848_v53, %v1842_v57  ;;  %v2082_v8 = vmin.f32 %v2078_v12, %v11986_v7  ;;  %v2083_v10 = vmin.f32 %v2078_v12, %v11987_v4  ;;  %v2084_v58 = vmin.f32 %v2078_v12, %v11988_v62  ;;  %v11995_v4 = vld [vmem:[#allocation126_spill] sm:$0xff]  ;;  %v11997_v62 = vld [vmem:[#allocation128_spill] sm:$0xff] }
 0x473   :  { %v1850_v14 = vsel %vm1849_vm9, %v1848_v53, %v1842_v57  ;;  %v2085_v56 = vmin.f32 %v2078_v12, %v11989_v32  ;;  %v2086_v0 = vmin.f32 %v2078_v12, %v11990_v17  ;;  %v2087_v52 = vmin.f32 %v2078_v12, %v11991_v11  ;;  %v11996_v57 = vld [vmem:[#allocation127_spill] sm:$0xff]  ;;  %v12001_v11 = vld [vmem:[#allocation132_spill] sm:$0xff] }
 0x474   :  { %vm1853_vm2 = vcmp.lt.s32.totalorder %v1850_v14, %v1852_v31  ;;  %v2089_v28 = vmax.f32 %v2088_v19, %v11992_v2  ;;  %v2090_v7 = vmax.f32 %v2088_v19, %v11993_v1  ;;  %v2091_v53 = vmax.f32 %v2088_v19, %v11995_v4 }
 0x475   :  { %v6956_v30 = vsel %vm1853_vm2, %v1850_v14, %v1852_v31  ;;  %v2092_v59 = vmax.f32 %v2088_v19, %v11996_v57  ;;  %v2093_v32 = vmax.f32 %v2088_v19, %v11997_v62  ;;  %v2094_v20 = vmax.f32 %v2088_v19, %v11998_v50 }
 0x476   :  { %11994 = vst [vmem:[#allocation114_spill] sm:$0xff] %v6956_v30  ;;  %v1856_v17 = vshra.s32 %v6956_v30, 16  ;;  %v2095_v3 = vmax.f32 %v2088_v19, %v11999_v21  ;;  %v2096_v12 = vmax.f32 %v2088_v19, %v12000_v40  ;;  %v2097_v2 = vmax.f32 %v2088_v19, %v12001_v11 }
 0x477   :  { %v6966_v9 = vsub.f32 %v2079_v46, %v2089_v28  ;;  %v6968_v31 = vsub.f32 %v2080_v43, %v2090_v7  ;;  %v6970_v14 = vsub.f32 %v2081_v44, %v2091_v53  ;;  %v2101_v4 = vsub.f32 %v2082_v8, %v2092_v59  ;;  %v12005_v59 = vld [vmem:[#allocation136_spill] sm:$0xff] }
 0x478   :  { %v6972_v1 = vcvt.s32.f32 %v1856_v17  ;;  %v2102_v57 = vsub.f32 %v2083_v10, %v2093_v32  ;;  %v2103_v50 = vsub.f32 %v2084_v58, %v2094_v20  ;;  %v2104_v21 = vsub.f32 %v2085_v56, %v2095_v3  ;;  %v12006_v32 = vld [vmem:[#allocation137_spill] sm:$0xff] }
 0x479   :  { %v2105_v40 = vsub.f32 %v2086_v0, %v2096_v12  ;;  %v6974_v19 = vsub.f32 %v2087_v52, %v2097_v2  ;;  %v2107_v44 = vmax.f32 %v6966_v9, 0.0  ;;  %v2108_v43 = vmax.f32 %v6968_v31, 0.0  ;;  %v12003_v0 = vld [vmem:[#allocation134_spill] sm:$0xff]  ;;  %v12004_v9 = vld [vmem:[#allocation135_spill] sm:$0xff] }
 0x47a   :  { %12002 = vst [vmem:[#allocation115_spill] sm:$0xff] %v6972_v1  ;;  %1859 = vmin.xlane.f32.xlu1 %v6972_v1  ;;  %v2109_v46 = vmax.f32 %v6970_v14, 0.0  ;;  %v2110_v28 = vmax.f32 %v2101_v4, 0.0  ;;  %v2111_v8 = vmax.f32 %v2102_v57, 0.0  ;;  %v2112_v10 = vmax.f32 %v2103_v50, 0.0  ;;  %v12007_v12 = vld [vmem:[#allocation138_spill] sm:$0xff] }
 0x47b   :  { %v2113_v7 = vmax.f32 %v2104_v21, 0.0  ;;  %v2114_v3 = vmax.f32 %v2105_v40, 0.0  ;;  %v2115_v20 = vmax.f32 %v6974_v19, 0.0  ;;  %v2116_v58 = vstv %s6951_s24  ;;  %v12008_v2 = vld [vmem:[#allocation139_spill] sm:$0xff]  ;;  %v12009_v14 = vld [vmem:[#allocation140_spill] sm:$0xff]  ;;  %v12010_v57 = vld [vmem:[#allocation141_spill] sm:$0xff] }
 0x47c   :  { %v2126_v56 = vstv %s6949_s23  ;;  %v2117_v52 = vmin.f32 %v2116_v58, %v12003_v0  ;;  %v2118_v53 = vmin.f32 %v2116_v58, %v12004_v9  ;;  %v2119_v62 = vmin.f32 %v2116_v58, %v12005_v59  ;;  %v12011_v21 = vld [vmem:[#allocation142_spill] sm:$0xff]  ;;  %v12012_v19 = vld [vmem:[#allocation143_spill] sm:$0xff]  ;;  %s2673_s23 = smul.f32 0.0016666667, %s2672_s18 }
 0x47d   :  { %v2120_v17 = vmin.f32 %v2116_v58, %v12006_v32  ;;  %v2121_v11 = vmin.f32 %v2116_v58, %v12007_v12  ;;  %v2122_v31 = vmin.f32 %v2116_v58, %v12008_v2  ;;  %v2123_v4 = vmin.f32 %v2116_v58, %v12009_v14  ;;  %v12019_v14 = vld [vmem:[#allocation150_spill] sm:$0xff]  ;;  %s2675_s24 = smul.f32 0.0016666667, %s2674_s19 }
 0x47e   :  { %v2124_v50 = vmin.f32 %v2116_v58, %v12010_v57  ;;  %v2125_v40 = vmin.f32 %v2116_v58, %v12011_v21  ;;  %v2127_v0 = vmax.f32 %v2126_v56, %v12012_v19  ;;  %v2128_v49 = vmax.f32 %v2126_v56, %v12013_v22 }
 0x47f   :  { %v2129_v9 = vmax.f32 %v2126_v56, %v12014_v13  ;;  %v2130_v59 = vmax.f32 %v2126_v56, %v12015_v6  ;;  %v2131_v32 = vmax.f32 %v2126_v56, %v12016_v15  ;;  %v2132_v12 = vmax.f32 %v2126_v56, %v12017_v25 }
 0x480   :  { %v2133_v2 = vmax.f32 %v2126_v56, %v12018_v60  ;;  %v2134_v24 = vmax.f32 %v2126_v56, %v12019_v14  ;;  %v2135_v57 = vmax.f32 %v2126_v56, %v5662_v38  ;;  %v2136_v58 = vsub.f32 %v2117_v52, %v2127_v0  ;;  %v12021_v0 = vld [vmem:[#allocation156_spill] sm:$0xff] }
 0x481   :  { %v2137_v21 = vsub.f32 %v2118_v53, %v2128_v49  ;;  %v2138_v19 = vsub.f32 %v2119_v62, %v2129_v9  ;;  %v2139_v35 = vsub.f32 %v2120_v17, %v2130_v59  ;;  %v2140_v22 = vsub.f32 %v2121_v11, %v2131_v32  ;;  %v12024_v59 = vld [vmem:[#allocation152_spill] sm:$0xff]  ;;  %v12025_v32 = vld [vmem:[#allocation158_spill] sm:$0xff] }
 0x482   :  { %v2141_v5 = vsub.f32 %v2122_v31, %v2132_v12  ;;  %v2142_v13 = vsub.f32 %v2123_v4, %v2133_v2  ;;  %v2143_v39 = vsub.f32 %v2124_v50, %v2134_v24  ;;  %v2144_v6 = vsub.f32 %v2125_v40, %v2135_v57  ;;  %v12020_v40 = vld [vmem:[#allocation151_spill] sm:$0xff] }
 0x483   :  { %v2145_v51 = vmax.f32 %v2136_v58, 0.0  ;;  %v2146_v15 = vmax.f32 %v2137_v21, 0.0  ;;  %v2147_v54 = vmax.f32 %v2138_v19, 0.0  ;;  %v2148_v25 = vmax.f32 %v2139_v35, 0.0  ;;  %v12028_v58 = vld [vmem:[#allocation153_spill] sm:$0xff]  ;;  %v12029_v21 = vld [vmem:[#allocation159_spill] sm:$0xff] }
 0x484   :  { %v2149_v1 = vmax.f32 %v2140_v22, 0.0  ;;  %v2150_v60 = vmax.f32 %v2141_v5, 0.0  ;;  %v2151_v30 = vmax.f32 %v2142_v13, 0.0  ;;  %v2152_v27 = vmax.f32 %v2143_v39, 0.0  ;;  %v12032_v22 = vld [vmem:[#allocation154_spill] sm:$0xff] }
 0x485   :  { %v2163_v14 = vstv %s2071_s26  ;;  %v2153_v37 = vmax.f32 %v2144_v6, 0.0  ;;  %v7011_v38 = vmul.f32 %v2145_v51, %v2107_v44  ;;  %v7013_v49 = vmul.f32 %v2146_v15, %v2108_v43  ;;  %v12036_v6 = vld [vmem:[#allocation155_spill] sm:$0xff] }
 0x486   :  { %v7015_v56 = vmul.f32 %v2147_v54, %v2109_v46  ;;  %v7017_v24 = vmul.f32 %v2148_v25, %v2110_v28  ;;  %v7019_v52 = vmul.f32 %v2149_v1, %v2111_v8  ;;  %v7021_v35 = vmul.f32 %v2150_v60, %v2112_v10 }
 0x487   :  { %v7023_v5 = vmul.f32 %v2151_v30, %v2113_v7  ;;  %v7025_v39 = vmul.f32 %v2152_v27, %v2114_v3  ;;  %v2164_v53 = vadd.f32 %v5697_v47, %v2163_v14  ;;  %v2165_v51 = vadd.f32 %v5700_v16, %v2163_v14 }
 0x488   :  { %v2166_v44 = vadd.f32 %v5703_v18, %v2163_v14  ;;  %v2167_v54 = vadd.f32 %v5706_v33, %v2163_v14  ;;  %v2168_v43 = vadd.f32 %v5709_v26, %v2163_v14  ;;  %v2169_v1 = vadd.f32 %v5712_v61, %v2163_v14 }
 0x489   :  { %v2170_v46 = vadd.f32 %v5715_v29, %v2163_v14  ;;  %v7036_v28 = vmul.f32 %v2153_v37, %v2115_v20  ;;  %v2171_v27 = vadd.f32 %v5724_v42, %v2163_v14  ;;  %v7040_v30 = vsub.f32 %v2164_v53, %v7011_v38  ;;  %v12044_v53 = vld [vmem:[#allocation27_spill] sm:$0xff] }
 0x48a   :  { %v7043_v47 = vsub.f32 %v2165_v51, %v7013_v49  ;;  %v2172_v16 = vadd.f32 %v5735_v36, %v2163_v14  ;;  %v7049_v18 = vsub.f32 %v2166_v44, %v7015_v56  ;;  %v7052_v33 = vsub.f32 %v2167_v54, %v7017_v24  ;;  %v12040_v14 = vld [vmem:[#allocation37_spill] sm:$0xff] }
 0x48b   :  { %v7055_v26 = vsub.f32 %v2168_v43, %v7019_v52  ;;  %v7058_v61 = vsub.f32 %v2169_v1, %v7021_v35  ;;  %vm2182_vm7 = vcmp.gt.f32.partialorder %v7040_v30, 0.0  ;;  %v7062_v29 = vsub.f32 %v2170_v46, %v7023_v5  ;;  %v12048_v43 = vld [vmem:[#allocation38_spill] sm:$0xff]  ;;  %v12050_v1 = vld [vmem:[#allocation165_spill] sm:$0xff] }
 0x48c   :  { %vm2183_vm0 = vcmp.gt.f32.partialorder %v7043_v47, 0.0  ;;  %vm11082_vm3 = vcmp.gt.f32.partialorder %v7049_v18, 0.0  ;;  %v7067_v42 = vsub.f32 %v2171_v27, %v7025_v39  ;;  %vm11081_vm11 = vcmp.gt.f32.partialorder %v7052_v33, 0.0  ;;  %v12053_v27 = vld [vmem:[#allocation28_spill] sm:$0xff] }
 0x48d   :  { %v7071_v36 = vsub.f32 %v2172_v16, %v7036_v28  ;;  %vm11080_vm1 = vcmp.gt.f32.partialorder %v7055_v26, 0.0  ;;  %v2191_v37 = vsel %vm2182_vm7, %v7040_v30, 1.0  ;;  %v2192_v8 = vsel %vm2183_vm0, %v7043_v47, 1.0  ;;  %v12055_v16 = vld [vmem:[#allocation166_spill] sm:$0xff] }
 0x48e   :  { %vm11079_vm10 = vcmp.gt.f32.partialorder %v7058_v61, 0.0  ;;  %v2193_v10 = vsel %vm11082_vm3, %v7049_v18, 1.0  ;;  %vm11078_vm6 = vcmp.gt.f32.partialorder %v7062_v29, 0.0  ;;  %v2194_v7 = vsel %vm11081_vm11, %v7052_v33, 1.0 }
 0x48f   :  { %3862 = vrcp.f32 %v2191_v37  ;;  %vm11077_vm8 = vcmp.gt.f32.partialorder %v7067_v42, 0.0  ;;  %v2195_v3 = vsel %vm11080_vm1, %v7055_v26, 1.0  ;;  %vm11076_vm15 = vcmp.gt.f32.partialorder %v7071_v36, 0.0 }
 0x490   :  { %3864 = vrcp.f32 %v2192_v8  ;;  %v2196_v20 = vsel %vm11079_vm10, %v7058_v61, 1.0  ;;  %v2197_v62 = vsel %vm11078_vm6, %v7062_v29, 1.0  ;;  %v2198_v17 = vsel %vm11077_vm8, %v7067_v42, 1.0 }
 0x491   :  { %3866 = vrcp.f32 %v2193_v10  ;;  %v2199_v11 = vsel %vm11076_vm15, %v7071_v36, 1.0  ;;  %vm12022_vm9 = vnez %v12021_v0  ;;  %vm12026_vm2 = vnez %v12025_v32 }
 0x492   :  { %3868 = vrcp.f32 %v2194_v7  ;;  %v7113_v9 = vsel %vm12022_vm9, %v5867_v63, %v12020_v40  ;;  %v7119_v12 = vsel %vm12026_vm2, %v5876_v41, %v12024_v59  ;;  %vm12030_vm15 = vnez %v12029_v21  ;;  %v12033_v63 = vld [vmem:[#allocation160_spill] sm:$0xff]  ;;  %v12037_v41 = vld [vmem:[#allocation161_spill] sm:$0xff] }
 0x493   :  { %3870 = vrcp.f32 %v2195_v3  ;;  %12023 = vst [vmem:[#allocation116_spill] sm:$0xff] %v7113_v9  ;;  %12027 = vst [vmem:[#allocation117_spill] sm:$0xff] %v7119_v12  ;;  %v7129_v19 = vsel %vm12030_vm15, %v5889_v34, %v12028_v58  ;;  %vm12034_vm8 = vnez %v12033_v63  ;;  %vm12038_vm6 = vnez %v12037_v41  ;;  %v12041_v34 = vld [vmem:[#allocation162_spill] sm:$0xff] }
 0x494   :  { %3872 = vrcp.f32 %v2196_v20  ;;  %12031 = vst [vmem:[#allocation118_spill] sm:$0xff] %v7129_v19  ;;  %v7135_v13 = vsel %vm12034_vm8, %v5893_v48, %v12032_v22  ;;  %v7141_v15 = vsel %vm12038_vm6, %v5904_v45, %v12036_v6  ;;  %vm12042_vm10 = vnez %v12041_v34  ;;  %v12045_v48 = vld [vmem:[#allocation163_spill] sm:$0xff]  ;;  %v12194_v6 = vld [vmem:[#allocation133_spill] sm:$0xff] }
 0x495   :  { %3874 = vrcp.f32 %v2197_v62  ;;  %12035 = vst [vmem:[#allocation119_spill] sm:$0xff] %v7135_v13  ;;  %12039 = vst [vmem:[#allocation120_spill] sm:$0xff] %v7141_v15  ;;  %vm12046_vm1 = vnez %v12045_v48  ;;  %vm12051_vm11 = vnez %v12050_v1  ;;  %vm12056_vm3 = vnez %v12055_v16 }
 0x496   :  { %3876 = vrcp.f32 %v2198_v17  ;;  %v7155_v51 = vsel %vm12046_vm1, %v5924_v23, %v12044_v53  ;;  %v7172_v8 = vstv %s2073_s27  ;;  %v7179_v7 = vstv %s2075_s28  ;;  %s4191_s27 = smov [#allocation19]  }
 0x497   :  { %3878 = vrcp.f32 %v2199_v11  ;;  %12047 = vst [vmem:[#allocation122_spill] sm:$0xff] %v7155_v51  ;;  %12058 = vst [vmem:[#allocation126_spill] sm:$0xff] %v7172_v8  ;;  %v7181_v3 = vstv %s2076_s1  ;;  %v12071_v47 = vmov 0  ;;  %vm12074_vm1 = vcmp.gt.f32.partialorder %v7055_v26, 0.0  ;;  %s3734_s28 = sshll.u32 %s4191_s27, 4  ;;  %s10556_s28 = int_to_ptr.vmem [resolvable:$true] %s3734_s28 }
 0x498   :  { %12060 = vst [vmem:[#allocation128_spill] sm:$0xff] %v7179_v7  ;;  %12061 = vst [vmem:[#allocation129_spill] sm:$0xff] %v7181_v3  ;;  %vm12084_vm6 = vcmp.gt.f32.partialorder %v7062_v29, 0.0  ;;  %v12086_v26 = vmov 0  ;;  %vm12090_vm8 = vcmp.gt.f32.partialorder %v7067_v42, 0.0  ;;  %v12092_v29 = vmov 0  ;;  %p4133_p4 = scmp.lt.s32.totalorder %s10556_s28, %s10556_s28 }
 0x499   :  { %v3863_v31 = vpop.eup %3862  ;;  %v12101_v22 = vmov 0  ;;  %v12195_v40 = vsel %vm6451_vm14, 1, %v12194_v6  ;;  %v12226_v6 = vld [vmem:[#allocation107_spill] sm:$0xff] }
 0x49a   :  { %v3865_v4 = vpop.eup %3864  ;;  %v2201_v2 = vmul.f32 %v3863_v31, %v7011_v38  ;;  %v7149_v38 = vsel %vm12042_vm10, %v5920_v55, %v12040_v14  ;;  %v12054_v55 = vld [vmem:[#allocation164_spill] sm:$0xff]  ;;  %vm12082_vm10 = vcmp.gt.f32.partialorder %v7058_v61, 0.0 }
 0x49b   :  { %v3867_v50 = vpop.eup %3866  ;;  %v2203_v25 = vmul.f32 %v3865_v4, %v7013_v49  ;;  %12043 = vst [vmem:[#allocation121_spill] sm:$0xff] %v7149_v38  ;;  %v12049_v49 = vld [vmem:[#allocation89_spill] sm:$0xff]  ;;  %v7169_v37 = vsel %vm12056_vm3, %v12054_v55, %v12053_v27 }
 0x49c   :  { %v3869_v57 = vpop.eup %3868  ;;  %v2205_v44 = vmul.f32 %v3867_v50, %v7015_v56  ;;  %v7163_v46 = vsel %vm12051_vm11, %v12049_v49, %v12048_v43  ;;  %12057 = vst [vmem:[#allocation124_spill] sm:$0xff] %v7169_v37  ;;  %v7177_v10 = vsel %vm2182_vm7, %v2201_v2, 0.0  ;;  %vm12067_vm7 = vcmp.gt.f32.partialorder %v7049_v18, 0.0  ;;  %v12142_v49 = vld [vmem:[#allocation115_spill] sm:$0xff] }
 0x49d   :  { %v3871_v60 = vpop.eup %3870  ;;  %v2207_v45 = vmul.f32 %v3869_v57, %v7017_v24  ;;  %12052 = vst [vmem:[#allocation123_spill] sm:$0xff] %v7163_v46  ;;  %12059 = vst [vmem:[#allocation127_spill] sm:$0xff] %v7177_v10  ;;  %v7186_v17 = vsel %vm2183_vm0, %v2203_v25, 0.0  ;;  %vm7190_vm3 = vcmp.gt.f32.partialorder %v7177_v10, %v7113_v9  ;;  %vm12069_vm11 = vcmp.gt.f32.partialorder %v7052_v33, 0.0  ;;  %v4016_v57 = vld [vmem:[#allocation15 + $0x98] sm:$0xff] }
 0x49e   :  { %v3873_v54 = vpop.eup %3872  ;;  %v2209_v23 = vmul.f32 %v3871_v60, %v7019_v52  ;;  %12062 = vst [vmem:[#allocation130_spill] sm:$0xff] %v7186_v17  ;;  %v12063_v52 = vmov 0  ;;  %v7199_v31 = vsel %vm12067_vm7, %v2205_v44, 0.0  ;;  %vm7207_vm0 = vcmp.gt.f32.partialorder %v7186_v17, %v7119_v12 }
 0x49f   :  { %v3875_v56 = vpop.eup %3874  ;;  %v2211_v24 = vmul.f32 %v3873_v54, %v7021_v35  ;;  %v12064_v52 = vsel %vm7190_vm3, 4294967295, %v12063_v52  ;;  %v7194_v35 = vstv %s2077_s29  ;;  %12068 = vst [vmem:[#allocation134_spill] sm:$0xff] %v7199_v31  ;;  %v12072_v47 = vsel %vm7207_vm0, 4294967295, %v12071_v47  ;;  %v12141_v54 = vld [vmem:[#allocation114_spill] sm:$0xff]  ;;  %s4128_s29 = scalar_lea.vmem %s10556_s28, 1152 }
 0x4a0   :  { %v3877_v20 = vpop.eup %3876  ;;  %v2213_v62 = vmul.f32 %v3875_v56, %v7023_v5  ;;  %12065 = vst [vmem:[#allocation131_spill] sm:$0xff] %v12064_v52  ;;  %12066 = vst [vmem:[#allocation132_spill] sm:$0xff] %v7194_v35  ;;  %v7203_v5 = vsel %vm12069_vm11, %v2207_v45, 0.0  ;;  %v7214_v50 = vsel %vm12074_vm1, %v2209_v23, 0.0  ;;  %vm7218_vm7 = vcmp.gt.f32.partialorder %v7199_v31, %v7129_v19  ;;  %v12172_v45 = vld [vmem:[#allocation88_spill] sm:$0xff]  ;;  %p4129_p3 = scmp.ne.s32.totalorder %s10556_s28, %s4128_s29  ;;  %p4134_p5 = scmp.lt.s32.totalorder %s4128_s29, %s4128_s29 }
 0x4a1   :  { %v3879_v30 = vpop.eup %3878  ;;  %v2215_v11 = vmul.f32 %v3877_v20, %v7025_v39  ;;  %12070 = vst [vmem:[#allocation135_spill] sm:$0xff] %v7203_v5  ;;  %12073 = vst [vmem:[#allocation136_spill] sm:$0xff] %v12072_v47  ;;  %v12076_v39 = vmov 0  ;;  %vm7224_vm11 = vcmp.gt.f32.partialorder %v7203_v5, %v7135_v13  ;;  %v12079_v18 = vmov 0  ;;  %v4048_v13 = vld [vmem:[#allocation15 + $0x78] sm:$0xff] }
 0x4a2   :  { %v2217_v4 = vmul.f32 %v3879_v30, %v7036_v28  ;;  %12075 = vst [vmem:[#allocation137_spill] sm:$0xff] %v7214_v50  ;;  %v12077_v39 = vsel %vm7218_vm7, 4294967295, %v12076_v39  ;;  %v12080_v18 = vsel %vm7224_vm11, 4294967295, %v12079_v18  ;;  %v7230_v33 = vsel %vm12082_vm10, %v2211_v24, 0.0  ;;  %p4135_p6 = por %p4134_p5, %p4133_p4 }
 0x4a3   :  { %12078 = vst [vmem:[#allocation138_spill] sm:$0xff] %v12077_v39  ;;  %12081 = vst [vmem:[#allocation139_spill] sm:$0xff] %v12080_v18  ;;  %v7234_v28 = vsel %vm12084_vm6, %v2213_v62, 0.0  ;;  %vm7238_vm1 = vcmp.gt.f32.partialorder %v7214_v50, %v7141_v15  ;;  %v7248_v61 = vsel %vm12090_vm8, %v2215_v11, 0.0  ;;  %vm7252_vm10 = vcmp.gt.f32.partialorder %v7230_v33, %v7149_v38 }
 0x4a4   :  { %12083 = vst [vmem:[#allocation140_spill] sm:$0xff] %v7230_v33  ;;  %12085 = vst [vmem:[#allocation141_spill] sm:$0xff] %v7234_v28  ;;  %v12087_v26 = vsel %vm7238_vm1, 4294967295, %v12086_v26  ;;  %v12093_v29 = vsel %vm7252_vm10, 4294967295, %v12092_v29  ;;  %vm7258_vm6 = vcmp.gt.f32.partialorder %v7234_v28, %v7155_v51  ;;  %v12095_v2 = vmov 0  ;;  %p4136_p7 = pnand %p4135_p6, %p4129_p3 }
 0x4a5   :  { %12088 = vst [vmem:[#allocation142_spill] sm:$0xff] %v12087_v26  ;;  %12091 = vst [vmem:[#allocation143_spill] sm:$0xff] %v7248_v61  ;;  %v12096_v2 = vsel %vm7258_vm6, 4294967295, %v12095_v2  ;;  %vm12099_vm8 = vcmp.gt.f32.partialorder %v7071_v36, 0.0  ;;  %vm7272_vm15 = vcmp.gt.f32.partialorder %v7248_v61, %v7163_v46  ;;  %v12106_v36 = vmov 0 }
 0x4a6   :  { %12094 = vst [vmem:[#allocation144_spill] sm:$0xff] %v12093_v29  ;;  %12097 = vst [vmem:[#allocation145_spill] sm:$0xff] %v12096_v2  ;;  %v7268_v42 = vsel %vm12099_vm8, %v2217_v4, 0.0  ;;  %v12102_v22 = vsel %vm7272_vm15, 4294967295, %v12101_v22  ;;  %v2403_v14 = vmax.f32 %v7177_v10, %v7214_v50  ;;  %v2404_v56 = vmax.f32 %v7186_v17, %v7230_v33 }
 0x4a7   :  { %12100 = vst [vmem:[#allocation146_spill] sm:$0xff] %v7268_v42  ;;  %12103 = vst [vmem:[#allocation147_spill] sm:$0xff] %v12102_v22  ;;  %vm7286_vm8 = vcmp.gt.f32.partialorder %v7268_v42, %v7169_v37  ;;  %v2405_v25 = vmax.f32 %v7199_v31, %v7234_v28  ;;  %v2406_v20 = vmax.f32 %v7203_v5, %v7248_v61  ;;  %v1855_v4 = vand.u32 65535, %v12141_v54 }
 0x4a8   :  { %v12107_v36 = vsel %vm7286_vm8, 4294967295, %v12106_v36  ;;  %v2407_v58 = vmax.f32 %v2403_v14, %v7268_v42  ;;  %v12173_v53 = vsel %vm6417_vm12, 1, %v12172_v45  ;;  %v12204_v45 = vld [vmem:[#allocation102_spill] sm:$0xff] }
 0x4a9   :  { %12108 = vst [vmem:[#allocation148_spill] sm:$0xff] %v12107_v36  ;;  %v2409_v30 = vmax.f32 %v2405_v25, %v2406_v20  ;;  %v1857_v35 = vcvt.s32.f32 %v1855_v4  ;;  %v12205_v37 = vsel %vm11947_vm4, 1, %v12204_v45  ;;  %v12213_v45 = vld [vmem:[#allocation173_spill] sm:$0xff] }
 0x4aa   :  { %v2408_v59 = vmax.f32 %v2407_v58, %v2404_v56  ;;  %vm12214_vm4 = vnez %v12213_v45  ;;  %v12237_v45 = vld [vmem:[#allocation108_spill] sm:$0xff] }
 0x4ac   :  { %v2410_v3 = vmax.f32 %v2408_v59, %v2409_v30 }
 0x4ae   :  { %2411 = vmax.xlane.f32.xlu1 %v2410_v3 }
 0x507   :  { %v1860_v44 = vpop.xlane.xlu1 %1859 }
 0x508   :  { %vm1861_vm8 = vcmp.eq.f32.partialorder %v12142_v49, %v1860_v44  ;;  %v1866_v24 = vcvt.f32.s32 %v1860_v44  ;;  %v1891_v44 = vstv %s1890_s6 }
 0x509   :  { %v1862_v55 = vsel %vm1861_vm8, %v1857_v35, inf }
 0x50a   :  { %1863 = vmin.xlane.f32.xlu0 %v1862_v55  ;;  %v1867_v27 = vshll.u32 %v1866_v24, 16 }
 0x53b   :  { %v2412_v11 = vpop.xlane.xlu1 %2411 }
 0x53c   :  { %v2413_v62 = vrot.slane %v2412_v11, 4 }
 0x53e   :  { %v2414_v7 = vmax.f32 %v2412_v11, %v2413_v62  ;;  %v12148_v62 = vld [vmem:[#allocation51_spill] sm:$0xff]  ;;  %v12150_v11 = vld [vmem:[#allocation52_spill] sm:$0xff] }
 0x540   :  { %v2415_v58 = vrot.slane %v2414_v7, 2 }
 0x542   :  { %v2416_v25 = vmax.f32 %v2414_v7, %v2415_v58  ;;  %v12146_v7 = vld [vmem:[#allocation50_spill] sm:$0xff] }
 0x544   :  { %v2417_v49 = vrot.slane %v2416_v25, 1 }
 0x546   :  { %v2418_v20 = vmax.f32 %v2416_v25, %v2417_v49  ;;  %v12158_v49 = vld [vmem:[#allocation95_spill] sm:$0xff] }
 0x597   :  { %v1864_v23 = vpop.xlane.xlu0 %1863 }
 0x598   :  { %v1865_v43 = vcvt.f32.s32 %v1864_v23 }
 0x59a   :  { %v1868_v14 = vadd.s32 %v1867_v27, %v1865_v43  ;;  %v12143_v43 = vld [vmem:[#allocation86_spill] sm:$0xff]  ;;  %v12144_v27 = vld [vmem:[#allocation48_spill] sm:$0xff] }
 0x59b   :  { %vm12145_vm10 = vcmp.gt.f32.partialorder %v12144_v27, -1.0  ;;  %v12162_v27 = vld [vmem:[#allocation99_spill] sm:$0xff] }
 0x59c   :  { %v1869_v59 = vrot.slane %v1868_v14, 4  ;;  %v7433_v23 = vsel %vm12145_vm10, %v12143_v43, 0 }
 0x59e   :  { %vm1870_vm15 = vcmp.lt.s32.totalorder %v1868_v14, %v1869_v59 }
 0x59f   :  { %v1871_v3 = vsel %vm1870_vm15, %v1868_v14, %v1869_v59  ;;  %vm12147_vm15 = vcmp.gt.f32.partialorder %v12146_v7, -1.0  ;;  %v12152_v14 = vld [vmem:[#allocation53_spill] sm:$0xff]  ;;  %v7455_v59 = vstv %s3765_s30  ;;  %v12163_v7 = vld [vmem:[#allocation100_spill] sm:$0xff] }
 0x5a0   :  { %v1872_v54 = vrot.slane %v1871_v3, 2  ;;  %v7438_v24 = vsel %vm12147_vm15, %v12143_v43, 0  ;;  %vm12153_vm10 = vcmp.gt.f32.partialorder %v12152_v14, -1.0  ;;  %vm7457_vm15 = vcmp.eq.s32.totalorder %v1891_v44, 1 }
 0x5a1   :  { %v7453_v58 = vsel %vm12153_vm10, %v12143_v43, 0  ;;  %v12164_v44 = vmov 0  ;;  %v12179_v14 = vmov 0 }
 0x5a2   :  { %vm1873_vm6 = vcmp.lt.s32.totalorder %v1871_v3, %v1872_v54 }
 0x5a3   :  { %v1874_v56 = vsel %vm1873_vm6, %v1871_v3, %v1872_v54  ;;  %vm12149_vm6 = vcmp.gt.f32.partialorder %v12148_v62, -1.0  ;;  %v12156_v54 = vld [vmem:[#allocation93_spill] sm:$0xff] }
 0x5a4   :  { %v1875_v35 = vrot.slane %v1874_v56, 1  ;;  %v7443_v30 = vsel %vm12149_vm6, %v12143_v43, 0  ;;  %v12167_v62 = vld [vmem:[#allocation101_spill] sm:$0xff] }
 0x5a6   :  { %vm1876_vm8 = vcmp.lt.s32.totalorder %v1874_v56, %v1875_v35 }
 0x5a7   :  { %v1877_v55 = vsel %vm1876_vm8, %v1874_v56, %v1875_v35  ;;  %vm12151_vm8 = vcmp.gt.f32.partialorder %v12150_v11, -1.0  ;;  %v12157_v56 = vld [vmem:[#allocation94_spill] sm:$0xff]  ;;  %v12159_v35 = vld [vmem:[#allocation96_spill] sm:$0xff]  ;;  %v12168_v11 = vmov 0 }
 0x5a8   :  { %3786 = vpush %v1877_v55  ;;  %v7448_v4 = vsel %vm12151_vm8, %v12143_v43, 0  ;;  %v12160_v55 = vld [vmem:[#allocation97_spill] sm:$0xff] }
 0x5a9   :  { %3788 = vpush %v2418_v20  ;;  %v12161_v20 = vld [vmem:[#allocation98_spill] sm:$0xff] }
 0x5d9   :  { %s3787_s7 = spop %3786 }
 0x5da   :  { %v1879_v25 = vstv %s3787_s7  ;;  %s7744_s8 = spop %3788 }
 0x5db   :  { %vm1880_vm6 = vcmp.eq.s32.totalorder %v12156_v54, %v1879_v25  ;;  %vm1881_vm1 = vcmp.eq.s32.totalorder %v12157_v56, %v1879_v25  ;;  %vm1882_vm8 = vcmp.eq.s32.totalorder %v12158_v49, %v1879_v25  ;;  %vm1883_vm11 = vcmp.eq.s32.totalorder %v12159_v35, %v1879_v25  ;;  %p2489_p1 = scmp.gt.f32.partialorder %s7744_s8, 0.0 }
 0x5dc   :  { %vm1884_vm7 = vcmp.eq.s32.totalorder %v12160_v55, %v1879_v25  ;;  %vm1885_vm10 = vcmp.eq.s32.totalorder %v12161_v20, %v1879_v25  ;;  %vm1886_vm0 = vcmp.eq.s32.totalorder %v12162_v27, %v1879_v25  ;;  %vm1887_vm3 = vcmp.eq.s32.totalorder %v12163_v7, %v1879_v25  ;;  %vm7471_vm2 = vmand %vm1880_vm6, %vm7457_vm15 }
 0x5dd   :  { %v12165_v44 = vsel %vm7471_vm2, 4294967295, %v12164_v44  ;;  %vm1888_vm9 = vcmp.eq.s32.totalorder %v12167_v62, %v1879_v25  ;;  %vm7478_vm13 = vmand %vm1881_vm1, %vm7457_vm15  ;;  %v7488_v60 = vsel %vm7471_vm2, 2, %v12173_v53  ;;  %v12183_v53 = vld [vmem:[#allocation125_spill] sm:$0xff]  ;;  %v2420_v3 = vstv %s7744_s8  ;;  %s2490_s25 = scalar_select %p2489_p1, 1, 0 }
 0x5de   :  { %12166 = vst [vmem:[#allocation149_spill] sm:$0xff] %v12165_v44  ;;  %v12169_v11 = vsel %vm7478_vm13, 4294967295, %v12168_v11  ;;  %12174 = vst [vmem:[#allocation151_spill] sm:$0xff] %v7488_v60  ;;  %v12184_v60 = vsel %vm11964_vm5, 1, %v12183_v53  ;;  %v12215_v53 = vld [vmem:[#allocation103_spill] sm:$0xff] }
 0x5df   :  { %12170 = vst [vmem:[#allocation150_spill] sm:$0xff] %v12169_v11  ;;  %vm7500_vm1 = vmand %vm1882_vm8, %vm7457_vm15  ;;  %v7510_v22 = vsel %vm7478_vm13, 2, %v12184_v60  ;;  %v12190_v60 = vmov 0  ;;  %v12216_v46 = vsel %vm12214_vm4, 1, %v12215_v53  ;;  %v12224_v53 = vld [vmem:[#allocation177_spill] sm:$0xff]  ;;  %vm2422_vm4 = vcmp.eq.f32.partialorder %v7186_v17, %v2420_v3  ;;  %v4015_v11 = vld [vmem:[#allocation15 + $0x90] sm:$0xff] }
 0x5e0   :  { %v12180_v14 = vsel %vm7500_vm1, 4294967295, %v12179_v14  ;;  %12185 = vst [vmem:[#allocation152_spill] sm:$0xff] %v7510_v22  ;;  %vm7528_vm12 = vmand %vm1883_vm11, %vm7457_vm15  ;;  %v7538_v8 = vsel %vm7500_vm1, 2, %v12195_v40  ;;  %v12200_v40 = vmov 0  ;;  %vm12225_vm11 = vnez %v12224_v53  ;;  %v12248_v53 = vld [vmem:[#allocation109_spill] sm:$0xff] }
 0x5e1   :  { %12181 = vst [vmem:[#allocation156_spill] sm:$0xff] %v12180_v14  ;;  %v12191_v60 = vsel %vm7528_vm12, 4294967295, %v12190_v60  ;;  %12196 = vst [vmem:[#allocation153_spill] sm:$0xff] %v7538_v8  ;;  %v7566_v22 = vsel %vm7528_vm12, 2, %v12205_v37  ;;  %v12210_v37 = vmov 0  ;;  %v12227_v51 = vsel %vm12225_vm11, 1, %v12226_v6 }
 0x5e2   :  { %12192 = vst [vmem:[#allocation158_spill] sm:$0xff] %v12191_v60  ;;  %vm7556_vm14 = vmand %vm1884_vm7, %vm7457_vm15  ;;  %v12235_v6 = vld [vmem:[#allocation181_spill] sm:$0xff]  ;;  %vm2423_vm11 = vcmp.eq.f32.partialorder %v7199_v31, %v2420_v3  ;;  %v2688_v60 = vstv %s7791_s9  ;;  %v4050_v31 = vld [vmem:[#allocation15 + $0x88] sm:$0xff] }
 0x5e3   :  { %v12201_v40 = vsel %vm7556_vm14, 4294967295, %v12200_v40  ;;  %12206 = vst [vmem:[#allocation154_spill] sm:$0xff] %v7566_v22  ;;  %vm7584_vm5 = vmand %vm1885_vm10, %vm7457_vm15  ;;  %v7594_v8 = vsel %vm7556_vm14, 2, %v12216_v46  ;;  %v12221_v46 = vmov 0  ;;  %vm12236_vm6 = vnez %v12235_v6  ;;  %v12284_v6 = vld [vmem:[#allocation56_spill] sm:$0xff] }
 0x5e4   :  { %12202 = vst [vmem:[#allocation159_spill] sm:$0xff] %v12201_v40  ;;  %v12211_v37 = vsel %vm7584_vm5, 4294967295, %v12210_v37  ;;  %12217 = vst [vmem:[#allocation155_spill] sm:$0xff] %v7594_v8  ;;  %v7622_v22 = vsel %vm7584_vm5, 2, %v12227_v51  ;;  %v12232_v51 = vmov 0  ;;  %v12238_v29 = vsel %vm12236_vm6, 1, %v12237_v45 }
 0x5e5   :  { %12212 = vst [vmem:[#allocation160_spill] sm:$0xff] %v12211_v37  ;;  %vm7612_vm7 = vmand %vm1886_vm0, %vm7457_vm15  ;;  %v12246_v45 = vld [vmem:[#allocation185_spill] sm:$0xff]  ;;  %vm2421_vm10 = vcmp.eq.f32.partialorder %v7177_v10, %v2420_v3  ;;  %vm12285_vm6 = vcmp.gt.f32.partialorder %v12284_v6, -1.0  ;;  %v2432_v6 = vsel %vm2423_vm11, %v12158_v49, 9216  ;;  %v2678_v40 = vstv %s7793_s10 }
 0x5e6   :  { %v12222_v46 = vsel %vm7612_vm7, 4294967295, %v12221_v46  ;;  %12228 = vst [vmem:[#allocation37_spill] sm:$0xff] %v7622_v22  ;;  %vm7640_vm0 = vmand %vm1887_vm3, %vm7457_vm15  ;;  %v7650_v8 = vsel %vm7612_vm7, 2, %v12238_v29  ;;  %v12243_v29 = vmov 0  ;;  %vm12247_vm8 = vnez %v12246_v45 }
 0x5e7   :  { %12223 = vst [vmem:[#allocation161_spill] sm:$0xff] %v12222_v46  ;;  %v12233_v51 = vsel %vm7640_vm0, 4294967295, %v12232_v51  ;;  %12239 = vst [vmem:[#allocation27_spill] sm:$0xff] %v7650_v8  ;;  %v12249_v38 = vsel %vm12247_vm8, 1, %v12248_v53  ;;  %v12254_v53 = vld [vmem:[#allocation189_spill] sm:$0xff]  ;;  %v12256_v8 = vld [vmem:[#allocation110_spill] sm:$0xff]  ;;  %vm2424_vm8 = vcmp.eq.f32.partialorder %v7203_v5, %v2420_v3  ;;  %vm2429_vm7 = vcmp.eq.f32.partialorder %v7268_v42, %v2420_v3 }
 0x5e8   :  { %12234 = vst [vmem:[#allocation162_spill] sm:$0xff] %v12233_v51  ;;  %vm7668_vm3 = vmand %vm1888_vm9, %vm7457_vm15  ;;  %v7678_v22 = vsel %vm7640_vm0, 2, %v12249_v38  ;;  %vm12255_vm9 = vnez %v12254_v53  ;;  %v12282_v53 = vld [vmem:[#allocation54_spill] sm:$0xff]  ;;  %v7806_v25 = vsel %vm12285_vm6, %v12143_v43, 0  ;;  %vm2428_vm0 = vcmp.eq.f32.partialorder %v7248_v61, %v2420_v3  ;;  %v4031_v42 = vld [vmem:[#allocation15 + $0x38] sm:$0xff] }
 0x5e9   :  { %v12244_v29 = vsel %vm7668_vm3, 4294967295, %v12243_v29  ;;  %12250 = vst [vmem:[#allocation89_spill] sm:$0xff] %v7678_v22  ;;  %v12257_v38 = vsel %vm12255_vm9, 1, %v12256_v8  ;;  %vm12283_vm15 = vcmp.gt.f32.partialorder %v12282_v53, -1.0  ;;  %vm2425_vm9 = vcmp.eq.f32.partialorder %v7214_v50, %v2420_v3  ;;  %v4046_v50 = vld [vmem:[#allocation15 + $0x68] sm:$0xff]  ;;  %v4047_v5 = vld [vmem:[#allocation15 + $0x70] sm:$0xff] }
 0x5ea   :  { %12245 = vst [vmem:[#allocation38_spill] sm:$0xff] %v12244_v29  ;;  %v7698_v22 = vsel %vm7668_vm3, 2, %v12257_v38  ;;  %v7798_v8 = vsel %vm12283_vm15, %v12143_v43, 0  ;;  %vm2426_vm3 = vcmp.eq.f32.partialorder %v7230_v33, %v2420_v3  ;;  %vm2427_vm15 = vcmp.eq.f32.partialorder %v7234_v28, %v2420_v3  ;;  %v4044_v28 = vld [vmem:[#allocation15 + $0x58] sm:$0xff]  ;;  %v4045_v33 = vld [vmem:[#allocation15 + $0x60] sm:$0xff] }
 0x5eb   :  { %12258 = vst [vmem:[#allocation28_spill] sm:$0xff] %v7698_v22  ;;  %v2430_v53 = vsel %vm2421_vm10, %v12156_v54, 9216  ;;  %v2431_v38 = vsel %vm2422_vm4, %v12157_v56, 9216  ;;  %v2433_v26 = vsel %vm2424_vm8, %v12159_v35, 9216  ;;  %v2434_v18 = vsel %vm2425_vm9, %v12160_v55, 9216  ;;  %v4019_v55 = vld [vmem:[#allocation15 + $0xb0] sm:$0xff] }
 0x5ec   :  { %v2435_v45 = vsel %vm2426_vm3, %v12161_v20, 9216  ;;  %v2436_v22 = vsel %vm2427_vm15, %v12162_v27, 9216  ;;  %v2437_v29 = vsel %vm2428_vm0, %v12163_v7, 9216  ;;  %v2438_v3 = vsel %vm2429_vm7, %v12167_v62, 9216  ;;  %v4017_v62 = vld [vmem:[#allocation15 + $0xa0] sm:$0xff]  ;;  %v4018_v27 = vld [vmem:[#allocation15 + $0xa8] sm:$0xff] }
 0x5ed   :  { %vm2439_vm6 = vcmp.lt.s32.totalorder %v2430_v53, %v2434_v18  ;;  %vm2441_vm10 = vcmp.lt.s32.totalorder %v2431_v38, %v2435_v45  ;;  %vm2443_vm5 = vcmp.lt.s32.totalorder %v2432_v6, %v2436_v22  ;;  %vm2445_vm4 = vcmp.lt.s32.totalorder %v2433_v26, %v2437_v29  ;;  %v4029_v35 = vld [vmem:[#allocation15 + $0x28] sm:$0xff]  ;;  %v4030_v56 = vld [vmem:[#allocation15 + $0x30] sm:$0xff] }
 0x5ee   :  { %v2440_v15 = vsel %vm2439_vm6, %v2430_v53, %v2434_v18  ;;  %v2442_v51 = vsel %vm2441_vm10, %v2431_v38, %v2435_v45  ;;  %v2444_v46 = vsel %vm2443_vm5, %v2432_v6, %v2436_v22  ;;  %v2446_v37 = vsel %vm2445_vm4, %v2433_v26, %v2437_v29  ;;  %v4020_v22 = vld [vmem:[#allocation15 + $0xb8] sm:$0xff]  ;;  %v4021_v29 = vld [vmem:[#allocation15 + $0xc0] sm:$0xff]  ;;  %v4022_v53 = vld [vmem:[#allocation15 + $0xc8] sm:$0xff] }
 0x5ef   :  { %vm2447_vm11 = vcmp.lt.s32.totalorder %v2440_v15, %v2438_v3  ;;  %vm2451_vm8 = vcmp.lt.s32.totalorder %v2444_v46, %v2446_v37  ;;  %v2679_v36 = vmin.f32 %v2678_v40, %v4015_v11  ;;  %v2680_v44 = vmin.f32 %v2678_v40, %v4016_v57  ;;  %v4024_v11 = vld [vmem:[#allocation15] sm:$0xff] }
 0x5f0   :  { %v2448_v14 = vsel %vm2447_vm11, %v2440_v15, %v2438_v3  ;;  %v2452_v2 = vsel %vm2451_vm8, %v2444_v46, %v2446_v37  ;;  %v2681_v7 = vmin.f32 %v2678_v40, %v4017_v62  ;;  %v2682_v20 = vmin.f32 %v2678_v40, %v4018_v27  ;;  %v4023_v15 = vld [vmem:[#allocation15 + $0xd0] sm:$0xff]  ;;  %v4025_v37 = vld [vmem:[#allocation15 + $0x8] sm:$0xff] }
 0x5f1   :  { %vm2449_vm0 = vcmp.lt.s32.totalorder %v2448_v14, %v2442_v51  ;;  %v2683_v18 = vmin.f32 %v2678_v40, %v4019_v55  ;;  %v2684_v26 = vmin.f32 %v2678_v40, %v4020_v22  ;;  %v2685_v38 = vmin.f32 %v2678_v40, %v4021_v29  ;;  %v4026_v55 = vld [vmem:[#allocation15 + $0x10] sm:$0xff]  ;;  %v4028_v22 = vld [vmem:[#allocation15 + $0x20] sm:$0xff] }
 0x5f2   :  { %v2450_v45 = vsel %vm2449_vm0, %v2448_v14, %v2442_v51  ;;  %v2686_v6 = vmin.f32 %v2678_v40, %v4022_v53  ;;  %v2687_v57 = vmin.f32 %v2678_v40, %v4023_v15  ;;  %v2689_v62 = vmax.f32 %v2688_v60, %v4024_v11  ;;  %v4027_v51 = vld [vmem:[#allocation15 + $0x18] sm:$0xff]  ;;  %v4032_v15 = vld [vmem:[#allocation15 + $0x40] sm:$0xff] }
 0x5f3   :  { %vm2453_vm5 = vcmp.lt.s32.totalorder %v2450_v45, %v2452_v2  ;;  %v2690_v27 = vmax.f32 %v2688_v60, %v4025_v37  ;;  %v2691_v14 = vmax.f32 %v2688_v60, %v4026_v55  ;;  %v2692_v3 = vmax.f32 %v2688_v60, %v4027_v51 }
 0x5f4   :  { %v7829_v46 = vsel %vm2453_vm5, %v2450_v45, %v2452_v2  ;;  %v2693_v29 = vmax.f32 %v2688_v60, %v4028_v22  ;;  %v2694_v49 = vmax.f32 %v2688_v60, %v4029_v35  ;;  %v2695_v54 = vmax.f32 %v2688_v60, %v4030_v56 }
 0x5f5   :  { %12286 = vst [vmem:[#allocation164_spill] sm:$0xff] %v7829_v46  ;;  %v2456_v53 = vshra.s32 %v7829_v46, 16  ;;  %v2696_v40 = vmax.f32 %v2688_v60, %v4031_v42  ;;  %v2697_v11 = vmax.f32 %v2688_v60, %v4032_v15  ;;  %v7832_v61 = vsub.f32 %v2679_v36, %v2689_v62  ;;  %v12288_v42 = vld [vmem:[#allocation58_spill] sm:$0xff]  ;;  %v4043_v46 = vld [vmem:[#allocation15 + $0x50] sm:$0xff] }
 0x5f6   :  { %v7834_v2 = vsub.f32 %v2680_v44, %v2690_v27  ;;  %v7836_v45 = vsub.f32 %v2681_v7, %v2691_v14  ;;  %v7840_v55 = vsub.f32 %v2682_v20, %v2692_v3  ;;  %v7842_v51 = vsub.f32 %v2683_v18, %v2693_v29  ;;  %v12290_v44 = vld [vmem:[#allocation47_spill] sm:$0xff]  ;;  %v4033_v3 = vld [vmem:[#allocation15 + $0xd8] sm:$0xff]  ;;  %v4034_v29 = vld [vmem:[#allocation15 + $0xe0] sm:$0xff] }
 0x5f7   :  { %v7838_v37 = vcvt.s32.f32 %v2456_v53  ;;  %v7844_v35 = vsub.f32 %v2684_v26, %v2694_v49  ;;  %vm12289_vm7 = vcmp.gt.f32.partialorder %v12288_v42, -1.0  ;;  %v7851_v36 = vsub.f32 %v2685_v38, %v2695_v54  ;;  %v4039_v26 = vld [vmem:[#allocation15 + $0x108] sm:$0xff]  ;;  %v4040_v54 = vld [vmem:[#allocation15 + $0x110] sm:$0xff]  ;;  %v4041_v18 = vld [vmem:[#allocation15 + $0x118] sm:$0xff] }
 0x5f8   :  { %v7849_v56 = vsel %vm12289_vm7, %v12143_v43, 0  ;;  %v7853_v7 = vsub.f32 %v2686_v6, %v2696_v40  ;;  %v7855_v20 = vsub.f32 %v2687_v57, %v2697_v11  ;;  %vm12291_vm3 = vcmp.gt.f32.partialorder %v12290_v44, -1.0  ;;  %v4035_v40 = vld [vmem:[#allocation15 + $0xe8] sm:$0xff]  ;;  %v4036_v11 = vld [vmem:[#allocation15 + $0xf0] sm:$0xff]  ;;  %v4037_v44 = vld [vmem:[#allocation15 + $0xf8] sm:$0xff] }
 0x5f9   :  { %12287 = vst [vmem:[#allocation114_spill] sm:$0xff] %v7838_v37  ;;  %v7860_v49 = vsel %vm12291_vm3, %v12143_v43, 0  ;;  %2459 = vmin.xlane.f32.xlu0 %v7838_v37  ;;  %v2716_v27 = vstv %s7827_s14  ;;  %v2726_v14 = vstv %s7825_s13  ;;  %v4038_v6 = vld [vmem:[#allocation15 + $0x100] sm:$0xff]  ;;  %v4042_v37 = vld [vmem:[#allocation15 + $0x48] sm:$0xff] }
 0x5fa   :  { %v2717_v22 = vmin.f32 %v2716_v27, %v4033_v3  ;;  %v2718_v53 = vmin.f32 %v2716_v27, %v4034_v29  ;;  %v2719_v15 = vmin.f32 %v2716_v27, %v4035_v40  ;;  %v2720_v42 = vmin.f32 %v2716_v27, %v4036_v11 }
 0x5fb   :  { %v2721_v57 = vmin.f32 %v2716_v27, %v4037_v44  ;;  %v2722_v38 = vmin.f32 %v2716_v27, %v4038_v6  ;;  %v2723_v43 = vmin.f32 %v2716_v27, %v4039_v26  ;;  %v2724_v62 = vmin.f32 %v2716_v27, %v4040_v54  ;;  %v4049_v54 = vld [vmem:[#allocation15 + $0x80] sm:$0xff] }
 0x5fc   :  { %v2725_v60 = vmin.f32 %v2716_v27, %v4041_v18  ;;  %v2727_v3 = vmax.f32 %v2726_v14, %v4042_v37  ;;  %v2728_v29 = vmax.f32 %v2726_v14, %v4043_v46  ;;  %v2729_v40 = vmax.f32 %v2726_v14, %v4044_v28 }
 0x5fd   :  { %v2730_v11 = vmax.f32 %v2726_v14, %v4045_v33  ;;  %v2731_v44 = vmax.f32 %v2726_v14, %v4046_v50  ;;  %v2732_v6 = vmax.f32 %v2726_v14, %v4047_v5  ;;  %v2733_v26 = vmax.f32 %v2726_v14, %v4048_v13 }
 0x5fe   :  { %v2734_v39 = vmax.f32 %v2726_v14, %v4049_v54  ;;  %v2735_v19 = vmax.f32 %v2726_v14, %v4050_v31  ;;  %v2736_v18 = vsub.f32 %v2717_v22, %v2727_v3  ;;  %v2737_v27 = vsub.f32 %v2718_v53, %v2728_v29  ;;  %v4052_v22 = vld [vmem:[#allocation15 + $0x128] sm:$0xff]  ;;  %v4054_v53 = vld [vmem:[#allocation15 + $0x138] sm:$0xff]  ;;  %v4057_v29 = vld [vmem:[#allocation15 + $0x150] sm:$0xff] }
 0x5ff   :  { %v2738_v37 = vsub.f32 %v2719_v15, %v2729_v40  ;;  %v2739_v47 = vsub.f32 %v2720_v42, %v2730_v11  ;;  %v2740_v46 = vsub.f32 %v2721_v57, %v2731_v44  ;;  %v2741_v17 = vsub.f32 %v2722_v38, %v2732_v6  ;;  %v4055_v42 = vld [vmem:[#allocation15 + $0x140] sm:$0xff]  ;;  %v4058_v11 = vld [vmem:[#allocation15 + $0x158] sm:$0xff] }
 0x600   :  { %v2742_v28 = vsub.f32 %v2723_v43, %v2733_v26  ;;  %v2743_v12 = vsub.f32 %v2724_v62, %v2734_v39  ;;  %v2744_v33 = vsub.f32 %v2725_v60, %v2735_v19  ;;  %v2745_v52 = vmax.f32 %v2736_v18, 0.0  ;;  %v4059_v18 = vld [vmem:[#allocation15 + $0x160] sm:$0xff] }
 0x601   :  { %v2746_v50 = vmax.f32 %v2737_v27, 0.0  ;;  %v2747_v10 = vmax.f32 %v2738_v37, 0.0  ;;  %v2748_v5 = vmax.f32 %v2739_v47, 0.0  ;;  %v2749_v9 = vmax.f32 %v2740_v46, 0.0 }
 0x602   :  { %v2750_v13 = vmax.f32 %v2741_v17, 0.0  ;;  %v2751_v16 = vmax.f32 %v2742_v28, 0.0  ;;  %v2752_v1 = vmax.f32 %v2743_v12, 0.0  ;;  %v2763_v54 = vstv %s2671_s17  ;;  %v12302_v28 = vld [vmem:[#allocation35_spill] sm:$0xff] }
 0x603   :  { %v2753_v48 = vmax.f32 %v2744_v33, 0.0  ;;  %v12292_v31 = vmax.f32 %v7832_v61, 0.0  ;;  %v12293_v57 = vmax.f32 %v7834_v2, 0.0  ;;  %v12294_v19 = vmax.f32 %v7836_v45, 0.0 }
 0x604   :  { %v12295_v47 = vmax.f32 %v7840_v55, 0.0  ;;  %v12296_v12 = vmax.f32 %v7842_v51, 0.0  ;;  %v12297_v61 = vmax.f32 %v7844_v35, 0.0  ;;  %v12298_v2 = vmax.f32 %v7851_v36, 0.0  ;;  %v4051_v55 = vld [vmem:[#allocation15 + $0x120] sm:$0xff] }
 0x605   :  { %v7886_v14 = vmul.f32 %v2745_v52, %v12292_v31  ;;  %v7890_v38 = vmul.f32 %v2746_v50, %v12293_v57  ;;  %v7894_v39 = vmul.f32 %v2747_v10, %v12294_v19  ;;  %v12299_v45 = vmax.f32 %v7853_v7, 0.0  ;;  %v12304_v50 = vld [vmem:[#allocation39_spill] sm:$0xff]  ;;  %v12310_v19 = vld [vmem:[#allocation40_spill] sm:$0xff] }
 0x606   :  { %v7898_v60 = vmul.f32 %v2748_v5, %v12295_v47  ;;  %v7902_v17 = vmul.f32 %v2749_v9, %v12296_v12  ;;  %v7906_v52 = vmul.f32 %v2750_v13, %v12297_v61  ;;  %v7910_v43 = vmul.f32 %v2751_v16, %v12298_v2  ;;  %v4053_v9 = vld [vmem:[#allocation15 + $0x130] sm:$0xff]  ;;  %v4056_v16 = vld [vmem:[#allocation15 + $0x148] sm:$0xff] }
 0x607   :  { %v7914_v10 = vmul.f32 %v2752_v1, %v12299_v45  ;;  %v2764_v62 = vadd.f32 %v4051_v55, %v2763_v54  ;;  %v2765_v51 = vadd.f32 %v4052_v22, %v2763_v54  ;;  %v2766_v35 = vadd.f32 %v4053_v9, %v2763_v54  ;;  %v12312_v61 = vld [vmem:[#allocation42_spill] sm:$0xff]  ;;  %v12314_v45 = vld [vmem:[#allocation43_spill] sm:$0xff]  ;;  %v12316_v22 = vld [vmem:[#allocation105_spill] sm:$0xff] }
 0x608   :  { %v2767_v15 = vadd.f32 %v4054_v53, %v2763_v54  ;;  %v2768_v36 = vadd.f32 %v4055_v42, %v2763_v54  ;;  %v2769_v3 = vadd.f32 %v4056_v16, %v2763_v54  ;;  %v2770_v7 = vadd.f32 %v4057_v29, %v2763_v54 }
 0x609   :  { %v12300_v1 = vmax.f32 %v7855_v20, 0.0  ;;  %v2771_v44 = vadd.f32 %v4058_v11, %v2763_v54  ;;  %v7923_v6 = vsub.f32 %v2764_v62, %v7886_v14  ;;  %v7926_v26 = vsub.f32 %v2765_v51, %v7890_v38  ;;  %v12301_v20 = vld [vmem:[#allocation87_spill] sm:$0xff]  ;;  %v12332_v11 = vld [vmem:[#allocation116_spill] sm:$0xff] }
 0x60a   :  { %v2772_v27 = vadd.f32 %v4059_v18, %v2763_v54  ;;  %v7931_v37 = vsub.f32 %v2766_v35, %v7894_v39  ;;  %v7934_v46 = vsub.f32 %v2767_v15, %v7898_v60  ;;  %vm12303_vm9 = vnez %v12302_v28  ;;  %v12306_v54 = vld [vmem:[#allocation30_spill] sm:$0xff]  ;;  %v12334_v18 = vld [vmem:[#allocation131_spill] sm:$0xff] }
 0x60b   :  { %v7920_v40 = vmul.f32 %v2753_v48, %v12300_v1  ;;  %v7937_v48 = vsub.f32 %v2768_v36, %v7902_v17  ;;  %v1185_v33 = vsel %vm12303_vm9, %v12301_v20, %v7860_v49  ;;  %vm12305_vm15 = vnez %v12304_v50  ;;  %v12337_v28 = vld [vmem:[#allocation130_spill] sm:$0xff] }
 0x60c   :  { %v1186_v5 = vsel %vm12305_vm15, %v12301_v20, %v7433_v23  ;;  %v7948_v13 = vsub.f32 %v2769_v3, %v7906_v52  ;;  %vm2782_vm6 = vcmp.gt.f32.partialorder %v7923_v6, 0.0  ;;  %vm12307_vm10 = vnez %v12306_v54  ;;  %v12308_v23 = vld [vmem:[#allocation31_spill] sm:$0xff]  ;;  %v12328_v3 = vld [vmem:[#allocation165_spill] sm:$0xff]  ;;  %v12342_v54 = vld [vmem:[#allocation134_spill] sm:$0xff] }
 0x60d   :  { %v1187_v31 = vsel %vm12307_vm10, %v12301_v20, %v7438_v24  ;;  %v7956_v57 = vsub.f32 %v2770_v7, %v7910_v43  ;;  %vm2783_vm4 = vcmp.gt.f32.partialorder %v7926_v26, 0.0  ;;  %vm11202_vm11 = vcmp.gt.f32.partialorder %v7931_v37, 0.0 }
 0x60e   :  { %vm12309_vm8 = vnez %v12308_v23  ;;  %vm12311_vm0 = vnez %v12310_v19  ;;  %v7969_v12 = vsub.f32 %v2771_v44, %v7914_v10  ;;  %vm11201_vm5 = vcmp.gt.f32.partialorder %v7934_v46, 0.0  ;;  %v12333_v44 = vld [vmem:[#allocation127_spill] sm:$0xff] }
 0x60f   :  { %v1188_v49 = vsel %vm12309_vm8, %v12301_v20, %v7443_v30  ;;  %v1189_v47 = vsel %vm12311_vm0, %v12301_v20, %v7448_v4  ;;  %v7975_v24 = vsub.f32 %v2772_v27, %v7920_v40  ;;  %vm11196_vm7 = vcmp.gt.f32.partialorder %v7937_v48, 0.0  ;;  %v12347_v19 = vld [vmem:[#allocation135_spill] sm:$0xff] }
 0x610   :  { %v2791_v30 = vsel %vm2782_vm6, %v7923_v6, 1.0  ;;  %v2792_v4 = vsel %vm2783_vm4, %v7926_v26, 1.0  ;;  %vm12313_vm3 = vnez %v12312_v61  ;;  %vm12315_vm9 = vnez %v12314_v45  ;;  %v12352_v61 = vld [vmem:[#allocation137_spill] sm:$0xff] }
 0x611   :  { %v1190_v2 = vsel %vm12313_vm3, %v12301_v20, %v7453_v58  ;;  %v1191_v55 = vsel %vm12315_vm9, %v12301_v20, %v7798_v8  ;;  %vm11200_vm15 = vcmp.gt.f32.partialorder %v7948_v13, 0.0  ;;  %v2793_v62 = vsel %vm11202_vm11, %v7931_v37, 1.0  ;;  %v12318_v8 = vld [vmem:[#allocation106_spill] sm:$0xff] }
 0x612   :  { %vm12317_vm10 = vnez %v12316_v22  ;;  %vm11199_vm8 = vcmp.gt.f32.partialorder %v7956_v57, 0.0  ;;  %v2794_v58 = vsel %vm11201_vm5, %v7934_v46, 1.0  ;;  %3880 = vrcp.f32 %v2791_v30  ;;  %v12358_v22 = vld [vmem:[#allocation144_spill] sm:$0xff] }
 0x613   :  { %v1192_v51 = vsel %vm12317_vm10, %v12301_v20, %v7806_v25  ;;  %vm12319_vm0 = vnez %v12318_v8  ;;  %vm11198_vm3 = vcmp.gt.f32.partialorder %v7969_v12, 0.0  ;;  %v2795_v35 = vsel %vm11196_vm7, %v7937_v48, 1.0  ;;  %v12362_v8 = vld [vmem:[#allocation141_spill] sm:$0xff] }
 0x614   :  { %v1193_v9 = vsel %vm12319_vm0, %v12301_v20, %v7849_v56  ;;  %3882 = vrcp.f32 %v2792_v4  ;;  %vm12320_vm9 = vnez %v12021_v0  ;;  %vm11197_vm10 = vcmp.gt.f32.partialorder %v7975_v24, 0.0  ;;  %v12336_v20 = vld [vmem:[#allocation117_spill] sm:$0xff]  ;;  %v12351_v4 = vld [vmem:[#allocation120_spill] sm:$0xff] }
 0x615   :  { %v8015_v25 = vsel %vm12320_vm9, %v7455_v59, %v1185_v33  ;;  %v2796_v53 = vsel %vm11200_vm15, %v7948_v13, 1.0  ;;  %3884 = vrcp.f32 %v2793_v62  ;;  %vm12321_vm0 = vnez %v12025_v32  ;;  %v12338_v33 = vld [vmem:[#allocation136_spill] sm:$0xff] }
 0x616   :  { %v8024_v56 = vsel %vm12321_vm0, %v7455_v59, %v1186_v5  ;;  %vm12322_vm7 = vnez %v12029_v21  ;;  %v2797_v15 = vsel %vm11199_vm8, %v7956_v57, 1.0  ;;  %3886 = vrcp.f32 %v2794_v58  ;;  %v12341_v5 = vld [vmem:[#allocation118_spill] sm:$0xff]  ;;  %v12357_v62 = vld [vmem:[#allocation140_spill] sm:$0xff] }
 0x617   :  { %v8029_v0 = vsel %vm12322_vm7, %v7455_v59, %v1187_v31  ;;  %vm12323_vm9 = vnez %v12033_v63  ;;  %vm12324_vm0 = vnez %v12037_v41  ;;  %v2798_v21 = vsel %vm11198_vm3, %v7969_v12, 1.0  ;;  %v12326_v63 = vld [vmem:[#allocation163_spill] sm:$0xff]  ;;  %v12343_v31 = vld [vmem:[#allocation138_spill] sm:$0xff] }
 0x618   :  { %v8037_v42 = vsel %vm12323_vm9, %v7455_v59, %v1188_v49  ;;  %v8042_v32 = vsel %vm12324_vm0, %v7455_v59, %v1189_v47  ;;  %3888 = vrcp.f32 %v2795_v35  ;;  %vm12325_vm7 = vnez %v12041_v34  ;;  %v12330_v34 = vld [vmem:[#allocation166_spill] sm:$0xff]  ;;  %v12346_v49 = vld [vmem:[#allocation119_spill] sm:$0xff] }
 0x619   :  { %v8050_v36 = vsel %vm12325_vm7, %v7455_v59, %v1190_v2  ;;  %vm12327_vm9 = vnez %v12326_v63  ;;  %v2799_v41 = vsel %vm11197_vm10, %v7975_v24, 1.0  ;;  %3890 = vrcp.f32 %v2796_v53  ;;  %v12348_v47 = vld [vmem:[#allocation139_spill] sm:$0xff]  ;;  %v12353_v2 = vld [vmem:[#allocation142_spill] sm:$0xff] }
 0x61a   :  { %v8055_v16 = vsel %vm12327_vm9, %v7455_v59, %v1191_v55  ;;  %vm12329_vm0 = vnez %v12328_v3  ;;  %vm12331_vm7 = vnez %v12330_v34  ;;  %v8071_v1 = vstv %s7972_s20  ;;  %v12356_v55 = vld [vmem:[#allocation121_spill] sm:$0xff]  ;;  %v12361_v58 = vld [vmem:[#allocation122_spill] sm:$0xff]  ;;  %v12366_v53 = vld [vmem:[#allocation123_spill] sm:$0xff] }
 0x61b   :  { %v8063_v29 = vsel %vm12329_vm0, %v7455_v59, %v1192_v51  ;;  %v8068_v7 = vsel %vm12331_vm7, %v7455_v59, %v1193_v9  ;;  %3892 = vrcp.f32 %v2797_v15  ;;  %vm12335_vm9 = vnez %v12334_v18  ;;  %v12363_v9 = vld [vmem:[#allocation145_spill] sm:$0xff]  ;;  %v12367_v15 = vld [vmem:[#allocation143_spill] sm:$0xff]  ;;  %v12371_v3 = vld [vmem:[#allocation124_spill] sm:$0xff] }
 0x61c   :  { %v8080_v27 = vsel %vm12335_vm9, %v12333_v44, %v12332_v11  ;;  %vm12339_vm0 = vnez %v12338_v33  ;;  %vm12344_vm7 = vnez %v12343_v31  ;;  %3894 = vrcp.f32 %v2798_v21  ;;  %v12368_v21 = vld [vmem:[#allocation147_spill] sm:$0xff]  ;;  %v12372_v34 = vld [vmem:[#allocation146_spill] sm:$0xff]  ;;  %v12373_v11 = vld [vmem:[#allocation148_spill] sm:$0xff] }
 0x61d   :  { %v8086_v50 = vsel %vm12339_vm0, %v12337_v28, %v12336_v20  ;;  %v8092_v23 = vsel %vm12344_vm7, %v12342_v54, %v12341_v5  ;;  %vm12349_vm10 = vnez %v12348_v47  ;;  %vm12354_vm3 = vnez %v12353_v2  ;;  %v3881_v20 = vpop.eup %3880 }
 0x61e   :  { %12340 = vst [vmem:[#allocation115_spill] sm:$0xff] %v8086_v50  ;;  %12345 = vst [vmem:[#allocation86_spill] sm:$0xff] %v8092_v23  ;;  %v8101_v30 = vsel %vm12349_vm10, %v12347_v19, %v12346_v49  ;;  %v8107_v45 = vsel %vm12354_vm3, %v12352_v61, %v12351_v4  ;;  %vm12359_vm8 = vnez %v12358_v22  ;;  %3896 = vrcp.f32 %v2799_v41  ;;  %v3883_v19 = vpop.eup %3882  ;;  %v12423_v49 = vld [vmem:[#allocation59_spill] sm:$0xff] }
 0x61f   :  { %12350 = vst [vmem:[#allocation48_spill] sm:$0xff] %v8101_v30  ;;  %12355 = vst [vmem:[#allocation50_spill] sm:$0xff] %v8107_v45  ;;  %v8113_v51 = vsel %vm12359_vm8, %v12357_v62, %v12356_v55  ;;  %vm12364_vm15 = vnez %v12363_v9  ;;  %vm12369_vm5 = vnez %v12368_v21  ;;  %vm12374_vm11 = vnez %v12373_v11 }
 0x620   :  { %12360 = vst [vmem:[#allocation51_spill] sm:$0xff] %v8113_v51  ;;  %v8122_v35 = vsel %vm12364_vm15, %v12362_v8, %v12361_v58  ;;  %v8128_v63 = vsel %vm12369_vm5, %v12367_v15, %v12366_v53  ;;  %v8134_v44 = vsel %vm12374_vm11, %v12372_v34, %v12371_v3  ;;  %v2801_v62 = vmul.f32 %v3881_v20, %v7886_v14  ;;  %v3885_v58 = vpop.eup %3884 }
 0x621   :  { %12365 = vst [vmem:[#allocation52_spill] sm:$0xff] %v8122_v35  ;;  %12370 = vst [vmem:[#allocation53_spill] sm:$0xff] %v8128_v63  ;;  %v2803_v53 = vmul.f32 %v3883_v19, %v7890_v38  ;;  %v8175_v15 = vstv %s2673_s23  ;;  %v8177_v3 = vstv %s2675_s24  ;;  %v3887_v34 = vpop.eup %3886  ;;  %v2805_v61 = vmul.f32 %v3885_v58, %v7894_v39 }
 0x622   :  { %12375 = vst [vmem:[#allocation111_spill] sm:$0xff] %v8134_v44  ;;  %v8182_v55 = vsel %vm2782_vm6, %v2801_v62, 0.0  ;;  %v8186_v14 = vstv %s2676_s22  ;;  %v8188_v20 = vstv %s2677_s2  ;;  %v3889_v4 = vpop.eup %3888  ;;  %v2807_v8 = vmul.f32 %v3887_v34, %v7898_v60 }
 0x623   :  { %12376 = vst [vmem:[#allocation88_spill] sm:$0xff] %v8186_v14  ;;  %12377 = vst [vmem:[#allocation112_spill] sm:$0xff] %v8188_v20  ;;  %v8193_v38 = vsel %vm2783_vm4, %v2803_v53, 0.0  ;;  %vm8197_vm14 = vcmp.gt.f32.partialorder %v8182_v55, %v8080_v27  ;;  %v12378_v39 = vmov 0  ;;  %v8202_v6 = vstv %s8073_s21  ;;  %v3891_v19 = vpop.eup %3890 }
 0x624   :  { %v12379_v39 = vsel %vm8197_vm14, 4294967295, %v12378_v39  ;;  %12380 = vst [vmem:[#allocation125_spill] sm:$0xff] %v8202_v6  ;;  %v2809_v62 = vmul.f32 %v3889_v4, %v7902_v17  ;;  %vm12381_vm6 = vcmp.gt.f32.partialorder %v7931_v37, 0.0  ;;  %vm8211_vm12 = vcmp.gt.f32.partialorder %v8193_v38, %v8086_v50 }
 0x625   :  { %v8207_v58 = vsel %vm12381_vm6, %v2805_v61, 0.0  ;;  %v12382_v60 = vmov 0  ;;  %v3893_v53 = vpop.eup %3892  ;;  %v2811_v34 = vmul.f32 %v3891_v19, %v7906_v52  ;;  %vm12385_vm4 = vcmp.gt.f32.partialorder %v7934_v46, 0.0 }
 0x626   :  { %v12383_v60 = vsel %vm8211_vm12, 4294967295, %v12382_v60  ;;  %v8222_v17 = vsel %vm12385_vm4, %v2807_v8, 0.0  ;;  %vm8226_vm6 = vcmp.gt.f32.partialorder %v8207_v58, %v8092_v23  ;;  %v12386_v37 = vmov 0  ;;  %v3895_v61 = vpop.eup %3894 }
 0x627   :  { %12384 = vst [vmem:[#allocation45_spill] sm:$0xff] %v12383_v60  ;;  %v12387_v37 = vsel %vm8226_vm6, 4294967295, %v12386_v37  ;;  %v2813_v26 = vmul.f32 %v3893_v53, %v7910_v43  ;;  %vm12389_vm1 = vcmp.gt.f32.partialorder %v7937_v48, 0.0  ;;  %vm8241_vm4 = vcmp.gt.f32.partialorder %v8222_v17, %v8101_v30 }
 0x628   :  { %12388 = vst [vmem:[#allocation133_spill] sm:$0xff] %v12387_v37  ;;  %v8237_v52 = vsel %vm12389_vm1, %v2809_v62, 0.0  ;;  %v12390_v46 = vmov 0  ;;  %v3897_v19 = vpop.eup %3896  ;;  %v2815_v4 = vmul.f32 %v3895_v61, %v7914_v10  ;;  %vm12393_vm13 = vcmp.gt.f32.partialorder %v7948_v13, 0.0 }
 0x629   :  { %v12391_v46 = vsel %vm8241_vm4, 4294967295, %v12390_v46  ;;  %v8252_v43 = vsel %vm12393_vm13, %v2811_v34, 0.0  ;;  %vm8256_vm1 = vcmp.gt.f32.partialorder %v8237_v52, %v8107_v45  ;;  %v12394_v48 = vmov 0  ;;  %v12609_v45 = vld [vmem:[#allocation176_spill] sm:$0xff] }
 0x62a   :  { %12392 = vst [vmem:[#allocation169_spill] sm:$0xff] %v12391_v46  ;;  %v12395_v48 = vsel %vm8256_vm1, 4294967295, %v12394_v48  ;;  %v2817_v53 = vmul.f32 %v3897_v19, %v7920_v40  ;;  %vm12397_vm2 = vcmp.gt.f32.partialorder %v7956_v57, 0.0  ;;  %vm8271_vm13 = vcmp.gt.f32.partialorder %v8252_v43, %v8113_v51  ;;  %v12406_v19 = vld [vmem:[#allocation32_spill] sm:$0xff] }
 0x62b   :  { %12396 = vst [vmem:[#allocation102_spill] sm:$0xff] %v12395_v48  ;;  %v8267_v10 = vsel %vm12397_vm2, %v2813_v26, 0.0  ;;  %v12398_v13 = vmov 0  ;;  %vm12401_vm11 = vcmp.gt.f32.partialorder %v7969_v12, 0.0  ;;  %v12402_v40 = vmov 0  ;;  %v12405_v26 = vld [vmem:[#allocation126_spill] sm:$0xff] }
 0x62c   :  { %v12399_v13 = vsel %vm8271_vm13, 4294967295, %v12398_v13  ;;  %v8281_v61 = vsel %vm12401_vm11, %v2815_v4, 0.0  ;;  %vm8285_vm5 = vcmp.gt.f32.partialorder %v8267_v10, %v8122_v35  ;;  %v12407_v34 = vsel %vm12335_vm9, %v12405_v26, %v12406_v19 }
 0x62d   :  { %12400 = vst [vmem:[#allocation173_spill] sm:$0xff] %v12399_v13  ;;  %v12403_v40 = vsel %vm8285_vm5, 4294967295, %v12402_v40  ;;  %v8301_v12 = vsel %vm8197_vm14, %v8175_v15, %v12407_v34  ;;  %vm12409_vm2 = vcmp.gt.f32.partialorder %v7975_v24, 0.0  ;;  %vm8309_vm11 = vcmp.gt.f32.partialorder %v8281_v61, %v8128_v63  ;;  %v12414_v34 = vld [vmem:[#allocation55_spill] sm:$0xff]  ;;  %v12595_v63 = vld [vmem:[#allocation172_spill] sm:$0xff] }
 0x62e   :  { %12404 = vst [vmem:[#allocation103_spill] sm:$0xff] %v12403_v40  ;;  %12408 = vst [vmem:[#allocation177_spill] sm:$0xff] %v8301_v12  ;;  %v8305_v4 = vsel %vm12409_vm2, %v2817_v53, 0.0  ;;  %v12411_v62 = vmov 0  ;;  %v12415_v57 = vsel %vm12339_vm0, %v12405_v26, %v12414_v34  ;;  %v12417_v53 = vmov 0  ;;  %v12420_v34 = vld [vmem:[#allocation57_spill] sm:$0xff] }
 0x62f   :  { %12410 = vst [vmem:[#allocation107_spill] sm:$0xff] %v8305_v4  ;;  %v12412_v62 = vsel %vm8309_vm11, 4294967295, %v12411_v62  ;;  %v8325_v24 = vsel %vm8211_vm12, %v8175_v15, %v12415_v57  ;;  %vm8329_vm2 = vcmp.gt.f32.partialorder %v8305_v4, %v8134_v44  ;;  %v12421_v8 = vsel %vm12344_vm7, %v12405_v26, %v12420_v34  ;;  %v12432_v34 = vld [vmem:[#allocation62_spill] sm:$0xff]  ;;  %v12579_v12 = vld [vmem:[#allocation168_spill] sm:$0xff]  ;;  %v12592_v40 = vld [vmem:[#allocation171_spill] sm:$0xff] }
 0x630   :  { %12413 = vst [vmem:[#allocation181_spill] sm:$0xff] %v12412_v62  ;;  %12416 = vst [vmem:[#allocation108_spill] sm:$0xff] %v8325_v24  ;;  %v12418_v53 = vsel %vm8329_vm2, 4294967295, %v12417_v53  ;;  %v8345_v57 = vsel %vm8226_vm6, %v8175_v15, %v12421_v8  ;;  %v12424_v54 = vsel %vm12349_vm10, %v12405_v26, %v12423_v49  ;;  %v12426_v8 = vld [vmem:[#allocation60_spill] sm:$0xff]  ;;  %v12505_v24 = vld [vmem:[#allocation79_spill] sm:$0xff] }
 0x631   :  { %12419 = vst [vmem:[#allocation185_spill] sm:$0xff] %v12418_v53  ;;  %12422 = vst [vmem:[#allocation109_spill] sm:$0xff] %v8345_v57  ;;  %v8355_v5 = vsel %vm8241_vm4, %v8175_v15, %v12424_v54  ;;  %v12427_v19 = vsel %vm12354_vm3, %v12405_v26, %v12426_v8  ;;  %v12429_v54 = vld [vmem:[#allocation61_spill] sm:$0xff]  ;;  %v12433_v8 = vsel %vm12364_vm15, %v12405_v26, %v12432_v34  ;;  %v12474_v57 = vld [vmem:[#allocation72_spill] sm:$0xff] }
 0x632   :  { %12425 = vst [vmem:[#allocation189_spill] sm:$0xff] %v8355_v5  ;;  %v8369_v28 = vsel %vm8256_vm1, %v8175_v15, %v12427_v19  ;;  %v12430_v49 = vsel %vm12359_vm8, %v12405_v26, %v12429_v54  ;;  %v8389_v19 = vsel %vm8285_vm5, %v8175_v15, %v12433_v8  ;;  %vm12435_vm1 = vnez %v12368_v21  ;;  %v12444_v5 = vld [vmem:[#allocation33_spill] sm:$0xff]  ;;  %v12587_v62 = vld [vmem:[#allocation156_spill] sm:$0xff] }
 0x633   :  { %12428 = vst [vmem:[#allocation110_spill] sm:$0xff] %v8369_v28  ;;  %v8379_v41 = vsel %vm8271_vm13, %v8175_v15, %v12430_v49  ;;  %12434 = vst [vmem:[#allocation56_spill] sm:$0xff] %v8389_v19  ;;  %v12436_v28 = vld [vmem:[#allocation63_spill] sm:$0xff]  ;;  %vm12439_vm13 = vnez %v12373_v11  ;;  %v12443_v19 = vld [vmem:[#allocation128_spill] sm:$0xff]  ;;  %v3005_v11 = vmax.f32 %v8207_v58, %v8267_v10 }
 0x634   :  { %12431 = vst [vmem:[#allocation54_spill] sm:$0xff] %v8379_v41  ;;  %v12437_v54 = vsel %vm12435_vm1, %v12405_v26, %v12436_v28  ;;  %v12440_v41 = vld [vmem:[#allocation64_spill] sm:$0xff]  ;;  %v12445_v28 = vsel %vm12335_vm9, %v12443_v19, %v12444_v5 }
 0x635   :  { %v8399_v49 = vsel %vm8309_vm11, %v8175_v15, %v12437_v54  ;;  %v12441_v34 = vsel %vm12439_vm13, %v12405_v26, %v12440_v41  ;;  %v8419_v54 = vsel %vm8197_vm14, %v8177_v3, %v12445_v28 }
 0x636   :  { %12438 = vst [vmem:[#allocation58_spill] sm:$0xff] %v8399_v49  ;;  %v8409_v8 = vsel %vm8329_vm2, %v8175_v15, %v12441_v34  ;;  %12446 = vst [vmem:[#allocation87_spill] sm:$0xff] %v8419_v54  ;;  %v12447_v49 = vld [vmem:[#allocation90_spill] sm:$0xff] }
 0x637   :  { %12442 = vst [vmem:[#allocation47_spill] sm:$0xff] %v8409_v8  ;;  %v12448_v41 = vsel %vm12339_vm0, %v12443_v19, %v12447_v49  ;;  %v12450_v8 = vld [vmem:[#allocation65_spill] sm:$0xff]  ;;  %v12453_v54 = vld [vmem:[#allocation66_spill] sm:$0xff] }
 0x638   :  { %v8429_v34 = vsel %vm8211_vm12, %v8177_v3, %v12448_v41  ;;  %v12451_v5 = vsel %vm12344_vm7, %v12443_v19, %v12450_v8  ;;  %v12454_v49 = vsel %vm12349_vm10, %v12443_v19, %v12453_v54  ;;  %vm12458_vm7 = vnez %v12395_v48 }
 0x639   :  { %12449 = vst [vmem:[#allocation35_spill] sm:$0xff] %v8429_v34  ;;  %v8439_v28 = vsel %vm8226_vm6, %v8177_v3, %v12451_v5  ;;  %v8449_v41 = vsel %vm8241_vm4, %v8177_v3, %v12454_v49  ;;  %v12456_v34 = vld [vmem:[#allocation67_spill] sm:$0xff]  ;;  %vm12462_vm10 = vnez %v12399_v13 }
 0x63a   :  { %12452 = vst [vmem:[#allocation39_spill] sm:$0xff] %v8439_v28  ;;  %12455 = vst [vmem:[#allocation30_spill] sm:$0xff] %v8449_v41  ;;  %v12457_v8 = vsel %vm12354_vm3, %v12443_v19, %v12456_v34  ;;  %v12460_v28 = vld [vmem:[#allocation68_spill] sm:$0xff]  ;;  %v12464_v41 = vld [vmem:[#allocation69_spill] sm:$0xff] }
 0x63b   :  { %v8459_v5 = vsel %vm12458_vm7, %v8177_v3, %v12457_v8  ;;  %v12461_v54 = vsel %vm12359_vm8, %v12443_v19, %v12460_v28  ;;  %v12465_v34 = vsel %vm12364_vm15, %v12443_v19, %v12464_v41 }
 0x63c   :  { %12459 = vst [vmem:[#allocation31_spill] sm:$0xff] %v8459_v5  ;;  %v8469_v49 = vsel %vm12462_vm10, %v8177_v3, %v12461_v54  ;;  %v8479_v8 = vsel %vm8285_vm5, %v8177_v3, %v12465_v34  ;;  %v12467_v5 = vld [vmem:[#allocation70_spill] sm:$0xff] }
 0x63d   :  { %12463 = vst [vmem:[#allocation40_spill] sm:$0xff] %v8469_v49  ;;  %12466 = vst [vmem:[#allocation42_spill] sm:$0xff] %v8479_v8  ;;  %v12468_v28 = vsel %vm12435_vm1, %v12443_v19, %v12467_v5  ;;  %v12470_v49 = vld [vmem:[#allocation71_spill] sm:$0xff]  ;;  %v12473_v8 = vld [vmem:[#allocation129_spill] sm:$0xff] }
 0x63e   :  { %v8489_v54 = vsel %vm8309_vm11, %v8177_v3, %v12468_v28  ;;  %v12471_v41 = vsel %vm12439_vm13, %v12443_v19, %v12470_v49  ;;  %v12475_v5 = vsel %vm12335_vm9, %v12473_v8, %v12474_v57 }
 0x63f   :  { %12469 = vst [vmem:[#allocation43_spill] sm:$0xff] %v8489_v54  ;;  %v8499_v34 = vsel %vm8329_vm2, %v8177_v3, %v12471_v41  ;;  %v8509_v28 = vsel %vm8197_vm14, %v8186_v14, %v12475_v5  ;;  %v12477_v54 = vld [vmem:[#allocation34_spill] sm:$0xff]  ;;  %vm12480_vm2 = vnez %v12343_v31  ;;  %vm12484_vm14 = vnez %v12348_v47 }
 0x640   :  { %12472 = vst [vmem:[#allocation105_spill] sm:$0xff] %v8499_v34  ;;  %12476 = vst [vmem:[#allocation106_spill] sm:$0xff] %v8509_v28  ;;  %v12478_v49 = vsel %vm12339_vm0, %v12473_v8, %v12477_v54  ;;  %v12481_v34 = vld [vmem:[#allocation91_spill] sm:$0xff]  ;;  %v12485_v28 = vld [vmem:[#allocation73_spill] sm:$0xff]  ;;  %v12537_v18 = vsel %vm12480_vm2, %v8071_v1, %v8029_v0  ;;  %v12538_v33 = vsel %vm12484_vm14, %v8071_v1, %v8037_v42 }
 0x641   :  { %v8519_v41 = vsel %vm8211_vm12, %v8186_v14, %v12478_v49  ;;  %v12482_v57 = vsel %vm12480_vm2, %v12473_v8, %v12481_v34  ;;  %v12486_v54 = vsel %vm12484_vm14, %v12473_v8, %v12485_v28  ;;  %v12540_v31 = vsel %vm12354_vm3, %v8071_v1, %v8042_v32 }
 0x642   :  { %12479 = vst [vmem:[#allocation163_spill] sm:$0xff] %v8519_v41  ;;  %v8529_v5 = vsel %vm8226_vm6, %v8186_v14, %v12482_v57  ;;  %v8539_v49 = vsel %vm8241_vm4, %v8186_v14, %v12486_v54  ;;  %v12488_v41 = vld [vmem:[#allocation74_spill] sm:$0xff]  ;;  %v12542_v47 = vsel %vm12359_vm8, %v8071_v1, %v8050_v36 }
 0x643   :  { %12483 = vst [vmem:[#allocation165_spill] sm:$0xff] %v8529_v5  ;;  %12487 = vst [vmem:[#allocation166_spill] sm:$0xff] %v8539_v49  ;;  %v12489_v34 = vsel %vm12354_vm3, %v12473_v8, %v12488_v41  ;;  %v12491_v5 = vld [vmem:[#allocation75_spill] sm:$0xff]  ;;  %v12494_v49 = vld [vmem:[#allocation76_spill] sm:$0xff]  ;;  %v2990_v42 = vsel %vm12462_vm10, %v8202_v6, %v12542_v47 }
 0x644   :  { %v8549_v57 = vsel %vm12458_vm7, %v8186_v14, %v12489_v34  ;;  %v12492_v28 = vsel %vm12359_vm8, %v12473_v8, %v12491_v5  ;;  %v12495_v41 = vsel %vm12364_vm15, %v12473_v8, %v12494_v49  ;;  %vm12502_vm15 = vnez %v12418_v53  ;;  %2999 = vst [vmem:[#allocation19 + $0x28] sm:$0xff] %v2990_v42  ;;  %v12582_v53 = vld [vmem:[#allocation46_spill] sm:$0xff] }
 0x645   :  { %12490 = vst [vmem:[#allocation116_spill] sm:$0xff] %v8549_v57  ;;  %v8559_v54 = vsel %vm12462_vm10, %v8186_v14, %v12492_v28  ;;  %v8569_v34 = vsel %vm8285_vm5, %v8186_v14, %v12495_v41  ;;  %v12497_v57 = vld [vmem:[#allocation77_spill] sm:$0xff] }
 0x646   :  { %12493 = vst [vmem:[#allocation127_spill] sm:$0xff] %v8559_v54  ;;  %12496 = vst [vmem:[#allocation131_spill] sm:$0xff] %v8569_v34  ;;  %v12498_v5 = vsel %vm12435_vm1, %v12473_v8, %v12497_v57  ;;  %v12500_v54 = vld [vmem:[#allocation78_spill] sm:$0xff]  ;;  %v12504_v34 = vld [vmem:[#allocation132_spill] sm:$0xff]  ;;  %vm12507_vm1 = vnez %v12379_v39 }
 0x647   :  { %v8579_v28 = vsel %vm8309_vm11, %v8186_v14, %v12498_v5  ;;  %v12501_v49 = vsel %vm12439_vm13, %v12473_v8, %v12500_v54  ;;  %v12506_v57 = vsel %vm12335_vm9, %v12504_v34, %v12505_v24 }
 0x648   :  { %12499 = vst [vmem:[#allocation117_spill] sm:$0xff] %v8579_v28  ;;  %v8589_v41 = vsel %vm12502_vm15, %v8186_v14, %v12501_v49  ;;  %v8599_v5 = vsel %vm12507_vm1, %v8188_v20, %v12506_v57  ;;  %v12509_v28 = vld [vmem:[#allocation80_spill] sm:$0xff]  ;;  %v12674_v14 = vld [vmem:[#allocation193_spill] sm:$0xff] }
 0x649   :  { %12503 = vst [vmem:[#allocation130_spill] sm:$0xff] %v8589_v41  ;;  %12508 = vst [vmem:[#allocation136_spill] sm:$0xff] %v8599_v5  ;;  %v12510_v54 = vsel %vm12339_vm0, %v12504_v34, %v12509_v28  ;;  %v12512_v41 = vld [vmem:[#allocation36_spill] sm:$0xff] }
 0x64a   :  { %v8609_v49 = vsel %vm8211_vm12, %v8188_v20, %v12510_v54  ;;  %v12513_v24 = vsel %vm12480_vm2, %v12504_v34, %v12512_v41  ;;  %v12515_v5 = vld [vmem:[#allocation92_spill] sm:$0xff] }
 0x64b   :  { %12511 = vst [vmem:[#allocation118_spill] sm:$0xff] %v8609_v49  ;;  %v8619_v57 = vsel %vm8226_vm6, %v8188_v20, %v12513_v24  ;;  %v12516_v28 = vsel %vm12484_vm14, %v12504_v34, %v12515_v5  ;;  %v12518_v49 = vld [vmem:[#allocation81_spill] sm:$0xff] }
 0x64c   :  { %12514 = vst [vmem:[#allocation134_spill] sm:$0xff] %v8619_v57  ;;  %v8629_v54 = vsel %vm8241_vm4, %v8188_v20, %v12516_v28  ;;  %v12519_v41 = vsel %vm12354_vm3, %v12504_v34, %v12518_v49  ;;  %v12521_v57 = vld [vmem:[#allocation82_spill] sm:$0xff]  ;;  %vm12524_vm4 = vnez %v12363_v9 }
 0x64d   :  { %12517 = vst [vmem:[#allocation138_spill] sm:$0xff] %v8629_v54  ;;  %v8639_v24 = vsel %vm12458_vm7, %v8188_v20, %v12519_v41  ;;  %v12522_v5 = vsel %vm12359_vm8, %v12504_v34, %v12521_v57  ;;  %v12525_v54 = vld [vmem:[#allocation83_spill] sm:$0xff]  ;;  %vm12528_vm7 = vnez %v12368_v21  ;;  %v12543_v2 = vsel %vm12524_vm4, %v8071_v1, %v8055_v16 }
 0x64e   :  { %12520 = vst [vmem:[#allocation119_spill] sm:$0xff] %v8639_v24  ;;  %v8649_v28 = vsel %vm12462_vm10, %v8188_v20, %v12522_v5  ;;  %v12526_v49 = vsel %vm12524_vm4, %v12504_v34, %v12525_v54  ;;  %v12529_v24 = vld [vmem:[#allocation84_spill] sm:$0xff]  ;;  %v2991_v32 = vsel %vm8285_vm5, %v8202_v6, %v12543_v2  ;;  %v12544_v36 = vsel %vm12528_vm7, %v8071_v1, %v8063_v29 }
 0x64f   :  { %12523 = vst [vmem:[#allocation135_spill] sm:$0xff] %v8649_v28  ;;  %v8659_v41 = vsel %vm8285_vm5, %v8188_v20, %v12526_v49  ;;  %v12530_v57 = vsel %vm12528_vm7, %v12504_v34, %v12529_v24  ;;  %v12532_v28 = vld [vmem:[#allocation85_spill] sm:$0xff]  ;;  %v12535_v24 = vsel %vm12335_vm9, %v8071_v1, %v8015_v25  ;;  %v2987_v25 = vsel %vm8226_vm6, %v8202_v6, %v12537_v18 }
 0x650   :  { %12527 = vst [vmem:[#allocation139_spill] sm:$0xff] %v8659_v41  ;;  %v8669_v5 = vsel %vm8309_vm11, %v8188_v20, %v12530_v57  ;;  %v12533_v54 = vsel %vm12439_vm13, %v12504_v34, %v12532_v28  ;;  %v2985_v57 = vsel %vm12507_vm1, %v8202_v6, %v12535_v24  ;;  %vm12539_vm9 = vnez %v12391_v46  ;;  %2996 = vst [vmem:[#allocation19 + $0x10] sm:$0xff] %v2987_v25  ;;  %v12577_v41 = vld [vmem:[#allocation167_spill] sm:$0xff] }
 0x651   :  { %12531 = vst [vmem:[#allocation120_spill] sm:$0xff] %v8669_v5  ;;  %v8679_v49 = vsel %vm12502_vm15, %v8188_v20, %v12533_v54  ;;  %v12536_v5 = vsel %vm12339_vm0, %v8071_v1, %v8024_v56  ;;  %v2988_v56 = vsel %vm12539_vm9, %v8202_v6, %v12538_v33  ;;  %vm12541_vm0 = vnez %v12395_v48  ;;  %2994 = vst [vmem:[#allocation19] sm:$0xff] %v2985_v57  ;;  %v12601_v48 = vld [vmem:[#allocation158_spill] sm:$0xff]  ;;  %v12606_v46 = vld [vmem:[#allocation175_spill] sm:$0xff] }
 0x652   :  { %12534 = vst [vmem:[#allocation137_spill] sm:$0xff] %v8679_v49  ;;  %v2986_v28 = vsel %vm8211_vm12, %v8202_v6, %v12536_v5  ;;  %v2989_v0 = vsel %vm12541_vm0, %v8202_v6, %v12540_v31  ;;  %v2992_v22 = vsel %vm8309_vm11, %v8202_v6, %v12544_v36  ;;  %v12545_v16 = vsel %vm12439_vm13, %v8071_v1, %v8068_v7  ;;  %v12575_v49 = vld [vmem:[#allocation150_spill] sm:$0xff] }
 0x653   :  { %2995 = vst [vmem:[#allocation19 + $0x8] sm:$0xff] %v2986_v28  ;;  %v2993_v9 = vsel %vm12502_vm15, %v8202_v6, %v12545_v16  ;;  %2997 = vst [vmem:[#allocation19 + $0x18] sm:$0xff] %v2988_v56  ;;  %v3003_v21 = vmax.f32 %v8182_v55, %v8237_v52  ;;  %v3004_v29 = vmax.f32 %v8193_v38, %v8252_v43  ;;  %v12546_v28 = vld [vmem:[#allocation164_spill] sm:$0xff]  ;;  %v12547_v56 = vld [vmem:[#allocation114_spill] sm:$0xff]  ;;  %vm12588_vm10 = vnez %v12587_v62 }
 0x654   :  { %3000 = vst [vmem:[#allocation19 + $0x30] sm:$0xff] %v2991_v32  ;;  %2998 = vst [vmem:[#allocation19 + $0x20] sm:$0xff] %v2989_v0  ;;  %v3006_v7 = vmax.f32 %v8222_v17, %v8281_v61  ;;  %v2455_v18 = vand.u32 65535, %v12546_v28  ;;  %vm12602_vm15 = vnez %v12601_v48  ;;  %v12732_v48 = vld [vmem:[#allocation210_spill] sm:$0xff] }
 0x655   :  { %3001 = vst [vmem:[#allocation19 + $0x38] sm:$0xff] %v2992_v22  ;;  %3002 = vst [vmem:[#allocation19 + $0x40] sm:$0xff] %v2993_v9  ;;  %v3007_v5 = vmax.f32 %v3003_v21, %v8305_v4 }
 0x656   :  { %v3009_v54 = vmax.f32 %v3005_v11, %v3006_v7  ;;  %v2457_v33 = vcvt.s32.f32 %v2455_v18  ;;  %v2491_v18 = vstv %s2490_s25 }
 0x657   :  { %v3008_v24 = vmax.f32 %v3007_v5, %v3004_v29  ;;  %vm8765_vm4 = vcmp.eq.s32.totalorder %v2491_v18, 1 }
 0x659   :  { %v3010_v57 = vmax.f32 %v3008_v24, %v3009_v54 }
 0x65b   :  { %3011 = vmax.xlane.f32.xlu0 %v3010_v57 }
 0x686   :  { %v2460_v25 = vpop.xlane.xlu0 %2459 }
 0x687   :  { %vm2461_vm14 = vcmp.eq.f32.partialorder %v12547_v56, %v2460_v25  ;;  %v2466_v42 = vcvt.f32.s32 %v2460_v25  ;;  %v12550_v56 = vld [vmem:[#allocation93_spill] sm:$0xff]  ;;  %v12665_v25 = vld [vmem:[#allocation191_spill] sm:$0xff] }
 0x688   :  { %v2462_v31 = vsel %vm2461_vm14, %v2457_v33, inf }
 0x689   :  { %2463 = vmin.xlane.f32.xlu1 %v2462_v31  ;;  %v2467_v36 = vshll.u32 %v2466_v42, 16  ;;  %v12551_v31 = vld [vmem:[#allocation94_spill] sm:$0xff]  ;;  %v12554_v42 = vld [vmem:[#allocation97_spill] sm:$0xff] }
 0x6e8   :  { %v3012_v0 = vpop.xlane.xlu0 %3011 }
 0x6e9   :  { %v3013_v47 = vrot.slane %v3012_v0, 4 }
 0x6eb   :  { %v3014_v2 = vmax.f32 %v3012_v0, %v3013_v47  ;;  %v12552_v0 = vld [vmem:[#allocation95_spill] sm:$0xff]  ;;  %v12553_v47 = vld [vmem:[#allocation96_spill] sm:$0xff] }
 0x6ed   :  { %v3015_v9 = vrot.slane %v3014_v2, 2 }
 0x6ef   :  { %v3016_v11 = vmax.f32 %v3014_v2, %v3015_v9  ;;  %v12555_v2 = vld [vmem:[#allocation98_spill] sm:$0xff]  ;;  %v12561_v9 = vmov 0 }
 0x6f1   :  { %v3017_v54 = vrot.slane %v3016_v11, 1 }
 0x6f3   :  { %v3018_v28 = vmax.f32 %v3016_v11, %v3017_v54  ;;  %v12564_v11 = vld [vmem:[#allocation149_spill] sm:$0xff] }
 0x6f4   :  { %vm12565_vm11 = vnez %v12564_v11  ;;  %v12723_v11 = vld [vmem:[#allocation207_spill] sm:$0xff] }
 0x716   :  { %v2464_v32 = vpop.xlane.xlu1 %2463 }
 0x717   :  { %v2465_v22 = vcvt.f32.s32 %v2464_v32  ;;  %v12556_v32 = vld [vmem:[#allocation99_spill] sm:$0xff] }
 0x719   :  { %v2468_v16 = vadd.s32 %v2467_v36, %v2465_v22  ;;  %v12557_v36 = vld [vmem:[#allocation100_spill] sm:$0xff] }
 0x71b   :  { %v2469_v21 = vrot.slane %v2468_v16, 4 }
 0x71d   :  { %vm2470_vm8 = vcmp.lt.s32.totalorder %v2468_v16, %v2469_v21 }
 0x71e   :  { %v2471_v29 = vsel %vm2470_vm8, %v2468_v16, %v2469_v21  ;;  %v12560_v16 = vld [vmem:[#allocation101_spill] sm:$0xff]  ;;  %v12563_v21 = vld [vmem:[#allocation151_spill] sm:$0xff] }
 0x71f   :  { %v2472_v7 = vrot.slane %v2471_v29, 2 }
 0x721   :  { %vm2473_vm3 = vcmp.lt.s32.totalorder %v2471_v29, %v2472_v7 }
 0x722   :  { %v2474_v5 = vsel %vm2473_vm3, %v2471_v29, %v2472_v7  ;;  %v12566_v7 = vld [vmem:[#allocation41_spill] sm:$0xff]  ;;  %v12811_v29 = vmov 0 }
 0x723   :  { %v2475_v24 = vrot.slane %v2474_v5, 1 }
 0x725   :  { %vm2476_vm7 = vcmp.lt.s32.totalorder %v2474_v5, %v2475_v24 }
 0x726   :  { %v2477_v57 = vsel %vm2476_vm7, %v2474_v5, %v2475_v24  ;;  %v12567_v5 = vld [vmem:[#allocation113_spill] sm:$0xff] }
 0x727   :  { %3790 = vpush %v2477_v57  ;;  %v12568_v54 = vsel %vm12565_vm11, %v12566_v7, %v12567_v5  ;;  %v12569_v57 = vld [vmem:[#allocation29_spill] sm:$0xff]  ;;  %v12574_v5 = vld [vmem:[#allocation152_spill] sm:$0xff] }
 0x728   :  { %3792 = vpush %v3018_v28  ;;  %v12570_v28 = vld [vmem:[#allocation44_spill] sm:$0xff]  ;;  %v12593_v51 = vsel %vm12588_vm10, %v12569_v57, %v12592_v40  ;;  %v12598_v40 = vmov 0  ;;  %v12607_v23 = vsel %vm12602_vm15, %v12569_v57, %v12606_v46  ;;  %v12612_v46 = vmov 0 }
 0x729   :  { %v12571_v18 = vsel %vm12565_vm11, %v12569_v57, %v12570_v28 }
 0x758   :  { %s3791_s26 = spop %3790 }
 0x759   :  { %v2479_v33 = vstv %s3791_s26  ;;  %s9211_s0 = spop %3792 }
 0x75a   :  { %vm2480_vm13 = vcmp.eq.s32.totalorder %v12550_v56, %v2479_v33  ;;  %vm2481_vm2 = vcmp.eq.s32.totalorder %v12551_v31, %v2479_v33  ;;  %vm2482_vm14 = vcmp.eq.s32.totalorder %v12552_v0, %v2479_v33  ;;  %vm2483_vm8 = vcmp.eq.s32.totalorder %v12553_v47, %v2479_v33  ;;  %p3089_p2 = scmp.gt.f32.partialorder %s9211_s0, 0.0 }
 0x75b   :  { %vm2484_vm3 = vcmp.eq.s32.totalorder %v12554_v42, %v2479_v33  ;;  %vm2485_vm7 = vcmp.eq.s32.totalorder %v12555_v2, %v2479_v33  ;;  %vm8779_vm5 = vmand %vm2480_vm13, %vm8765_vm4 }
 0x75c   :  { %vm8786_vm0 = vmand %vm2481_vm2, %vm8765_vm4  ;;  %v8801_v24 = vsel %vm8779_vm5, %v12405_v26, %v12568_v54  ;;  %v8811_v6 = vsel %vm8779_vm5, %v12443_v19, %v12571_v18  ;;  %vm12576_vm2 = vnez %v12575_v49  ;;  %v12581_v54 = vld [vmem:[#allocation104_spill] sm:$0xff]  ;;  %s3090_s3 = scalar_select %p3089_p2, 1, 0 }
 0x75d   :  { %v12562_v9 = vsel %vm8786_vm0, 4294967295, %v12561_v9  ;;  %vm8815_vm13 = vmand %vm2482_vm14, %vm8765_vm4  ;;  %v12578_v28 = vsel %vm12576_vm2, %v12566_v7, %v12577_v41  ;;  %v12580_v20 = vsel %vm12576_vm2, %v12569_v57, %v12579_v12  ;;  %v12583_v41 = vsel %vm12565_vm11, %v12581_v54, %v12582_v53  ;;  %v12589_v53 = vld [vmem:[#allocation170_spill] sm:$0xff]  ;;  %v12726_v49 = vld [vmem:[#allocation208_spill] sm:$0xff] }
 0x75e   :  { %v8830_v18 = vsel %vm8786_vm0, %v12405_v26, %v12578_v28  ;;  %v8840_v44 = vsel %vm8786_vm0, %v12443_v19, %v12580_v20  ;;  %v8850_v28 = vsel %vm8779_vm5, %v12473_v8, %v12583_v41  ;;  %vm8856_vm14 = vmand %vm2483_vm8, %vm8765_vm4  ;;  %v12584_v12 = vmov 0 }
 0x75f   :  { %v12585_v12 = vsel %vm8856_vm14, 4294967295, %v12584_v12  ;;  %v12590_v35 = vsel %vm12588_vm10, %v12566_v7, %v12589_v53  ;;  %v8881_v13 = vsel %vm8815_vm13, %v12443_v19, %v12593_v51  ;;  %v12596_v53 = vsel %vm12576_vm2, %v12581_v54, %v12595_v63  ;;  %vm8897_vm8 = vmand %vm2484_vm3, %vm8765_vm4  ;;  %v12603_v63 = vld [vmem:[#allocation174_spill] sm:$0xff] }
 0x760   :  { %v8871_v41 = vsel %vm8815_vm13, %v12405_v26, %v12590_v35  ;;  %12594 = vst [vmem:[#allocation121_spill] sm:$0xff] %v8881_v13  ;;  %v8891_v35 = vsel %vm8786_vm0, %v12473_v8, %v12596_v53  ;;  %v12599_v40 = vsel %vm8897_vm8, 4294967295, %v12598_v40  ;;  %v12604_v30 = vsel %vm12602_vm15, %v12566_v7, %v12603_v63  ;;  %vm8938_vm3 = vmand %vm2485_vm7, %vm8765_vm4 }
 0x761   :  { %12591 = vst [vmem:[#allocation142_spill] sm:$0xff] %v8871_v41  ;;  %12597 = vst [vmem:[#allocation140_spill] sm:$0xff] %v8891_v35  ;;  %v8912_v53 = vsel %vm8856_vm14, %v12405_v26, %v12604_v30  ;;  %v8922_v37 = vsel %vm8856_vm14, %v12443_v19, %v12607_v23  ;;  %v12610_v63 = vsel %vm12588_vm10, %v12581_v54, %v12609_v45  ;;  %v12613_v46 = vsel %vm8938_vm3, 4294967295, %v12612_v46  ;;  %v12617_v45 = vld [vmem:[#allocation178_spill] sm:$0xff] }
 0x762   :  { %12605 = vst [vmem:[#allocation144_spill] sm:$0xff] %v8912_v53  ;;  %12608 = vst [vmem:[#allocation122_spill] sm:$0xff] %v8922_v37  ;;  %v8932_v30 = vsel %vm8815_vm13, %v12473_v8, %v12610_v63  ;;  %v12615_v53 = vld [vmem:[#allocation159_spill] sm:$0xff]  ;;  %v12623_v37 = vld [vmem:[#allocation180_spill] sm:$0xff]  ;;  %vm12626_vm7 = vcmp.eq.s32.totalorder %v12556_v32, %v2479_v33 }
 0x763   :  { %12611 = vst [vmem:[#allocation141_spill] sm:$0xff] %v8932_v30  ;;  %vm12616_vm9 = vnez %v12615_v53  ;;  %v12620_v30 = vld [vmem:[#allocation179_spill] sm:$0xff]  ;;  %vm8979_vm6 = vmand %vm12626_vm7, %vm8765_vm4  ;;  %vm12641_vm7 = vcmp.eq.s32.totalorder %v12557_v36, %v2479_v33 }
 0x764   :  { %v12618_v51 = vsel %vm12616_vm9, %v12566_v7, %v12617_v45  ;;  %v12621_v35 = vsel %vm12616_vm9, %v12569_v57, %v12620_v30  ;;  %v12624_v45 = vsel %vm12602_vm15, %v12581_v54, %v12623_v37  ;;  %v12627_v30 = vmov 0  ;;  %v12632_v37 = vld [vmem:[#allocation182_spill] sm:$0xff]  ;;  %vm9020_vm1 = vmand %vm12641_vm7, %vm8765_vm4 }
 0x765   :  { %v8953_v63 = vsel %vm8897_vm8, %v12405_v26, %v12618_v51  ;;  %v8963_v13 = vsel %vm8897_vm8, %v12443_v19, %v12621_v35  ;;  %v8973_v51 = vsel %vm8856_vm14, %v12473_v8, %v12624_v45  ;;  %v12628_v30 = vsel %vm8979_vm6, 4294967295, %v12627_v30 }
 0x766   :  { %12619 = vst [vmem:[#allocation145_spill] sm:$0xff] %v8953_v63  ;;  %12622 = vst [vmem:[#allocation123_spill] sm:$0xff] %v8963_v13  ;;  %v12630_v63 = vld [vmem:[#allocation160_spill] sm:$0xff]  ;;  %vm12656_vm7 = vcmp.eq.s32.totalorder %v12560_v16, %v2479_v33 }
 0x767   :  { %12625 = vst [vmem:[#allocation143_spill] sm:$0xff] %v8973_v51  ;;  %vm12631_vm12 = vnez %v12630_v63  ;;  %v12635_v51 = vld [vmem:[#allocation183_spill] sm:$0xff]  ;;  %v12638_v13 = vld [vmem:[#allocation184_spill] sm:$0xff] }
 0x768   :  { %v12633_v23 = vsel %vm12631_vm12, %v12566_v7, %v12632_v37  ;;  %v12636_v41 = vsel %vm12631_vm12, %v12569_v57, %v12635_v51  ;;  %v12639_v37 = vsel %vm12616_vm9, %v12581_v54, %v12638_v13  ;;  %v12642_v51 = vmov 0  ;;  %v12647_v13 = vld [vmem:[#allocation186_spill] sm:$0xff]  ;;  %v12738_v63 = vld [vmem:[#allocation212_spill] sm:$0xff] }
 0x769   :  { %v8994_v45 = vsel %vm8938_vm3, %v12405_v26, %v12633_v23  ;;  %v9004_v20 = vsel %vm8938_vm3, %v12443_v19, %v12636_v41  ;;  %v9014_v23 = vsel %vm8897_vm8, %v12473_v8, %v12639_v37  ;;  %v12643_v51 = vsel %vm9020_vm1, 4294967295, %v12642_v51  ;;  %vm9061_vm8 = vmand %vm12656_vm7, %vm8765_vm4 }
 0x76a   :  { %12634 = vst [vmem:[#allocation147_spill] sm:$0xff] %v8994_v45  ;;  %12637 = vst [vmem:[#allocation124_spill] sm:$0xff] %v9004_v20  ;;  %v12645_v45 = vld [vmem:[#allocation161_spill] sm:$0xff]  ;;  %v12653_v20 = vld [vmem:[#allocation188_spill] sm:$0xff]  ;;  %vm12696_vm7 = vnez %v12585_v12 }
 0x76b   :  { %12640 = vst [vmem:[#allocation146_spill] sm:$0xff] %v9014_v23  ;;  %vm12646_vm14 = vnez %v12645_v45  ;;  %v12650_v23 = vld [vmem:[#allocation187_spill] sm:$0xff]  ;;  %v12742_v45 = vld [vmem:[#allocation213_spill] sm:$0xff] }
 0x76c   :  { %v12648_v35 = vsel %vm12646_vm14, %v12566_v7, %v12647_v13  ;;  %v12651_v50 = vsel %vm12646_vm14, %v12569_v57, %v12650_v23  ;;  %v12654_v13 = vsel %vm12631_vm12, %v12581_v54, %v12653_v20  ;;  %v12657_v23 = vmov 0  ;;  %v12662_v20 = vld [vmem:[#allocation190_spill] sm:$0xff] }
 0x76d   :  { %v9035_v37 = vsel %vm8979_vm6, %v12405_v26, %v12648_v35  ;;  %v9045_v60 = vsel %vm8979_vm6, %v12443_v19, %v12651_v50  ;;  %v9055_v35 = vsel %vm8938_vm3, %v12473_v8, %v12654_v13  ;;  %v12658_v23 = vsel %vm9061_vm8, 4294967295, %v12657_v23  ;;  %v12678_v50 = vld [vmem:[#allocation195_spill] sm:$0xff] }
 0x76e   :  { %12649 = vst [vmem:[#allocation148_spill] sm:$0xff] %v9035_v37  ;;  %12652 = vst [vmem:[#allocation126_spill] sm:$0xff] %v9045_v60  ;;  %v12660_v37 = vld [vmem:[#allocation162_spill] sm:$0xff]  ;;  %v12668_v60 = vld [vmem:[#allocation192_spill] sm:$0xff] }
 0x76f   :  { %12655 = vst [vmem:[#allocation32_spill] sm:$0xff] %v9055_v35  ;;  %vm12661_vm9 = vnez %v12660_v37 }
 0x770   :  { %v12663_v41 = vsel %vm12661_vm9, %v12566_v7, %v12662_v20  ;;  %v12666_v33 = vsel %vm12661_vm9, %v12569_v57, %v12665_v25  ;;  %v12669_v20 = vsel %vm12646_vm14, %v12581_v54, %v12668_v60  ;;  %v12672_v25 = vld [vmem:[#allocation38_spill] sm:$0xff] }
 0x771   :  { %v9076_v13 = vsel %vm9020_vm1, %v12405_v26, %v12663_v41  ;;  %v9086_v35 = vsel %vm9020_vm1, %v12443_v19, %v12666_v33  ;;  %v9096_v41 = vsel %vm8979_vm6, %v12473_v8, %v12669_v20  ;;  %vm12673_vm4 = vnez %v12672_v25  ;;  %v12676_v60 = vld [vmem:[#allocation194_spill] sm:$0xff] }
 0x772   :  { %12664 = vst [vmem:[#allocation55_spill] sm:$0xff] %v9076_v13  ;;  %12667 = vst [vmem:[#allocation57_spill] sm:$0xff] %v9086_v35  ;;  %v12671_v13 = vld [vmem:[#allocation28_spill] sm:$0xff]  ;;  %v12675_v33 = vsel %vm12673_vm4, %v12566_v7, %v12674_v14  ;;  %v12677_v20 = vsel %vm12673_vm4, %v12569_v57, %v12676_v60  ;;  %v12679_v14 = vsel %vm12661_vm9, %v12581_v54, %v12678_v50  ;;  %v12685_v60 = vld [vmem:[#allocation49_spill] sm:$0xff] }
 0x773   :  { %12670 = vst [vmem:[#allocation59_spill] sm:$0xff] %v9096_v41  ;;  %v9109_v35 = vsel %vm9061_vm8, %v12405_v26, %v12675_v33  ;;  %v9119_v41 = vsel %vm9061_vm8, %v12443_v19, %v12677_v20  ;;  %v9129_v26 = vsel %vm9020_vm1, %v12473_v8, %v12679_v14  ;;  %v12681_v7 = vld [vmem:[#allocation196_spill] sm:$0xff]  ;;  %v12684_v33 = vld [vmem:[#allocation157_spill] sm:$0xff] }
 0x774   :  { %12680 = vst [vmem:[#allocation60_spill] sm:$0xff] %v9129_v26  ;;  %v12682_v57 = vsel %vm12673_vm4, %v12581_v54, %v12681_v7  ;;  %v12686_v50 = vsel %vm12565_vm11, %v12684_v33, %v12685_v60  ;;  %v12688_v14 = vld [vmem:[#allocation197_spill] sm:$0xff]  ;;  %v12691_v7 = vld [vmem:[#allocation198_spill] sm:$0xff] }
 0x775   :  { %v9139_v19 = vsel %vm9061_vm8, %v12473_v8, %v12682_v57  ;;  %v9149_v20 = vsel %vm8779_vm5, %v12504_v34, %v12686_v50  ;;  %v12689_v54 = vsel %vm12576_vm2, %v12684_v33, %v12688_v14  ;;  %v12692_v57 = vsel %vm12588_vm10, %v12684_v33, %v12691_v7  ;;  %v12694_v50 = vld [vmem:[#allocation199_spill] sm:$0xff] }
 0x776   :  { %12683 = vst [vmem:[#allocation61_spill] sm:$0xff] %v9139_v19  ;;  %12687 = vst [vmem:[#allocation62_spill] sm:$0xff] %v9149_v20  ;;  %v9159_v8 = vsel %vm8786_vm0, %v12504_v34, %v12689_v54  ;;  %v9169_v60 = vsel %vm8815_vm13, %v12504_v34, %v12692_v57  ;;  %v12695_v14 = vsel %vm12602_vm15, %v12684_v33, %v12694_v50  ;;  %vm12698_vm0 = vnez %v12615_v53  ;;  %v12735_v53 = vld [vmem:[#allocation211_spill] sm:$0xff] }
 0x777   :  { %12690 = vst [vmem:[#allocation63_spill] sm:$0xff] %v9159_v8  ;;  %12693 = vst [vmem:[#allocation64_spill] sm:$0xff] %v9169_v60  ;;  %v9179_v54 = vsel %vm12696_vm7, %v12504_v34, %v12695_v14  ;;  %v12699_v8 = vld [vmem:[#allocation200_spill] sm:$0xff]  ;;  %vm12701_vm10 = vnez %v12599_v40  ;;  %v12703_v60 = vld [vmem:[#allocation201_spill] sm:$0xff] }
 0x778   :  { %12697 = vst [vmem:[#allocation128_spill] sm:$0xff] %v9179_v54  ;;  %v12700_v7 = vsel %vm12698_vm0, %v12684_v33, %v12699_v8  ;;  %v12704_v50 = vsel %vm12631_vm12, %v12684_v33, %v12703_v60  ;;  %v12706_v54 = vld [vmem:[#allocation202_spill] sm:$0xff]  ;;  %v12709_v60 = vld [vmem:[#allocation203_spill] sm:$0xff] }
 0x779   :  { %v9189_v57 = vsel %vm12701_vm10, %v12504_v34, %v12700_v7  ;;  %v9199_v14 = vsel %vm8938_vm3, %v12504_v34, %v12704_v50  ;;  %v12707_v8 = vsel %vm12646_vm14, %v12684_v33, %v12706_v54  ;;  %v12712_v54 = vld [vmem:[#allocation204_spill] sm:$0xff] }
 0x77a   :  { %12702 = vst [vmem:[#allocation33_spill] sm:$0xff] %v9189_v57  ;;  %12705 = vst [vmem:[#allocation90_spill] sm:$0xff] %v9199_v14  ;;  %v9209_v7 = vsel %vm8979_vm6, %v12504_v34, %v12707_v8  ;;  %v12710_v57 = vsel %vm12661_vm9, %v12684_v33, %v12709_v60  ;;  %v12713_v14 = vsel %vm12673_vm4, %v12684_v33, %v12712_v54  ;;  %v12715_v60 = vld [vmem:[#allocation205_spill] sm:$0xff]  ;;  %vm12720_vm4 = vnez %v12562_v9 }
 0x77b   :  { %12708 = vst [vmem:[#allocation65_spill] sm:$0xff] %v9209_v7  ;;  %v9221_v50 = vsel %vm9020_vm1, %v12504_v34, %v12710_v57  ;;  %v9231_v8 = vsel %vm9061_vm8, %v12504_v34, %v12713_v14  ;;  %v12716_v7 = vsel %vm12565_vm11, %v7455_v59, %v12715_v60  ;;  %vm12722_vm8 = vnez %v12587_v62  ;;  %v12729_v62 = vld [vmem:[#allocation209_spill] sm:$0xff] }
 0x77c   :  { %12711 = vst [vmem:[#allocation66_spill] sm:$0xff] %v9221_v50  ;;  %12714 = vst [vmem:[#allocation67_spill] sm:$0xff] %v9231_v8  ;;  %v9241_v57 = vsel %vm8779_vm5, %v8071_v1, %v12716_v7  ;;  %v12718_v50 = vld [vmem:[#allocation206_spill] sm:$0xff]  ;;  %v12724_v14 = vsel %vm12722_vm8, %v7455_v59, %v12723_v11  ;;  %v12730_v60 = vsel %vm12698_vm0, %v7455_v59, %v12729_v62 }
 0x77d   :  { %12717 = vst [vmem:[#allocation68_spill] sm:$0xff] %v9241_v57  ;;  %v12719_v33 = vsel %vm12576_vm2, %v7455_v59, %v12718_v50  ;;  %v9261_v7 = vsel %vm8815_vm13, %v8071_v1, %v12724_v14  ;;  %v12727_v50 = vsel %vm12602_vm15, %v7455_v59, %v12726_v49  ;;  %v12733_v11 = vsel %vm12631_vm12, %v7455_v59, %v12732_v48 }
 0x77e   :  { %v9251_v34 = vsel %vm12720_vm4, %v8071_v1, %v12719_v33  ;;  %12725 = vst [vmem:[#allocation70_spill] sm:$0xff] %v9261_v7  ;;  %v9271_v54 = vsel %vm12696_vm7, %v8071_v1, %v12727_v50  ;;  %v9281_v33 = vsel %vm12701_vm10, %v8071_v1, %v12730_v60  ;;  %v9291_v14 = vsel %vm8938_vm3, %v8071_v1, %v12733_v11 }
 0x77f   :  { %12721 = vst [vmem:[#allocation69_spill] sm:$0xff] %v9251_v34  ;;  %12728 = vst [vmem:[#allocation71_spill] sm:$0xff] %v9271_v54  ;;  %v12736_v49 = vsel %vm12646_vm14, %v7455_v59, %v12735_v53  ;;  %v12739_v62 = vsel %vm12661_vm9, %v7455_v59, %v12738_v63  ;;  %vm12741_vm12 = vnez %v12672_v25  ;;  %vm12744_vm15 = vnez %v12658_v23 }
 0x780   :  { %12731 = vst [vmem:[#allocation129_spill] sm:$0xff] %v9281_v33  ;;  %12734 = vst [vmem:[#allocation72_spill] sm:$0xff] %v9291_v14  ;;  %v9301_v50 = vsel %vm8979_vm6, %v8071_v1, %v12736_v49  ;;  %v9311_v60 = vsel %vm9020_vm1, %v8071_v1, %v12739_v62  ;;  %v12743_v48 = vsel %vm12741_vm12, %v7455_v59, %v12742_v45  ;;  %v3020_v53 = vstv %s9211_s0 }
 0x781   :  { %12737 = vst [vmem:[#allocation34_spill] sm:$0xff] %v9301_v50  ;;  %12740 = vst [vmem:[#allocation91_spill] sm:$0xff] %v9311_v60  ;;  %v9321_v11 = vsel %vm12744_vm15, %v8071_v1, %v12743_v48  ;;  %vm3021_vm11 = vcmp.eq.f32.partialorder %v8182_v55, %v3020_v53  ;;  %vm3022_vm9 = vcmp.eq.f32.partialorder %v8193_v38, %v3020_v53  ;;  %v12877_v26 = vld [vmem:[#allocation33_spill] sm:$0xff] }
 0x782   :  { %12745 = vst [vmem:[#allocation73_spill] sm:$0xff] %v9321_v11  ;;  %vm3023_vm0 = vcmp.eq.f32.partialorder %v8207_v58, %v3020_v53  ;;  %vm3024_vm2 = vcmp.eq.f32.partialorder %v8222_v17, %v3020_v53  ;;  %vm3025_vm14 = vcmp.eq.f32.partialorder %v8237_v52, %v3020_v53  ;;  %vm3026_vm8 = vcmp.eq.f32.partialorder %v8252_v43, %v3020_v53 }
 0x783   :  { %vm3027_vm12 = vcmp.eq.f32.partialorder %v8267_v10, %v3020_v53  ;;  %vm3028_vm1 = vcmp.eq.f32.partialorder %v8281_v61, %v3020_v53  ;;  %vm3029_vm15 = vcmp.eq.f32.partialorder %v8305_v4, %v3020_v53  ;;  %v3030_v59 = vsel %vm3021_vm11, %v12550_v56, 9216 }
 0x784   :  { %v3031_v1 = vsel %vm3022_vm9, %v12551_v31, 9216  ;;  %v3032_v37 = vsel %vm3023_vm0, %v12552_v0, 9216  ;;  %v3033_v25 = vsel %vm3024_vm2, %v12553_v47, 9216  ;;  %v3034_v49 = vsel %vm3025_vm14, %v12554_v42, 9216 }
 0x785   :  { %v3035_v63 = vsel %vm3026_vm8, %v12555_v2, 9216  ;;  %v3036_v62 = vsel %vm3027_vm12, %v12556_v32, 9216  ;;  %v3037_v45 = vsel %vm3028_vm1, %v12557_v36, 9216  ;;  %vm3039_vm6 = vcmp.lt.s32.totalorder %v3030_v59, %v3034_v49 }
 0x786   :  { %vm3041_vm3 = vcmp.lt.s32.totalorder %v3031_v1, %v3035_v63  ;;  %vm3043_vm10 = vcmp.lt.s32.totalorder %v3032_v37, %v3036_v62  ;;  %vm3045_vm7 = vcmp.lt.s32.totalorder %v3033_v25, %v3037_v45  ;;  %v3038_v48 = vsel %vm3029_vm15, %v12560_v16, 9216 }
 0x787   :  { %v3040_v53 = vsel %vm3039_vm6, %v3030_v59, %v3034_v49  ;;  %v3044_v11 = vsel %vm3043_vm10, %v3032_v37, %v3036_v62  ;;  %v3046_v60 = vsel %vm3045_vm7, %v3033_v25, %v3037_v45  ;;  %v3042_v50 = vsel %vm3041_vm3, %v3031_v1, %v3035_v63  ;;  %v12762_v62 = vld [vmem:[#allocation88_spill] sm:$0xff]  ;;  %v12765_v45 = vld [vmem:[#allocation115_spill] sm:$0xff] }
 0x788   :  { %vm3047_vm11 = vcmp.lt.s32.totalorder %v3040_v53, %v3038_v48  ;;  %vm3051_vm9 = vcmp.lt.s32.totalorder %v3044_v11, %v3046_v60 }
 0x789   :  { %v3048_v14 = vsel %vm3047_vm11, %v3040_v53, %v3038_v48  ;;  %v3052_v54 = vsel %vm3051_vm9, %v3044_v11, %v3046_v60  ;;  %v12761_v11 = vsel %vm12720_vm4, 3, %v12574_v5  ;;  %v12763_v5 = vld [vmem:[#allocation45_spill] sm:$0xff]  ;;  %v12894_v53 = vmov 0 }
 0x78a   :  { %vm3049_vm0 = vcmp.lt.s32.totalorder %v3048_v14, %v3042_v50  ;;  %vm12764_vm4 = vnez %v12763_v5 }
 0x78b   :  { %v3050_v33 = vsel %vm3049_vm0, %v3048_v14, %v3042_v50  ;;  %v12766_v48 = vsel %vm12764_vm4, %v8193_v38, %v12765_v45  ;;  %v12774_v38 = vld [vmem:[#allocation142_spill] sm:$0xff]  ;;  %vm12785_vm4 = vnez %v12585_v12 }
 0x78c   :  { %vm3053_vm2 = vcmp.lt.s32.totalorder %v3050_v33, %v3052_v54  ;;  %v12790_v45 = vld [vmem:[#allocation122_spill] sm:$0xff] }
 0x78d   :  { %v3054_v7 = vsel %vm3053_vm2, %v3050_v33, %v3052_v54  ;;  %vm12815_vm2 = vnez %v12613_v46 }
 0x78e   :  { %v3056_v34 = vshra.s32 %v3054_v7, 16  ;;  %v3055_v8 = vand.u32 65535, %v3054_v7 }
 0x790   :  { %v3058_v57 = vcvt.s32.f32 %v3056_v34  ;;  %v3057_v19 = vcvt.s32.f32 %v3055_v8  ;;  %v12748_v8 = vmov 0 }
 0x792   :  { %3059 = vmin.xlane.f32.xlu1 %v3058_v57 }
 0x81f   :  { %v3060_v20 = vpop.xlane.xlu1 %3059 }
 0x820   :  { %vm3061_vm1 = vcmp.eq.f32.partialorder %v3058_v57, %v3060_v20  ;;  %v3066_v59 = vcvt.f32.s32 %v3060_v20 }
 0x821   :  { %v3062_v4 = vsel %vm3061_vm1, %v3057_v19, inf  ;;  %v3091_v19 = vstv %s3090_s3 }
 0x822   :  { %3063 = vmin.xlane.f32.xlu0 %v3062_v4  ;;  %v3067_v25 = vshll.u32 %v3066_v59, 16  ;;  %vm9343_vm7 = vcmp.eq.s32.totalorder %v3091_v19, 1  ;;  %v12852_v4 = vld [vmem:[#allocation57_spill] sm:$0xff] }
 0x8af   :  { %v3064_v37 = vpop.xlane.xlu0 %3063 }
 0x8b0   :  { %v3065_v1 = vcvt.f32.s32 %v3064_v37  ;;  %v12771_v37 = vld [vmem:[#allocation153_spill] sm:$0xff] }
 0x8b2   :  { %v3068_v49 = vadd.s32 %v3067_v25, %v3065_v1  ;;  %v12772_v25 = vsel %vm8815_vm13, 3, %v12771_v37  ;;  %v12792_v37 = vld [vmem:[#allocation169_spill] sm:$0xff] }
 0x8b4   :  { %v3069_v63 = vrot.slane %v3068_v49, 4 }
 0x8b6   :  { %vm3070_vm10 = vcmp.lt.s32.totalorder %v3068_v49, %v3069_v63 }
 0x8b7   :  { %v3071_v14 = vsel %vm3070_vm10, %v3068_v49, %v3069_v63  ;;  %v12775_v63 = vld [vmem:[#allocation121_spill] sm:$0xff]  ;;  %vm12800_vm10 = vnez %v12599_v40  ;;  %v12961_v49 = vld [vmem:[#allocation163_spill] sm:$0xff] }
 0x8b8   :  { %v3072_v50 = vrot.slane %v3071_v14, 2  ;;  %v12816_v40 = vld [vmem:[#allocation37_spill] sm:$0xff] }
 0x8b9   :  { %v12817_v9 = vsel %vm12815_vm2, 3, %v12816_v40  ;;  %v12822_v40 = vld [vmem:[#allocation173_spill] sm:$0xff] }
 0x8ba   :  { %vm3073_vm6 = vcmp.lt.s32.totalorder %v3071_v14, %v3072_v50 }
 0x8bb   :  { %v3074_v54 = vsel %vm3073_vm6, %v3071_v14, %v3072_v50  ;;  %v12776_v14 = vld [vmem:[#allocation140_spill] sm:$0xff]  ;;  %v12777_v50 = vld [vmem:[#allocation133_spill] sm:$0xff] }
 0x8bc   :  { %v3075_v34 = vrot.slane %v3074_v54, 1  ;;  %vm12778_vm13 = vnez %v12777_v50 }
 0x8be   :  { %vm3076_vm3 = vcmp.lt.s32.totalorder %v3074_v54, %v3075_v34 }
 0x8bf   :  { %v3077_v7 = vsel %vm3076_vm3, %v3074_v54, %v3075_v34  ;;  %vm12755_vm3 = vnez %v12379_v39  ;;  %v12779_v54 = vld [vmem:[#allocation86_spill] sm:$0xff] }
 0x8c0   :  { %3794 = vpush %v3077_v7  ;;  %v12756_v22 = vsel %vm12755_vm3, %v8182_v55, %v8080_v27  ;;  %v12780_v34 = vsel %vm12778_vm13, %v8207_v58, %v12779_v54  ;;  %v12781_v7 = vmov 0  ;;  %v12789_v58 = vld [vmem:[#allocation144_spill] sm:$0xff]  ;;  %v12796_v54 = vmov 0 }
 0x8c1   :  { %v12858_v27 = vmov 0 }
 0x8f1   :  { %s3795_s1 = spop %3794 }
 0x8f2   :  { %v3079_v20 = vstv %s3795_s1 }
 0x8f3   :  { %vm3080_vm15 = vcmp.eq.s32.totalorder %v12550_v56, %v3079_v20  ;;  %vm3081_vm14 = vcmp.eq.s32.totalorder %v12551_v31, %v3079_v20  ;;  %vm3082_vm8 = vcmp.eq.s32.totalorder %v12552_v0, %v3079_v20  ;;  %vm3083_vm12 = vcmp.eq.s32.totalorder %v12553_v47, %v3079_v20 }
 0x8f4   :  { %vm3084_vm11 = vcmp.eq.s32.totalorder %v12554_v42, %v3079_v20  ;;  %vm3085_vm9 = vcmp.eq.s32.totalorder %v12555_v2, %v3079_v20  ;;  %vm3086_vm0 = vcmp.eq.s32.totalorder %v12556_v32, %v3079_v20  ;;  %vm9357_vm1 = vmand %vm3080_vm15, %vm9343_vm7  ;;  %v12751_v56 = vmov 0  ;;  %v12879_v2 = vld [vmem:[#allocation65_spill] sm:$0xff] }
 0x8f5   :  { %v12749_v8 = vsel %vm9357_vm1, 4294967295, %v12748_v8  ;;  %vm9364_vm6 = vmand %vm3081_vm14, %vm9343_vm7  ;;  %v12754_v31 = vsel %vm8779_vm5, 3, %v12563_v21  ;;  %vm9389_vm5 = vcmp.ge.f32.partialorder %v12756_v22, 0.5  ;;  %vm9424_vm14 = vcmp.ge.f32.partialorder %v12766_v48, 0.5  ;;  %v12791_v48 = vld [vmem:[#allocation141_spill] sm:$0xff] }
 0x8f6   :  { %12750 = vst [vmem:[#allocation74_spill] sm:$0xff] %v12749_v8  ;;  %v12752_v56 = vsel %vm9364_vm6, 4294967295, %v12751_v56  ;;  %v9374_v0 = vsel %vm9357_vm1, 4, %v12754_v31  ;;  %vm9395_vm15 = vmand %vm3082_vm8, %vm9343_vm7  ;;  %v9405_v39 = vsel %vm9364_vm6, 4, %v12761_v11  ;;  %v12786_v31 = vld [vmem:[#allocation154_spill] sm:$0xff]  ;;  %v12826_v47 = vmov 0 }
 0x8f7   :  { %12753 = vst [vmem:[#allocation75_spill] sm:$0xff] %v12752_v56  ;;  %vm9432_vm8 = vmand %vm3083_vm12, %vm9343_vm7  ;;  %v9442_v1 = vsel %vm9395_vm15, 4, %v12772_v25  ;;  %vm9461_vm12 = vcmp.ge.f32.partialorder %v12780_v34, 0.5  ;;  %v12787_v22 = vsel %vm12785_vm4, 3, %v12786_v31  ;;  %v12794_v25 = vld [vmem:[#allocation48_spill] sm:$0xff]  ;;  %v12798_v34 = vmov 0 }
 0x8f8   :  { %12773 = vst [vmem:[#allocation76_spill] sm:$0xff] %v9442_v1  ;;  %v12782_v7 = vsel %vm9461_vm12, 4294967295, %v12781_v7  ;;  %vm9469_vm3 = vmand %vm3084_vm11, %vm9343_vm7  ;;  %v9479_v11 = vsel %vm9432_vm8, 4, %v12787_v22  ;;  %v3141_v5 = vsel %vm9432_vm8, %v8175_v15, %v12789_v58  ;;  %vm12793_vm11 = vnez %v12792_v37  ;;  %v12801_v31 = vld [vmem:[#allocation155_spill] sm:$0xff]  ;;  %v12984_v56 = vld [vmem:[#allocation32_spill] sm:$0xff] }
 0x8f9   :  { %12788 = vst [vmem:[#allocation77_spill] sm:$0xff] %v9479_v11  ;;  %v12795_v50 = vsel %vm12793_vm11, %v8222_v17, %v12794_v25  ;;  %vm9506_vm4 = vmand %vm3085_vm9, %vm9343_vm7  ;;  %v12802_v22 = vsel %vm12800_vm10, 3, %v12801_v31  ;;  %v12804_v17 = vld [vmem:[#allocation145_spill] sm:$0xff]  ;;  %v12805_v25 = vld [vmem:[#allocation123_spill] sm:$0xff]  ;;  %vm12847_vm12 = vnez %v12643_v51  ;;  %v12868_v51 = vmov 0 }
 0x8fa   :  { %vm9498_vm13 = vcmp.ge.f32.partialorder %v12795_v50, 0.5  ;;  %v12799_v34 = vsel %vm9506_vm4, 4294967295, %v12798_v34  ;;  %v9516_v58 = vsel %vm9469_vm3, 4, %v12802_v22  ;;  %v3142_v37 = vsel %vm9469_vm3, %v8175_v15, %v12804_v17  ;;  %v12806_v50 = vld [vmem:[#allocation143_spill] sm:$0xff]  ;;  %v12807_v31 = vld [vmem:[#allocation102_spill] sm:$0xff]  ;;  %vm9543_vm11 = vmand %vm3086_vm0, %vm9343_vm7 }
 0x8fb   :  { %v12797_v54 = vsel %vm9498_vm13, 4294967295, %v12796_v54  ;;  %12803 = vst [vmem:[#allocation78_spill] sm:$0xff] %v9516_v58  ;;  %vm12808_vm9 = vnez %v12807_v31  ;;  %v12809_v22 = vld [vmem:[#allocation50_spill] sm:$0xff]  ;;  %v12813_v17 = vmov 0  ;;  %v9553_v31 = vsel %vm9506_vm4, 4, %v12817_v9  ;;  %v12824_v9 = vld [vmem:[#allocation51_spill] sm:$0xff] }
 0x8fc   :  { %v12810_v12 = vsel %vm12808_vm9, %v8237_v52, %v12809_v22  ;;  %v12814_v17 = vsel %vm9543_vm11, 4294967295, %v12813_v17  ;;  %12818 = vst [vmem:[#allocation132_spill] sm:$0xff] %v9553_v31  ;;  %v12819_v52 = vld [vmem:[#allocation147_spill] sm:$0xff]  ;;  %v12820_v22 = vld [vmem:[#allocation124_spill] sm:$0xff]  ;;  %vm12823_vm0 = vnez %v12822_v40  ;;  %vm12828_vm9 = vcmp.eq.s32.totalorder %v12557_v36, %v3079_v20 }
 0x8fd   :  { %vm9535_vm10 = vcmp.ge.f32.partialorder %v12810_v12, 0.5  ;;  %v3143_v12 = vsel %vm9506_vm4, %v8175_v15, %v12819_v52  ;;  %v3170_v32 = vsel %vm9506_vm4, %v8177_v3, %v12820_v22  ;;  %v12825_v42 = vsel %vm12823_vm0, %v8252_v43, %v12824_v9  ;;  %v12832_v22 = vld [vmem:[#allocation27_spill] sm:$0xff]  ;;  %v12835_v43 = vld [vmem:[#allocation148_spill] sm:$0xff]  ;;  %v12836_v9 = vld [vmem:[#allocation126_spill] sm:$0xff] }
 0x8fe   :  { %v12812_v29 = vsel %vm9535_vm10, 4294967295, %v12811_v29  ;;  %vm9572_vm2 = vcmp.ge.f32.partialorder %v12825_v42, 0.5  ;;  %vm9580_vm10 = vmand %vm12828_vm9, %vm9343_vm7  ;;  %v12829_v52 = vmov 0  ;;  %vm12831_vm13 = vnez %v12628_v30 }
 0x8ff   :  { %v12827_v47 = vsel %vm9572_vm2, 4294967295, %v12826_v47  ;;  %v12830_v52 = vsel %vm9580_vm10, 4294967295, %v12829_v52  ;;  %v12833_v46 = vsel %vm12831_vm13, 3, %v12832_v22  ;;  %v3144_v42 = vsel %vm9543_vm11, %v8175_v15, %v12835_v43  ;;  %v12838_v22 = vld [vmem:[#allocation103_spill] sm:$0xff] }
 0x900   :  { %v9590_v40 = vsel %vm9543_vm11, 4, %v12833_v46  ;;  %v3171_v36 = vsel %vm9543_vm11, %v8177_v3, %v12836_v9  ;;  %vm12839_vm13 = vnez %v12838_v22  ;;  %v12840_v46 = vld [vmem:[#allocation52_spill] sm:$0xff]  ;;  %vm12844_vm9 = vcmp.eq.s32.totalorder %v12560_v16, %v3079_v20  ;;  %v12848_v9 = vld [vmem:[#allocation89_spill] sm:$0xff] }
 0x901   :  { %12834 = vst [vmem:[#allocation79_spill] sm:$0xff] %v9590_v40  ;;  %v12841_v33 = vsel %vm12839_vm13, %v8267_v10, %v12840_v46  ;;  %vm9617_vm2 = vmand %vm12844_vm9, %vm9343_vm7  ;;  %v12845_v43 = vmov 0  ;;  %v12849_v30 = vsel %vm12847_vm12, 3, %v12848_v9  ;;  %v12851_v10 = vld [vmem:[#allocation55_spill] sm:$0xff]  ;;  %v3172_v16 = vsel %vm9580_vm10, %v8177_v3, %v12852_v4  ;;  %v12854_v46 = vld [vmem:[#allocation181_spill] sm:$0xff] }
 0x902   :  { %vm9609_vm0 = vcmp.ge.f32.partialorder %v12841_v33, 0.5  ;;  %v12846_v43 = vsel %vm9617_vm2, 4294967295, %v12845_v43  ;;  %v9627_v22 = vsel %vm9580_vm10, 4, %v12849_v30  ;;  %v3145_v33 = vsel %vm9580_vm10, %v8175_v15, %v12851_v10  ;;  %v12856_v30 = vld [vmem:[#allocation53_spill] sm:$0xff]  ;;  %v12873_v20 = vld [vmem:[#allocation112_spill] sm:$0xff] }
 0x903   :  { %12850 = vst [vmem:[#allocation80_spill] sm:$0xff] %v9627_v22  ;;  %vm12855_vm7 = vnez %v12854_v46  ;;  %vm12860_vm13 = vnez %v12658_v23  ;;  %v3146_v46 = vsel %vm9617_vm2, %v8175_v15, %v9109_v35  ;;  %v12871_v35 = vld [vmem:[#allocation61_spill] sm:$0xff]  ;;  %v12874_v23 = vld [vmem:[#allocation63_spill] sm:$0xff]  ;;  %vm12885_vm4 = vcmp.ge.s32.totalorder %v9405_v39, 0 }
 0x904   :  { %v12857_v9 = vsel %vm12855_vm7, %v8281_v61, %v12856_v30  ;;  %v12861_v10 = vsel %vm12860_vm13, 3, %v12671_v13  ;;  %v3173_v61 = vsel %vm9617_vm2, %v8177_v3, %v9119_v41  ;;  %v12863_v13 = vld [vmem:[#allocation185_spill] sm:$0xff]  ;;  %v12865_v30 = vld [vmem:[#allocation107_spill] sm:$0xff]  ;;  %v3200_v57 = vsel %vm9617_vm2, %v12762_v62, %v12871_v35  ;;  %v12872_v41 = vld [vmem:[#allocation62_spill] sm:$0xff] }
 0x905   :  { %vm9646_vm12 = vcmp.ge.f32.partialorder %v12857_v9, 0.5  ;;  %v9656_v4 = vsel %vm9617_vm2, 4, %v12861_v10  ;;  %vm12864_vm9 = vnez %v12863_v13  ;;  %v12866_v9 = vld [vmem:[#allocation111_spill] sm:$0xff]  ;;  %v3219_v55 = vsel %vm9357_vm1, %v12873_v20, %v12872_v41  ;;  %vm9740_vm11 = vmor %vm9424_vm14, %vm12885_vm4 }
 0x906   :  { %v12859_v27 = vsel %vm9646_vm12, 4294967295, %v12858_v27  ;;  %12862 = vst [vmem:[#allocation36_spill] sm:$0xff] %v9656_v4  ;;  %v12867_v10 = vsel %vm12864_vm9, %v12865_v30, %v12866_v9  ;;  %v3220_v13 = vsel %vm9364_vm6, %v12873_v20, %v12874_v23  ;;  %v12880_v30 = vld [vmem:[#allocation66_spill] sm:$0xff]  ;;  %vm11310_vm13 = vcmp.ge.s32.totalorder %v9374_v0, 0  ;;  %v12889_v9 = vld [vmem:[#allocation177_spill] sm:$0xff]  ;;  %vm12899_vm14 = vmmov %vm12885_vm4 }
 0x907   :  { %vm9675_vm7 = vcmp.ge.f32.partialorder %v12867_v10, 0.5  ;;  %v12881_v10 = vld [vmem:[#allocation67_spill] sm:$0xff]  ;;  %vm11311_vm12 = vcmp.ge.s32.totalorder %v9553_v31, 0  ;;  %vm9729_vm10 = vmor %vm9389_vm5, %vm11310_vm13  ;;  %v12882_v35 = vmov 0  ;;  %v12886_v41 = vmov 0 }
 0x908   :  { %v12869_v51 = vsel %vm9675_vm7, 4294967295, %v12868_v51  ;;  %v12883_v35 = vsel %vm9729_vm10, 4294967295, %v12882_v35  ;;  %v12887_v41 = vsel %vm9740_vm11, 4294967295, %v12886_v41  ;;  %v12890_v21 = vsel %vm9357_vm1, %v8175_v15, %v8801_v24 }
 0x909   :  { %12870 = vst [vmem:[#allocation92_spill] sm:$0xff] %v12869_v51  ;;  %v12878_v51 = vld [vmem:[#allocation90_spill] sm:$0xff]  ;;  %12884 = vst [vmem:[#allocation81_spill] sm:$0xff] %v12883_v35  ;;  %v9752_v23 = vsel %vm11310_vm13, %v12890_v21, %v12889_v9  ;;  %vm12892_vm5 = vcmp.ge.s32.totalorder %v9442_v1, 0  ;;  %vm12893_vm7 = vnez %v12782_v7  ;;  %v12897_v35 = vld [vmem:[#allocation108_spill] sm:$0xff]  ;;  %v12901_v7 = vsel %vm9395_vm15, %v8175_v15, %v12774_v38 }
 0x90a   :  { %12888 = vst [vmem:[#allocation82_spill] sm:$0xff] %v12887_v41  ;;  %12891 = vst [vmem:[#allocation83_spill] sm:$0xff] %v9752_v23  ;;  %v12898_v41 = vsel %vm9364_vm6, %v8175_v15, %v8830_v18  ;;  %v12900_v9 = vld [vmem:[#allocation109_spill] sm:$0xff]  ;;  %v12906_v18 = vld [vmem:[#allocation110_spill] sm:$0xff]  ;;  %vm12909_vm13 = vnez %v12797_v54  ;;  %v12910_v15 = vmov 0 }
 0x90b   :  { %vm9758_vm9 = vmor %vm12893_vm7, %vm12892_vm5  ;;  %v9770_v24 = vsel %vm12899_vm14, %v12898_v41, %v12897_v35  ;;  %v12904_v23 = vld [vmem:[#allocation189_spill] sm:$0xff]  ;;  %vm12905_vm7 = vcmp.ge.s32.totalorder %v9479_v11, 0  ;;  %v12913_v38 = vld [vmem:[#allocation54_spill] sm:$0xff] }
 0x90c   :  { %v12895_v53 = vsel %vm9758_vm9, 4294967295, %v12894_v53  ;;  %vm12902_vm4 = vmmov %vm12892_vm5  ;;  %vm12907_vm5 = vcmp.ge.s32.totalorder %v9516_v58, 0  ;;  %v9803_v41 = vsel %vm11311_vm12, %v3143_v12, %v12913_v38  ;;  %v12918_v54 = vld [vmem:[#allocation47_spill] sm:$0xff] }
 0x90d   :  { %12896 = vst [vmem:[#allocation84_spill] sm:$0xff] %v12895_v53  ;;  %v9780_v21 = vsel %vm12902_vm4, %v12901_v7, %v12900_v9  ;;  %v9785_v53 = vsel %vm12905_vm7, %v3141_v5, %v12904_v23  ;;  %v9790_v35 = vsel %vm12907_vm5, %v3142_v37, %v12906_v18  ;;  %vm12908_vm14 = vmmov %vm12905_vm7  ;;  %v12914_v5 = vld [vmem:[#allocation56_spill] sm:$0xff]  ;;  %vm12915_vm4 = vcmp.ge.s32.totalorder %v9590_v40, 0  ;;  %v12916_v37 = vld [vmem:[#allocation58_spill] sm:$0xff] }
 0x90e   :  { %12903 = vst [vmem:[#allocation85_spill] sm:$0xff] %v9780_v21  ;;  %vm9796_vm2 = vmor %vm12909_vm13, %vm12908_vm14  ;;  %v9808_v23 = vsel %vm12915_vm4, %v3144_v42, %v12914_v5  ;;  %vm12917_vm7 = vcmp.ge.s32.totalorder %v9627_v22, 0  ;;  %vm12919_vm13 = vcmp.ge.s32.totalorder %v9656_v4, 0  ;;  %vm12920_vm14 = vnez %v12812_v29  ;;  %v12923_v42 = vld [vmem:[#allocation87_spill] sm:$0xff] }
 0x90f   :  { %v12911_v15 = vsel %vm9796_vm2, 4294967295, %v12910_v15  ;;  %v9813_v9 = vsel %vm12917_vm7, %v3145_v33, %v12916_v37  ;;  %v9818_v7 = vsel %vm12919_vm13, %v3146_v46, %v12918_v54  ;;  %vm9824_vm12 = vmor %vm12920_vm14, %vm12907_vm5  ;;  %v12924_v33 = vsel %vm9357_vm1, %v8177_v3, %v8811_v6  ;;  %v12926_v46 = vld [vmem:[#allocation35_spill] sm:$0xff]  ;;  %v12933_v54 = vld [vmem:[#allocation30_spill] sm:$0xff] }
 0x910   :  { %12912 = vst [vmem:[#allocation164_spill] sm:$0xff] %v12911_v15  ;;  %vm12925_vm4 = vcmp.ge.s32.totalorder %v9374_v0, 0  ;;  %v12927_v29 = vsel %vm9364_vm6, %v8177_v3, %v8840_v44  ;;  %vm12928_vm7 = vcmp.ge.s32.totalorder %v9405_v39, 0  ;;  %v12929_v5 = vld [vmem:[#allocation39_spill] sm:$0xff]  ;;  %v12930_v6 = vsel %vm9395_vm15, %v8177_v3, %v12775_v63  ;;  %v10206_v15 = vld [vmem:[#allocation16 + $0x60] sm:$0xff] }
 0x911   :  { %v9836_v18 = vsel %vm12925_vm4, %v12924_v33, %v12923_v42  ;;  %v9846_v38 = vsel %vm12928_vm7, %v12927_v29, %v12926_v46  ;;  %vm12931_vm13 = vcmp.ge.s32.totalorder %v9442_v1, 0  ;;  %v12934_v44 = vsel %vm9432_vm8, %v8177_v3, %v12790_v45  ;;  %v12940_v33 = vld [vmem:[#allocation31_spill] sm:$0xff]  ;;  %v12943_v29 = vld [vmem:[#allocation40_spill] sm:$0xff]  ;;  %13061 = vst [vmem:[#allocation179_spill] sm:$0xff] %v10206_v15  ;;  %v3426_v15 = vld [vmem:[#allocation19] sm:$0xff] }
 0x912   :  { %v9856_v37 = vsel %vm12931_vm13, %v12930_v6, %v12929_v5  ;;  %vm12935_vm5 = vcmp.ge.s32.totalorder %v9479_v11, 0  ;;  %vm12936_vm14 = vcmp.ge.s32.totalorder %v9553_v31, 0  ;;  %vm12937_vm4 = vnez %v12827_v47  ;;  %v12945_v47 = vld [vmem:[#allocation42_spill] sm:$0xff]  ;;  %v3431_v21 = vld [vmem:[#allocation19 + $0x28] sm:$0xff] }
 0x913   :  { %12932 = vst [vmem:[#allocation114_spill] sm:$0xff] %v9856_v37  ;;  %v9866_v42 = vsel %vm12935_vm5, %v12934_v44, %v12933_v54  ;;  %vm9872_vm7 = vmor %vm12937_vm4, %vm12936_vm14  ;;  %v12938_v63 = vmov 0  ;;  %v12941_v46 = vsel %vm9469_vm3, %v8177_v3, %v12805_v25  ;;  %vm12942_vm13 = vcmp.ge.s32.totalorder %v9516_v58, 0  ;;  %v12947_v54 = vld [vmem:[#allocation43_spill] sm:$0xff]  ;;  %v9901_v3 = vld [vmem:[#allocation16 + $0x90] sm:$0xff] }
 0x914   :  { %v12939_v63 = vsel %vm9872_vm7, 4294967295, %v12938_v63  ;;  %v9884_v45 = vsel %vm12942_vm13, %v12941_v46, %v12940_v33  ;;  %vm12944_vm5 = vmmov %vm12936_vm14  ;;  %vm12946_vm14 = vcmp.ge.s32.totalorder %v9590_v40, 0  ;;  %vm12948_vm4 = vcmp.ge.s32.totalorder %v9627_v22, 0  ;;  %v12957_v33 = vld [vmem:[#allocation106_spill] sm:$0xff]  ;;  %v13070_v37 = vld [vmem:[#allocation125_spill] sm:$0xff] }
 0x915   :  { %v9889_v5 = vsel %vm12944_vm5, %v3170_v32, %v12943_v29  ;;  %v9894_v6 = vsel %vm12946_vm14, %v3171_v36, %v12945_v47  ;;  %v9899_v44 = vsel %vm12948_vm4, %v3172_v16, %v12947_v54  ;;  %vm12950_vm13 = vmmov %vm12946_vm14  ;;  %v12951_v25 = vmov 0  ;;  %v12954_v32 = vld [vmem:[#allocation105_spill] sm:$0xff] }
 0x916   :  { %12949 = vst [vmem:[#allocation93_spill] sm:$0xff] %v9899_v44  ;;  %vm9907_vm7 = vmor %vm9609_vm0, %vm12950_vm13  ;;  %vm12955_vm5 = vcmp.ge.s32.totalorder %v9656_v4, 0  ;;  %v12958_v16 = vsel %vm9357_vm1, %v12762_v62, %v8850_v28  ;;  %vm12959_vm14 = vcmp.ge.s32.totalorder %v9374_v0, 0  ;;  %v12962_v29 = vsel %vm9364_vm6, %v12762_v62, %v12776_v14  ;;  %v12965_v47 = vld [vmem:[#allocation165_spill] sm:$0xff]  ;;  %v9952_v14 = vld [vmem:[#allocation16 + $0xb0] sm:$0xff] }
 0x917   :  { %v12952_v25 = vsel %vm9907_vm7, 4294967295, %v12951_v25  ;;  %v9914_v36 = vsel %vm12955_vm5, %v3173_v61, %v12954_v32  ;;  %v9924_v46 = vsel %vm12959_vm14, %v12958_v16, %v12957_v33  ;;  %vm12963_vm0 = vcmp.ge.s32.totalorder %v9405_v39, 0  ;;  %v9946_v32 = vld [vmem:[#allocation16 + $0x98] sm:$0xff]  ;;  %v9948_v33 = vld [vmem:[#allocation16 + $0xa0] sm:$0xff]  ;;  %v9950_v16 = vld [vmem:[#allocation16 + $0xa8] sm:$0xff] }
 0x918   :  { %12953 = vst [vmem:[#allocation94_spill] sm:$0xff] %v12952_v25  ;;  %12956 = vst [vmem:[#allocation95_spill] sm:$0xff] %v9914_v36  ;;  %v9934_v61 = vsel %vm12963_vm0, %v12962_v29, %v12961_v49  ;;  %v12966_v28 = vsel %vm9395_vm15, %v12762_v62, %v12791_v48  ;;  %vm12967_vm4 = vcmp.ge.s32.totalorder %v9442_v1, 0  ;;  %vm12969_vm13 = vcmp.ge.s32.totalorder %v9627_v22, 0  ;;  %v12973_v48 = vld [vmem:[#allocation166_spill] sm:$0xff] }
 0x919   :  { %12960 = vst [vmem:[#allocation96_spill] sm:$0xff] %v9924_v46  ;;  %12964 = vst [vmem:[#allocation97_spill] sm:$0xff] %v9934_v61  ;;  %v9944_v54 = vsel %vm12967_vm4, %v12966_v28, %v12965_v47  ;;  %vm12970_vm5 = vnez %v12859_v27  ;;  %v12971_v49 = vmov 0  ;;  %v12974_v29 = vsel %vm9432_vm8, %v12762_v62, %v12806_v50  ;;  %v12977_v28 = vld [vmem:[#allocation116_spill] sm:$0xff]  ;;  %v12982_v46 = vld [vmem:[#allocation127_spill] sm:$0xff] }
 0x91a   :  { %12968 = vst [vmem:[#allocation98_spill] sm:$0xff] %v9944_v54  ;;  %vm9958_vm14 = vmor %vm12970_vm5, %vm12969_vm13  ;;  %vm12975_vm0 = vcmp.ge.s32.totalorder %v9479_v11, 0  ;;  %v12978_v54 = vld [vmem:[#allocation146_spill] sm:$0xff]  ;;  %vm12980_vm4 = vcmp.ge.s32.totalorder %v9516_v58, 0  ;;  %vm12983_vm13 = vnez %v12799_v34  ;;  %vm12986_vm5 = vcmp.ge.s32.totalorder %v9553_v31, 0 }
 0x91b   :  { %v12972_v49 = vsel %vm9958_vm14, 4294967295, %v12971_v49  ;;  %v9970_v47 = vsel %vm12975_vm0, %v12974_v29, %v12973_v48  ;;  %v12979_v27 = vsel %vm9469_vm3, %v12762_v62, %v12978_v54  ;;  %v12985_v50 = vsel %vm12983_vm13, %v12762_v62, %v12984_v56  ;;  %v12988_v29 = vld [vmem:[#allocation131_spill] sm:$0xff]  ;;  %v12995_v56 = vld [vmem:[#allocation92_spill] sm:$0xff]  ;;  %v13011_v36 = vld [vmem:[#allocation118_spill] sm:$0xff] }
 0x91c   :  { %12976 = vst [vmem:[#allocation99_spill] sm:$0xff] %v9970_v47  ;;  %v9980_v61 = vsel %vm12980_vm4, %v12979_v27, %v12977_v28  ;;  %v9990_v48 = vsel %vm12986_vm5, %v12985_v50, %v12982_v46  ;;  %vm12989_vm0 = vnez %v12814_v17  ;;  %v12990_v47 = vld [vmem:[#allocation59_spill] sm:$0xff]  ;;  %vm12992_vm6 = vcmp.ge.s32.totalorder %v9590_v40, 0  ;;  %v10002_v27 = vld [vmem:[#allocation16 + $0xb8] sm:$0xff] }
 0x91d   :  { %12981 = vst [vmem:[#allocation100_spill] sm:$0xff] %v9980_v61  ;;  %12987 = vst [vmem:[#allocation101_spill] sm:$0xff] %v9990_v48  ;;  %v12991_v54 = vsel %vm12989_vm0, %v12762_v62, %v12990_v47  ;;  %v10004_v61 = vld [vmem:[#allocation16 + $0xc0] sm:$0xff]  ;;  %vm12994_vm4 = vcmp.ge.s32.totalorder %v9656_v4, 0  ;;  %vm12996_vm1 = vnez %v12995_v56  ;;  %v12999_v50 = vld [vmem:[#allocation117_spill] sm:$0xff]  ;;  %vm13000_vm14 = vnez %v12830_v52 }
 0x91e   :  { %v10000_v28 = vsel %vm12992_vm6, %v12991_v54, %v12988_v29  ;;  %vm10010_vm5 = vmor %vm12996_vm1, %vm12994_vm4  ;;  %v13001_v47 = vld [vmem:[#allocation60_spill] sm:$0xff]  ;;  %vm13003_vm6 = vcmp.ge.s32.totalorder %v9627_v22, 0  ;;  %v13005_v54 = vld [vmem:[#allocation130_spill] sm:$0xff]  ;;  %vm13009_vm1 = vcmp.ge.s32.totalorder %v9374_v0, 0 }
 0x91f   :  { %12993 = vst [vmem:[#allocation151_spill] sm:$0xff] %v10000_v28  ;;  %v13002_v48 = vsel %vm13000_vm14, %v12762_v62, %v13001_v47  ;;  %vm13006_vm7 = vmmov %vm12994_vm4  ;;  %v13008_v56 = vld [vmem:[#allocation136_spill] sm:$0xff]  ;;  %vm13012_vm4 = vcmp.ge.s32.totalorder %v9405_v39, 0  ;;  %v10039_v62 = vld [vmem:[#allocation16 + $0xc8] sm:$0xff] }
 0x920   :  { %v10022_v29 = vsel %vm13003_vm6, %v13002_v48, %v12999_v50  ;;  %v10027_v28 = vsel %vm13006_vm7, %v3200_v57, %v13005_v54  ;;  %v10032_v8 = vsel %vm13009_vm1, %v3219_v55, %v13008_v56  ;;  %v10037_v44 = vsel %vm13012_vm4, %v3220_v13, %v13011_v36  ;;  %v10041_v47 = vld [vmem:[#allocation16 + $0xd0] sm:$0xff]  ;;  %v13015_v48 = vld [vmem:[#allocation134_spill] sm:$0xff] }
 0x921   :  { %13004 = vst [vmem:[#allocation149_spill] sm:$0xff] %v10022_v29  ;;  %13007 = vst [vmem:[#allocation41_spill] sm:$0xff] %v10027_v28  ;;  %v13016_v57 = vld [vmem:[#allocation64_spill] sm:$0xff]  ;;  %vm13018_vm7 = vcmp.ge.s32.totalorder %v9442_v1, 0  ;;  %v13020_v55 = vld [vmem:[#allocation138_spill] sm:$0xff]  ;;  %vm13023_vm6 = vcmp.ge.s32.totalorder %v9479_v11, 0 }
 0x922   :  { %13010 = vst [vmem:[#allocation113_spill] sm:$0xff] %v10032_v8  ;;  %13013 = vst [vmem:[#allocation29_spill] sm:$0xff] %v10037_v44  ;;  %v13017_v50 = vsel %vm9395_vm15, %v12873_v20, %v13016_v57  ;;  %v13021_v13 = vld [vmem:[#allocation128_spill] sm:$0xff]  ;;  %v13025_v44 = vld [vmem:[#allocation119_spill] sm:$0xff]  ;;  %v13026_v57 = vsel %vm9469_vm3, %v12873_v20, %v12877_v26  ;;  %vm13027_vm1 = vcmp.ge.s32.totalorder %v9516_v58, 0  ;;  %vm13031_vm4 = vcmp.ge.s32.totalorder %v9553_v31, 0 }
 0x923   :  { %13014 = vst [vmem:[#allocation44_spill] sm:$0xff] %v10041_v47  ;;  %v10051_v54 = vsel %vm13018_vm7, %v13017_v50, %v13015_v48  ;;  %v13022_v36 = vsel %vm9432_vm8, %v12873_v20, %v13021_v13  ;;  %v10071_v48 = vsel %vm13027_vm1, %v13026_v57, %v13025_v44  ;;  %v13029_v50 = vld [vmem:[#allocation135_spill] sm:$0xff]  ;;  %v13030_v13 = vsel %vm12983_vm13, %v12873_v20, %v12878_v51  ;;  %v13038_v51 = vld [vmem:[#allocation120_spill] sm:$0xff]  ;;  %v10156_v31 = vld [vmem:[#allocation16 + $0x118] sm:$0xff] }
 0x924   :  { %13019 = vst [vmem:[#allocation152_spill] sm:$0xff] %v10051_v54  ;;  %v10061_v56 = vsel %vm13023_vm6, %v13022_v36, %v13020_v55  ;;  %13028 = vst [vmem:[#allocation167_spill] sm:$0xff] %v10071_v48  ;;  %v10081_v55 = vsel %vm13031_vm4, %v13030_v13, %v13029_v50  ;;  %v10083_v36 = vld [vmem:[#allocation16 + $0xd8] sm:$0xff]  ;;  %v10087_v54 = vld [vmem:[#allocation16 + $0xe8] sm:$0xff]  ;;  %v13035_v44 = vsel %vm12989_vm0, %v12873_v20, %v12879_v2  ;;  %vm13036_vm7 = vcmp.ge.s32.totalorder %v9590_v40, 0 }
 0x925   :  { %13024 = vst [vmem:[#allocation150_spill] sm:$0xff] %v10061_v56  ;;  %13032 = vst [vmem:[#allocation168_spill] sm:$0xff] %v10081_v55  ;;  %v10085_v56 = vld [vmem:[#allocation16 + $0xe0] sm:$0xff]  ;;  %v13034_v26 = vld [vmem:[#allocation139_spill] sm:$0xff]  ;;  %v13039_v50 = vsel %vm13000_vm14, %v12873_v20, %v12880_v30  ;;  %vm13040_vm6 = vcmp.ge.s32.totalorder %v9627_v22, 0  ;;  %vm13043_vm1 = vnez %v12846_v43  ;;  %vm13045_vm4 = vcmp.ge.s32.totalorder %v9656_v4, 0 }
 0x926   :  { %13033 = vst [vmem:[#allocation104_spill] sm:$0xff] %v10087_v54  ;;  %v10097_v57 = vsel %vm13036_vm7, %v13035_v44, %v13034_v26  ;;  %v10107_v13 = vsel %vm13040_vm6, %v13039_v50, %v13038_v51  ;;  %v13042_v55 = vld [vmem:[#allocation137_spill] sm:$0xff]  ;;  %v13044_v2 = vsel %vm13043_vm1, %v12873_v20, %v12881_v10  ;;  %v10119_v44 = vld [vmem:[#allocation16] sm:$0xff]  ;;  %v10123_v48 = vld [vmem:[#allocation16 + $0x10] sm:$0xff]  ;;  %v3501_v20 = vsel %vm9729_vm10, %v9901_v3, 1.0 }
 0x927   :  { %13037 = vst [vmem:[#allocation46_spill] sm:$0xff] %v10097_v57  ;;  %13041 = vst [vmem:[#allocation156_spill] sm:$0xff] %v10107_v13  ;;  %v10117_v26 = vsel %vm13045_vm4, %v13044_v2, %v13042_v55  ;;  %v10121_v57 = vld [vmem:[#allocation16 + $0x8] sm:$0xff]  ;;  %v10125_v30 = vld [vmem:[#allocation16 + $0xf0] sm:$0xff]  ;;  %v3502_v28 = vsel %vm9740_vm11, %v9946_v32, 1.0  ;;  %v3503_v4 = vsel %vm9758_vm9, %v9948_v33, 1.0  ;;  %vm13057_vm7 = vnez %v12939_v63 }
 0x928   :  { %13046 = vst [vmem:[#allocation170_spill] sm:$0xff] %v10117_v26  ;;  %13047 = vst [vmem:[#allocation171_spill] sm:$0xff] %v10123_v48  ;;  %v10127_v51 = vld [vmem:[#allocation16 + $0xf8] sm:$0xff]  ;;  %v10129_v50 = vld [vmem:[#allocation16 + $0x100] sm:$0xff]  ;;  %v3504_v3 = vsel %vm9796_vm2, %v9950_v16, 1.0  ;;  %v3505_v22 = vsel %vm9824_vm12, %v9952_v14, 1.0  ;;  %vm13058_vm6 = vnez %v12952_v25  ;;  %vm13059_vm4 = vnez %v12972_v49 }
 0x929   :  { %13048 = vst [vmem:[#allocation172_spill] sm:$0xff] %v10125_v30  ;;  %13049 = vst [vmem:[#allocation158_spill] sm:$0xff] %v10127_v51  ;;  %v10134_v10 = vld [vmem:[#allocation16 + $0x18] sm:$0xff]  ;;  %v10136_v55 = vld [vmem:[#allocation16 + $0x20] sm:$0xff]  ;;  %v3506_v32 = vsel %vm13057_vm7, %v10002_v27, 1.0  ;;  %v3507_v33 = vsel %vm13058_vm6, %v10004_v61, 1.0  ;;  %3898 = vrcp.f32 %v3501_v20 }
 0x92a   :  { %13050 = vst [vmem:[#allocation174_spill] sm:$0xff] %v10129_v50  ;;  %v10138_v2 = vld [vmem:[#allocation16 + $0x108] sm:$0xff]  ;;  %v10140_v26 = vld [vmem:[#allocation16 + $0x110] sm:$0xff]  ;;  %13056 = vst [vmem:[#allocation159_spill] sm:$0xff] %v10156_v31  ;;  %3900 = vrcp.f32 %v3502_v28 }
 0x92b   :  { %13052 = vst [vmem:[#allocation175_spill] sm:$0xff] %v10138_v2  ;;  %13053 = vst [vmem:[#allocation176_spill] sm:$0xff] %v10140_v26  ;;  %v10154_v40 = vld [vmem:[#allocation16 + $0x28] sm:$0xff]  ;;  %v10170_v58 = vld [vmem:[#allocation16 + $0x30] sm:$0xff]  ;;  %3902 = vrcp.f32 %v3503_v4 }
 0x92c   :  { %v10172_v11 = vld [vmem:[#allocation16 + $0x38] sm:$0xff]  ;;  %v10186_v47 = vld [vmem:[#allocation16 + $0x40] sm:$0xff]  ;;  %v10188_v1 = vld [vmem:[#allocation16 + $0x48] sm:$0xff]  ;;  %3904 = vrcp.f32 %v3504_v3 }
 0x92d   :  { %v10202_v30 = vld [vmem:[#allocation16 + $0x50] sm:$0xff]  ;;  %v10204_v54 = vld [vmem:[#allocation16 + $0x58] sm:$0xff]  ;;  %v13062_v61 = vld [vmem:[#allocation83_spill] sm:$0xff]  ;;  %3906 = vrcp.f32 %v3505_v22 }
 0x92e   :  { %13060 = vst [vmem:[#allocation178_spill] sm:$0xff] %v10204_v54  ;;  %v10217_v14 = vld [vmem:[#allocation16 + $0x68] sm:$0xff]  ;;  %v10219_v26 = vld [vmem:[#allocation16 + $0x70] sm:$0xff]  ;;  %v10221_v25 = vld [vmem:[#allocation16 + $0x78] sm:$0xff]  ;;  %3908 = vrcp.f32 %v3506_v32 }
 0x92f   :  { %13063 = vst [vmem:[#allocation180_spill] sm:$0xff] %v10219_v26  ;;  %13064 = vst [vmem:[#allocation160_spill] sm:$0xff] %v10221_v25  ;;  %v10231_v31 = vld [vmem:[#allocation16 + $0x80] sm:$0xff]  ;;  %v10233_v2 = vld [vmem:[#allocation16 + $0x88] sm:$0xff]  ;;  %3910 = vrcp.f32 %v3507_v33 }
 0x930   :  { %13065 = vst [vmem:[#allocation182_spill] sm:$0xff] %v10231_v31  ;;  %13066 = vst [vmem:[#allocation183_spill] sm:$0xff] %v10233_v2  ;;  %v13069_v54 = vld [vmem:[#allocation68_spill] sm:$0xff]  ;;  %v13071_v51 = vld [vmem:[#allocation74_spill] sm:$0xff] }
 0x931   :  { %vm13072_vm6 = vnez %v13071_v51  ;;  %v13073_v48 = vld [vmem:[#allocation69_spill] sm:$0xff]  ;;  %v13074_v20 = vld [vmem:[#allocation75_spill] sm:$0xff]  ;;  %v13076_v27 = vld [vmem:[#allocation70_spill] sm:$0xff] }
 0x932   :  { %v3246_v4 = vsel %vm13072_vm6, %v13070_v37, %v13069_v54  ;;  %vm13075_vm7 = vnez %v13074_v20  ;;  %v3248_v3 = vsel %vm9395_vm15, %v13070_v37, %v13076_v27  ;;  %v13077_v50 = vld [vmem:[#allocation71_spill] sm:$0xff]  ;;  %v3428_v51 = vld [vmem:[#allocation19 + $0x10] sm:$0xff]  ;;  %v3429_v54 = vld [vmem:[#allocation19 + $0x18] sm:$0xff]  ;;  %vm13083_vm15 = vcmp.ge.s32.totalorder %v9374_v0, 0 }
 0x933   :  { %v3247_v26 = vsel %vm13075_vm7, %v13070_v37, %v13073_v48  ;;  %v3249_v16 = vsel %vm9432_vm8, %v13070_v37, %v13077_v50  ;;  %v3427_v2 = vld [vmem:[#allocation19 + $0x8] sm:$0xff]  ;;  %v13078_v22 = vld [vmem:[#allocation129_spill] sm:$0xff]  ;;  %v13079_v48 = vld [vmem:[#allocation72_spill] sm:$0xff]  ;;  %v3435_v17 = vsel %vm13083_vm15, %v3246_v4, %v3426_v15  ;;  %vm13085_vm8 = vcmp.ge.s32.totalorder %v9405_v39, 0 }
 0x934   :  { %v3250_v20 = vsel %vm9469_vm3, %v13070_v37, %v13078_v22  ;;  %v3251_v60 = vsel %vm12983_vm13, %v13070_v37, %v13079_v48  ;;  %v13080_v27 = vld [vmem:[#allocation34_spill] sm:$0xff]  ;;  %v3432_v31 = vld [vmem:[#allocation19 + $0x30] sm:$0xff]  ;;  %v13081_v32 = vld [vmem:[#allocation91_spill] sm:$0xff]  ;;  %v3436_v33 = vsel %vm13085_vm8, %v3247_v26, %v3427_v2  ;;  %vm13113_vm15 = vnez %v12939_v63 }
 0x935   :  { %v3252_v59 = vsel %vm12989_vm0, %v13070_v37, %v13080_v27  ;;  %v3430_v50 = vld [vmem:[#allocation19 + $0x20] sm:$0xff]  ;;  %v3253_v19 = vsel %vm13000_vm14, %v13070_v37, %v13081_v32  ;;  %v13082_v22 = vld [vmem:[#allocation73_spill] sm:$0xff]  ;;  %v13084_v27 = vsel %vm13059_vm4, %v10039_v62, 1.0  ;;  %v13086_v52 = vld [vmem:[#allocation76_spill] sm:$0xff] }
 0x936   :  { %v3254_v34 = vsel %vm13043_vm1, %v13070_v37, %v13082_v22  ;;  %v3433_v48 = vld [vmem:[#allocation19 + $0x38] sm:$0xff]  ;;  %v3434_v28 = vld [vmem:[#allocation19 + $0x40] sm:$0xff]  ;;  %3912 = vrcp.f32 %v13084_v27  ;;  %vm13087_vm3 = vcmp.ge.s32.totalorder %v13086_v52, 0  ;;  %v13090_v37 = vld [vmem:[#allocation44_spill] sm:$0xff]  ;;  %v13109_v52 = vsub.f32 %v9770_v24, %v10121_v57 }
 0x937   :  { %v3437_v32 = vsel %vm13087_vm3, %v3248_v3, %v3428_v51  ;;  %v13088_v25 = vld [vmem:[#allocation77_spill] sm:$0xff]  ;;  %v13091_v22 = vsel %vm10010_vm5, %v13090_v37, 1.0  ;;  %v13092_v0 = vld [vmem:[#allocation78_spill] sm:$0xff]  ;;  %v13094_v4 = vld [vmem:[#allocation132_spill] sm:$0xff]  ;;  %v3899_v51 = vpop.eup %3898 }
 0x938   :  { %vm13089_vm14 = vcmp.ge.s32.totalorder %v13088_v25, 0  ;;  %3914 = vrcp.f32 %v13091_v22  ;;  %vm13093_vm13 = vcmp.ge.s32.totalorder %v13092_v0, 0  ;;  %vm13095_vm0 = vcmp.ge.s32.totalorder %v13094_v4, 0  ;;  %v13096_v27 = vld [vmem:[#allocation79_spill] sm:$0xff]  ;;  %v13099_v26 = vld [vmem:[#allocation80_spill] sm:$0xff]  ;;  %v13117_v57 = vld [vmem:[#allocation158_spill] sm:$0xff] }
 0x939   :  { %v3438_v43 = vsel %vm13089_vm14, %v3249_v16, %v3429_v54  ;;  %v3439_v15 = vsel %vm13093_vm13, %v3250_v20, %v3430_v50  ;;  %v3440_v62 = vsel %vm13095_vm0, %v3251_v60, %v3431_v21  ;;  %vm13097_vm1 = vcmp.ge.s32.totalorder %v13096_v27, 0  ;;  %v13101_v16 = vld [vmem:[#allocation36_spill] sm:$0xff]  ;;  %v13115_v4 = vld [vmem:[#allocation171_spill] sm:$0xff] }
 0x93a   :  { %v10315_v39 = vsel %vm13097_vm1, %v3252_v59, %v3432_v31  ;;  %v13098_v25 = vsel %vm9729_vm10, %v10083_v36, 1.0  ;;  %vm13100_vm7 = vcmp.ge.s32.totalorder %v13099_v26, 0  ;;  %vm13102_vm6 = vcmp.ge.s32.totalorder %v13101_v16, 0  ;;  %v13119_v16 = vld [vmem:[#allocation98_spill] sm:$0xff] }
 0x93b   :  { %3916 = vrcp.f32 %v13098_v25  ;;  %v10323_v2 = vsel %vm13100_vm7, %v3253_v19, %v3433_v48  ;;  %v10327_v3 = vsel %vm13102_vm6, %v3254_v34, %v3434_v28  ;;  %v3444_v21 = vsel %vm9729_vm10, %v3435_v17, 0  ;;  %v3901_v28 = vpop.eup %3900  ;;  %v13106_v19 = vld [vmem:[#allocation104_spill] sm:$0xff] }
 0x93c   :  { %v13103_v31 = vsel %vm9740_vm11, %v10085_v56, 1.0  ;;  %v3445_v36 = vsel %vm9740_vm11, %v3436_v33, 0  ;;  %v3446_v54 = vsel %vm9758_vm9, %v3437_v32, 0  ;;  %v3447_v60 = vsel %vm9796_vm2, %v3438_v43, 0  ;;  %3453 = vst [vmem:[#allocation19] sm:$0xff] %v3444_v21  ;;  %v13108_v34 = vld [vmem:[#allocation96_spill] sm:$0xff]  ;;  %v3903_v33 = vpop.eup %3902 }
 0x93d   :  { %3918 = vrcp.f32 %v13103_v31  ;;  %v13105_v59 = vsub.f32 %v13062_v61, %v10119_v44  ;;  %v13107_v56 = vsel %vm9758_vm9, %v13106_v19, 1.0  ;;  %v10349_v48 = vmul.f32 %v3899_v51, %v13108_v34  ;;  %3454 = vst [vmem:[#allocation19 + $0x8] sm:$0xff] %v3445_v36  ;;  %3455 = vst [vmem:[#allocation19 + $0x10] sm:$0xff] %v3446_v54  ;;  %v13110_v61 = vld [vmem:[#allocation172_spill] sm:$0xff]  ;;  %v13112_v43 = vld [vmem:[#allocation97_spill] sm:$0xff]  ;;  %v3905_v0 = vpop.eup %3904 }
 0x93e   :  { %3920 = vrcp.f32 %v13107_v56  ;;  %v3448_v17 = vsel %vm9824_vm12, %v3439_v15, 0  ;;  %3456 = vst [vmem:[#allocation19 + $0x18] sm:$0xff] %v3447_v60  ;;  %v3531_v44 = vmul.f32 %v3901_v28, %v13109_v52  ;;  %v13111_v32 = vsel %vm9796_vm2, %v13110_v61, 1.0  ;;  %v13114_v15 = vld [vmem:[#allocation85_spill] sm:$0xff]  ;;  %v13121_v54 = vld [vmem:[#allocation174_spill] sm:$0xff]  ;;  %v13127_v34 = vld [vmem:[#allocation175_spill] sm:$0xff] }
 0x93f   :  { %v3529_v50 = vmul.f32 %v3899_v51, %v13105_v59  ;;  %3922 = vrcp.f32 %v13111_v32  ;;  %v10361_v37 = vmul.f32 %v3901_v28, %v13112_v43  ;;  %v3449_v22 = vsel %vm13113_vm15, %v3440_v62, 0  ;;  %3457 = vst [vmem:[#allocation19 + $0x20] sm:$0xff] %v3448_v17  ;;  %v3907_v51 = vpop.eup %3906  ;;  %v13123_v28 = vld [vmem:[#allocation99_spill] sm:$0xff] }
 0x940   :  { %v13116_v27 = vsub.f32 %v13114_v15, %v13115_v4  ;;  %v13118_v26 = vsel %vm9824_vm12, %v13117_v57, 1.0  ;;  %v10375_v21 = vmul.f32 %v3903_v33, %v13119_v16  ;;  %3458 = vst [vmem:[#allocation19 + $0x28] sm:$0xff] %v3449_v22  ;;  %v13120_v62 = vsub.f32 %v9785_v53, %v10134_v10  ;;  %v13125_v10 = vld [vmem:[#allocation94_spill] sm:$0xff]  ;;  %v13133_v22 = vld [vmem:[#allocation101_spill] sm:$0xff] }
 0x941   :  { %v3546_v24 = vsel %vm9729_vm10, %v3529_v50, 0.0  ;;  %3924 = vrcp.f32 %v13118_v26  ;;  %v3547_v36 = vsel %vm9740_vm11, %v3531_v44, 0.0  ;;  %v13122_v60 = vsel %vm13113_vm15, %v13121_v54, 1.0  ;;  %v3909_v50 = vpop.eup %3908 }
 0x942   :  { %v3533_v25 = vmul.f32 %v3903_v33, %v13116_v27  ;;  %v3535_v31 = vmul.f32 %v3905_v0, %v13120_v62  ;;  %3555 = vst [vmem:[#allocation18] sm:$0xff] %v3546_v24  ;;  %3926 = vrcp.f32 %v13122_v60  ;;  %v10387_v59 = vmul.f32 %v3905_v0, %v13123_v28  ;;  %3556 = vst [vmem:[#allocation18 + $0x8] sm:$0xff] %v3547_v36  ;;  %v13129_v33 = vld [vmem:[#allocation100_spill] sm:$0xff]  ;;  %v3911_v44 = vpop.eup %3910  ;;  %v13137_v24 = vld [vmem:[#allocation151_spill] sm:$0xff] }
 0x943   :  { %v13124_v19 = vsub.f32 %v9790_v35, %v10136_v55  ;;  %vm13126_vm8 = vnez %v13125_v10  ;;  %v10399_v52 = vmul.f32 %v3907_v51, %v13129_v33  ;;  %v13130_v61 = vsub.f32 %v9803_v41, %v10154_v40  ;;  %v13131_v55 = vld [vmem:[#allocation176_spill] sm:$0xff]  ;;  %v3913_v15 = vpop.eup %3912  ;;  %v13135_v41 = vld [vmem:[#allocation159_spill] sm:$0xff] }
 0x944   :  { %v3548_v53 = vsel %vm9758_vm9, %v3533_v25, 0.0  ;;  %v13128_v17 = vsel %vm13126_vm8, %v13127_v34, 1.0  ;;  %v3549_v35 = vsel %vm9796_vm2, %v3535_v31, 0.0  ;;  %v13132_v43 = vsel %vm13059_vm4, %v13131_v55, 1.0  ;;  %v3915_v26 = vpop.eup %3914  ;;  %v13147_v55 = vld [vmem:[#allocation179_spill] sm:$0xff] }
 0x945   :  { %v3537_v56 = vmul.f32 %v3907_v51, %v13124_v19  ;;  %3928 = vrcp.f32 %v13128_v17  ;;  %v3539_v32 = vmul.f32 %v3909_v50, %v13130_v61  ;;  %3557 = vst [vmem:[#allocation18 + $0x10] sm:$0xff] %v3548_v53  ;;  %v10411_v0 = vmul.f32 %v3909_v50, %v13133_v22  ;;  %3558 = vst [vmem:[#allocation18 + $0x18] sm:$0xff] %v3549_v35  ;;  %v3917_v36 = vpop.eup %3916 }
 0x946   :  { %3930 = vrcp.f32 %v13132_v43  ;;  %v13134_v4 = vsub.f32 %v9808_v23, %v10170_v58  ;;  %v13136_v25 = vsel %vm10010_vm5, %v13135_v41, 1.0  ;;  %v10423_v57 = vmul.f32 %v3911_v44, %v13137_v24  ;;  %v13139_v23 = vld [vmem:[#allocation149_spill] sm:$0xff] }
 0x947   :  { %v3550_v40 = vsel %vm9824_vm12, %v3537_v56, 0.0  ;;  %3932 = vrcp.f32 %v13136_v25  ;;  %v13138_v16 = vsub.f32 %v9813_v9, %v10172_v11  ;;  %v3551_v58 = vsel %vm13113_vm15, %v3539_v32, 0.0  ;;  %v13141_v9 = vld [vmem:[#allocation41_spill] sm:$0xff]  ;;  %v3919_v19 = vpop.eup %3918 }
 0x948   :  { %v3541_v27 = vmul.f32 %v3911_v44, %v13134_v4  ;;  %3559 = vst [vmem:[#allocation18 + $0x20] sm:$0xff] %v3550_v40  ;;  %v10431_v62 = vmul.f32 %v3913_v15, %v13139_v23  ;;  %v3618_v31 = vsel %vm9729_vm10, %v10349_v48, 1.0  ;;  %v13140_v54 = vsub.f32 %v9818_v7, %v10186_v47  ;;  %3560 = vst [vmem:[#allocation18 + $0x28] sm:$0xff] %v3551_v58  ;;  %v3921_v34 = vpop.eup %3920  ;;  %v13145_v44 = vld [vmem:[#allocation178_spill] sm:$0xff]  ;;  %v13153_v58 = vld [vmem:[#allocation29_spill] sm:$0xff] }
 0x949   :  { %v3543_v51 = vmul.f32 %v3913_v15, %v13138_v16  ;;  %v10442_v28 = vmul.f32 %v3915_v26, %v13141_v9  ;;  %v3619_v50 = vsel %vm9740_vm11, %v10361_v37, 1.0  ;;  %v13142_v7 = vsub.f32 %v9836_v18, %v10188_v1  ;;  %v13154_v23 = vld [vmem:[#allocation160_spill] sm:$0xff]  ;;  %v13158_v9 = vld [vmem:[#allocation182_spill] sm:$0xff] }
 0x94a   :  { %v3545_v60 = vmul.f32 %v3915_v26, %v13140_v54  ;;  %v3552_v11 = vsel %vm13126_vm8, %v3541_v27, 0.0  ;;  %v3620_v56 = vsel %vm9758_vm9, %v10375_v21, 1.0  ;;  %v3621_v53 = vsel %vm9796_vm2, %v10387_v59, 1.0  ;;  %v3923_v21 = vpop.eup %3922  ;;  %v13144_v59 = vld [vmem:[#allocation114_spill] sm:$0xff]  ;;  %v13156_v54 = vld [vmem:[#allocation152_spill] sm:$0xff] }
 0x94b   :  { %v3553_v48 = vsel %vm13059_vm4, %v3543_v51, 0.0  ;;  %3561 = vst [vmem:[#allocation18 + $0x30] sm:$0xff] %v3552_v11  ;;  %v3574_v47 = vmul.f32 %v3917_v36, %v13142_v7  ;;  %v13143_v17 = vsub.f32 %v9846_v38, %v10202_v30  ;;  %v3622_v1 = vsel %vm9824_vm12, %v10399_v52, 1.0  ;;  %v3925_v52 = vpop.eup %3924  ;;  %v13157_v11 = vld [vmem:[#allocation93_spill] sm:$0xff]  ;;  %v13161_v7 = vld [vmem:[#allocation95_spill] sm:$0xff] }
 0x94c   :  { %v3554_v37 = vsel %vm10010_vm5, %v3545_v60, 0.0  ;;  %3562 = vst [vmem:[#allocation18 + $0x38] sm:$0xff] %v3553_v48  ;;  %v3623_v18 = vsel %vm13113_vm15, %v10411_v0, 1.0  ;;  %v13146_v61 = vsub.f32 %v13144_v59, %v13145_v44  ;;  %v3624_v38 = vsel %vm13126_vm8, %v10423_v57, 1.0  ;;  %v3927_v4 = vpop.eup %3926  ;;  %v13151_v57 = vld [vmem:[#allocation180_spill] sm:$0xff]  ;;  %v13160_v48 = vld [vmem:[#allocation150_spill] sm:$0xff] }
 0x94d   :  { %v3576_v33 = vmul.f32 %v3919_v19, %v13143_v17  ;;  %3563 = vst [vmem:[#allocation18 + $0x40] sm:$0xff] %v3554_v37  ;;  %v3591_v35 = vsel %vm9729_vm10, %v3574_v47, 0.0  ;;  %v3625_v30 = vsel %vm13059_vm4, %v10431_v62, 1.0  ;;  %v13148_v43 = vsub.f32 %v9866_v42, %v13147_v55  ;;  %v13150_v42 = vld [vmem:[#allocation113_spill] sm:$0xff]  ;;  %v13162_v47 = vld [vmem:[#allocation183_spill] sm:$0xff]  ;;  %v13165_v59 = vld [vmem:[#allocation168_spill] sm:$0xff] }
 0x94e   :  { %v3578_v32 = vmul.f32 %v3921_v34, %v13146_v61  ;;  %3600 = vst [vmem:[#allocation18 + $0x48] sm:$0xff] %v3591_v35  ;;  %v3626_v15 = vsel %vm10010_vm5, %v10442_v28, 1.0  ;;  %3934 = vlog2.f32 %v3618_v31  ;;  %v13149_v27 = vsub.f32 %v9884_v45, %v10217_v14  ;;  %v13166_v44 = vld [vmem:[#allocation46_spill] sm:$0xff] }
 0x94f   :  { %v3580_v22 = vmul.f32 %v3923_v21, %v13148_v43  ;;  %v3592_v0 = vsel %vm9740_vm11, %v3576_v33, 0.0  ;;  %3936 = vlog2.f32 %v3619_v50  ;;  %v3663_v25 = vmul.f32 %v3917_v36, %v13150_v42  ;;  %v3929_v24 = vpop.eup %3928 }
 0x950   :  { %v3582_v40 = vmul.f32 %v3925_v52, %v13149_v27  ;;  %v3593_v41 = vsel %vm9758_vm9, %v3578_v32, 0.0  ;;  %3601 = vst [vmem:[#allocation18 + $0x50] sm:$0xff] %v3592_v0  ;;  %v13152_v26 = vsub.f32 %v9889_v5, %v13151_v57  ;;  %3938 = vlog2.f32 %v3620_v56  ;;  %v3931_v14 = vpop.eup %3930  ;;  %v13167_v32 = vld [vmem:[#allocation156_spill] sm:$0xff] }
 0x951   :  { %v3594_v51 = vsel %vm9796_vm2, %v3580_v22, 0.0  ;;  %3602 = vst [vmem:[#allocation18 + $0x58] sm:$0xff] %v3593_v41  ;;  %v3664_v45 = vmul.f32 %v3919_v19, %v13153_v58  ;;  %v13155_v62 = vsub.f32 %v9894_v6, %v13154_v23  ;;  %3940 = vlog2.f32 %v3621_v53  ;;  %v3933_v60 = vpop.eup %3932 }
 0x952   :  { %v3584_v16 = vmul.f32 %v3927_v4, %v13152_v26  ;;  %v3595_v36 = vsel %vm9824_vm12, %v3582_v40, 0.0  ;;  %3603 = vst [vmem:[#allocation18 + $0x60] sm:$0xff] %v3594_v51  ;;  %v3665_v5 = vmul.f32 %v3921_v34, %v13156_v54  ;;  %v13159_v28 = vsub.f32 %v13157_v11, %v13158_v9  ;;  %v13164_v34 = vld [vmem:[#allocation167_spill] sm:$0xff] }
 0x953   :  { %v3586_v31 = vmul.f32 %v3929_v24, %v13155_v62  ;;  %3604 = vst [vmem:[#allocation18 + $0x68] sm:$0xff] %v3595_v36  ;;  %3942 = vlog2.f32 %v3622_v1  ;;  %v3666_v6 = vmul.f32 %v3923_v21, %v13160_v48  ;;  %v13163_v56 = vsub.f32 %v13161_v7, %v13162_v47 }
 0x954   :  { %v3588_v50 = vmul.f32 %v3931_v14, %v13159_v28  ;;  %v3596_v19 = vsel %vm13113_vm15, %v3584_v16, 0.0  ;;  %3944 = vlog2.f32 %v3623_v18  ;;  %v3667_v17 = vmul.f32 %v3925_v52, %v13164_v34  ;;  %v13168_v18 = vld [vmem:[#allocation170_spill] sm:$0xff] }
 0x955   :  { %v3590_v37 = vmul.f32 %v3933_v60, %v13163_v56  ;;  %v3597_v53 = vsel %vm13126_vm8, %v3586_v31, 0.0  ;;  %3605 = vst [vmem:[#allocation18 + $0x70] sm:$0xff] %v3596_v19  ;;  %3946 = vlog2.f32 %v3624_v38  ;;  %v3668_v1 = vmul.f32 %v3927_v4, %v13165_v59 }
 0x956   :  { %v3598_v33 = vsel %vm13059_vm4, %v3588_v50, 0.0  ;;  %3606 = vst [vmem:[#allocation18 + $0x78] sm:$0xff] %v3597_v53  ;;  %v10522_v21 = vmul.f32 %v3929_v24, %v13166_v44  ;;  %3948 = vlog2.f32 %v3625_v30  ;;  %v10527_v35 = vmul.f32 %v3931_v14, %v13167_v32 }
 0x957   :  { %v3599_v61 = vsel %vm10010_vm5, %v3590_v37, 0.0  ;;  %3607 = vst [vmem:[#allocation18 + $0x80] sm:$0xff] %v3598_v33  ;;  %v10530_v52 = vmul.f32 %v3933_v60, %v13168_v18  ;;  %3950 = vlog2.f32 %v3626_v15  ;;  %v3672_v38 = vsel %vm9729_vm10, %v3663_v25, 1.0 }
 0x958   :  { %3608 = vst [vmem:[#allocation18 + $0x88] sm:$0xff] %v3599_v61  ;;  %v3673_v55 = vsel %vm9740_vm11, %v3664_v45, 1.0  ;;  %v3674_v43 = vsel %vm9758_vm9, %v3665_v5, 1.0  ;;  %v3675_v30 = vsel %vm9796_vm2, %v3666_v6, 1.0  ;;  %v3676_v22 = vsel %vm9824_vm12, %v3667_v17, 1.0  ;;  %v3935_v4 = vpop.eup %3934 }
 0x959   :  { %v3677_v0 = vsel %vm13113_vm15, %v3668_v1, 1.0  ;;  %v3678_v15 = vsel %vm13126_vm8, %v10522_v21, 1.0  ;;  %v3679_v27 = vsel %vm13059_vm4, %v10527_v35, 1.0  ;;  %v3680_v40 = vsel %vm10010_vm5, %v10530_v52, 1.0  ;;  %v3937_v42 = vpop.eup %3936 }
 0x95a   :  { %3952 = vlog2.f32 %v3672_v38  ;;  %v3450_v41 = vsel %vm13126_vm8, %v10315_v39, 0  ;;  %v3628_v25 = vmul.f32 0.6931472, %v3935_v4  ;;  %v3451_v24 = vsel %vm13059_vm4, %v10323_v2, 0  ;;  %v3939_v26 = vpop.eup %3938 }
 0x95b   :  { %3954 = vlog2.f32 %v3673_v55  ;;  %v3452_v57 = vsel %vm10010_vm5, %v10327_v3, 0  ;;  %3459 = vst [vmem:[#allocation19 + $0x30] sm:$0xff] %v3450_v41  ;;  %v3630_v16 = vmul.f32 0.6931472, %v3937_v42  ;;  %3460 = vst [vmem:[#allocation19 + $0x38] sm:$0xff] %v3451_v24  ;;  %v3941_v39 = vpop.eup %3940 }
 0x95c   :  { %3956 = vlog2.f32 %v3674_v43  ;;  %3461 = vst [vmem:[#allocation19 + $0x40] sm:$0xff] %v3452_v57  ;;  %v3632_v51 = vmul.f32 0.6931472, %v3939_v26  ;;  %v3645_v58 = vsel %vm9729_vm10, %v3628_v25, 0.0 }
 0x95d   :  { %3958 = vlog2.f32 %v3675_v30 }
 0x95e   :  { %4139 = shalt.err (!%p4136_p7)
}
 0x95f   :  { %s4140_s7 = scalar_lea.hbm %s10640_s5, 1152 }
 0x960   :  { %p4141_p8 = scmp.ne.s32.totalorder %s10640_s5, %s4140_s7  ;;  %p4144_p9 = scmp.lt.u32.totalorder %s4140_s7, %s10640_s5 }
 0x962   :  { %p4146_p10 = pnand %p4144_p9, %p4141_p8 }
 0x964   :  { %4149 = shalt.err (!%p4146_p10)
}
 0x965   :  { %3740 = dma.vmem_to_hbm [thread:$0]  %s10556_s28, 1152, %s10640_s5, [#allocation20], %s4187_s11, %s4187_s11, %s4188_s12   ;;  %v3943_v2 = vpop.eup %3942  ;;  %v3634_v3 = vmul.f32 0.6931472, %v3941_v39  ;;  %v3646_v45 = vsel %vm9740_vm11, %v3630_v16, 0.0  ;;  %3654 = vst [vmem:[#allocation18 + $0x90] sm:$0xff] %v3645_v58  ;;  %3960 = vlog2.f32 %v3676_v22 }
 0x966   :  { %v3945_v14 = vpop.eup %3944  ;;  %v3636_v23 = vmul.f32 0.6931472, %v3943_v2  ;;  %v3647_v62 = vsel %vm9758_vm9, %v3632_v51, 0.0  ;;  %3655 = vst [vmem:[#allocation18 + $0x98] sm:$0xff] %v3646_v45  ;;  %3962 = vlog2.f32 %v3677_v0  ;;  %s4192_s5 = smov [#allocation18]  }
 0x967   :  { %v3947_v31 = vpop.eup %3946  ;;  %v3638_v36 = vmul.f32 0.6931472, %v3945_v14  ;;  %v3648_v54 = vsel %vm9796_vm2, %v3634_v3, 0.0  ;;  %3656 = vst [vmem:[#allocation18 + $0xa0] sm:$0xff] %v3647_v62  ;;  %3964 = vlog2.f32 %v3678_v15  ;;  %s3722_s16 = sshll.u32 %s4192_s5, 4  ;;  %s3723_s16 = int_to_ptr.vmem [resolvable:$true] %s3722_s16 }
 0x968   :  { %v3949_v5 = vpop.eup %3948  ;;  %v3640_v60 = vmul.f32 0.6931472, %v3947_v31  ;;  %v3649_v11 = vsel %vm9824_vm12, %v3636_v23, 0.0  ;;  %3657 = vst [vmem:[#allocation18 + $0xa8] sm:$0xff] %v3648_v54  ;;  %3966 = vlog2.f32 %v3679_v27  ;;  %s4150_s17 = scalar_lea.vmem %s3723_s16, 4608  ;;  %p4155_p12 = scmp.lt.s32.totalorder %s3723_s16, %s3723_s16 }
 0x969   :  { %v3951_v9 = vpop.eup %3950  ;;  %v3642_v28 = vmul.f32 0.6931472, %v3949_v5  ;;  %v3650_v50 = vsel %vm13113_vm15, %v3638_v36, 0.0  ;;  %3658 = vst [vmem:[#allocation18 + $0xb0] sm:$0xff] %v3649_v11  ;;  %3968 = vlog2.f32 %v3680_v40  ;;  %p4151_p11 = scmp.ne.s32.totalorder %s3723_s16, %s4150_s17  ;;  %p4156_p13 = scmp.lt.s32.totalorder %s4150_s17, %s4150_s17 }
 0x96a   :  { %v3644_v19 = vmul.f32 0.6931472, %v3951_v9  ;;  %v3651_v48 = vsel %vm13126_vm8, %v3640_v60, 0.0  ;;  %3659 = vst [vmem:[#allocation18 + $0xb8] sm:$0xff] %v3650_v50  ;;  %v3953_v6 = vpop.eup %3952 }
 0x96b   :  { %v3652_v7 = vsel %vm13059_vm4, %v3642_v28, 0.0  ;;  %3660 = vst [vmem:[#allocation18 + $0xc0] sm:$0xff] %v3651_v48  ;;  %v3955_v47 = vpop.eup %3954  ;;  %v3682_v37 = vmul.f32 0.6931472, %v3953_v6  ;;  %p4157_p0 = por %p4156_p13, %p4155_p12 }
 0x96c   :  { %v3653_v56 = vsel %vm10010_vm5, %v3644_v19, 0.0  ;;  %3661 = vst [vmem:[#allocation18 + $0xc8] sm:$0xff] %v3652_v7  ;;  %v3957_v53 = vpop.eup %3956  ;;  %v3684_v34 = vmul.f32 0.6931472, %v3955_v47 }
 0x96d   :  { %3662 = vst [vmem:[#allocation18 + $0xd0] sm:$0xff] %v3653_v56  ;;  %v3959_v17 = vpop.eup %3958  ;;  %v3686_v33 = vmul.f32 0.6931472, %v3957_v53  ;;  %v3699_v59 = vsel %vm9729_vm10, %v3682_v37, 0.0  ;;  %p4158_p1 = pnand %p4157_p0, %p4151_p11 }
 0x96e   :  { %v3688_v44 = vmul.f32 0.6931472, %v3959_v17  ;;  %v3700_v21 = vsel %vm9740_vm11, %v3684_v34, 0.0  ;;  %3708 = vst [vmem:[#allocation18 + $0xd8] sm:$0xff] %v3699_v59 }
 0x96f   :  { %v3961_v1 = vpop.eup %3960  ;;  %v3701_v35 = vsel %vm9758_vm9, %v3686_v33, 0.0  ;;  %3709 = vst [vmem:[#allocation18 + $0xe0] sm:$0xff] %v3700_v21 }
 0x970   :  { %v3963_v61 = vpop.eup %3962  ;;  %v3690_v32 = vmul.f32 0.6931472, %v3961_v1  ;;  %v3702_v38 = vsel %vm9796_vm2, %v3688_v44, 0.0  ;;  %3710 = vst [vmem:[#allocation18 + $0xe8] sm:$0xff] %v3701_v35 }
 0x971   :  { %v3965_v18 = vpop.eup %3964  ;;  %v3692_v52 = vmul.f32 0.6931472, %v3963_v61  ;;  %3711 = vst [vmem:[#allocation18 + $0xf0] sm:$0xff] %v3702_v38 }
 0x972   :  { %v3967_v13 = vpop.eup %3966  ;;  %v3694_v55 = vmul.f32 0.6931472, %v3965_v18  ;;  %v3703_v43 = vsel %vm9824_vm12, %v3690_v32, 0.0 }
 0x973   :  { %v3969_v8 = vpop.eup %3968  ;;  %v3696_v30 = vmul.f32 0.6931472, %v3967_v13  ;;  %v3704_v29 = vsel %vm13113_vm15, %v3692_v52, 0.0  ;;  %3712 = vst [vmem:[#allocation18 + $0xf8] sm:$0xff] %v3703_v43 }
 0x974   :  { %v3698_v22 = vmul.f32 0.6931472, %v3969_v8  ;;  %v3705_v20 = vsel %vm13126_vm8, %v3694_v55, 0.0  ;;  %3713 = vst [vmem:[#allocation18 + $0x100] sm:$0xff] %v3704_v29 }
 0x975   :  { %v3706_v0 = vsel %vm13059_vm4, %v3696_v30, 0.0  ;;  %3714 = vst [vmem:[#allocation18 + $0x108] sm:$0xff] %v3705_v20 }
 0x976   :  { %v3707_v12 = vsel %vm10010_vm5, %v3698_v22, 0.0  ;;  %3715 = vst [vmem:[#allocation18 + $0x110] sm:$0xff] %v3706_v0 }
 0x977   :  { %3716 = vst [vmem:[#allocation18 + $0x118] sm:$0xff] %v3707_v12 }
 0x978   :  { %4161 = shalt.err (!%p4158_p1)
}
 0x979   :  { %s4162_s20 = scalar_lea.hbm %s10639_s4, 4608 }
 0x97a   :  { %p4163_p2 = scmp.ne.s32.totalorder %s10639_s4, %s4162_s20  ;;  %p4166_p3 = scmp.lt.u32.totalorder %s4162_s20, %s10639_s4 }
 0x97c   :  { %p4168_p4 = pnand %p4166_p3, %p4163_p2 }
 0x97e   :  { %4171 = shalt.err (!%p4168_p4)
}
 0x97f   :  { %3728 = dma.vmem_to_hbm [thread:$0]  %s3723_s16, 4608, %s10639_s4, [#allocation11], %s4187_s11, %s4187_s11, %s4188_s12  }
 0x980   :  { %4180 = dma.done.wait [#allocation11], 4608  }
 0x981   :  { %4181 = vsyncadd [#allocation11], 4294962688 }
 0x982   :  { %4182 = dma.done.wait [#allocation20], 1152  }
 0x983   :  { %4183 = vsyncadd [#allocation20], 4294966144 }
 0x984   :  { %3747 = vsyncpa [#allocation10], 1 }
 0x985   :  { %3748 = vsyncpa [#allocation17], 1 }
 0x986   :  { %3749 = vsyncpa [#allocation11], 1 }
 0x987   :  { %3750 = vsyncpa [#allocation20], 1 }
 0x988   :  { %3751 = vsyncpa [#allocation12], 1 }
 0x989   :  { %3752 = vsyncpa [#allocation14], 1 }

</bundles_post_ra>
